<compile_context>
chip_gen: v7x
topology: tpu7x:2x2x1
jax: 0.10.0
libtpu: 0.0.40
codegen_flags: <defaults>
</compile_context>

<pallas_src>
import functools

import jax
import jax.numpy as jnp
from jax import lax
from jax.experimental import pallas as pl
from jax.experimental.pallas import tpu as pltpu


def _round_up(x, m):
    return ((x + m - 1) // m) * m


# --------------------------------------------------------------------------
# Pallas kernel: 18 shifted accumulating dots + f32 BN scale/shift + ReLU.
# One padded image (both streams) per grid step.
# --------------------------------------------------------------------------
def _rir_kernel(xr_ref, xt_ref, wr_ref, wt_ref, scale_ref, shift_ref,
                out_r_ref, out_t_ref):
    hp, wp, cin = xr_ref.shape          # spatially padded input (H+2, W+2, Cin)
    h, w = hp - 2, wp - 2               # dense (stride-1) output extent
    m, cp = out_r_ref.shape             # m == h*w, cp == per-stream padded Cout
    acc = jnp.zeros((m, 2 * cp), jnp.float32)
    k = 0
    for dh in range(3):
        for dw in range(3):
            r = xr_ref[dh:dh + h, dw:dw + w, :].reshape(m, cin)
            t = xt_ref[dh:dh + h, dw:dw + w, :].reshape(m, cin)
            acc = acc + jnp.dot(r, wr_ref[k], preferred_element_type=jnp.float32)
            acc = acc + jnp.dot(t, wt_ref[k], preferred_element_type=jnp.float32)
            k += 1
    # BN (eval) as f32 per-column scale + shift, then ReLU.
    y = jnp.maximum(acc * scale_ref[...] + shift_ref[...], 0.0)
    out_r_ref[...] = y[:, :cp].astype(out_r_ref.dtype)
    out_t_ref[...] = y[:, cp:].astype(out_t_ref.dtype)


# --------------------------------------------------------------------------
# JAX-side wrapper
# --------------------------------------------------------------------------
@functools.partial(jax.jit, static_argnames=("stride", "compute_dtype", "out_dtype"))
def resnet_init_forward(x_residual, x_transient, params, *, stride,
                        compute_dtype=jnp.bfloat16, out_dtype=jnp.bfloat16):
    """NHWC inputs (N, H, W, Cin). Returns (out_residual, out_transient) NHWC."""
    n, h, w, cin = x_residual.shape
    cout = params["w_rr"].shape[0]
    hp, wp = h + 2, w + 2
    cp = _round_up(cout, 128)                 # per-stream lane-dense channel pad

    # ---- activations: single fused cast + spatial-pad pass (no im2col) ------
    xr = jnp.pad(x_residual.astype(compute_dtype), ((0, 0), (1, 1), (1, 1), (0, 0)))
    xt = jnp.pad(x_transient.astype(compute_dtype), ((0, 0), (1, 1), (1, 1), (0, 0)))

    # ---- shortcut: fold into the center (dh=1, dw=1) tap of w_rr ------------
    if "w_sc" in params:
        w_sc = params["w_sc"][:, :, 0, 0].astype(jnp.float32)       # (Cout, Cin)
        b_sc = params["b_sc"].astype(jnp.float32)
    else:
        assert cin == cout and stride == 1, (
            "identity shortcut requires in_channel == out_channel and stride == 1")
        w_sc = jnp.eye(cout, cin, dtype=jnp.float32)
        b_sc = jnp.zeros((cout,), jnp.float32)

    w_rr_eff = params["w_rr"].astype(jnp.float32).at[:, :, 1, 1].add(w_sc)

    # ---- per-tap fused weights, split by INPUT stream ------------------------
    def taps(wmat):                           # (Cout, Cin, 3, 3) -> (9, Cin, Cout)
        return jnp.transpose(wmat.astype(jnp.float32), (2, 3, 1, 0)).reshape(9, cin, cout)

    def pad_c(a):                             # pad last dim Cout -> Cp
        return jnp.pad(a, [(0, 0)] * (a.ndim - 1) + [(0, cp - cout)])

    # columns [0:Cp) feed the residual output, [Cp:2Cp) the transient output.
    w_from_res = jnp.concatenate([pad_c(taps(w_rr_eff)),
                                  pad_c(taps(params["w_rt"]))], axis=2)
    w_from_tra = jnp.concatenate([pad_c(taps(params["w_tr"])),
                                  pad_c(taps(params["w_tt"]))], axis=2)
    w_from_res = w_from_res.astype(compute_dtype)      # (9, Cin, 2*Cp) bf16
    w_from_tra = w_from_tra.astype(compute_dtype)

    # ---- BatchNorm (eval) folded into f32 per-column scale + shift ----------
    eps = 1e-5
    bias_r = params["b_rr"] + params["b_tr"] + b_sc
    bias_t = params["b_rt"] + params["b_tt"]
    scale_r = params["bn_r_gamma"] / jnp.sqrt(params["bn_r_var"] + eps)
    scale_t = params["bn_t_gamma"] / jnp.sqrt(params["bn_t_var"] + eps)
    shift_r = (bias_r - params["bn_r_mean"]) * scale_r + params["bn_r_beta"]
    shift_t = (bias_t - params["bn_t_mean"]) * scale_t + params["bn_t_beta"]
    scale = jnp.concatenate([pad_c(scale_r), pad_c(scale_t)]).reshape(1, 2 * cp)
    shift = jnp.concatenate([pad_c(shift_r), pad_c(shift_t)]).reshape(1, 2 * cp)
    scale = scale.astype(jnp.float32)
    shift = shift.astype(jnp.float32)

    # ---- explicit VMEM budget (whole padded image per step, double-buffered) -
    in_bytes = 2 * hp * wp * cin * jnp.dtype(compute_dtype).itemsize
    out_bytes = 2 * h * w * cp * jnp.dtype(out_dtype).itemsize
    w_bytes = 2 * 9 * cin * 2 * cp * jnp.dtype(compute_dtype).itemsize
    acc_bytes = h * w * 2 * cp * 4
    est = 2 * (in_bytes + out_bytes + w_bytes) + 2 * acc_bytes + (2 << 20)
    vmem_limit = int(min(max(est, 32 << 20), 56 << 20))

    out_r_pad, out_t_pad = pl.pallas_call(
        _rir_kernel,
        out_shape=(jax.ShapeDtypeStruct((n, h * w, cp), out_dtype),
                   jax.ShapeDtypeStruct((n, h * w, cp), out_dtype)),
        grid=(n,),
        in_specs=[
            pl.BlockSpec((None, hp, wp, cin), lambda i: (i, 0, 0, 0)),   # x_res (padded)
            pl.BlockSpec((None, hp, wp, cin), lambda i: (i, 0, 0, 0)),   # x_tra (padded)
            pl.BlockSpec((9, cin, 2 * cp), lambda i: (0, 0, 0)),         # taps from x_res
            pl.BlockSpec((9, cin, 2 * cp), lambda i: (0, 0, 0)),         # taps from x_tra
            pl.BlockSpec((1, 2 * cp), lambda i: (0, 0)),                 # BN scale (f32)
            pl.BlockSpec((1, 2 * cp), lambda i: (0, 0)),                 # BN shift (f32)
        ],
        out_specs=[
            pl.BlockSpec((None, h * w, cp), lambda i: (i, 0, 0)),
            pl.BlockSpec((None, h * w, cp), lambda i: (i, 0, 0)),
        ],
        compiler_params=pltpu.CompilerParams(
            dimension_semantics=("parallel",),
            vmem_limit_bytes=vmem_limit),
    )(xr, xt, w_from_res, w_from_tra, scale, shift)

    # Free metadata reshape; channel slice only when Cout is not 128-aligned,
    # spatial subsample only when stride > 1.
    out_r = out_r_pad.reshape(n, h, w, cp)[:, ::stride, ::stride, :cout]
    out_t = out_t_pad.reshape(n, h, w, cp)[:, ::stride, ::stride, :cout]
    return out_r, out_t


# --------------------------------------------------------------------------
# Pure-JAX reference (lax.conv, full f32 precision) for the correctness check
# --------------------------------------------------------------------------
def _conv3x3_ref(x, w, b, stride):
    w_hwio = jnp.transpose(w, (2, 3, 1, 0))
    y = lax.conv_general_dilated(x, w_hwio, (stride, stride), [(1, 1), (1, 1)],
                                 dimension_numbers=("NHWC", "HWIO", "NHWC"),
                                 precision=lax.Precision.HIGHEST)
    return y + b.reshape(1, 1, 1, -1)


def _conv1x1_ref(x, w, b, stride):
    w_hwio = jnp.transpose(w, (2, 3, 1, 0))
    y = lax.conv_general_dilated(x, w_hwio, (stride, stride), "VALID",
                                 dimension_numbers=("NHWC", "HWIO", "NHWC"),
                                 precision=lax.Precision.HIGHEST)
    return y + b.reshape(1, 1, 1, -1)


def _bn_relu_ref(x, gamma, beta, mean, var, eps=1e-5):
    y = (x - mean.reshape(1, 1, 1, -1)) / jnp.sqrt(var.reshape(1, 1, 1, -1) + eps)
    return jnp.maximum(y * gamma.reshape(1, 1, 1, -1) + beta.reshape(1, 1, 1, -1), 0.0)


def resnet_init_reference(x_res, x_tra, p, stride):
    r_r = _conv3x3_ref(x_res, p["w_rr"], p["b_rr"], stride)
    r_t = _conv3x3_ref(x_res, p["w_rt"], p["b_rt"], stride)
    sc = _conv1x1_ref(x_res, p["w_sc"], p["b_sc"], stride)
    t_t = _conv3x3_ref(x_tra, p["w_tt"], p["b_tt"], stride)
    t_r = _conv3x3_ref(x_tra, p["w_tr"], p["b_tr"], stride)
    out_r = _bn_relu_ref(r_r + t_r + sc, p["bn_r_gamma"], p["bn_r_beta"],
                         p["bn_r_mean"], p["bn_r_var"])
    out_t = _bn_relu_ref(r_t + t_t, p["bn_t_gamma"], p["bn_t_beta"],
                         p["bn_t_mean"], p["bn_t_var"])
    return out_r, out_t


# --------------------------------------------------------------------------
if __name__ == "__main__":
    key = jax.random.PRNGKey(0)
    N, Cin, Cout, H, W, stride = 2, 4, 8, 16, 16, 1

    ks = jax.random.split(key, 20)
    params = {
        "w_rr": 0.1 * jax.random.normal(ks[0], (Cout, Cin, 3, 3), jnp.float32),
        "b_rr": 0.1 * jax.random.normal(ks[1], (Cout,), jnp.float32),
        "w_tt": 0.1 * jax.random.normal(ks[2], (Cout, Cin, 3, 3), jnp.float32),
        "b_tt": 0.1 * jax.random.normal(ks[3], (Cout,), jnp.float32),
        "w_rt": 0.1 * jax.random.normal(ks[4], (Cout, Cin, 3, 3), jnp.float32),
        "b_rt": 0.1 * jax.random.normal(ks[5], (Cout,), jnp.float32),
        "w_tr": 0.1 * jax.random.normal(ks[6], (Cout, Cin, 3, 3), jnp.float32),
        "b_tr": 0.1 * jax.random.normal(ks[7], (Cout,), jnp.float32),
        # shortcut: in_channel != out_channel -> 1x1 conv (with bias, torch default)
        "w_sc": 0.1 * jax.random.normal(ks[8], (Cout, Cin, 1, 1), jnp.float32),
        "b_sc": 0.1 * jax.random.normal(ks[9], (Cout,), jnp.float32),
        # BatchNorm (eval-mode running stats)
        "bn_r_gamma": 1.0 + 0.1 * jax.random.normal(ks[10], (Cout,), jnp.float32),
        "bn_r_beta": 0.1 * jax.random.normal(ks[11], (Cout,), jnp.float32),
        "bn_r_mean": 0.1 * jax.random.normal(ks[12], (Cout,), jnp.float32),
        "bn_r_var": 0.5 + jax.random.uniform(ks[13], (Cout,), jnp.float32),
        "bn_t_gamma": 1.0 + 0.1 * jax.random.normal(ks[14], (Cout,), jnp.float32),
        "bn_t_beta": 0.1 * jax.random.normal(ks[15], (Cout,), jnp.float32),
        "bn_t_mean": 0.1 * jax.random.normal(ks[16], (Cout,), jnp.float32),
        "bn_t_var": 0.5 + jax.random.uniform(ks[17], (Cout,), jnp.float32),
    }

    # Inputs in NHWC (equivalent to PyTorch NCHW [2, 4, 16, 16] transposed).
    x_res = jax.random.normal(ks[18], (N, H, W, Cin), jnp.float32)
    x_tra = jax.random.normal(ks[19], (N, H, W, Cin), jnp.float32)

    out_r, out_t = resnet_init_forward(x_res, x_tra, params, stride=stride)
    jax.block_until_ready((out_r, out_t))

    ref_r, ref_t = resnet_init_reference(x_res, x_tra, params, stride)
    # bf16 activations/weights/outputs (f32 accumulate + f32 BN) -> loose tol.
    assert out_r.shape == ref_r.shape and out_t.shape == ref_t.shape
    assert jnp.allclose(out_r.astype(jnp.float32), ref_r, atol=5e-2, rtol=5e-2), \
        "residual stream mismatch"
    assert jnp.allclose(out_t.astype(jnp.float32), ref_t, atol=5e-2, rtol=5e-2), \
        "transient stream mismatch"

    print("KERNEL_OK")
</pallas_src>

<mosaic_0001>
module attributes {stable_mosaic.version = 11 : i64} {
  func.func @_rir_kernel(%arg0: i32, %arg1: memref<1x18x18x4xbf16, #tpu.memory_space<vmem>>, %arg2: memref<1x18x18x4xbf16, #tpu.memory_space<vmem>>, %arg3: memref<9x4x256xbf16, #tpu.memory_space<vmem>>, %arg4: memref<9x4x256xbf16, #tpu.memory_space<vmem>>, %arg5: memref<1x256xf32, #tpu.memory_space<vmem>>, %arg6: memref<1x256xf32, #tpu.memory_space<vmem>>, %arg7: memref<1x256x128xbf16, #tpu.memory_space<vmem>>, %arg8: memref<1x256x128xbf16, #tpu.memory_space<vmem>>) attributes {dimension_semantics = [#tpu.dimension_semantics<parallel>], iteration_bounds = array<i64: 2>, scalar_prefetch = 0 : i64, scratch_operands = 0 : i64, tpu.core_type = #tpu.core_type<tc>, window_params = [{transform_indices = @transform_0, window_bounds = array<i64: 1, 18, 18, 4>}, {transform_indices = @transform_1, window_bounds = array<i64: 1, 18, 18, 4>}, {pipeline_mode = #tpu.pipeline_mode<synchronous>, transform_indices = @transform_2, window_bounds = array<i64: 9, 4, 256>}, {pipeline_mode = #tpu.pipeline_mode<synchronous>, transform_indices = @transform_3, window_bounds = array<i64: 9, 4, 256>}, {pipeline_mode = #tpu.pipeline_mode<synchronous>, transform_indices = @transform_4, window_bounds = array<i64: 1, 256>}, {pipeline_mode = #tpu.pipeline_mode<synchronous>, transform_indices = @transform_5, window_bounds = array<i64: 1, 256>}, {transform_indices = @transform_6, window_bounds = array<i64: 1, 256, 128>}, {transform_indices = @transform_7, window_bounds = array<i64: 1, 256, 128>}]} {
    %cst = arith.constant 0.000000e+00 : f32
    %0 = vector.broadcast %cst : f32 to vector<256x256xf32>
    %c0 = arith.constant 0 : index
    %c0_0 = arith.constant 0 : index
    %c0_1 = arith.constant 0 : index
    %c0_2 = arith.constant 0 : index
    %1 = vector.load %arg1[%c0, %c0_0, %c0_1, %c0_2] : memref<1x18x18x4xbf16, #tpu.memory_space<vmem>>, vector<1x16x16x4xbf16>
    %2 = vector.shape_cast %1 : vector<1x16x16x4xbf16> to vector<16x16x4xbf16>
    %3 = vector.shape_cast %2 : vector<16x16x4xbf16> to vector<256x4xbf16>
    %c0_3 = arith.constant 0 : index
    %c0_4 = arith.constant 0 : index
    %c0_5 = arith.constant 0 : index
    %c0_6 = arith.constant 0 : index
    %4 = vector.load %arg2[%c0_3, %c0_4, %c0_5, %c0_6] : memref<1x18x18x4xbf16, #tpu.memory_space<vmem>>, vector<1x16x16x4xbf16>
    %5 = vector.shape_cast %4 : vector<1x16x16x4xbf16> to vector<16x16x4xbf16>
    %6 = vector.shape_cast %5 : vector<16x16x4xbf16> to vector<256x4xbf16>
    %c0_7 = arith.constant 0 : index
    %c0_8 = arith.constant 0 : index
    %c0_9 = arith.constant 0 : index
    %7 = vector.load %arg3[%c0_7, %c0_8, %c0_9] : memref<9x4x256xbf16, #tpu.memory_space<vmem>>, vector<1x4x256xbf16>
    %8 = vector.shape_cast %7 : vector<1x4x256xbf16> to vector<4x256xbf16>
    %cst_10 = arith.constant dense<0.000000e+00> : vector<256x256xf32>
    %9 = tpu.matmul %3, %8, %cst_10 {dimension_numbers = #tpu.dot_dimension_numbers<[1], [0], [0], [1], [0, 0, 1, 1], [], []>} : vector<256x4xbf16>, vector<4x256xbf16>, vector<256x256xf32> -> vector<256x256xf32>
    %10 = arith.addf %0, %9 : vector<256x256xf32>
    %c0_11 = arith.constant 0 : index
    %c0_12 = arith.constant 0 : index
    %c0_13 = arith.constant 0 : index
    %11 = vector.load %arg4[%c0_11, %c0_12, %c0_13] : memref<9x4x256xbf16, #tpu.memory_space<vmem>>, vector<1x4x256xbf16>
    %12 = vector.shape_cast %11 : vector<1x4x256xbf16> to vector<4x256xbf16>
    %cst_14 = arith.constant dense<0.000000e+00> : vector<256x256xf32>
    %13 = tpu.matmul %6, %12, %cst_14 {dimension_numbers = #tpu.dot_dimension_numbers<[1], [0], [0], [1], [0, 0, 1, 1], [], []>} : vector<256x4xbf16>, vector<4x256xbf16>, vector<256x256xf32> -> vector<256x256xf32>
    %14 = arith.addf %10, %13 : vector<256x256xf32>
    %c0_15 = arith.constant 0 : index
    %c0_16 = arith.constant 0 : index
    %c1 = arith.constant 1 : index
    %c0_17 = arith.constant 0 : index
    %15 = vector.load %arg1[%c0_15, %c0_16, %c1, %c0_17] : memref<1x18x18x4xbf16, #tpu.memory_space<vmem>>, vector<1x16x16x4xbf16>
    %16 = vector.shape_cast %15 : vector<1x16x16x4xbf16> to vector<16x16x4xbf16>
    %17 = vector.shape_cast %16 : vector<16x16x4xbf16> to vector<256x4xbf16>
    %c0_18 = arith.constant 0 : index
    %c0_19 = arith.constant 0 : index
    %c1_20 = arith.constant 1 : index
    %c0_21 = arith.constant 0 : index
    %18 = vector.load %arg2[%c0_18, %c0_19, %c1_20, %c0_21] : memref<1x18x18x4xbf16, #tpu.memory_space<vmem>>, vector<1x16x16x4xbf16>
    %19 = vector.shape_cast %18 : vector<1x16x16x4xbf16> to vector<16x16x4xbf16>
    %20 = vector.shape_cast %19 : vector<16x16x4xbf16> to vector<256x4xbf16>
    %c1_22 = arith.constant 1 : index
    %c0_23 = arith.constant 0 : index
    %c0_24 = arith.constant 0 : index
    %21 = vector.load %arg3[%c1_22, %c0_23, %c0_24] : memref<9x4x256xbf16, #tpu.memory_space<vmem>>, vector<1x4x256xbf16>
    %22 = vector.shape_cast %21 : vector<1x4x256xbf16> to vector<4x256xbf16>
    %cst_25 = arith.constant dense<0.000000e+00> : vector<256x256xf32>
    %23 = tpu.matmul %17, %22, %cst_25 {dimension_numbers = #tpu.dot_dimension_numbers<[1], [0], [0], [1], [0, 0, 1, 1], [], []>} : vector<256x4xbf16>, vector<4x256xbf16>, vector<256x256xf32> -> vector<256x256xf32>
    %24 = arith.addf %14, %23 : vector<256x256xf32>
    %c1_26 = arith.constant 1 : index
    %c0_27 = arith.constant 0 : index
    %c0_28 = arith.constant 0 : index
    %25 = vector.load %arg4[%c1_26, %c0_27, %c0_28] : memref<9x4x256xbf16, #tpu.memory_space<vmem>>, vector<1x4x256xbf16>
    %26 = vector.shape_cast %25 : vector<1x4x256xbf16> to vector<4x256xbf16>
    %cst_29 = arith.constant dense<0.000000e+00> : vector<256x256xf32>
    %27 = tpu.matmul %20, %26, %cst_29 {dimension_numbers = #tpu.dot_dimension_numbers<[1], [0], [0], [1], [0, 0, 1, 1], [], []>} : vector<256x4xbf16>, vector<4x256xbf16>, vector<256x256xf32> -> vector<256x256xf32>
    %28 = arith.addf %24, %27 : vector<256x256xf32>
    %c0_30 = arith.constant 0 : index
    %c0_31 = arith.constant 0 : index
    %c2 = arith.constant 2 : index
    %c0_32 = arith.constant 0 : index
    %29 = vector.load %arg1[%c0_30, %c0_31, %c2, %c0_32] : memref<1x18x18x4xbf16, #tpu.memory_space<vmem>>, vector<1x16x16x4xbf16>
    %30 = vector.shape_cast %29 : vector<1x16x16x4xbf16> to vector<16x16x4xbf16>
    %31 = vector.shape_cast %30 : vector<16x16x4xbf16> to vector<256x4xbf16>
    %c0_33 = arith.constant 0 : index
    %c0_34 = arith.constant 0 : index
    %c2_35 = arith.constant 2 : index
    %c0_36 = arith.constant 0 : index
    %32 = vector.load %arg2[%c0_33, %c0_34, %c2_35, %c0_36] : memref<1x18x18x4xbf16, #tpu.memory_space<vmem>>, vector<1x16x16x4xbf16>
    %33 = vector.shape_cast %32 : vector<1x16x16x4xbf16> to vector<16x16x4xbf16>
    %34 = vector.shape_cast %33 : vector<16x16x4xbf16> to vector<256x4xbf16>
    %c2_37 = arith.constant 2 : index
    %c0_38 = arith.constant 0 : index
    %c0_39 = arith.constant 0 : index
    %35 = vector.load %arg3[%c2_37, %c0_38, %c0_39] : memref<9x4x256xbf16, #tpu.memory_space<vmem>>, vector<1x4x256xbf16>
    %36 = vector.shape_cast %35 : vector<1x4x256xbf16> to vector<4x256xbf16>
    %cst_40 = arith.constant dense<0.000000e+00> : vector<256x256xf32>
    %37 = tpu.matmul %31, %36, %cst_40 {dimension_numbers = #tpu.dot_dimension_numbers<[1], [0], [0], [1], [0, 0, 1, 1], [], []>} : vector<256x4xbf16>, vector<4x256xbf16>, vector<256x256xf32> -> vector<256x256xf32>
    %38 = arith.addf %28, %37 : vector<256x256xf32>
    %c2_41 = arith.constant 2 : index
    %c0_42 = arith.constant 0 : index
    %c0_43 = arith.constant 0 : index
    %39 = vector.load %arg4[%c2_41, %c0_42, %c0_43] : memref<9x4x256xbf16, #tpu.memory_space<vmem>>, vector<1x4x256xbf16>
    %40 = vector.shape_cast %39 : vector<1x4x256xbf16> to vector<4x256xbf16>
    %cst_44 = arith.constant dense<0.000000e+00> : vector<256x256xf32>
    %41 = tpu.matmul %34, %40, %cst_44 {dimension_numbers = #tpu.dot_dimension_numbers<[1], [0], [0], [1], [0, 0, 1, 1], [], []>} : vector<256x4xbf16>, vector<4x256xbf16>, vector<256x256xf32> -> vector<256x256xf32>
    %42 = arith.addf %38, %41 : vector<256x256xf32>
    %c0_45 = arith.constant 0 : index
    %c1_46 = arith.constant 1 : index
    %c0_47 = arith.constant 0 : index
    %c0_48 = arith.constant 0 : index
    %43 = vector.load %arg1[%c0_45, %c1_46, %c0_47, %c0_48] : memref<1x18x18x4xbf16, #tpu.memory_space<vmem>>, vector<1x16x16x4xbf16>
    %44 = vector.shape_cast %43 : vector<1x16x16x4xbf16> to vector<16x16x4xbf16>
    %45 = vector.shape_cast %44 : vector<16x16x4xbf16> to vector<256x4xbf16>
    %c0_49 = arith.constant 0 : index
    %c1_50 = arith.constant 1 : index
    %c0_51 = arith.constant 0 : index
    %c0_52 = arith.constant 0 : index
    %46 = vector.load %arg2[%c0_49, %c1_50, %c0_51, %c0_52] : memref<1x18x18x4xbf16, #tpu.memory_space<vmem>>, vector<1x16x16x4xbf16>
    %47 = vector.shape_cast %46 : vector<1x16x16x4xbf16> to vector<16x16x4xbf16>
    %48 = vector.shape_cast %47 : vector<16x16x4xbf16> to vector<256x4xbf16>
    %c3 = arith.constant 3 : index
    %c0_53 = arith.constant 0 : index
    %c0_54 = arith.constant 0 : index
    %49 = vector.load %arg3[%c3, %c0_53, %c0_54] : memref<9x4x256xbf16, #tpu.memory_space<vmem>>, vector<1x4x256xbf16>
    %50 = vector.shape_cast %49 : vector<1x4x256xbf16> to vector<4x256xbf16>
    %cst_55 = arith.constant dense<0.000000e+00> : vector<256x256xf32>
    %51 = tpu.matmul %45, %50, %cst_55 {dimension_numbers = #tpu.dot_dimension_numbers<[1], [0], [0], [1], [0, 0, 1, 1], [], []>} : vector<256x4xbf16>, vector<4x256xbf16>, vector<256x256xf32> -> vector<256x256xf32>
    %52 = arith.addf %42, %51 : vector<256x256xf32>
    %c3_56 = arith.constant 3 : index
    %c0_57 = arith.constant 0 : index
    %c0_58 = arith.constant 0 : index
    %53 = vector.load %arg4[%c3_56, %c0_57, %c0_58] : memref<9x4x256xbf16, #tpu.memory_space<vmem>>, vector<1x4x256xbf16>
    %54 = vector.shape_cast %53 : vector<1x4x256xbf16> to vector<4x256xbf16>
    %cst_59 = arith.constant dense<0.000000e+00> : vector<256x256xf32>
    %55 = tpu.matmul %48, %54, %cst_59 {dimension_numbers = #tpu.dot_dimension_numbers<[1], [0], [0], [1], [0, 0, 1, 1], [], []>} : vector<256x4xbf16>, vector<4x256xbf16>, vector<256x256xf32> -> vector<256x256xf32>
    %56 = arith.addf %52, %55 : vector<256x256xf32>
    %c0_60 = arith.constant 0 : index
    %c1_61 = arith.constant 1 : index
    %c1_62 = arith.constant 1 : index
    %c0_63 = arith.constant 0 : index
    %57 = vector.load %arg1[%c0_60, %c1_61, %c1_62, %c0_63] : memref<1x18x18x4xbf16, #tpu.memory_space<vmem>>, vector<1x16x16x4xbf16>
    %58 = vector.shape_cast %57 : vector<1x16x16x4xbf16> to vector<16x16x4xbf16>
    %59 = vector.shape_cast %58 : vector<16x16x4xbf16> to vector<256x4xbf16>
    %c0_64 = arith.constant 0 : index
    %c1_65 = arith.constant 1 : index
    %c1_66 = arith.constant 1 : index
    %c0_67 = arith.constant 0 : index
    %60 = vector.load %arg2[%c0_64, %c1_65, %c1_66, %c0_67] : memref<1x18x18x4xbf16, #tpu.memory_space<vmem>>, vector<1x16x16x4xbf16>
    %61 = vector.shape_cast %60 : vector<1x16x16x4xbf16> to vector<16x16x4xbf16>
    %62 = vector.shape_cast %61 : vector<16x16x4xbf16> to vector<256x4xbf16>
    %c4 = arith.constant 4 : index
    %c0_68 = arith.constant 0 : index
    %c0_69 = arith.constant 0 : index
    %63 = vector.load %arg3[%c4, %c0_68, %c0_69] : memref<9x4x256xbf16, #tpu.memory_space<vmem>>, vector<1x4x256xbf16>
    %64 = vector.shape_cast %63 : vector<1x4x256xbf16> to vector<4x256xbf16>
    %cst_70 = arith.constant dense<0.000000e+00> : vector<256x256xf32>
    %65 = tpu.matmul %59, %64, %cst_70 {dimension_numbers = #tpu.dot_dimension_numbers<[1], [0], [0], [1], [0, 0, 1, 1], [], []>} : vector<256x4xbf16>, vector<4x256xbf16>, vector<256x256xf32> -> vector<256x256xf32>
    %66 = arith.addf %56, %65 : vector<256x256xf32>
    %c4_71 = arith.constant 4 : index
    %c0_72 = arith.constant 0 : index
    %c0_73 = arith.constant 0 : index
    %67 = vector.load %arg4[%c4_71, %c0_72, %c0_73] : memref<9x4x256xbf16, #tpu.memory_space<vmem>>, vector<1x4x256xbf16>
    %68 = vector.shape_cast %67 : vector<1x4x256xbf16> to vector<4x256xbf16>
    %cst_74 = arith.constant dense<0.000000e+00> : vector<256x256xf32>
    %69 = tpu.matmul %62, %68, %cst_74 {dimension_numbers = #tpu.dot_dimension_numbers<[1], [0], [0], [1], [0, 0, 1, 1], [], []>} : vector<256x4xbf16>, vector<4x256xbf16>, vector<256x256xf32> -> vector<256x256xf32>
    %70 = arith.addf %66, %69 : vector<256x256xf32>
    %c0_75 = arith.constant 0 : index
    %c1_76 = arith.constant 1 : index
    %c2_77 = arith.constant 2 : index
    %c0_78 = arith.constant 0 : index
    %71 = vector.load %arg1[%c0_75, %c1_76, %c2_77, %c0_78] : memref<1x18x18x4xbf16, #tpu.memory_space<vmem>>, vector<1x16x16x4xbf16>
    %72 = vector.shape_cast %71 : vector<1x16x16x4xbf16> to vector<16x16x4xbf16>
    %73 = vector.shape_cast %72 : vector<16x16x4xbf16> to vector<256x4xbf16>
    %c0_79 = arith.constant 0 : index
    %c1_80 = arith.constant 1 : index
    %c2_81 = arith.constant 2 : index
    %c0_82 = arith.constant 0 : index
    %74 = vector.load %arg2[%c0_79, %c1_80, %c2_81, %c0_82] : memref<1x18x18x4xbf16, #tpu.memory_space<vmem>>, vector<1x16x16x4xbf16>
    %75 = vector.shape_cast %74 : vector<1x16x16x4xbf16> to vector<16x16x4xbf16>
    %76 = vector.shape_cast %75 : vector<16x16x4xbf16> to vector<256x4xbf16>
    %c5 = arith.constant 5 : index
    %c0_83 = arith.constant 0 : index
    %c0_84 = arith.constant 0 : index
    %77 = vector.load %arg3[%c5, %c0_83, %c0_84] : memref<9x4x256xbf16, #tpu.memory_space<vmem>>, vector<1x4x256xbf16>
    %78 = vector.shape_cast %77 : vector<1x4x256xbf16> to vector<4x256xbf16>
    %cst_85 = arith.constant dense<0.000000e+00> : vector<256x256xf32>
    %79 = tpu.matmul %73, %78, %cst_85 {dimension_numbers = #tpu.dot_dimension_numbers<[1], [0], [0], [1], [0, 0, 1, 1], [], []>} : vector<256x4xbf16>, vector<4x256xbf16>, vector<256x256xf32> -> vector<256x256xf32>
    %80 = arith.addf %70, %79 : vector<256x256xf32>
    %c5_86 = arith.constant 5 : index
    %c0_87 = arith.constant 0 : index
    %c0_88 = arith.constant 0 : index
    %81 = vector.load %arg4[%c5_86, %c0_87, %c0_88] : memref<9x4x256xbf16, #tpu.memory_space<vmem>>, vector<1x4x256xbf16>
    %82 = vector.shape_cast %81 : vector<1x4x256xbf16> to vector<4x256xbf16>
    %cst_89 = arith.constant dense<0.000000e+00> : vector<256x256xf32>
    %83 = tpu.matmul %76, %82, %cst_89 {dimension_numbers = #tpu.dot_dimension_numbers<[1], [0], [0], [1], [0, 0, 1, 1], [], []>} : vector<256x4xbf16>, vector<4x256xbf16>, vector<256x256xf32> -> vector<256x256xf32>
    %84 = arith.addf %80, %83 : vector<256x256xf32>
    %c0_90 = arith.constant 0 : index
    %c2_91 = arith.constant 2 : index
    %c0_92 = arith.constant 0 : index
    %c0_93 = arith.constant 0 : index
    %85 = vector.load %arg1[%c0_90, %c2_91, %c0_92, %c0_93] : memref<1x18x18x4xbf16, #tpu.memory_space<vmem>>, vector<1x16x16x4xbf16>
    %86 = vector.shape_cast %85 : vector<1x16x16x4xbf16> to vector<16x16x4xbf16>
    %87 = vector.shape_cast %86 : vector<16x16x4xbf16> to vector<256x4xbf16>
    %c0_94 = arith.constant 0 : index
    %c2_95 = arith.constant 2 : index
    %c0_96 = arith.constant 0 : index
    %c0_97 = arith.constant 0 : index
    %88 = vector.load %arg2[%c0_94, %c2_95, %c0_96, %c0_97] : memref<1x18x18x4xbf16, #tpu.memory_space<vmem>>, vector<1x16x16x4xbf16>
    %89 = vector.shape_cast %88 : vector<1x16x16x4xbf16> to vector<16x16x4xbf16>
    %90 = vector.shape_cast %89 : vector<16x16x4xbf16> to vector<256x4xbf16>
    %c6 = arith.constant 6 : index
    %c0_98 = arith.constant 0 : index
    %c0_99 = arith.constant 0 : index
    %91 = vector.load %arg3[%c6, %c0_98, %c0_99] : memref<9x4x256xbf16, #tpu.memory_space<vmem>>, vector<1x4x256xbf16>
    %92 = vector.shape_cast %91 : vector<1x4x256xbf16> to vector<4x256xbf16>
    %cst_100 = arith.constant dense<0.000000e+00> : vector<256x256xf32>
    %93 = tpu.matmul %87, %92, %cst_100 {dimension_numbers = #tpu.dot_dimension_numbers<[1], [0], [0], [1], [0, 0, 1, 1], [], []>} : vector<256x4xbf16>, vector<4x256xbf16>, vector<256x256xf32> -> vector<256x256xf32>
    %94 = arith.addf %84, %93 : vector<256x256xf32>
    %c6_101 = arith.constant 6 : index
    %c0_102 = arith.constant 0 : index
    %c0_103 = arith.constant 0 : index
    %95 = vector.load %arg4[%c6_101, %c0_102, %c0_103] : memref<9x4x256xbf16, #tpu.memory_space<vmem>>, vector<1x4x256xbf16>
    %96 = vector.shape_cast %95 : vector<1x4x256xbf16> to vector<4x256xbf16>
    %cst_104 = arith.constant dense<0.000000e+00> : vector<256x256xf32>
    %97 = tpu.matmul %90, %96, %cst_104 {dimension_numbers = #tpu.dot_dimension_numbers<[1], [0], [0], [1], [0, 0, 1, 1], [], []>} : vector<256x4xbf16>, vector<4x256xbf16>, vector<256x256xf32> -> vector<256x256xf32>
    %98 = arith.addf %94, %97 : vector<256x256xf32>
    %c0_105 = arith.constant 0 : index
    %c2_106 = arith.constant 2 : index
    %c1_107 = arith.constant 1 : index
    %c0_108 = arith.constant 0 : index
    %99 = vector.load %arg1[%c0_105, %c2_106, %c1_107, %c0_108] : memref<1x18x18x4xbf16, #tpu.memory_space<vmem>>, vector<1x16x16x4xbf16>
    %100 = vector.shape_cast %99 : vector<1x16x16x4xbf16> to vector<16x16x4xbf16>
    %101 = vector.shape_cast %100 : vector<16x16x4xbf16> to vector<256x4xbf16>
    %c0_109 = arith.constant 0 : index
    %c2_110 = arith.constant 2 : index
    %c1_111 = arith.constant 1 : index
    %c0_112 = arith.constant 0 : index
    %102 = vector.load %arg2[%c0_109, %c2_110, %c1_111, %c0_112] : memref<1x18x18x4xbf16, #tpu.memory_space<vmem>>, vector<1x16x16x4xbf16>
    %103 = vector.shape_cast %102 : vector<1x16x16x4xbf16> to vector<16x16x4xbf16>
    %104 = vector.shape_cast %103 : vector<16x16x4xbf16> to vector<256x4xbf16>
    %c7 = arith.constant 7 : index
    %c0_113 = arith.constant 0 : index
    %c0_114 = arith.constant 0 : index
    %105 = vector.load %arg3[%c7, %c0_113, %c0_114] : memref<9x4x256xbf16, #tpu.memory_space<vmem>>, vector<1x4x256xbf16>
    %106 = vector.shape_cast %105 : vector<1x4x256xbf16> to vector<4x256xbf16>
    %cst_115 = arith.constant dense<0.000000e+00> : vector<256x256xf32>
    %107 = tpu.matmul %101, %106, %cst_115 {dimension_numbers = #tpu.dot_dimension_numbers<[1], [0], [0], [1], [0, 0, 1, 1], [], []>} : vector<256x4xbf16>, vector<4x256xbf16>, vector<256x256xf32> -> vector<256x256xf32>
    %108 = arith.addf %98, %107 : vector<256x256xf32>
    %c7_116 = arith.constant 7 : index
    %c0_117 = arith.constant 0 : index
    %c0_118 = arith.constant 0 : index
    %109 = vector.load %arg4[%c7_116, %c0_117, %c0_118] : memref<9x4x256xbf16, #tpu.memory_space<vmem>>, vector<1x4x256xbf16>
    %110 = vector.shape_cast %109 : vector<1x4x256xbf16> to vector<4x256xbf16>
    %cst_119 = arith.constant dense<0.000000e+00> : vector<256x256xf32>
    %111 = tpu.matmul %104, %110, %cst_119 {dimension_numbers = #tpu.dot_dimension_numbers<[1], [0], [0], [1], [0, 0, 1, 1], [], []>} : vector<256x4xbf16>, vector<4x256xbf16>, vector<256x256xf32> -> vector<256x256xf32>
    %112 = arith.addf %108, %111 : vector<256x256xf32>
    %c0_120 = arith.constant 0 : index
    %c2_121 = arith.constant 2 : index
    %c2_122 = arith.constant 2 : index
    %c0_123 = arith.constant 0 : index
    %113 = vector.load %arg1[%c0_120, %c2_121, %c2_122, %c0_123] : memref<1x18x18x4xbf16, #tpu.memory_space<vmem>>, vector<1x16x16x4xbf16>
    %114 = vector.shape_cast %113 : vector<1x16x16x4xbf16> to vector<16x16x4xbf16>
    %115 = vector.shape_cast %114 : vector<16x16x4xbf16> to vector<256x4xbf16>
    %c0_124 = arith.constant 0 : index
    %c2_125 = arith.constant 2 : index
    %c2_126 = arith.constant 2 : index
    %c0_127 = arith.constant 0 : index
    %116 = vector.load %arg2[%c0_124, %c2_125, %c2_126, %c0_127] : memref<1x18x18x4xbf16, #tpu.memory_space<vmem>>, vector<1x16x16x4xbf16>
    %117 = vector.shape_cast %116 : vector<1x16x16x4xbf16> to vector<16x16x4xbf16>
    %118 = vector.shape_cast %117 : vector<16x16x4xbf16> to vector<256x4xbf16>
    %c8 = arith.constant 8 : index
    %c0_128 = arith.constant 0 : index
    %c0_129 = arith.constant 0 : index
    %119 = vector.load %arg3[%c8, %c0_128, %c0_129] : memref<9x4x256xbf16, #tpu.memory_space<vmem>>, vector<1x4x256xbf16>
    %120 = vector.shape_cast %119 : vector<1x4x256xbf16> to vector<4x256xbf16>
    %cst_130 = arith.constant dense<0.000000e+00> : vector<256x256xf32>
    %121 = tpu.matmul %115, %120, %cst_130 {dimension_numbers = #tpu.dot_dimension_numbers<[1], [0], [0], [1], [0, 0, 1, 1], [], []>} : vector<256x4xbf16>, vector<4x256xbf16>, vector<256x256xf32> -> vector<256x256xf32>
    %122 = arith.addf %112, %121 : vector<256x256xf32>
    %c8_131 = arith.constant 8 : index
    %c0_132 = arith.constant 0 : index
    %c0_133 = arith.constant 0 : index
    %123 = vector.load %arg4[%c8_131, %c0_132, %c0_133] : memref<9x4x256xbf16, #tpu.memory_space<vmem>>, vector<1x4x256xbf16>
    %124 = vector.shape_cast %123 : vector<1x4x256xbf16> to vector<4x256xbf16>
    %cst_134 = arith.constant dense<0.000000e+00> : vector<256x256xf32>
    %125 = tpu.matmul %118, %124, %cst_134 {dimension_numbers = #tpu.dot_dimension_numbers<[1], [0], [0], [1], [0, 0, 1, 1], [], []>} : vector<256x4xbf16>, vector<4x256xbf16>, vector<256x256xf32> -> vector<256x256xf32>
    %126 = arith.addf %122, %125 : vector<256x256xf32>
    %c0_135 = arith.constant 0 : index
    %c0_136 = arith.constant 0 : index
    %127 = vector.load %arg5[%c0_135, %c0_136] : memref<1x256xf32, #tpu.memory_space<vmem>>, vector<1x256xf32>
    %128 = vector.broadcast %127 : vector<1x256xf32> to vector<256x256xf32>
    %129 = arith.mulf %126, %128 : vector<256x256xf32>
    %c0_137 = arith.constant 0 : index
    %c0_138 = arith.constant 0 : index
    %130 = vector.load %arg6[%c0_137, %c0_138] : memref<1x256xf32, #tpu.memory_space<vmem>>, vector<1x256xf32>
    %131 = vector.broadcast %130 : vector<1x256xf32> to vector<256x256xf32>
    %132 = arith.addf %129, %131 : vector<256x256xf32>
    %cst_139 = arith.constant 0.000000e+00 : f32
    %133 = vector.broadcast %cst_139 : f32 to vector<256x256xf32>
    %134 = arith.maximumf %132, %133 : vector<256x256xf32>
    %135 = vector.extract_strided_slice %134 {offsets = [0, 0], sizes = [256, 128], strides = [1, 1]} : vector<256x256xf32> to vector<256x128xf32>
    %136 = arith.truncf %135 : vector<256x128xf32> to vector<256x128xbf16>
    %c0_140 = arith.constant 0 : index
    %c0_141 = arith.constant 0 : index
    %c0_142 = arith.constant 0 : index
    %137 = vector.load %arg7[%c0_140, %c0_141, %c0_142] : memref<1x256x128xbf16, #tpu.memory_space<vmem>>, vector<1x256x128xbf16>
    %138 = vector.shape_cast %137 : vector<1x256x128xbf16> to vector<256x128xbf16>
    %139 = vector.shape_cast %136 : vector<256x128xbf16> to vector<1x256x128xbf16>
    tpu.vector_store %arg7[%c0_140, %c0_141, %c0_142], %139 {strides = array<i32>} : memref<1x256x128xbf16, #tpu.memory_space<vmem>>, vector<1x256x128xbf16>,
    %140 = vector.extract_strided_slice %134 {offsets = [0, 128], sizes = [256, 128], strides = [1, 1]} : vector<256x256xf32> to vector<256x128xf32>
    %141 = arith.truncf %140 : vector<256x128xf32> to vector<256x128xbf16>
    %c0_143 = arith.constant 0 : index
    %c0_144 = arith.constant 0 : index
    %c0_145 = arith.constant 0 : index
    %142 = vector.load %arg8[%c0_143, %c0_144, %c0_145] : memref<1x256x128xbf16, #tpu.memory_space<vmem>>, vector<1x256x128xbf16>
    %143 = vector.shape_cast %142 : vector<1x256x128xbf16> to vector<256x128xbf16>
    %144 = vector.shape_cast %141 : vector<256x128xbf16> to vector<1x256x128xbf16>
    tpu.vector_store %arg8[%c0_143, %c0_144, %c0_145], %144 {strides = array<i32>} : memref<1x256x128xbf16, #tpu.memory_space<vmem>>, vector<1x256x128xbf16>,
    return
  }
  func.func @transform_0(%arg0: i32) -> (i32, i32, i32, i32) {
    %c0_i32 = arith.constant 0 : i32
    %c0_i32_0 = arith.constant 0 : i32
    %c0_i32_1 = arith.constant 0 : i32
    %c0_i32_2 = arith.constant 0 : i32
    return %arg0, %c0_i32, %c0_i32_0, %c0_i32_1 : i32, i32, i32, i32
  }
  func.func @transform_1(%arg0: i32) -> (i32, i32, i32, i32) {
    %c0_i32 = arith.constant 0 : i32
    %c0_i32_0 = arith.constant 0 : i32
    %c0_i32_1 = arith.constant 0 : i32
    %c0_i32_2 = arith.constant 0 : i32
    return %arg0, %c0_i32, %c0_i32_0, %c0_i32_1 : i32, i32, i32, i32
  }
  func.func @transform_2(%arg0: i32) -> (i32, i32, i32) {
    %c0_i32 = arith.constant 0 : i32
    %c0_i32_0 = arith.constant 0 : i32
    %c0_i32_1 = arith.constant 0 : i32
    %c0_i32_2 = arith.constant 0 : i32
    return %c0_i32, %c0_i32_0, %c0_i32_1 : i32, i32, i32
  }
  func.func @transform_3(%arg0: i32) -> (i32, i32, i32) {
    %c0_i32 = arith.constant 0 : i32
    %c0_i32_0 = arith.constant 0 : i32
    %c0_i32_1 = arith.constant 0 : i32
    %c0_i32_2 = arith.constant 0 : i32
    return %c0_i32, %c0_i32_0, %c0_i32_1 : i32, i32, i32
  }
  func.func @transform_4(%arg0: i32) -> (i32, i32) {
    %c0_i32 = arith.constant 0 : i32
    %c0_i32_0 = arith.constant 0 : i32
    %c0_i32_1 = arith.constant 0 : i32
    return %c0_i32, %c0_i32_0 : i32, i32
  }
  func.func @transform_5(%arg0: i32) -> (i32, i32) {
    %c0_i32 = arith.constant 0 : i32
    %c0_i32_0 = arith.constant 0 : i32
    %c0_i32_1 = arith.constant 0 : i32
    return %c0_i32, %c0_i32_0 : i32, i32
  }
  func.func @transform_6(%arg0: i32) -> (i32, i32, i32) {
    %c0_i32 = arith.constant 0 : i32
    %c0_i32_0 = arith.constant 0 : i32
    %c0_i32_1 = arith.constant 0 : i32
    return %arg0, %c0_i32, %c0_i32_0 : i32, i32, i32
  }
  func.func @transform_7(%arg0: i32) -> (i32, i32, i32) {
    %c0_i32 = arith.constant 0 : i32
    %c0_i32_0 = arith.constant 0 : i32
    %c0_i32_1 = arith.constant 0 : i32
    return %arg0, %c0_i32, %c0_i32_0 : i32, i32, i32
  }
}

</mosaic_0001>

<bundles_post_ra>
// kernel: resnet_init_forward.1
= control target key start
LH: loop header
LB: loop body
LE: loop exit
PB: predicated region body
PF: predicated region fallthrough
CT: control target
= control target key end

     0   :  { %s14529_s24 = smov 0   ;;  %s17076_s0 = inlined_call_operand.vmem [shape: bf16[2,18,18,4], index: 0, kind: input, shape index: {}]   ;;  %s17077_s1 = inlined_call_operand.vmem [shape: bf16[2,18,18,4], index: 1, kind: input, shape index: {}]   ;;  %s17078_s2 = inlined_call_operand.vmem [shape: bf16[9,4,256], index: 2, kind: input, shape index: {}]   ;;  %s17079_s3 = inlined_call_operand.vmem [shape: bf16[9,4,256], index: 3, kind: input, shape index: {}]   ;;  %s17080_s4 = inlined_call_operand.vmem [shape: f32[1,256], index: 4, kind: input, shape index: {}]   ;;  %s17081_s5 = inlined_call_operand.vmem [shape: f32[1,256], index: 5, kind: input, shape index: {}]   ;;  %s17082_s6 = inlined_call_operand.vmem [shape: bf16[2,256,128], index: 6, kind: output, shape index: {0}]   ;;  %s17083_s7 = inlined_call_operand.vmem [shape: bf16[2,256,128], index: 7, kind: output, shape index: {1}]  }
   0x1 LB: > { %s11715_s25 = sadd.s32 4294967295, %s14486_s24   ;;  %p11719_p0 = scmp.ge.s32.totalorder %s14486_s24, 1  ;;  %s14486_s24 = sphi %s14529_s24, %s18_s24  }
   0x2   : > { %p250_p1 = scmp.lt.s32.totalorder %s14486_s24, 3 }
   0x4   : > { %p251_p2 = pnand %p11719_p0, %p250_p1 }
   0x5   : > { %v11742_v0 = vld.sshfl [vmem:[%s17079_s3] sm:$0x33 pattern:$0x76325410] (!%p251_p2)  ;;  %vm517_vm0 = vcmask (!%p251_p2), 1041408   ;;  %v14488_v3 = vmov (!%p251_p2), 0  }
   0x6   : > { %254 = sbr.rel (%p251_p2) target bundleno = 1399 (0x577), region = 44  ;;  %v467_v1 = vcombine.high (!%p251_p2), %v11742_v0, %v11742_v0  ;;  %v519_v2 = vsel (!%p251_p2), %vm517_vm0, %v11742_v0, 0  ;;  %556 = vmatprep.mubr.bf16.mxu1 (!%p251_p2), %v14488_v3  ;;  %p292_p3 = scmp.lt.s32.totalorder (!%p251_p2), %s11715_s25, 1  ;;  %6068 = vmatprep.mubr.bf16.mxu0 (!%p251_p2), %v14488_v3  ;;  %vm468_vm1 = vcmask (!%p251_p2), 31744   ;;  %vm1101_vm2 = vsmask.f32 (!%p251_p2), 3328 }
   0x7   : > { %v12248_v4 = vld.sshfl [vmem:[%s17079_s3 + $0x10] sm:$0x33 pattern:$0x76325410] (!%p251_p2)  ;;  %vm1102_vm3 = vsmask.f32 (!%p251_p2), 7440 }
   0x8   : > { %11743 = vmatprep.subr.msk.bf16.mxu1 (!%p251_p2), %vm517_vm0, %v467_v1  ;;  %v5981_v5 = vcombine.high (!%p251_p2), %v12248_v4, %v12248_v4  ;;  %v6031_v6 = vsel (!%p251_p2), %vm517_vm0, %v12248_v4, 0  ;;  %v11776_v7 = vld.sshfl [vmem:[%s17078_s2] sm:$0x33 pattern:$0x76325410] (!%p251_p2)  ;;  %vm14580_vm4 = vmor (!%p251_p2), %vm1101_vm2, %vm1102_vm3  ;;  %vm2756_vm5 = vcmask (!%p251_p2), 1042432  }
   0x9   : > { %525 = vmatpush1.bf16.msra.mxu1 (!%p251_p2), %v519_v2  ;;  %v805_v8 = vcombine.high (!%p251_p2), %v11776_v7, %v11776_v7  ;;  %v12411_v9 = vld.sshfl [vmem:[%s17078_s2 + $0x14] sm:$0x33 pattern:$0x76325410] (!%p251_p2)  ;;  %v855_v12 = vsel (!%p251_p2), %vm517_vm0, %v11776_v7, 0  ;;  %vm2757_vm6 = vcmask (!%p251_p2), 1046532  }
   0xa   : > { %12249 = vmatprep.subr.msk.bf16.mxu0 (!%p251_p2), %vm517_vm0, %v5981_v5  ;;  %v6767_v10 = vcombine.high (!%p251_p2), %v12411_v9, %v12411_v9  ;;  %v6817_v38 = vsel (!%p251_p2), %vm517_vm0, %v12411_v9, 0  ;;  %vm14796_vm7 = vmor (!%p251_p2), %vm2756_vm5, %vm2757_vm6 }
   0xb   : > { %6037 = vmatpush1.bf16.msra.mxu0 (!%p251_p2), %v6031_v6  ;;  %11777 = vmatprep.subr.msk.bf16.mxu1 (!%p251_p2), %vm517_vm0, %v805_v8 }
   0xc   : > { %12412 = vmatprep.subr.msk.bf16.mxu0 (!%p251_p2), %vm517_vm0, %v6767_v10 }
   0xd   : > { %s17089_s25 = smov (!%p292_p3, %s11715_s25), 1 }
   0xe   : > { %s14372_s11 = smul.u32 216, %s17089_s25  ;;  %s13028_s12 = sshll.u32 %s17089_s25, 7 }
   0xf   : > { %s16914_s16 = scalar_lea.vmem %s17082_s6, %s13028_s12  ;;  %s16919_s19 = scalar_lea.vmem %s17083_s7, %s13028_s12 }
  0x10   : > { %s14564_s14 = scalar_lea.vmem %s17077_s1, %s14372_s11  ;;  %s14661_s17 = scalar_lea.vmem %s17076_s0, %s14372_s11 }
  0x11   : > { %v14382_v11 = vld [vmem:[%s14564_s14] sm:$0xff]   ;;  %v12148_v13 = vld [vmem:[%s14564_s14 + $0xc] sm:$0xf]  ;;  %v12149_v14 = vld [vmem:[%s14564_s14 + $0x10] sm:$0xf] }
  0x12   : > { %11744 = vmatmul.mubr.msk.bf16.vlgmr.msra.gmra.mrb[0].mxu1 %vm468_vm1, %v14382_v11  ;;  %v12150_v15 = vld [vmem:[%s14564_s14 + $0x14] sm:$0x1]  ;;  %v5170_v16 = vshrl.u32 %v12148_v13, 16  ;;  %v5173_v17 = vshll.u32 %v12148_v13, 16  ;;  %v5179_v18 = vshll.u32 %v12149_v14, 16  ;;  %v5183_v19 = vshrl.u32 %v12149_v14, 16 }
  0x13   : > { %566 = vmatprep.mubr.bf16.mxu1 %v14488_v3  ;;  %861 = vmatpush1.bf16.msra.mxu1 %v855_v12  ;;  %v14383_v20 = vld [vmem:[%s14564_s14 + $0xc] sm:$0xff]   ;;  %v5189_v21 = vshll.u32 %v12150_v15, 16  ;;  %v12151_v22 = vld [vmem:[%s14564_s14 + $0x18] sm:$0xf]  ;;  %v12152_v27 = vld [vmem:[%s14564_s14 + $0x1c] sm:$0xf] }
  0x14   : > { %v5172_v23 = vrot.slane %v5170_v16, 4  ;;  %v5175_v24 = vrot.slane %v5173_v17, 5  ;;  %v5181_v25 = vrot.slane %v5179_v18, 5  ;;  %v5185_v26 = vrot.slane %v5183_v19, 4  ;;  %v12153_v29 = vld [vmem:[%s14564_s14 + $0x20] sm:$0x1] }
  0x15   : > { %v5191_v28 = vrot.slane %v5189_v21, 5  ;;  %v5194_v30 = vshrl.u32 %v12151_v22, 16  ;;  %v5197_v31 = vshll.u32 %v12151_v22, 16  ;;  %v5203_v32 = vshll.u32 %v12152_v27, 16  ;;  %v12154_v42 = vld [vmem:[%s14564_s14 + $0x24] sm:$0xf] }
  0x16   : > { %v5176_v33 = vor.u32 %v5175_v24, %v5172_v23  ;;  %v5186_v34 = vor.u32 %v5185_v26, %v5181_v25  ;;  %v5207_v35 = vshrl.u32 %v12152_v27, 16  ;;  %v5213_v36 = vshll.u32 %v12153_v29, 16  ;;  %v12155_v47 = vld [vmem:[%s14564_s14 + $0x28] sm:$0xf]  ;;  %v12156_v49 = vld [vmem:[%s14564_s14 + $0x2c] sm:$0x1] }
  0x17   : > { %v5196_v39 = vrot.slane %v5194_v30, 4  ;;  %v5199_v40 = vrot.slane %v5197_v31, 5  ;;  %v5205_v41 = vrot.slane %v5203_v32, 5  ;;  %v5218_v50 = vshrl.u32 %v12154_v42, 16  ;;  %v12157_v61 = vld [vmem:[%s14564_s14 + $0x30] sm:$0xf] }
  0x18   : > { %v5177_v43 = vrot.slane %v5176_v33, 4  ;;  %v5187_v44 = vrot.slane %v5186_v34, 4  ;;  %v5209_v45 = vrot.slane %v5207_v35, 4  ;;  %v5215_v46 = vrot.slane %v5213_v36, 5  ;;  %v12158_v1 = vld [vmem:[%s14564_s14 + $0x34] sm:$0xf] }
  0x19   : > { %v5200_v48 = vor.u32 %v5199_v40, %v5196_v39  ;;  %v5221_v51 = vshll.u32 %v12154_v42, 16  ;;  %v5227_v52 = vshll.u32 %v12155_v47, 16  ;;  %v5231_v56 = vshrl.u32 %v12155_v47, 16  ;;  %v14384_v2 = vld [vmem:[%s14564_s14 + $0x18] sm:$0xff]   ;;  %v12161_v23 = vld [vmem:[%s14564_s14 + $0x40] sm:$0xf] }
  0x1a   : > { %11745 = vmatmul.mubr.msk.bf16.gmra.mrb[4].mxu1 %vm468_vm1, %v14383_v20  ;;  %v5182_v53 = vsel %vm14580_vm4, %v5177_v43, %v5181_v25  ;;  %v5192_v54 = vsel %vm14580_vm4, %v5187_v44, %v5191_v28  ;;  %v5210_v55 = vor.u32 %v5209_v45, %v5205_v41  ;;  %v5220_v59 = vrot.slane %v5218_v50, 4  ;;  %v12159_v13 = vld [vmem:[%s14564_s14 + $0x38] sm:$0x1]  ;;  %v12160_v22 = vld [vmem:[%s14564_s14 + $0x3c] sm:$0xf]  ;;  %v14385_v24 = vld [vmem:[%s14564_s14 + $0x24] sm:$0xff]  }
  0x1b   : > { %576 = vmatprep.mubr.bf16.mxu1 %v14488_v3  ;;  %v12232_v57 = vcombine.low %v5182_v53, %v5192_v54  ;;  %v5201_v58 = vrot.slane %v5200_v48, 4  ;;  %v5223_v60 = vrot.slane %v5221_v51, 5  ;;  %v5229_v63 = vrot.slane %v5227_v52, 5  ;;  %v12162_v34 = vld [vmem:[%s14564_s14 + $0x44] sm:$0x1]  ;;  %v14386_v47 = vld [vmem:[%s14564_s14 + $0x30] sm:$0xff]  }
  0x1c   : > { %v5211_v62 = vrot.slane %v5210_v55, 4  ;;  %v5233_v0 = vrot.slane %v5231_v56, 4  ;;  %v5237_v5 = vshll.u32 %v12156_v49, 16  ;;  %v5242_v6 = vshrl.u32 %v12157_v61, 16  ;;  %v12163_v44 = vld [vmem:[%s14564_s14 + $0x48] sm:$0xf] }
  0x1d   : > { %12250 = vmatmul.mubr.msk.bf16.vlgmr.msra.gmra.mrb[0].mxu0 %vm468_vm1, %v12232_v57  ;;  %v5224_v4 = vor.u32 %v5223_v60, %v5220_v59  ;;  %v5245_v7 = vshll.u32 %v12157_v61, 16  ;;  %v5206_v8 = vsel %vm14580_vm4, %v5201_v58, %v5205_v41  ;;  %v5251_v11 = vshll.u32 %v12158_v1, 16  ;;  %v12164_v45 = vld [vmem:[%s14564_s14 + $0x4c] sm:$0xf]  ;;  %v12165_v58 = vld [vmem:[%s14564_s14 + $0x50] sm:$0x1] }
  0x1e   : > { %6823 = vmatpush1.bf16.msra.mxu0 %v6817_v38  ;;  %6078 = vmatprep.mubr.bf16.mxu0 %v14488_v3  ;;  %v5216_v9 = vsel %vm14580_vm4, %v5211_v62, %v5215_v46  ;;  %v5234_v10 = vor.u32 %v5233_v0, %v5229_v63  ;;  %v5255_v14 = vshrl.u32 %v12158_v1, 16  ;;  %v5244_v16 = vrot.slane %v5242_v6, 4  ;;  %v12166_v1 = vld [vmem:[%s14564_s14 + $0x54] sm:$0xf] }
  0x1f   : > { %v5225_v12 = vrot.slane %v5224_v4, 4  ;;  %v12233_v15 = vcombine.low %v5206_v8, %v5216_v9  ;;  %v5247_v17 = vrot.slane %v5245_v7, 5  ;;  %v5239_v19 = vrot.slane %v5237_v5, 5  ;;  %v14387_v5 = vld [vmem:[%s14564_s14 + $0x3c] sm:$0xff]  }
  0x20   : > { %v5235_v18 = vrot.slane %v5234_v10, 4  ;;  %v5253_v20 = vrot.slane %v5251_v11, 5  ;;  %v5257_v21 = vrot.slane %v5255_v14, 4  ;;  %v5261_v25 = vshll.u32 %v12159_v13, 16 }
  0x21   : > { %v5230_v26 = vsel %vm14580_vm4, %v5225_v12, %v5229_v63  ;;  %v5248_v27 = vor.u32 %v5247_v17, %v5244_v16  ;;  %v5266_v28 = vshrl.u32 %v12160_v22, 16  ;;  %v5269_v29 = vshll.u32 %v12160_v22, 16  ;;  %v12168_v16 = vld [vmem:[%s14564_s14 + $0x5c] sm:$0x1] }
  0x22   : > { %11746 = vmatmul.mubr.msk.bf16.gmra.mrb[8].mxu1 %vm468_vm1, %v14384_v2  ;;  %v5240_v30 = vsel %vm14580_vm4, %v5235_v18, %v5239_v19  ;;  %v5258_v31 = vor.u32 %v5257_v21, %v5253_v20  ;;  %v5275_v32 = vshll.u32 %v12161_v23, 16  ;;  %v5279_v33 = vshrl.u32 %v12161_v23, 16  ;;  %v12167_v2 = vld [vmem:[%s14564_s14 + $0x58] sm:$0xf]  ;;  %v12169_v23 = vld [vmem:[%s14564_s14 + $0x60] sm:$0xf] }
  0x23   : > { %586 = vmatprep.mubr.bf16.mxu1 %v14488_v3  ;;  %v12234_v35 = vcombine.low %v5230_v26, %v5240_v30  ;;  %v5249_v36 = vrot.slane %v5248_v27, 4  ;;  %v5268_v38 = vrot.slane %v5266_v28, 4  ;;  %v5271_v39 = vrot.slane %v5269_v29, 5  ;;  %v14388_v26 = vld [vmem:[%s14564_s14 + $0x48] sm:$0xff]  }
  0x24   : > { %v5259_v40 = vrot.slane %v5258_v31, 4  ;;  %v5263_v41 = vrot.slane %v5261_v25, 5  ;;  %v5277_v42 = vrot.slane %v5275_v32, 5  ;;  %v5281_v43 = vrot.slane %v5279_v33, 4 }
  0x25   : > { %12251 = vmatmul.mubr.msk.bf16.gmra.mrb[4].mxu0 %vm468_vm1, %v12233_v15  ;;  %v5285_v46 = vshll.u32 %v12162_v34, 16  ;;  %v5254_v48 = vsel %vm14580_vm4, %v5249_v36, %v5253_v20  ;;  %v5272_v49 = vor.u32 %v5271_v39, %v5268_v38  ;;  %v5290_v50 = vshrl.u32 %v12163_v44, 16  ;;  %v12171_v39 = vld [vmem:[%s14564_s14 + $0x68] sm:$0x1] }
  0x26   : > { %6088 = vmatprep.mubr.bf16.mxu0 %v14488_v3  ;;  %v5293_v51 = vshll.u32 %v12163_v44, 16  ;;  %v5264_v52 = vsel %vm14580_vm4, %v5259_v40, %v5263_v41  ;;  %v5282_v53 = vor.u32 %v5281_v43, %v5277_v42  ;;  %v5299_v54 = vshll.u32 %v12164_v45, 16 }
  0x27   : > { %v5303_v55 = vshrl.u32 %v12164_v45, 16  ;;  %v12235_v56 = vcombine.low %v5254_v48, %v5264_v52  ;;  %v5273_v57 = vrot.slane %v5272_v49, 4  ;;  %v5292_v59 = vrot.slane %v5290_v50, 4  ;;  %v14389_v49 = vld [vmem:[%s14564_s14 + $0x54] sm:$0xff]  }
  0x28   : > { %v5295_v60 = vrot.slane %v5293_v51, 5  ;;  %v5283_v61 = vrot.slane %v5282_v53, 4  ;;  %v5287_v62 = vrot.slane %v5285_v46, 5  ;;  %v5301_v63 = vrot.slane %v5299_v54, 5  ;;  %v12173_v46 = vld [vmem:[%s14564_s14 + $0x70] sm:$0xf] }
  0x29   : > { %v5305_v0 = vrot.slane %v5303_v55, 4  ;;  %v5309_v4 = vshll.u32 %v12165_v58, 16  ;;  %v5278_v6 = vsel %vm14580_vm4, %v5273_v57, %v5277_v42  ;;  %v5314_v8 = vshrl.u32 %v12166_v1, 16 }
  0x2a   : > { %11747 = vmatmul.mubr.msk.bf16.gmra.mrb[12].mxu1 %vm468_vm1, %v14385_v24  ;;  %v5296_v7 = vor.u32 %v5295_v60, %v5292_v59  ;;  %v5317_v9 = vshll.u32 %v12166_v1, 16  ;;  %v5288_v10 = vsel %vm14580_vm4, %v5283_v61, %v5287_v62  ;;  %v5323_v12 = vshll.u32 %v12167_v2, 16  ;;  %v12170_v24 = vld [vmem:[%s14564_s14 + $0x64] sm:$0xf]  ;;  %v12174_v59 = vld [vmem:[%s14564_s14 + $0x74] sm:$0x1] }
  0x2b   : > { %596 = vmatprep.mubr.bf16.mxu1 %v14488_v3  ;;  %v5306_v11 = vor.u32 %v5305_v0, %v5301_v63  ;;  %v5327_v13 = vshrl.u32 %v12167_v2, 16  ;;  %v12236_v14 = vcombine.low %v5278_v6, %v5288_v10  ;;  %v5316_v17 = vrot.slane %v5314_v8, 4  ;;  %v12175_v62 = vld [vmem:[%s14564_s14 + $0x78] sm:$0xf]  ;;  %v14390_v10 = vld [vmem:[%s14564_s14 + $0x60] sm:$0xff]  }
  0x2c   : > { %v5297_v15 = vrot.slane %v5296_v7, 4  ;;  %v5319_v18 = vrot.slane %v5317_v9, 5  ;;  %v5311_v20 = vrot.slane %v5309_v4, 5  ;;  %v5325_v21 = vrot.slane %v5323_v12, 5 }
  0x2d   : > { %12252 = vmatmul.mubr.msk.bf16.gmra.mrb[8].mxu0 %vm468_vm1, %v12234_v35  ;;  %v5307_v19 = vrot.slane %v5306_v11, 4  ;;  %v5329_v22 = vrot.slane %v5327_v13, 4  ;;  %v5333_v25 = vshll.u32 %v12168_v16, 16  ;;  %v5338_v29 = vshrl.u32 %v12169_v23, 16  ;;  %v12172_v35 = vld [vmem:[%s14564_s14 + $0x6c] sm:$0xf] }
  0x2e   : > { %6098 = vmatprep.mubr.bf16.mxu0 %v14488_v3  ;;  %v5302_v27 = vsel %vm14580_vm4, %v5297_v15, %v5301_v63  ;;  %v5320_v28 = vor.u32 %v5319_v18, %v5316_v17  ;;  %v5341_v30 = vshll.u32 %v12169_v23, 16  ;;  %v5347_v33 = vshll.u32 %v12170_v24, 16  ;;  %v12176_v63 = vld [vmem:[%s14564_s14 + $0x7c] sm:$0xf]  ;;  %v12178_v16 = vld [vmem:[%s14564_s14 + $0x84] sm:$0xf] }
  0x2f   : > { %v5312_v31 = vsel %vm14580_vm4, %v5307_v19, %v5311_v20  ;;  %v5330_v32 = vor.u32 %v5329_v22, %v5325_v21  ;;  %v5351_v34 = vshrl.u32 %v12170_v24, 16  ;;  %v5340_v40 = vrot.slane %v5338_v29, 4  ;;  %v14688_v23 = vld.sshfl [vmem:[%s17078_s2 + $0x4] sm:$0x33 pattern:$0x76325410] }
  0x30   : > { %v12237_v36 = vcombine.low %v5302_v27, %v5312_v31  ;;  %v5321_v38 = vrot.slane %v5320_v28, 4  ;;  %v5343_v41 = vrot.slane %v5341_v30, 5  ;;  %v5335_v43 = vrot.slane %v5333_v25, 5  ;;  %v12177_v27 = vld [vmem:[%s14564_s14 + $0x80] sm:$0x1]  ;;  %v14391_v29 = vld [vmem:[%s14564_s14 + $0x6c] sm:$0xff]  }
  0x31   : > { %v5331_v42 = vrot.slane %v5330_v32, 4  ;;  %v5349_v44 = vrot.slane %v5347_v33, 5  ;;  %v5353_v45 = vrot.slane %v5351_v34, 4  ;;  %v5365_v48 = vshll.u32 %v12172_v35, 16 }
  0x32   : > { %11748 = vmatmul.mubr.msk.bf16.gmra.mrb[16].mxu1 %vm468_vm1, %v14386_v47  ;;  %v5362_v47 = vshrl.u32 %v12172_v35, 16  ;;  %v5326_v50 = vsel %vm14580_vm4, %v5321_v38, %v5325_v21  ;;  %v5344_v51 = vor.u32 %v5343_v41, %v5340_v40  ;;  %v5357_v52 = vshll.u32 %v12171_v39, 16  ;;  %v12179_v21 = vld [vmem:[%s14564_s14 + $0x88] sm:$0xf] }
  0x33   : > { %606 = vmatprep.mubr.bf16.mxu1 %v14488_v3  ;;  %v5336_v53 = vsel %vm14580_vm4, %v5331_v42, %v5335_v43  ;;  %v5354_v54 = vor.u32 %v5353_v45, %v5349_v44  ;;  %v5371_v55 = vshll.u32 %v12173_v46, 16  ;;  %v5367_v58 = vrot.slane %v5365_v48, 5  ;;  %v12180_v42 = vld [vmem:[%s14564_s14 + $0x8c] sm:$0x1] }
  0x34   : > { %v5364_v57 = vrot.slane %v5362_v47, 4  ;;  %v12238_v60 = vcombine.low %v5326_v50, %v5336_v53  ;;  %v5359_v61 = vrot.slane %v5357_v52, 5  ;;  %v5345_v0 = vrot.slane %v5344_v51, 4  ;;  %v12181_v50 = vld [vmem:[%s14564_s14 + $0x90] sm:$0xf]  ;;  %v14392_v53 = vld [vmem:[%s14564_s14 + $0x78] sm:$0xff]  }
  0x35   : > { %12253 = vmatmul.mubr.msk.bf16.gmra.mrb[12].mxu0 %vm468_vm1, %v12235_v56  ;;  %v5375_v56 = vshrl.u32 %v12173_v46, 16  ;;  %v5355_v1 = vrot.slane %v5354_v54, 4  ;;  %v5373_v2 = vrot.slane %v5371_v55, 5  ;;  %v5381_v6 = vshll.u32 %v12174_v59, 16  ;;  %v12182_v51 = vld [vmem:[%s14564_s14 + $0x94] sm:$0xf] }
  0x36   : > { %6108 = vmatprep.mubr.bf16.mxu0 %v14488_v3  ;;  %v5386_v7 = vshrl.u32 %v12175_v62, 16  ;;  %v5389_v8 = vshll.u32 %v12175_v62, 16  ;;  %v5395_v9 = vshll.u32 %v12176_v63, 16  ;;  %v5350_v11 = vsel %vm14580_vm4, %v5345_v0, %v5349_v44  ;;  %v12184_v62 = vld [vmem:[%s14564_s14 + $0x9c] sm:$0xf] }
  0x37   : > { %v5377_v4 = vrot.slane %v5375_v56, 4  ;;  %v5360_v12 = vsel %vm14580_vm4, %v5355_v1, %v5359_v61  ;;  %v5383_v17 = vrot.slane %v5381_v6, 5  ;;  %v5410_v28 = vshrl.u32 %v12178_v16, 16 }
  0x38   : > { %v5388_v18 = vrot.slane %v5386_v7, 4  ;;  %v5391_v19 = vrot.slane %v5389_v8, 5  ;;  %v5397_v20 = vrot.slane %v5395_v9, 5  ;;  %v12239_v22 = vcombine.low %v5350_v11, %v5360_v12  ;;  %v12183_v9 = vld [vmem:[%s14564_s14 + $0x98] sm:$0x1]  ;;  %v14393_v12 = vld [vmem:[%s14564_s14 + $0x84] sm:$0xff]  }
  0x39   : > { %v5378_v13 = vor.u32 %v5377_v4, %v5373_v2  ;;  %v5413_v31 = vshll.u32 %v12178_v16, 16  ;;  %v1978_v32 = vcombine.high %v14688_v23, %v14688_v23  ;;  %v5419_v34 = vshll.u32 %v12179_v21, 16 }
  0x3a   : > { %11749 = vmatmul.mubr.msk.bf16.gmra.mrb[20].mxu1 %vm468_vm1, %v14387_v5  ;;  %v5368_v5 = vor.u32 %v5367_v58, %v5364_v57  ;;  %v5392_v30 = vor.u32 %v5391_v19, %v5388_v18  ;;  %v5423_v35 = vshrl.u32 %v12179_v21, 16  ;;  %v5405_v40 = vshll.u32 %v12177_v27, 16  ;;  %v12186_v21 = vld [vmem:[%s14564_s14 + $0xa4] sm:$0x1]  ;;  %v12188_v27 = vld [vmem:[%s14564_s14 + $0xac] sm:$0xf] }
  0x3b   : > { %616 = vmatprep.mubr.bf16.mxu1 %v14488_v3  ;;  %v5379_v24 = vrot.slane %v5378_v13, 4  ;;  %11812 = vmatprep.subr.msk.bf16.mxu1 %vm517_vm0, %v1978_v32  ;;  %v5412_v43 = vrot.slane %v5410_v28, 4  ;;  %v5415_v44 = vrot.slane %v5413_v31, 5  ;;  %v5421_v46 = vrot.slane %v5419_v34, 5 }
  0x3c   : > { %v5369_v15 = vrot.slane %v5368_v5, 4  ;;  %v5393_v41 = vrot.slane %v5392_v30, 4  ;;  %v5425_v47 = vrot.slane %v5423_v35, 4  ;;  %v5429_v52 = vshll.u32 %v12180_v42, 16 }
  0x3d   : > { %12254 = vmatmul.mubr.msk.bf16.gmra.mrb[16].mxu0 %vm468_vm1, %v12236_v14  ;;  %v5399_v14 = vshrl.u32 %v12176_v63, 16  ;;  %v5384_v38 = vsel %vm14580_vm4, %v5379_v24, %v5383_v17  ;;  %v5416_v55 = vor.u32 %v5415_v44, %v5412_v43  ;;  %v5434_v57 = vshrl.u32 %v12181_v50, 16  ;;  %v12185_v63 = vld [vmem:[%s14564_s14 + $0xa0] sm:$0xf]  ;;  %v12187_v17 = vld [vmem:[%s14564_s14 + $0xa8] sm:$0xf] }
  0x3e   : > { %6118 = vmatprep.mubr.bf16.mxu0 %v14488_v3  ;;  %v5398_v54 = vsel %vm14580_vm4, %v5393_v41, %v5397_v20  ;;  %v5426_v56 = vor.u32 %v5425_v47, %v5421_v46  ;;  %v5437_v59 = vshll.u32 %v12181_v50, 16  ;;  %v5447_v61 = vshrl.u32 %v12182_v51, 16  ;;  %v12189_v41 = vld [vmem:[%s14564_s14 + $0xb0] sm:$0x1] }
  0x3f   : > { %v5401_v25 = vrot.slane %v5399_v14, 4  ;;  %v5417_v1 = vrot.slane %v5416_v55, 4  ;;  %v5431_v4 = vrot.slane %v5429_v52, 5  ;;  %v5436_v5 = vrot.slane %v5434_v57, 4  ;;  %v12191_v52 = vld [vmem:[%s14564_s14 + $0xb8] sm:$0xf] }
  0x40   : > { %v5439_v6 = vrot.slane %v5437_v59, 5  ;;  %v5449_v8 = vrot.slane %v5447_v61, 4  ;;  %v5461_v11 = vshll.u32 %v12184_v62, 16  ;;  %v5471_v16 = vshrl.u32 %v12185_v63, 16  ;;  %v12192_v59 = vld [vmem:[%s14564_s14 + $0xbc] sm:$0x1] }
  0x41   : > { %v5402_v39 = vor.u32 %v5401_v25, %v5397_v20  ;;  %v5422_v13 = vsel %vm14580_vm4, %v5417_v1, %v5421_v46  ;;  %v5453_v20 = vshll.u32 %v12183_v9, 16  ;;  %v5482_v30 = vshrl.u32 %v12187_v17, 16 }
  0x42   : > { %11750 = vmatmul.mubr.msk.bf16.gmra.mrb[24].mxu1 %vm468_vm1, %v14388_v26  ;;  %v14694_v26 = vld.sshfl [vmem:[%s17079_s3 + $0x14] sm:$0x33 pattern:$0x76325410]  ;;  %v5440_v18 = vor.u32 %v5439_v6, %v5436_v5  ;;  %v5463_v24 = vrot.slane %v5461_v11, 5  ;;  %v5485_v31 = vshll.u32 %v12187_v17, 16 }
  0x43   : > { %626 = vmatprep.mubr.bf16.mxu1 %v14488_v3  ;;  %v7137_v33 = vcombine.high %v14694_v26, %v14694_v26  ;;  %v5403_v48 = vrot.slane %v5402_v39, 4  ;;  %v5455_v34 = vrot.slane %v5453_v20, 5  ;;  %v5477_v35 = vshll.u32 %v12186_v21, 16  ;;  %v14396_v20 = vld [vmem:[%s14564_s14 + $0xa8] sm:$0xff]  }
  0x44   : > { %v5441_v32 = vrot.slane %v5440_v18, 4  ;;  %v5495_v39 = vshrl.u32 %v12188_v27, 16  ;;  %v5484_v43 = vrot.slane %v5482_v30, 4  ;;  %v5487_v44 = vrot.slane %v5485_v31, 5 }
  0x45   : > { %12255 = vmatmul.mubr.msk.bf16.gmra.mrb[20].mxu0 %vm468_vm1, %v12237_v36  ;;  %v5374_v36 = vsel %vm14580_vm4, %v5369_v15, %v5373_v2  ;;  %12447 = vmatprep.subr.msk.bf16.mxu0 %vm517_vm0, %v7137_v33  ;;  %v5427_v2 = vrot.slane %v5426_v56, 4  ;;  %v5467_v15 = vshll.u32 %v12185_v63, 16  ;;  %v5519_v63 = vshrl.u32 %v12191_v52, 16 }
  0x46   : > { %6128 = vmatprep.mubr.bf16.mxu0 %v14488_v3  ;;  %v12240_v45 = vcombine.low %v5374_v36, %v5384_v38  ;;  %v5491_v38 = vshll.u32 %v12188_v27, 16  ;;  %v5488_v57 = vor.u32 %v5487_v44, %v5484_v43 }
  0x47   : > { %v5432_v14 = vsel %vm14580_vm4, %v5427_v2, %v5431_v4  ;;  %v5469_v28 = vrot.slane %v5467_v15, 5  ;;  %v12194_v4 = vld [vmem:[%s14564_s14 + $0xc4] sm:$0xf]  ;;  %v5521_v11 = vrot.slane %v5519_v63, 4  ;;  %v12271_v63 = vld [vmem:[%s14661_s17 + $0x20] sm:$0x1] }
  0x48   : > { %v12242_v25 = vcombine.low %v5422_v13, %v5432_v14  ;;  %v5493_v50 = vrot.slane %v5491_v38, 5  ;;  %v5489_v1 = vrot.slane %v5488_v57, 4  ;;  %v5539_v15 = vshll.u32 %v12194_v4, 16  ;;  %v11155_v57 = vld [vmem:[%s17081_s5] sm:$0x3] }
  0x4a   : > { %11751 = vmatmul.mubr.msk.bf16.gmra.mrb[28].mxu1 %vm468_vm1, %v14389_v49  ;;  %v5407_v49 = vrot.slane %v5405_v40, 5  ;;  %v14394_v40 = vld [vmem:[%s14564_s14 + $0x90] sm:$0xff]   ;;  %v5494_v21 = vsel %vm14580_vm4, %v5489_v1, %v5493_v50  ;;  %v5541_v31 = vrot.slane %v5539_v15, 5  ;;  %v12274_v15 = vld [vmem:[%s14661_s17 + $0x2c] sm:$0x1] }
  0x4b   : > { %636 = vmatprep.mubr.bf16.mxu1 %v14488_v3 }
  0x4c   : > { %v5408_v58 = vsel %vm14580_vm4, %v5403_v48, %v5407_v49  ;;  %v5479_v49 = vrot.slane %v5477_v35, 5 }
  0x4d   : > { %12256 = vmatmul.mubr.msk.bf16.gmra.mrb[24].mxu0 %vm468_vm1, %v12238_v60  ;;  %v5443_v60 = vshll.u32 %v12182_v51, 16  ;;  %v12241_v0 = vcombine.low %v5398_v54, %v5408_v58  ;;  %v5497_v51 = vrot.slane %v5495_v39, 4 }
  0x4e   : > { %6138 = vmatprep.mubr.bf16.mxu0 %v14488_v3 }
  0x4f   : > { %v5445_v7 = vrot.slane %v5443_v60, 5  ;;  %v14395_v60 = vld [vmem:[%s14564_s14 + $0x9c] sm:$0xff]   ;;  %v5498_v61 = vor.u32 %v5497_v51, %v5493_v50  ;;  %v2028_v51 = vsel %vm517_vm0, %v14688_v23, 0  ;;  %v14399_v23 = vld [vmem:[%s14661_s17 + $0xc] sm:$0xff]  }
  0x51   : > { %v5450_v19 = vor.u32 %v5449_v8, %v5445_v7  ;;  %v5446_v46 = vsel %vm14580_vm4, %v5441_v32, %v5445_v7  ;;  %v5499_v9 = vrot.slane %v5498_v61, 4 }
  0x52   : > { %11752 = vmatmul.mubr.msk.bf16.gmra.mrb[32].mxu1 %vm468_vm1, %v14390_v10  ;;  %v5458_v10 = vshrl.u32 %v12184_v62, 16  ;;  %v5515_v62 = vshll.u32 %v12191_v52, 16  ;;  %v12268_v52 = vld [vmem:[%s14661_s17 + $0x14] sm:$0x1] }
  0x53   : > { %646 = vmatprep.mubr.bf16.mxu1 %v14488_v3  ;;  %v5451_v33 = vrot.slane %v5450_v19, 4 }
  0x55   : > { %12257 = vmatmul.mubr.msk.bf16.gmra.mrb[28].mxu0 %vm468_vm1, %v12239_v22  ;;  %v5460_v22 = vrot.slane %v5458_v10, 4  ;;  %v5456_v47 = vsel %vm14580_vm4, %v5451_v33, %v5455_v34  ;;  %v5517_v10 = vrot.slane %v5515_v62, 5  ;;  %v14397_v34 = vld [vmem:[%s14564_s14 + $0xb4] sm:$0xff]  }
  0x56   : > { %6148 = vmatprep.mubr.bf16.mxu0 %v14488_v3  ;;  %v12243_v55 = vcombine.low %v5446_v46, %v5456_v47  ;;  %v14398_v46 = vld [vmem:[%s14661_s17] sm:$0xff]   ;;  %v12266_v47 = vld [vmem:[%s14661_s17 + $0xc] sm:$0xe] }
  0x57   : > { %v5464_v36 = vor.u32 %v5463_v24, %v5460_v22  ;;  %v5522_v19 = vor.u32 %v5521_v11, %v5517_v10  ;;  %v14400_v11 = vld [vmem:[%s14661_s17 + $0x18] sm:$0xff]  }
  0x59   : > { %v5465_v48 = vrot.slane %v5464_v36, 4 }
  0x5a   : > { %11753 = vmatmul.mubr.msk.bf16.gmra.mrb[36].mxu1 %vm468_vm1, %v14391_v29  ;;  %v5473_v29 = vrot.slane %v5471_v16, 4  ;;  %v5543_v16 = vshrl.u32 %v12194_v4, 16 }
  0x5b   : > { %656 = vmatprep.mubr.bf16.mxu1 %v14488_v3  ;;  %v5470_v5 = vsel %vm14580_vm4, %v5465_v48, %v5469_v28 }
  0x5c   : > { %v5474_v42 = vor.u32 %v5473_v29, %v5469_v28  ;;  %v5523_v28 = vrot.slane %v5522_v19, 4  ;;  %v12195_v29 = vld [vmem:[%s14564_s14 + $0xc8] sm:$0x1]  ;;  %v5545_v32 = vrot.slane %v5543_v16, 4  ;;  %v6408_v19 = vrot.slane %v12274_v15, 5 }
  0x5d   : > { %12258 = vmatmul.mubr.msk.bf16.gmra.mrb[32].mxu0 %vm468_vm1, %v12240_v45  ;;  %v12190_v45 = vld [vmem:[%s14564_s14 + $0xb4] sm:$0xf]  ;;  %v5549_v35 = vshll.u32 %v12195_v29, 16 }
  0x5e   : > { %6158 = vmatprep.mubr.bf16.mxu0 %v14488_v3  ;;  %v5506_v54 = vshrl.u32 %v12190_v45, 16  ;;  %v5475_v56 = vrot.slane %v5474_v42, 4  ;;  %v5509_v58 = vshll.u32 %v12190_v45, 16  ;;  %v12267_v45 = vld [vmem:[%s14661_s17 + $0x10] sm:$0xf] }
  0x5f   : > { %v5551_v42 = vrot.slane %v5549_v35, 5  ;;  %v6391_v50 = vrot.slane %v12267_v45, 5  ;;  %v12282_v45 = vld [vmem:[%s14661_s17 + $0x4c] sm:$0xf] }
  0x60   : > { %v5480_v6 = vsel %vm14580_vm4, %v5475_v56, %v5479_v49  ;;  %v5508_v7 = vrot.slane %v5506_v54, 4  ;;  %v5511_v8 = vrot.slane %v5509_v58, 5  ;;  %v12314_v54 = vrot.slane %v12266_v47, 9  ;;  %v12270_v58 = vld [vmem:[%s14661_s17 + $0x1c] sm:$0xf] }
  0x61   : > { %v12244_v17 = vcombine.low %v5470_v5, %v5480_v6  ;;  %v6394_v56 = vrot.slane %v12268_v52, 5  ;;  %v6398_v62 = vrot.slane %v12270_v58, 5  ;;  %v6401_v5 = vrot.slane %v12271_v63, 5  ;;  %v12281_v47 = vld [vmem:[%s14661_s17 + $0x48] sm:$0xe] }
  0x62   : > { %11754 = vmatmul.mubr.msk.bf16.gmra.mrb[40].mxu1 %vm468_vm1, %v14392_v53  ;;  %v5501_v53 = vshll.u32 %v12189_v41, 16  ;;  %v5512_v18 = vor.u32 %v5511_v8, %v5508_v7  ;;  %v14822_v7 = vld.sshfl [vmem:[%s17078_s2 + $0x18] sm:$0x33 pattern:$0x76325410]  ;;  %v7187_v8 = vsel %vm517_vm0, %v14694_v26, 0 }
  0x63   : > { %666 = vmatprep.mubr.bf16.mxu1 %v14488_v3  ;;  %v6400_v4 = vrot.slane %v6398_v62, 4  ;;  %v14404_v58 = vld [vmem:[%s14661_s17 + $0x48] sm:$0xff]  }
  0x64   : > { %v5503_v2 = vrot.slane %v5501_v53, 5  ;;  %v5513_v24 = vrot.slane %v5512_v18, 4 }
  0x65   : > { %12259 = vmatmul.mubr.msk.bf16.gmra.mrb[36].mxu0 %vm468_vm1, %v12241_v0  ;;  %v12193_v0 = vld [vmem:[%s14564_s14 + $0xc0] sm:$0xf]  ;;  %v6402_v26 = vsel %vm14796_vm7, %v6400_v4, %v6401_v5  ;;  %v12288_v5 = vld [vmem:[%s14661_s17 + $0x64] sm:$0xf] }
  0x66   : > { %6168 = vmatprep.mubr.bf16.mxu0 %v14488_v3  ;;  %v5530_v13 = vshrl.u32 %v12193_v0, 16  ;;  %v5533_v14 = vshll.u32 %v12193_v0, 16  ;;  %v5504_v22 = vsel %vm14580_vm4, %v5499_v9, %v5503_v2  ;;  %v5518_v36 = vsel %vm14580_vm4, %v5513_v24, %v5517_v10  ;;  %v14814_v2 = vld.sshfl [vmem:[%s17079_s3 + $0x4] sm:$0x33 pattern:$0x76325410] }
  0x67   : > { %v12245_v33 = vcombine.low %v5494_v21, %v5504_v22  ;;  %v2348_v6 = vcombine.high %v14814_v2, %v14814_v2  ;;  %v12273_v9 = vld [vmem:[%s14661_s17 + $0x28] sm:$0xf]  ;;  %v7605_v10 = vcombine.high %v14822_v7, %v14822_v7  ;;  %v12275_v22 = vld [vmem:[%s14661_s17 + $0x30] sm:$0xe] }
  0x68   : > { %v5532_v27 = vrot.slane %v5530_v13, 4  ;;  %v5535_v30 = vrot.slane %v5533_v14, 5  ;;  %v6405_v13 = vrot.slane %v12273_v9, 5  ;;  %v12272_v14 = vld [vmem:[%s14661_s17 + $0x24] sm:$0xe] }
  0x69   : > { %v14401_v21 = vld [vmem:[%s14661_s17 + $0x24] sm:$0xff]  }
  0x6a   : > { %11755 = vmatmul.mubr.msk.bf16.gmra.mrb[44].mxu1 %vm468_vm1, %v14393_v12  ;;  %v5525_v12 = vshll.u32 %v12192_v59, 16  ;;  %v5536_v39 = vor.u32 %v5535_v30, %v5532_v27  ;;  %v12269_v59 = vld [vmem:[%s14661_s17 + $0x18] sm:$0xe]  ;;  %v6407_v18 = vrot.slane %v6405_v13, 4  ;;  %v12317_v30 = vrot.slane %v12275_v22, 9 }
  0x6b   : > { %676 = vmatprep.mubr.bf16.mxu1 %v14488_v3  ;;  %v12315_v1 = vrot.slane %v12269_v59, 9  ;;  %v12292_v22 = vld [vmem:[%s14661_s17 + $0x74] sm:$0x1] }
  0x6c   : > { %v5537_v43 = vrot.slane %v5536_v39, 4 }
  0x6d   : > { %12260 = vmatmul.mubr.msk.bf16.gmra.mrb[40].mxu0 %vm468_vm1, %v12242_v25  ;;  %v5527_v25 = vrot.slane %v5525_v12, 5  ;;  %v6399_v12 = vsel %vm14796_vm7, %v12315_v1, %v6398_v62  ;;  %v12286_v62 = vld [vmem:[%s14661_s17 + $0x5c] sm:$0x1] }
  0x6e   : > { %6178 = vmatprep.mubr.bf16.mxu0 %v14488_v3  ;;  %v5542_v48 = vsel %vm14580_vm4, %v5537_v43, %v5541_v31  ;;  %v12396_v16 = vcombine.low %v6399_v12, %v6402_v26  ;;  %v6436_v4 = vrot.slane %v12286_v62, 5  ;;  %v12289_v12 = vld [vmem:[%s14661_s17 + $0x68] sm:$0x1] }
  0x6f   : > { %v5528_v38 = vsel %vm14580_vm4, %v5523_v28, %v5527_v25  ;;  %v6409_v25 = vsel %vm14796_vm7, %v6407_v18, %v6408_v19  ;;  %v12277_v28 = vld [vmem:[%s14661_s17 + $0x38] sm:$0x1]  ;;  %v6443_v15 = vrot.slane %v12289_v12, 5  ;;  %v12290_v18 = vld [vmem:[%s14661_s17 + $0x6c] sm:$0xe] }
  0x70   : > { %v12246_v41 = vcombine.low %v5518_v36, %v5528_v38  ;;  %v12278_v38 = vld [vmem:[%s14661_s17 + $0x3c] sm:$0xe] }
  0x72   : > { %11756 = vmatmul.mubr.msk.bf16.gmra.mrb[48].mxu1 %vm468_vm1, %v14394_v40  ;;  %v5546_v40 = vor.u32 %v5545_v32, %v5541_v31  ;;  %v6415_v32 = vrot.slane %v12277_v28, 5  ;;  %v6450_v28 = vrot.slane %v12292_v22, 5 }
  0x73   : > { %686 = vmatprep.mubr.bf16.mxu1 %v14488_v3 }
  0x74   : > { %v5547_v44 = vrot.slane %v5546_v40, 4  ;;  %v12280_v40 = vld [vmem:[%s14661_s17 + $0x44] sm:$0x1] }
  0x75   : > { %12261 = vmatmul.mubr.msk.bf16.gmra.mrb[44].mxu0 %vm468_vm1, %v12243_v55  ;;  %v6393_v55 = vrot.slane %v6391_v50, 4 }
  0x76   : > { %6188 = vmatprep.mubr.bf16.mxu0 %v14488_v3  ;;  %v5552_v49 = vsel %vm14580_vm4, %v5547_v44, %v5551_v42  ;;  %v12318_v42 = vrot.slane %v12278_v38, 9  ;;  %v6422_v44 = vrot.slane %v12280_v40, 5 }
  0x77   : > { %v12247_v53 = vcombine.low %v5542_v48, %v5552_v49  ;;  %v6395_v61 = vsel %vm14796_vm7, %v6393_v55, %v6394_v56  ;;  %v12285_v56 = vld [vmem:[%s14661_s17 + $0x58] sm:$0xf] }
  0x7a   : > { %11757 = vmatmul.mubr.msk.bf16.gmra.mrb[52].mxu1 %vm468_vm1, %v14395_v60  ;;  %v6392_v60 = vsel %vm14796_vm7, %v12314_v54, %v6391_v50  ;;  %v6426_v50 = vrot.slane %v12282_v45, 5 }
  0x7b   : > { %696 = vmatprep.mubr.bf16.mxu1 %v14488_v3  ;;  %v12395_v0 = vcombine.low %v6392_v60, %v6395_v61  ;;  %v6433_v61 = vrot.slane %v12285_v56, 5 }
  0x7c   : > { %v6428_v54 = vrot.slane %v6426_v50, 4 }
  0x7d   : > { %12262 = vmatmul.mubr.msk.bf16.gmra.mrb[48].mxu0 %vm468_vm1, %v12244_v17  ;;  %v12316_v17 = vrot.slane %v12272_v14, 9  ;;  %v6435_v1 = vrot.slane %v6433_v61, 4 }
  0x7e   : > { %6198 = vmatprep.mubr.bf16.mxu0 %v14488_v3 }
  0x7f   : > { %v6406_v24 = vsel %vm14796_vm7, %v12316_v17, %v6405_v13  ;;  %v6437_v9 = vsel %vm14796_vm7, %v6435_v1, %v6436_v4  ;;  %v14406_v17 = vld [vmem:[%s14661_s17 + $0x60] sm:$0xff]  }
  0x80   : > { %v12397_v29 = vcombine.low %v6406_v24, %v6409_v25  ;;  %v12322_v25 = vrot.slane %v12290_v18, 9  ;;  %v1054_v18 = vld [vmem:[%s14661_s17 + $0x4] sm:$0xf] }
  0x82   : > { %11758 = vmatmul.mubr.msk.bf16.gmra.mrb[56].mxu1 %vm468_vm1, %v14396_v20  ;;  %v12276_v20 = vld [vmem:[%s14661_s17 + $0x34] sm:$0xf] }
  0x83   : > { %706 = vmatprep.mubr.bf16.mxu1 %v14488_v3  ;;  %v6412_v27 = vrot.slane %v12276_v20, 5 }
  0x85   : > { %12263 = vmatmul.mubr.msk.bf16.gmra.mrb[52].mxu0 %vm468_vm1, %v12245_v33  ;;  %v6414_v31 = vrot.slane %v6412_v27, 4  ;;  %v12279_v33 = vld [vmem:[%s14661_s17 + $0x40] sm:$0xf]  ;;  %v6413_v35 = vsel %vm14796_vm7, %v12317_v30, %v6412_v27  ;;  %v14407_v30 = vld [vmem:[%s14661_s17 + $0x6c] sm:$0xff]  }
  0x86   : > { %6208 = vmatprep.mubr.bf16.mxu0 %v14488_v3  ;;  %v6419_v39 = vrot.slane %v12279_v33, 5 }
  0x87   : > { %v6416_v36 = vsel %vm14796_vm7, %v6414_v31, %v6415_v32  ;;  %v12293_v31 = vld [vmem:[%s14661_s17 + $0x78] sm:$0xe] }
  0x88   : > { %v6421_v43 = vrot.slane %v6419_v39, 4  ;;  %v6420_v48 = vsel %vm14796_vm7, %v12318_v42, %v6419_v39  ;;  %v12323_v38 = vrot.slane %v12293_v31, 9  ;;  %v14408_v42 = vld [vmem:[%s14661_s17 + $0x78] sm:$0xff]  }
  0x8a   : > { %11759 = vmatmul.mubr.msk.bf16.gmra.mrb[60].mxu1 %vm468_vm1, %v14397_v34  ;;  %v14402_v34 = vld [vmem:[%s14661_s17 + $0x30] sm:$0xff]   ;;  %v6423_v49 = vsel %vm14796_vm7, %v6421_v43, %v6422_v44 }
  0x8b   : > { %892 = vmatprep.mubr.bf16.mxu1 %v14488_v3  ;;  %v12399_v52 = vcombine.low %v6420_v48, %v6423_v49 }
  0x8d   : > { %12264 = vmatmul.mubr.msk.bf16.gmra.mrb[56].mxu0 %vm468_vm1, %v12246_v41  ;;  %v12398_v41 = vcombine.low %v6413_v35, %v6416_v36  ;;  %v12295_v35 = vld [vmem:[%s14661_s17 + $0x80] sm:$0x1] }
  0x8e   : > { %6218 = vmatprep.mubr.bf16.mxu0 %v14488_v3  ;;  %v6457_v40 = vrot.slane %v12295_v35, 5 }
  0x92   : > { %11778 = vmatmul.mubr.msk.bf16.vlgmr.msra.gmra.mrb[0].mxu1 %vm468_vm1, %v14398_v46  ;;  %v14403_v46 = vld [vmem:[%s14661_s17 + $0x3c] sm:$0xff]  }
  0x93   : > { %902 = vmatprep.mubr.bf16.mxu1 %v14488_v3  ;;  %2034 = vmatpush1.bf16.msra.mxu1 %v2028_v51  ;;  %v12283_v51 = vld [vmem:[%s14661_s17 + $0x50] sm:$0x1] }
  0x94   : > { %11847 = vmatprep.subr.msk.bf16.mxu1 %vm517_vm0, %v2348_v6  ;;  %v6429_v55 = vrot.slane %v12283_v51, 5  ;;  %v14405_v6 = vld [vmem:[%s14661_s17 + $0x54] sm:$0xff]  }
  0x95   : > { %12265 = vmatmul.mubr.msk.bf16.gmra.mrb[60].mxu0 %vm468_vm1, %v12247_v53  ;;  %v12319_v53 = vrot.slane %v12281_v47, 9  ;;  %v12298_v47 = vld [vmem:[%s14661_s17 + $0x8c] sm:$0x1] }
  0x96   : > { %6854 = vmatprep.mubr.bf16.mxu0 %v14488_v3  ;;  %v6430_v60 = vsel %vm14796_vm7, %v6428_v54, %v6429_v55  ;;  %v6464_v51 = vrot.slane %v12298_v47, 5 }
  0x97   : > { %v6427_v59 = vsel %vm14796_vm7, %v12319_v53, %v6426_v50  ;;  %v14409_v53 = vld [vmem:[%s14661_s17 + $0x84] sm:$0xff]  }
  0x98   : > { %v12400_v63 = vcombine.low %v6427_v59, %v6430_v60 }
  0x9a   : > { %11779 = vmatmul.mubr.msk.bf16.gmra.mrb[4].mxu1 %vm468_vm1, %v14399_v23  ;;  %v12284_v23 = vld [vmem:[%s14661_s17 + $0x54] sm:$0xe] }
  0x9b   : > { %912 = vmatprep.mubr.bf16.mxu1 %v14488_v3 }
  0x9d   : > { %12413 = vmatmul.mubr.msk.bf16.vlgmr.msra.gmra.mrb[0].mxu0 %vm468_vm1, %v12395_v0  ;;  %v12320_v0 = vrot.slane %v12284_v23, 9  ;;  %v12301_v23 = vld [vmem:[%s14661_s17 + $0x98] sm:$0x1] }
  0x9e   : > { %7193 = vmatpush1.bf16.msra.mxu0 %v7187_v8  ;;  %6864 = vmatprep.mubr.bf16.mxu0 %v14488_v3  ;;  %v6471_v62 = vrot.slane %v12301_v23, 5  ;;  %v14413_v23 = vld [vmem:[%s14661_s17 + $0xb4] sm:$0xff]  }
  0x9f   : > { %12546 = vmatprep.subr.msk.bf16.mxu0 %vm517_vm0, %v7605_v10  ;;  %v6434_v8 = vsel %vm14796_vm7, %v12320_v0, %v6433_v61  ;;  %v12287_v10 = vld [vmem:[%s14661_s17 + $0x60] sm:$0xe]  ;;  %v14410_v0 = vld [vmem:[%s14661_s17 + $0x90] sm:$0xff]  }
  0xa0   : > { %v12401_v26 = vcombine.low %v6434_v8, %v6437_v9  ;;  %v12321_v13 = vrot.slane %v12287_v10, 9  ;;  %v12304_v8 = vld [vmem:[%s14661_s17 + $0xa4] sm:$0x1]  ;;  %v12306_v9 = vld [vmem:[%s14661_s17 + $0xac] sm:$0xf] }
  0xa2   : > { %11780 = vmatmul.mubr.msk.bf16.gmra.mrb[8].mxu1 %vm468_vm1, %v14400_v11  ;;  %v6440_v11 = vrot.slane %v12288_v5, 5 }
  0xa3   : > { %922 = vmatprep.mubr.bf16.mxu1 %v14488_v3 }
  0xa4   : > { %v6442_v14 = vrot.slane %v6440_v11, 4  ;;  %v6441_v19 = vsel %vm14796_vm7, %v12321_v13, %v6440_v11  ;;  %v6482_v13 = vrot.slane %v12306_v9, 5 }
  0xa5   : > { %12414 = vmatmul.mubr.msk.bf16.gmra.mrb[4].mxu0 %vm468_vm1, %v12396_v16  ;;  %v12291_v16 = vld [vmem:[%s14661_s17 + $0x70] sm:$0xf] }
  0xa6   : > { %6874 = vmatprep.mubr.bf16.mxu0 %v14488_v3  ;;  %v6444_v20 = vsel %vm14796_vm7, %v6442_v14, %v6443_v15  ;;  %v12305_v14 = vld [vmem:[%s14661_s17 + $0xa8] sm:$0xe]  ;;  %v12307_v15 = vld [vmem:[%s14661_s17 + $0xb0] sm:$0x1]  ;;  %v6484_v22 = vrot.slane %v6482_v13, 4 }
  0xa7   : > { %v12402_v24 = vcombine.low %v6441_v19, %v6444_v20 }
  0xaa   : > { %11781 = vmatmul.mubr.msk.bf16.gmra.mrb[12].mxu1 %vm468_vm1, %v14401_v21  ;;  %v6447_v21 = vrot.slane %v12291_v16, 5  ;;  %v14411_v16 = vld [vmem:[%s14661_s17 + $0x9c] sm:$0xff]  }
  0xab   : > { %932 = vmatprep.mubr.bf16.mxu1 %v14488_v3 }
  0xac   : > { %v6449_v27 = vrot.slane %v6447_v21, 4  ;;  %v6448_v32 = vsel %vm14796_vm7, %v12322_v25, %v6447_v21  ;;  %v12327_v21 = vrot.slane %v12305_v14, 9  ;;  %v12309_v25 = vld [vmem:[%s14661_s17 + $0xb8] sm:$0xf]  ;;  %v1060_v14 = vld [vmem:[%s14661_s17 + $0x1c] sm:$0xf] }
  0xad   : > { %12415 = vmatmul.mubr.msk.bf16.gmra.mrb[8].mxu0 %vm468_vm1, %v12397_v29  ;;  %v12294_v29 = vld [vmem:[%s14661_s17 + $0x7c] sm:$0xf]  ;;  %v6489_v35 = vrot.slane %v12309_v25, 5  ;;  %v1162_v25 = vshll.u32 %v1060_v14, 16 }
  0xae   : > { %6884 = vmatprep.mubr.bf16.mxu0 %v14488_v3  ;;  %v6451_v33 = vsel %vm14796_vm7, %v6449_v27, %v6450_v28 }
  0xaf   : > { %v12403_v36 = vcombine.low %v6448_v32, %v6451_v33  ;;  %v6483_v32 = vsel %vm14796_vm7, %v12327_v21, %v6482_v13  ;;  %v12331_v21 = vld [vmem:[%s14564_s14 + $0x10] sm:$0xf] }
  0xb2   : > { %11782 = vmatmul.mubr.msk.bf16.gmra.mrb[16].mxu1 %vm468_vm1, %v14402_v34  ;;  %v6454_v34 = vrot.slane %v12294_v29, 5  ;;  %v1114_v29 = vshll.u32 %v1054_v18, 16 }
  0xb3   : > { %942 = vmatprep.mubr.bf16.mxu1 %v14488_v3 }
  0xb4   : > { %v6456_v39 = vrot.slane %v6454_v34, 4  ;;  %v6455_v43 = vsel %vm14796_vm7, %v12323_v38, %v6454_v34  ;;  %v12308_v34 = vld [vmem:[%s14661_s17 + $0xb4] sm:$0xe] }
  0xb5   : > { %12416 = vmatmul.mubr.msk.bf16.gmra.mrb[12].mxu0 %vm468_vm1, %v12398_v41  ;;  %v12297_v41 = vld [vmem:[%s14661_s17 + $0x88] sm:$0xf]  ;;  %v12328_v47 = vrot.slane %v12308_v34, 9 }
  0xb6   : > { %6894 = vmatprep.mubr.bf16.mxu0 %v14488_v3  ;;  %v6458_v44 = vsel %vm14796_vm7, %v6456_v39, %v6457_v40  ;;  %v6461_v45 = vrot.slane %v12297_v41, 5  ;;  %v1116_v40 = vrot.slane %v1114_v29, 5  ;;  %v1062_v29 = vld [vmem:[%s14661_s17 + $0x24] sm:$0xf]  ;;  %v1063_v34 = vld [vmem:[%s14661_s17 + $0x28] sm:$0xf] }
  0xb7   : > { %v12404_v48 = vcombine.low %v6455_v43, %v6458_v44  ;;  %v12310_v43 = vld [vmem:[%s14661_s17 + $0xbc] sm:$0x1]  ;;  %v1056_v44 = vld [vmem:[%s14661_s17 + $0xc] sm:$0xf] }
  0xb8   : > { %v6463_v50 = vrot.slane %v6461_v45, 4 }
  0xba   : > { %11783 = vmatmul.mubr.msk.bf16.gmra.mrb[20].mxu1 %vm468_vm1, %v14403_v46  ;;  %v12296_v46 = vld [vmem:[%s14661_s17 + $0x84] sm:$0xe]  ;;  %v6465_v55 = vsel %vm14796_vm7, %v6463_v50, %v6464_v51  ;;  %v6492_v50 = vrot.slane %v12310_v43, 5 }
  0xbb   : > { %952 = vmatprep.mubr.bf16.mxu1 %v14488_v3  ;;  %v12324_v49 = vrot.slane %v12296_v46, 9 }
  0xbd   : > { %12417 = vmatmul.mubr.msk.bf16.gmra.mrb[16].mxu0 %vm468_vm1, %v12399_v52  ;;  %v12300_v52 = vld [vmem:[%s14661_s17 + $0x94] sm:$0xf]  ;;  %v6462_v54 = vsel %vm14796_vm7, %v12324_v49, %v6461_v45  ;;  %v1057_v45 = vld [vmem:[%s14661_s17 + $0x10] sm:$0xf]  ;;  %v6491_v49 = vrot.slane %v6489_v35, 4 }
  0xbe   : > { %6904 = vmatprep.mubr.bf16.mxu0 %v14488_v3  ;;  %v6468_v56 = vrot.slane %v12300_v52, 5  ;;  %v12405_v59 = vcombine.low %v6462_v54, %v6465_v55  ;;  %v1129_v54 = vshrl.u32 %v1056_v44, 16  ;;  %v1132_v55 = vshll.u32 %v1056_v44, 16 }
  0xbf   : > { %v1177_v44 = vshrl.u32 %v1062_v29, 16 }
  0xc0   : > { %v6470_v61 = vrot.slane %v6468_v56, 4 }
  0xc2   : > { %11784 = vmatmul.mubr.msk.bf16.gmra.mrb[24].mxu1 %vm468_vm1, %v14404_v58  ;;  %v12299_v58 = vld [vmem:[%s14661_s17 + $0x90] sm:$0xe]  ;;  %v6472_v4 = vsel %vm14796_vm7, %v6470_v61, %v6471_v62  ;;  %v6490_v61 = vsel %vm14796_vm7, %v12328_v47, %v6489_v35  ;;  %v6493_v62 = vsel %vm14796_vm7, %v6491_v49, %v6492_v50  ;;  %v1061_v47 = vld [vmem:[%s14661_s17 + $0x20] sm:$0x1]  ;;  %v1190_v49 = vshrl.u32 %v1063_v34, 16 }
  0xc3   : > { %962 = vmatprep.mubr.bf16.mxu1 %v14488_v3  ;;  %v12325_v60 = vrot.slane %v12299_v58, 9  ;;  %v1142_v58 = vshrl.u32 %v1057_v45, 16 }
  0xc5   : > { %12418 = vmatmul.mubr.msk.bf16.gmra.mrb[20].mxu0 %vm468_vm1, %v12400_v63  ;;  %v12303_v63 = vld [vmem:[%s14661_s17 + $0xa0] sm:$0xf]  ;;  %v6469_v1 = vsel %vm14796_vm7, %v12325_v60, %v6468_v56  ;;  %v1138_v56 = vshll.u32 %v1057_v45, 16  ;;  %v1180_v45 = vshll.u32 %v1062_v29, 16 }
  0xc6   : > { %6914 = vmatprep.mubr.bf16.mxu0 %v14488_v3  ;;  %v6475_v5 = vrot.slane %v12303_v63, 5  ;;  %v12406_v10 = vcombine.low %v6469_v1, %v6472_v4  ;;  %v12311_v1 = vld [vmem:[%s14661_s17 + $0xc0] sm:$0xe]  ;;  %v12313_v4 = vld [vmem:[%s14661_s17 + $0xc8] sm:$0x1] }
  0xc7   : > { %v15001_v9 = vrot.slane %v1138_v56, 5 }
  0xc8   : > { %v6477_v12 = vrot.slane %v6475_v5, 4 }
  0xca   : > { %11785 = vmatmul.mubr.msk.bf16.gmra.mrb[28].mxu1 %vm468_vm1, %v14405_v6  ;;  %v12302_v6 = vld [vmem:[%s14661_s17 + $0x9c] sm:$0xe] }
  0xcb   : > { %972 = vmatprep.mubr.bf16.mxu1 %v14488_v3  ;;  %v12326_v11 = vrot.slane %v12302_v6, 9  ;;  %v1131_v6 = vrot.slane %v1129_v54, 4 }
  0xcd   : > { %12419 = vmatmul.mubr.msk.bf16.gmra.mrb[24].mxu0 %vm468_vm1, %v12401_v26  ;;  %v6478_v26 = vrot.slane %v12304_v8, 5  ;;  %v6476_v19 = vsel %vm14796_vm7, %v12326_v11, %v6475_v5  ;;  %v1058_v5 = vld [vmem:[%s14661_s17 + $0x14] sm:$0x1]  ;;  %v1134_v8 = vrot.slane %v1132_v55, 5  ;;  %v1059_v11 = vld [vmem:[%s14661_s17 + $0x18] sm:$0xf] }
  0xce   : > { %6924 = vmatprep.mubr.bf16.mxu0 %v14488_v3 }
  0xcf   : > { %v6479_v20 = vsel %vm14796_vm7, %v6477_v12, %v6478_v26  ;;  %v12409_v12 = vcombine.low %v6490_v61, %v6493_v62  ;;  %v12329_v26 = vrot.slane %v12311_v1, 9  ;;  %v1182_v61 = vrot.slane %v1180_v45, 5  ;;  %v12335_v1 = vld [vmem:[%s14564_s14 + $0x20] sm:$0x1] }
  0xd0   : > { %v12407_v31 = vcombine.low %v6476_v19, %v6479_v20  ;;  %v1135_v19 = vor.u32 %v1134_v8, %v1131_v6 }
  0xd2   : > { %11786 = vmatmul.mubr.msk.bf16.gmra.mrb[32].mxu1 %vm468_vm1, %v14406_v17  ;;  %v1053_v17 = vld [vmem:[%s14661_s17] sm:$0xf]  ;;  %v1136_v35 = vrot.slane %v1135_v19, 4  ;;  %v12337_v19 = vld [vmem:[%s14564_s14 + $0x28] sm:$0xf] }
  0xd3   : > { %982 = vmatprep.mubr.bf16.mxu1 %v14488_v3  ;;  %v1105_v27 = vshrl.u32 %v1053_v17, 16  ;;  %v1108_v28 = vshll.u32 %v1053_v17, 16  ;;  %v6499_v17 = vrot.slane %v12313_v4, 5  ;;  %v1064_v4 = vld [vmem:[%s14661_s17 + $0x2c] sm:$0x1] }
  0xd4   : > { %v1141_v54 = vsel %vm14580_vm4, %v1136_v35, %v15001_v9 }
  0xd5   : > { %12420 = vmatmul.mubr.msk.bf16.gmra.mrb[28].mxu0 %vm468_vm1, %v12402_v24  ;;  %v6485_v24 = vrot.slane %v12307_v15, 5  ;;  %v1107_v38 = vrot.slane %v1105_v27, 4  ;;  %v1110_v39 = vrot.slane %v1108_v28, 5  ;;  %v1166_v27 = vshrl.u32 %v1060_v14, 16 }
  0xd6   : > { %6934 = vmatprep.mubr.bf16.mxu0 %v14488_v3 }
  0xd7   : > { %v6486_v33 = vsel %vm14796_vm7, %v6484_v22, %v6485_v24  ;;  %v1111_v51 = vor.u32 %v1110_v39, %v1107_v38  ;;  %v1153_v22 = vshrl.u32 %v1059_v11, 16  ;;  %v1156_v24 = vshll.u32 %v1059_v11, 16  ;;  %v12330_v38 = vld [vmem:[%s14564_s14 + $0xc] sm:$0xe]  ;;  %v1066_v11 = vld [vmem:[%s14661_s17 + $0x34] sm:$0xf] }
  0xd8   : > { %v12408_v46 = vcombine.low %v6483_v32, %v6486_v33  ;;  %v6599_v33 = vrot.slane %v12331_v21, 5  ;;  %v1168_v43 = vrot.slane %v1166_v27, 4  ;;  %v7655_v27 = vsel %vm517_vm0, %v14822_v7, 0 }
  0xd9   : > { %v1112_v63 = vrot.slane %v1111_v51, 4  ;;  %v1155_v39 = vrot.slane %v1153_v22, 4  ;;  %v12378_v51 = vrot.slane %v12330_v38, 9  ;;  %v1210_v22 = vshll.u32 %v1066_v11, 16 }
  0xda   : > { %11787 = vmatmul.mubr.msk.bf16.gmra.mrb[36].mxu1 %vm468_vm1, %v14407_v30  ;;  %v1118_v30 = vshrl.u32 %v1054_v18, 16  ;;  %v1148_v18 = vshll.u32 %v1058_v5, 16  ;;  %v6613_v7 = vrot.slane %v12337_v19, 5 }
  0xdb   : > { %992 = vmatprep.mubr.bf16.mxu1 %v14488_v3  ;;  %v1117_v15 = vsel %vm14580_vm4, %v1112_v63, %v1116_v40  ;;  %v6600_v6 = vsel %vm14796_vm7, %v12378_v51, %v6599_v33  ;;  %v15079_v45 = vrot.slane %v1210_v22, 5 }
  0xdc   : > { %v1120_v41 = vrot.slane %v1118_v30, 4  ;;  %v1150_v32 = vrot.slane %v1148_v18, 5  ;;  %v1196_v18 = vshll.u32 %v1064_v4, 16 }
  0xdd   : > { %12421 = vmatmul.mubr.msk.bf16.gmra.mrb[32].mxu0 %vm468_vm1, %v12403_v36  ;;  %v1055_v36 = vld [vmem:[%s14661_s17 + $0x8] sm:$0x1] }
  0xde   : > { %6944 = vmatprep.mubr.bf16.mxu0 %v14488_v3  ;;  %v1121_v52 = vor.u32 %v1120_v41, %v1116_v40  ;;  %v1158_v40 = vrot.slane %v1156_v24, 5  ;;  %v12332_v41 = vld [vmem:[%s14564_s14 + $0x14] sm:$0x1]  ;;  %v1214_v24 = vshrl.u32 %v1066_v11, 16  ;;  %v1198_v38 = vrot.slane %v1196_v18, 5 }
  0xdf   : > { %v1070_v11 = vld [vmem:[%s14661_s17 + $0x44] sm:$0x1] }
  0xe0   : > { %v1159_v56 = vor.u32 %v1158_v40, %v1155_v39  ;;  %v12336_v39 = vld [vmem:[%s14564_s14 + $0x24] sm:$0xe]  ;;  %v12338_v40 = vld [vmem:[%s14564_s14 + $0x2c] sm:$0x1] }
  0xe1   : > { %v12380_v51 = vrot.slane %v12336_v39, 9 }
  0xe2   : > { %11788 = vmatmul.mubr.msk.bf16.gmra.mrb[40].mxu1 %vm468_vm1, %v14408_v42  ;;  %v14412_v42 = vld [vmem:[%s14661_s17 + $0xa8] sm:$0xff]   ;;  %v1160_v8 = vrot.slane %v1159_v56, 4 }
  0xe3   : > { %1002 = vmatprep.mubr.bf16.mxu1 %v14488_v3 }
  0xe5   : > { %12422 = vmatmul.mubr.msk.bf16.gmra.mrb[36].mxu0 %vm468_vm1, %v12404_v48  ;;  %v1124_v48 = vshll.u32 %v1055_v36, 16 }
  0xe6   : > { %6954 = vmatprep.mubr.bf16.mxu0 %v14488_v3 }
  0xea   : > { %11789 = vmatmul.mubr.msk.bf16.gmra.mrb[44].mxu1 %vm468_vm1, %v14409_v53  ;;  %v12312_v53 = vld [vmem:[%s14661_s17 + $0xc4] sm:$0xf] }
  0xeb   : > { %1012 = vmatprep.mubr.bf16.mxu1 %v14488_v3  ;;  %v6496_v60 = vrot.slane %v12312_v53, 5  ;;  %v12334_v53 = vld [vmem:[%s14564_s14 + $0x1c] sm:$0xf] }
  0xec   : > { %v6606_v62 = vrot.slane %v12334_v53, 5  ;;  %v6616_v53 = vrot.slane %v12338_v40, 5 }
  0xed   : > { %12423 = vmatmul.mubr.msk.bf16.gmra.mrb[40].mxu0 %vm468_vm1, %v12405_v59  ;;  %v1126_v59 = vrot.slane %v1124_v48, 5  ;;  %v6498_v13 = vrot.slane %v6496_v60, 4  ;;  %v6497_v30 = vsel %vm14796_vm7, %v12329_v26, %v6496_v60  ;;  %v1186_v48 = vshll.u32 %v1063_v34, 16 }
  0xee   : > { %6964 = vmatprep.mubr.bf16.mxu0 %v14488_v3  ;;  %v1179_v60 = vrot.slane %v1177_v44, 4  ;;  %v12580_v34 = vld.sshfl [vmem:[%s17079_s3 + $0x18] sm:$0x33 pattern:$0x76325410] }
  0xef   : > { %v15039_v63 = vrot.slane %v1186_v48, 5 }
  0xf0   : > { %v1183_v14 = vor.u32 %v1182_v61, %v1179_v60 }
  0xf2   : > { %11790 = vmatmul.mubr.msk.bf16.gmra.mrb[48].mxu1 %vm468_vm1, %v14410_v0  ;;  %v1122_v0 = vrot.slane %v1121_v52, 4  ;;  %v6601_v52 = vrot.slane %v6599_v33, 4 }
  0xf3   : > { %1022 = vmatprep.mubr.bf16.mxu1 %v14488_v3 }
  0xf5   : > { %12424 = vmatmul.mubr.msk.bf16.gmra.mrb[44].mxu0 %vm468_vm1, %v12406_v10  ;;  %v1144_v10 = vrot.slane %v1142_v58, 4 }
  0xf6   : > { %6974 = vmatprep.mubr.bf16.mxu0 %v14488_v3 }
  0xf7   : > { %v1145_v20 = vor.u32 %v1144_v10, %v15001_v9  ;;  %v1065_v10 = vld [vmem:[%s14661_s17 + $0x30] sm:$0xf] }
  0xf8   : > { %v1204_v21 = vshll.u32 %v1065_v10, 16 }
  0xf9   : > { %v1146_v36 = vrot.slane %v1145_v20, 4  ;;  %v1201_v20 = vshrl.u32 %v1065_v10, 16  ;;  %v12341_v10 = vld [vmem:[%s14564_s14 + $0x38] sm:$0x1] }
  0xfa   : > { %11791 = vmatmul.mubr.msk.bf16.gmra.mrb[52].mxu1 %vm468_vm1, %v14411_v16  ;;  %v1127_v16 = vsel %vm14580_vm4, %v1122_v0, %v1126_v59  ;;  %v12333_v59 = vld [vmem:[%s14564_s14 + $0x18] sm:$0xe]  ;;  %v1192_v0 = vrot.slane %v1190_v49, 4  ;;  %v1206_v44 = vrot.slane %v1204_v21, 5  ;;  %v1068_v49 = vld [vmem:[%s14661_s17 + $0x3c] sm:$0xf] }
  0xfb   : > { %1032 = vmatprep.mubr.bf16.mxu1 %v14488_v3  ;;  %v11795_v28 = vcombine.low %v1117_v15, %v1127_v16  ;;  %v1151_v55 = vsel %vm14580_vm4, %v1146_v36, %v1150_v32  ;;  %v12379_v9 = vrot.slane %v12333_v59, 9  ;;  %v6608_v15 = vrot.slane %v6606_v62, 4 }
  0xfc   : > { %v11796_v5 = vcombine.low %v1141_v54, %v1151_v55  ;;  %v6609_v16 = vrot.slane %v12335_v1, 5  ;;  %v1184_v32 = vrot.slane %v1183_v14, 4  ;;  %v1225_v59 = vshrl.u32 %v1068_v49, 16 }
  0xfd   : > { %12425 = vmatmul.mubr.msk.bf16.gmra.mrb[48].mxu0 %vm468_vm1, %v12407_v31  ;;  %v6500_v31 = vsel %vm14796_vm7, %v6498_v13, %v6499_v17  ;;  %v1193_v17 = vor.u32 %v1192_v0, %v15039_v63  ;;  %v6607_v29 = vsel %vm14796_vm7, %v12379_v9, %v6606_v62  ;;  %v1228_v60 = vshll.u32 %v1068_v49, 16  ;;  %v12339_v9 = vld [vmem:[%s14564_s14 + $0x30] sm:$0xe] }
  0xfe   : > { %6984 = vmatprep.mubr.bf16.mxu0 %v14488_v3  ;;  %v12410_v50 = vcombine.low %v6497_v30, %v6500_v31  ;;  %v15064_v30 = vld.sshfl [vmem:[%s17078_s2 + $0x8] sm:$0x33 pattern:$0x76325410]  ;;  %v6610_v35 = vsel %vm14796_vm7, %v6608_v15, %v6609_v16  ;;  %v1189_v55 = vsel %vm14580_vm4, %v1184_v32, %v15039_v63  ;;  %v6614_v63 = vsel %vm14796_vm7, %v12380_v51, %v6613_v7 }
  0xff   : > { %v3137_v33 = vcombine.high %v15064_v30, %v15064_v30  ;;  %v1194_v36 = vrot.slane %v1193_v17, 4  ;;  %v12431_v48 = vcombine.low %v6607_v29, %v6610_v35  ;;  %v1071_v16 = vld [vmem:[%s14661_s17 + $0x48] sm:$0xf]  ;;  %v1072_v17 = vld [vmem:[%s14661_s17 + $0x4c] sm:$0xf]  ;;  %v12381_v18 = vrot.slane %v12339_v9, 9 }
 0x100   : > { %v1244_v21 = vshll.u32 %v1070_v11, 16  ;;  %v1249_v29 = vshrl.u32 %v1071_v16, 16  ;;  %v1258_v32 = vshll.u32 %v1072_v17, 16  ;;  %v12347_v9 = vld [vmem:[%s14564_s14 + $0x50] sm:$0x1] }
 0x102   : > { %11792 = vmatmul.mubr.msk.bf16.gmra.mrb[56].mxu1 %vm468_vm1, %v14412_v42  ;;  %v15024_v42 = vrot.slane %v1162_v25, 5 }
 0x103   : > { %1042 = vmatprep.mubr.bf16.mxu1 %v14488_v3 }
 0x104   : > { %v1169_v58 = vor.u32 %v1168_v43, %v15024_v42  ;;  %v1203_v43 = vrot.slane %v1201_v20, 4  ;;  %v6623_v20 = vrot.slane %v12341_v10, 5 }
 0x105   : > { %12426 = vmatmul.mubr.msk.bf16.gmra.mrb[52].mxu0 %vm468_vm1, %v12408_v46  ;;  %v2398_v46 = vsel %vm517_vm0, %v14814_v2, 0  ;;  %v6602_v2 = vrot.slane %v12332_v41, 5  ;;  %v8007_v41 = vcombine.high %v12580_v34, %v12580_v34  ;;  %v1246_v34 = vrot.slane %v1244_v21, 5 }
 0x106   : > { %6994 = vmatprep.mubr.bf16.mxu0 %v14488_v3  ;;  %v1170_v26 = vrot.slane %v1169_v58, 4  ;;  %v1207_v56 = vor.u32 %v1206_v44, %v1203_v43  ;;  %v12342_v43 = vld [vmem:[%s14564_s14 + $0x3c] sm:$0xe]  ;;  %v12344_v44 = vld [vmem:[%s14564_s14 + $0x44] sm:$0x1] }
 0x10a   : > { %11793 = vmatmul.mubr.msk.bf16.gmra.mrb[60].mxu1 %vm468_vm1, %v14413_v23  ;;  %v1172_v23 = vshll.u32 %v1061_v47, 16 }
 0x10b   : > { %2065 = vmatprep.mubr.bf16.mxu1 %v14488_v3 }
 0x10c   : > { %v1174_v13 = vrot.slane %v1172_v23, 5  ;;  %v12340_v23 = vld [vmem:[%s14564_s14 + $0x34] sm:$0xf] }
 0x10d   : > { %12427 = vmatmul.mubr.msk.bf16.gmra.mrb[56].mxu0 %vm468_vm1, %v12409_v12  ;;  %v6603_v12 = vsel %vm14796_vm7, %v6601_v52, %v6602_v2  ;;  %v6615_v52 = vrot.slane %v6613_v7, 4  ;;  %v1199_v2 = vsel %vm14580_vm4, %v1194_v36, %v1198_v38  ;;  %v6620_v1 = vrot.slane %v12340_v23, 5  ;;  %v1074_v36 = vld [vmem:[%s14661_s17 + $0x54] sm:$0xf]  ;;  %v1075_v38 = vld [vmem:[%s14661_s17 + $0x58] sm:$0xf] }
 0x10e   : > { %7004 = vmatprep.mubr.bf16.mxu0 %v14488_v3  ;;  %v12430_v25 = vcombine.low %v6600_v6, %v6603_v12  ;;  %v1175_v31 = vsel %vm14580_vm4, %v1170_v26, %v1174_v13  ;;  %v11798_v4 = vcombine.low %v1189_v55, %v1199_v2  ;;  %v1208_v6 = vrot.slane %v1207_v56, 4 }
 0x10f   : > { %v1227_v12 = vrot.slane %v1225_v59, 4  ;;  %v1230_v26 = vrot.slane %v1228_v60, 5  ;;  %v6622_v19 = vrot.slane %v6620_v1, 4  ;;  %v1262_v7 = vshrl.u32 %v1072_v17, 16 }
 0x110   : > { %v1213_v22 = vsel %vm14580_vm4, %v1208_v6, %v15079_v45  ;;  %v1273_v51 = vshrl.u32 %v1074_v36, 16  ;;  %v12382_v2 = vrot.slane %v12342_v43, 9  ;;  %v6630_v23 = vrot.slane %v12344_v44, 5 }
 0x111   : > { %v6624_v40 = vsel %vm14796_vm7, %v6622_v19, %v6623_v20  ;;  %v1264_v49 = vrot.slane %v1262_v7, 4  ;;  %v6637_v20 = vrot.slane %v12347_v9, 5  ;;  %v12351_v9 = vld [vmem:[%s14564_s14 + $0x60] sm:$0xe] }
 0x112   : > { %11813 = vmatmul.mubr.msk.bf16.vlgmr.msra.gmra.mrb[0].mxu1 %vm468_vm1, %v11795_v28  ;;  %v1165_v28 = vsel %vm14580_vm4, %v1160_v8, %v15024_v42  ;;  %v1067_v42 = vld [vmem:[%s14661_s17 + $0x38] sm:$0x1] }
 0x113   : > { %2075 = vmatprep.mubr.bf16.mxu1 %v14488_v3  ;;  %2404 = vmatpush1.bf16.msra.mxu1 %v2398_v46  ;;  %v1216_v46 = vrot.slane %v1214_v24, 4  ;;  %v11797_v47 = vcombine.low %v1165_v28, %v1175_v31  ;;  %v1220_v54 = vshll.u32 %v1067_v42, 16  ;;  %v12343_v28 = vld [vmem:[%s14564_s14 + $0x40] sm:$0xf]  ;;  %v1252_v31 = vshll.u32 %v1071_v16, 16 }
 0x114   : > { %11914 = vmatprep.subr.msk.bf16.mxu1 %vm517_vm0, %v3137_v33  ;;  %v6621_v33 = vsel %vm14796_vm7, %v12381_v18, %v6620_v1  ;;  %v6627_v35 = vrot.slane %v12343_v28, 5  ;;  %v1076_v1 = vld [vmem:[%s14661_s17 + $0x5c] sm:$0x1] }
 0x115   : > { %12428 = vmatmul.mubr.msk.bf16.gmra.mrb[60].mxu0 %vm468_vm1, %v12410_v50  ;;  %v1069_v50 = vld [vmem:[%s14661_s17 + $0x40] sm:$0xf]  ;;  %v1217_v58 = vor.u32 %v1216_v46, %v15079_v45  ;;  %v1222_v0 = vrot.slane %v1220_v54, 5  ;;  %v1073_v45 = vld [vmem:[%s14661_s17 + $0x50] sm:$0x1]  ;;  %v1251_v46 = vrot.slane %v1249_v29, 4  ;;  %v12433_v55 = vcombine.low %v6621_v33, %v6624_v40 }
 0x116   : > { %7224 = vmatprep.mubr.bf16.mxu0 %v14488_v3  ;;  %v1234_v61 = vshll.u32 %v1069_v50, 16  ;;  %v1238_v62 = vshrl.u32 %v1069_v50, 16  ;;  %v12346_v50 = vld [vmem:[%s14564_s14 + $0x4c] sm:$0xf]  ;;  %v1286_v54 = vshrl.u32 %v1075_v38, 16  ;;  %v1268_v59 = vshll.u32 %v1073_v45, 16 }
 0x117   : > { %v1218_v8 = vrot.slane %v1217_v58, 4  ;;  %v6629_v58 = vrot.slane %v6627_v35, 4  ;;  %v6628_v11 = vsel %vm14796_vm7, %v12382_v2, %v6627_v35  ;;  %v1292_v18 = vshll.u32 %v1076_v1, 16  ;;  %v12348_v40 = vld [vmem:[%s14564_s14 + $0x54] sm:$0xe] }
 0x118   : > { %v15104_v13 = vrot.slane %v1234_v61, 5  ;;  %v1240_v14 = vrot.slane %v1238_v62, 4 }
 0x119   : > { %v1223_v24 = vsel %vm14580_vm4, %v1218_v8, %v1222_v0  ;;  %v6634_v0 = vrot.slane %v12346_v50, 5  ;;  %v1288_v8 = vrot.slane %v1286_v54, 4  ;;  %v1294_v33 = vrot.slane %v1292_v18, 5  ;;  %v1081_v50 = vld [vmem:[%s14661_s17 + $0x70] sm:$0xf] }
 0x11a   : > { %11814 = vmatmul.mubr.msk.bf16.gmra.mrb[4].mxu1 %vm468_vm1, %v11796_v5  ;;  %v6617_v5 = vsel %vm14796_vm7, %v6615_v52, %v6616_v53  ;;  %v11799_v39 = vcombine.low %v1213_v22, %v1223_v24  ;;  %v1276_v52 = vshll.u32 %v1074_v36, 16  ;;  %v1282_v53 = vshll.u32 %v1075_v38, 16  ;;  %v12349_v24 = vld [vmem:[%s14564_s14 + $0x58] sm:$0xf] }
 0x11b   : > { %2085 = vmatprep.mubr.bf16.mxu1 %v14488_v3  ;;  %v12432_v15 = vcombine.low %v6614_v63, %v6617_v5  ;;  %v12345_v63 = vld [vmem:[%s14564_s14 + $0x48] sm:$0xe]  ;;  %v6636_v19 = vrot.slane %v6634_v0, 4  ;;  %v12385_v18 = vrot.slane %v12351_v9, 9  ;;  %v12359_v9 = vld [vmem:[%s14564_s14 + $0x80] sm:$0x1] }
 0x11c   : > { %v1278_v5 = vrot.slane %v1276_v52, 5  ;;  %v15142_v6 = vrot.slane %v1282_v53, 5  ;;  %v12383_v17 = vrot.slane %v12345_v63, 9 }
 0x11d   : > { %12448 = vmatmul.mubr.msk.bf16.vlgmr.msra.gmra.mrb[0].mxu0 %vm468_vm1, %v12430_v25  ;;  %v1231_v25 = vor.u32 %v1230_v26, %v1227_v12  ;;  %v6631_v12 = vsel %vm14796_vm7, %v6629_v58, %v6630_v23  ;;  %v1270_v26 = vrot.slane %v1268_v59, 5  ;;  %v6638_v36 = vsel %vm14796_vm7, %v6636_v19, %v6637_v20  ;;  %v12352_v23 = vld [vmem:[%s14564_s14 + $0x64] sm:$0xf] }
 0x11e   : > { %7661 = vmatpush1.bf16.msra.mxu0 %v7655_v27  ;;  %7234 = vmatprep.mubr.bf16.mxu0 %v14488_v3  ;;  %v1241_v27 = vor.u32 %v1240_v14, %v15104_v13  ;;  %v1078_v14 = vld [vmem:[%s14661_s17 + $0x64] sm:$0xf]  ;;  %v1289_v22 = vor.u32 %v1288_v8, %v15142_v6  ;;  %v6635_v35 = vsel %vm14796_vm7, %v12383_v17, %v6634_v0  ;;  %v6648_v1 = vrot.slane %v12352_v23, 5  ;;  %v1084_v17 = vld [vmem:[%s14661_s17 + $0x7c] sm:$0xf] }
 0x11f   : > { %12581 = vmatprep.subr.msk.bf16.mxu0 %vm517_vm0, %v8007_v41  ;;  %v1232_v41 = vrot.slane %v1231_v25, 4  ;;  %v1306_v28 = vshll.u32 %v1078_v14, 16  ;;  %v1310_v29 = vshrl.u32 %v1078_v14, 16 }
 0x120   : > { %v1242_v42 = vrot.slane %v1241_v27, 4  ;;  %v6650_v19 = vrot.slane %v6648_v1, 4 }
 0x121   : > { %v1237_v56 = vsel %vm14580_vm4, %v1232_v41, %v15104_v13  ;;  %v1077_v13 = vld [vmem:[%s14661_s17 + $0x60] sm:$0xf]  ;;  %v12350_v41 = vld [vmem:[%s14564_s14 + $0x5c] sm:$0x1]  ;;  %v15169_v45 = vrot.slane %v1306_v28, 5 }
 0x122   : > { %11815 = vmatmul.mubr.msk.bf16.gmra.mrb[8].mxu1 %vm468_vm1, %v11797_v47  ;;  %v1254_v47 = vrot.slane %v1252_v31, 5  ;;  %v1247_v60 = vsel %vm14580_vm4, %v1242_v42, %v1246_v34  ;;  %v1297_v25 = vshrl.u32 %v1077_v13, 16  ;;  %v1300_v27 = vshll.u32 %v1077_v13, 16  ;;  %v1079_v42 = vld [vmem:[%s14661_s17 + $0x68] sm:$0x1] }
 0x123   : > { %2095 = vmatprep.mubr.bf16.mxu1 %v14488_v3  ;;  %v11800_v10 = vcombine.low %v1237_v56, %v1247_v60  ;;  %v12434_v31 = vcombine.low %v6628_v11, %v6631_v12  ;;  %v6641_v34 = vrot.slane %v12349_v24, 5  ;;  %v6644_v53 = vrot.slane %v12350_v41, 5  ;;  %v1082_v11 = vld [vmem:[%s14661_s17 + $0x74] sm:$0x1]  ;;  %v12355_v28 = vld [vmem:[%s14564_s14 + $0x70] sm:$0xf] }
 0x124   : > { %v1255_v61 = vor.u32 %v1254_v47, %v1251_v46  ;;  %v1299_v43 = vrot.slane %v1297_v25, 4  ;;  %v1302_v44 = vrot.slane %v1300_v27, 5  ;;  %v1312_v46 = vrot.slane %v1310_v29, 4 }
 0x125   : > { %12449 = vmatmul.mubr.msk.bf16.gmra.mrb[4].mxu0 %vm468_vm1, %v12431_v48  ;;  %v15129_v48 = vrot.slane %v1258_v32, 5  ;;  %v6643_v52 = vrot.slane %v6641_v34, 4  ;;  %v1316_v54 = vshll.u32 %v1079_v42, 16 }
 0x126   : > { %7244 = vmatprep.mubr.bf16.mxu0 %v14488_v3  ;;  %v1303_v56 = vor.u32 %v1302_v44, %v1299_v43  ;;  %v1313_v58 = vor.u32 %v1312_v46, %v15169_v45  ;;  %v12354_v43 = vld [vmem:[%s14564_s14 + $0x6c] sm:$0xe]  ;;  %v12356_v44 = vld [vmem:[%s14564_s14 + $0x74] sm:$0x1] }
 0x127   : > { %v1265_v62 = vor.u32 %v1264_v49, %v15129_v48  ;;  %v1080_v49 = vld [vmem:[%s14661_s17 + $0x6c] sm:$0xf]  ;;  %v1318_v0 = vrot.slane %v1316_v54, 5  ;;  %v6658_v23 = vrot.slane %v12356_v44, 5 }
 0x128   : > { %v1321_v59 = vshrl.u32 %v1080_v49, 16  ;;  %v1324_v60 = vshll.u32 %v1080_v49, 16  ;;  %v1314_v8 = vrot.slane %v1313_v58, 4 }
 0x129   : > { %v1266_v16 = vrot.slane %v1265_v62, 4  ;;  %v1334_v62 = vshrl.u32 %v1081_v50, 16 }
 0x12a   : > { %11816 = vmatmul.mubr.msk.bf16.gmra.mrb[12].mxu1 %vm468_vm1, %v11798_v4  ;;  %v1275_v4 = vrot.slane %v1273_v51, 4  ;;  %v12384_v51 = vrot.slane %v12348_v40, 9  ;;  %v1323_v12 = vrot.slane %v1321_v59, 4  ;;  %v1319_v24 = vsel %vm14580_vm4, %v1314_v8, %v1318_v0 }
 0x12b   : > { %2105 = vmatprep.mubr.bf16.mxu1 %v14488_v3  ;;  %v1271_v7 = vsel %vm14580_vm4, %v1266_v16, %v1270_v26  ;;  %v1326_v26 = vrot.slane %v1324_v60, 5  ;;  %v1336_v14 = vrot.slane %v1334_v62, 4  ;;  %v1083_v16 = vld [vmem:[%s14661_s17 + $0x78] sm:$0xf] }
 0x12c   : > { %v1279_v21 = vor.u32 %v1278_v5, %v1275_v4  ;;  %v6642_v63 = vsel %vm14796_vm7, %v12384_v51, %v6641_v34  ;;  %v6645_v5 = vsel %vm14796_vm7, %v6643_v52, %v6644_v53  ;;  %v1345_v29 = vshrl.u32 %v1083_v16, 16 }
 0x12d   : > { %12450 = vmatmul.mubr.msk.bf16.gmra.mrb[8].mxu0 %vm468_vm1, %v12432_v15  ;;  %v1256_v15 = vrot.slane %v1255_v61, 4  ;;  %v1330_v61 = vshll.u32 %v1081_v50, 16  ;;  %v1327_v25 = vor.u32 %v1326_v26, %v1323_v12  ;;  %v12358_v50 = vld [vmem:[%s14564_s14 + $0x7c] sm:$0xf] }
 0x12e   : > { %7254 = vmatprep.mubr.bf16.mxu0 %v14488_v3  ;;  %v1280_v38 = vrot.slane %v1279_v21, 4  ;;  %v1340_v21 = vshll.u32 %v1082_v11, 16  ;;  %v1347_v46 = vrot.slane %v1345_v29, 4  ;;  %v6662_v0 = vrot.slane %v12358_v50, 5  ;;  %v1093_v50 = vld [vmem:[%s14661_s17 + $0xa0] sm:$0xf] }
 0x12f   : > { %v1261_v32 = vsel %vm14580_vm4, %v1256_v15, %v15129_v48  ;;  %v12435_v48 = vcombine.low %v6635_v35, %v6638_v36  ;;  %v15192_v13 = vrot.slane %v1330_v61, 5  ;;  %v12436_v15 = vcombine.low %v6642_v63, %v6645_v5  ;;  %v1086_v36 = vld [vmem:[%s14661_s17 + $0x84] sm:$0xf]  ;;  %v12357_v63 = vld [vmem:[%s14564_s14 + $0x78] sm:$0xe] }
 0x130   : > { %v11801_v47 = vcombine.low %v1261_v32, %v1271_v7  ;;  %v1354_v32 = vshll.u32 %v1084_v17, 16  ;;  %v1358_v7 = vshrl.u32 %v1084_v17, 16  ;;  %v1342_v34 = vrot.slane %v1340_v21, 5 }
 0x131   : > { %v1337_v27 = vor.u32 %v1336_v14, %v15192_v13  ;;  %v6655_v35 = vrot.slane %v12355_v28, 5  ;;  %v1328_v41 = vrot.slane %v1327_v25, 4  ;;  %v1369_v51 = vshrl.u32 %v1086_v36, 16  ;;  %v1090_v14 = vld [vmem:[%s14661_s17 + $0x94] sm:$0xf] }
 0x132   : > { %11817 = vmatmul.mubr.msk.bf16.gmra.mrb[16].mxu1 %vm468_vm1, %v11799_v39  ;;  %v1290_v39 = vrot.slane %v1289_v22, 4  ;;  %v1360_v49 = vrot.slane %v1358_v7, 4  ;;  %v1372_v52 = vshll.u32 %v1086_v36, 16  ;;  %v12387_v17 = vrot.slane %v12357_v63, 9 }
 0x133   : > { %2115 = vmatprep.mubr.bf16.mxu1 %v14488_v3  ;;  %v1338_v42 = vrot.slane %v1337_v27, 4  ;;  %v6657_v58 = vrot.slane %v6655_v35, 4  ;;  %v1402_v28 = vshll.u32 %v1090_v14, 16  ;;  %v1406_v29 = vshrl.u32 %v1090_v14, 16 }
 0x134   : > { %v1295_v2 = vsel %vm14580_vm4, %v1290_v39, %v1294_v33  ;;  %v6649_v33 = vsel %vm14796_vm7, %v12385_v18, %v6648_v1  ;;  %v1088_v1 = vld [vmem:[%s14661_s17 + $0x8c] sm:$0x1]  ;;  %v1374_v5 = vrot.slane %v1372_v52, 5 }
 0x135   : > { %12451 = vmatmul.mubr.msk.bf16.gmra.mrb[12].mxu0 %vm468_vm1, %v12433_v55  ;;  %v1285_v55 = vsel %vm14580_vm4, %v1280_v38, %v15142_v6  ;;  %v1304_v6 = vrot.slane %v1303_v56, 4  ;;  %v1087_v38 = vld [vmem:[%s14661_s17 + $0x88] sm:$0xf]  ;;  %v1333_v56 = vsel %vm14580_vm4, %v1328_v41, %v15192_v13  ;;  %v1343_v60 = vsel %vm14580_vm4, %v1338_v42, %v1342_v34  ;;  %v1089_v13 = vld [vmem:[%s14661_s17 + $0x90] sm:$0xf] }
 0x136   : > { %7264 = vmatprep.mubr.bf16.mxu0 %v14488_v3  ;;  %v11802_v4 = vcombine.low %v1285_v55, %v1295_v2  ;;  %v1378_v53 = vshll.u32 %v1087_v38, 16  ;;  %v1382_v54 = vshrl.u32 %v1087_v38, 16  ;;  %v12386_v2 = vrot.slane %v12354_v43, 9  ;;  %v12362_v41 = vld [vmem:[%s14564_s14 + $0x8c] sm:$0x1] }
 0x137   : > { %v1309_v22 = vsel %vm14580_vm4, %v1304_v6, %v15169_v45  ;;  %v1085_v45 = vld [vmem:[%s14661_s17 + $0x80] sm:$0x1]  ;;  %v6659_v12 = vsel %vm14796_vm7, %v6657_v58, %v6658_v23  ;;  %v1388_v18 = vshll.u32 %v1088_v1, 16  ;;  %v1393_v25 = vshrl.u32 %v1089_v13, 16  ;;  %v1091_v42 = vld [vmem:[%s14661_s17 + $0x98] sm:$0x1] }
 0x138   : > { %v11803_v39 = vcombine.low %v1309_v22, %v1319_v24  ;;  %v1364_v59 = vshll.u32 %v1085_v45, 16  ;;  %v15230_v6 = vrot.slane %v1378_v53, 5  ;;  %v1384_v8 = vrot.slane %v1382_v54, 4  ;;  %v12361_v24 = vld [vmem:[%s14564_s14 + $0x88] sm:$0xf] }
 0x139   : > { %v6656_v11 = vsel %vm14796_vm7, %v12386_v2, %v6655_v35  ;;  %v1396_v27 = vshll.u32 %v1089_v13, 16  ;;  %v6669_v34 = vrot.slane %v12361_v24, 5  ;;  %v6663_v35 = vsel %vm14796_vm7, %v12387_v17, %v6662_v0  ;;  %v12364_v23 = vld [vmem:[%s14564_s14 + $0x94] sm:$0xf]  ;;  %v1096_v17 = vld [vmem:[%s14661_s17 + $0xac] sm:$0xf] }
 0x13a   : > { %11818 = vmatmul.mubr.msk.bf16.gmra.mrb[20].mxu1 %vm468_vm1, %v11800_v10  ;;  %v12353_v10 = vld [vmem:[%s14564_s14 + $0x68] sm:$0x1]  ;;  %v1366_v26 = vrot.slane %v1364_v59, 5  ;;  %v1385_v22 = vor.u32 %v1384_v8, %v15230_v6  ;;  %v1395_v43 = vrot.slane %v1393_v25, 4  ;;  %v15257_v45 = vrot.slane %v1402_v28, 5 }
 0x13b   : > { %2125 = vmatprep.mubr.bf16.mxu1 %v14488_v3  ;;  %v6651_v20 = vrot.slane %v12353_v10, 5  ;;  %v11804_v10 = vcombine.low %v1333_v56, %v1343_v60  ;;  %v1398_v44 = vrot.slane %v1396_v27, 5  ;;  %v6671_v52 = vrot.slane %v6669_v34, 4  ;;  %v12367_v28 = vld [vmem:[%s14564_s14 + $0xa0] sm:$0xf] }
 0x13c   : > { %v6672_v53 = vrot.slane %v12362_v41, 5  ;;  %v1412_v54 = vshll.u32 %v1091_v42, 16  ;;  %v6676_v1 = vrot.slane %v12364_v23, 5  ;;  %v12368_v42 = vld [vmem:[%s14564_s14 + $0xa4] sm:$0x1] }
 0x13d   : > { %12452 = vmatmul.mubr.msk.bf16.gmra.mrb[16].mxu0 %vm468_vm1, %v12434_v31  ;;  %v1348_v31 = vshll.u32 %v1083_v16, 16  ;;  %v6652_v40 = vsel %vm14796_vm7, %v6650_v19, %v6651_v20  ;;  %v6664_v19 = vrot.slane %v6662_v0, 4  ;;  %v6665_v20 = vrot.slane %v12359_v9, 5  ;;  %v12363_v9 = vld [vmem:[%s14564_s14 + $0x90] sm:$0xe] }
 0x13e   : > { %7274 = vmatprep.mubr.bf16.mxu0 %v14488_v3  ;;  %v12437_v55 = vcombine.low %v6649_v33, %v6652_v40  ;;  %v1390_v33 = vrot.slane %v1388_v18, 5  ;;  %v12360_v40 = vld [vmem:[%s14564_s14 + $0x84] sm:$0xe]  ;;  %v1399_v56 = vor.u32 %v1398_v44, %v1395_v43  ;;  %v1414_v0 = vrot.slane %v1412_v54, 5  ;;  %v1097_v43 = vld [vmem:[%s14661_s17 + $0xb0] sm:$0x1] }
 0x13f   : > { %v6666_v36 = vsel %vm14796_vm7, %v6664_v19, %v6665_v20  ;;  %v12389_v18 = vrot.slane %v12363_v9, 9  ;;  %v6678_v19 = vrot.slane %v6676_v1, 4  ;;  %v1460_v54 = vshll.u32 %v1097_v43, 16  ;;  %v12369_v9 = vld [vmem:[%s14564_s14 + $0xa8] sm:$0xe] }
 0x142   : > { %11819 = vmatmul.mubr.msk.bf16.gmra.mrb[24].mxu1 %vm468_vm1, %v11801_v47  ;;  %v1350_v47 = vrot.slane %v1348_v31, 5  ;;  %v12438_v31 = vcombine.low %v6656_v11, %v6659_v12  ;;  %v1094_v11 = vld [vmem:[%s14661_s17 + $0xa4] sm:$0x1] }
 0x143   : > { %2135 = vmatprep.mubr.bf16.mxu1 %v14488_v3 }
 0x144   : > { %v1351_v61 = vor.u32 %v1350_v47, %v1347_v46  ;;  %v1408_v46 = vrot.slane %v1406_v29, 4 }
 0x145   : > { %12453 = vmatmul.mubr.msk.bf16.gmra.mrb[20].mxu0 %vm468_vm1, %v12435_v48  ;;  %v15217_v48 = vrot.slane %v1354_v32, 5 }
 0x146   : > { %7284 = vmatprep.mubr.bf16.mxu0 %v14488_v3  ;;  %v1409_v58 = vor.u32 %v1408_v46, %v15257_v45 }
 0x147   : > { %v1361_v62 = vor.u32 %v1360_v49, %v15217_v48  ;;  %v1092_v49 = vld [vmem:[%s14661_s17 + $0x9c] sm:$0xf] }
 0x148   : > { %v1417_v59 = vshrl.u32 %v1092_v49, 16  ;;  %v1420_v60 = vshll.u32 %v1092_v49, 16  ;;  %v1410_v8 = vrot.slane %v1409_v58, 4 }
 0x149   : > { %v1362_v16 = vrot.slane %v1361_v62, 4  ;;  %v1430_v62 = vshrl.u32 %v1093_v50, 16 }
 0x14a   : > { %11820 = vmatmul.mubr.msk.bf16.gmra.mrb[28].mxu1 %vm468_vm1, %v11802_v4  ;;  %v1371_v4 = vrot.slane %v1369_v51, 4  ;;  %v12388_v51 = vrot.slane %v12360_v40, 9  ;;  %v1419_v12 = vrot.slane %v1417_v59, 4  ;;  %v1415_v24 = vsel %vm14580_vm4, %v1410_v8, %v1414_v0 }
 0x14b   : > { %2145 = vmatprep.mubr.bf16.mxu1 %v14488_v3  ;;  %v1367_v7 = vsel %vm14580_vm4, %v1362_v16, %v1366_v26  ;;  %v1422_v26 = vrot.slane %v1420_v60, 5  ;;  %v1432_v14 = vrot.slane %v1430_v62, 4  ;;  %v1095_v16 = vld [vmem:[%s14661_s17 + $0xa8] sm:$0xf]  ;;  %v1462_v0 = vrot.slane %v1460_v54, 5 }
 0x14c   : > { %v1375_v21 = vor.u32 %v1374_v5, %v1371_v4  ;;  %v6670_v63 = vsel %vm14796_vm7, %v12388_v51, %v6669_v34  ;;  %v6673_v5 = vsel %vm14796_vm7, %v6671_v52, %v6672_v53  ;;  %v1441_v29 = vshrl.u32 %v1095_v16, 16 }
 0x14d   : > { %12454 = vmatmul.mubr.msk.bf16.gmra.mrb[24].mxu0 %vm468_vm1, %v12436_v15  ;;  %v1352_v15 = vrot.slane %v1351_v61, 4  ;;  %v1426_v61 = vshll.u32 %v1093_v50, 16  ;;  %v1423_v25 = vor.u32 %v1422_v26, %v1419_v12  ;;  %v1099_v50 = vld [vmem:[%s14661_s17 + $0xb8] sm:$0xf]  ;;  %v6686_v53 = vrot.slane %v12368_v42, 5 }
 0x14e   : > { %7294 = vmatprep.mubr.bf16.mxu0 %v14488_v3  ;;  %v1376_v38 = vrot.slane %v1375_v21, 4  ;;  %v1436_v21 = vshll.u32 %v1094_v11, 16  ;;  %v1443_v44 = vrot.slane %v1441_v29, 4  ;;  %v1478_v62 = vshrl.u32 %v1099_v50, 16  ;;  %v1490_v42 = vld [vmem:[%s14564_s14 + $0x8] sm:$0x1] }
 0x14f   : > { %v1357_v32 = vsel %vm14580_vm4, %v1352_v15, %v15217_v48  ;;  %v12439_v48 = vcombine.low %v6663_v35, %v6666_v36  ;;  %v1428_v13 = vrot.slane %v1426_v61, 5  ;;  %v12440_v15 = vcombine.low %v6670_v63, %v6673_v5  ;;  %v12366_v36 = vld [vmem:[%s14564_s14 + $0x9c] sm:$0xe]  ;;  %v1489_v5 = vld [vmem:[%s14564_s14 + $0x4] sm:$0xf] }
 0x150   : > { %v11805_v47 = vcombine.low %v1357_v32, %v1367_v7  ;;  %v1450_v32 = vshll.u32 %v1096_v17, 16  ;;  %v1454_v7 = vshrl.u32 %v1096_v17, 16  ;;  %v1438_v35 = vrot.slane %v1436_v21, 5  ;;  %v12373_v17 = vld [vmem:[%s14564_s14 + $0xb8] sm:$0xf] }
 0x151   : > { %v1433_v27 = vor.u32 %v1432_v14, %v1428_v13  ;;  %v1424_v40 = vrot.slane %v1423_v25, 4  ;;  %v12390_v51 = vrot.slane %v12366_v36, 9  ;;  %v1474_v61 = vshll.u32 %v1099_v50, 16  ;;  %v1100_v14 = vld [vmem:[%s14661_s17 + $0xbc] sm:$0x1] }
 0x152   : > { %11821 = vmatmul.mubr.msk.bf16.gmra.mrb[32].mxu1 %vm468_vm1, %v11803_v39  ;;  %v1386_v39 = vrot.slane %v1385_v22, 4  ;;  %v15300_v46 = vrot.slane %v1450_v32, 5  ;;  %v1550_v21 = vshrl.u32 %v1489_v5, 16  ;;  %v1484_v29 = vshll.u32 %v1100_v14, 16  ;;  %v1493_v14 = vld [vmem:[%s14564_s14 + $0x14] sm:$0x1] }
 0x153   : > { %2155 = vmatprep.mubr.bf16.mxu1 %v14488_v3  ;;  %v1434_v41 = vrot.slane %v1433_v27, 4 }
 0x154   : > { %v1391_v2 = vsel %vm14580_vm4, %v1386_v39, %v1390_v33  ;;  %v6677_v33 = vsel %vm14796_vm7, %v12389_v18, %v6676_v1 }
 0x155   : > { %12455 = vmatmul.mubr.msk.bf16.gmra.mrb[28].mxu0 %vm468_vm1, %v12437_v55  ;;  %v1381_v55 = vsel %vm14580_vm4, %v1376_v38, %v15230_v6  ;;  %v1400_v6 = vrot.slane %v1399_v56, 4  ;;  %v6683_v38 = vrot.slane %v12367_v28, 5  ;;  %v12370_v56 = vld [vmem:[%s14564_s14 + $0xac] sm:$0xf] }
 0x156   : > { %7304 = vmatprep.mubr.bf16.mxu0 %v14488_v3  ;;  %v11806_v4 = vcombine.low %v1381_v55, %v1391_v2  ;;  %v1429_v55 = vsel %vm14580_vm4, %v1424_v40, %v1428_v13  ;;  %v1439_v2 = vsel %vm14580_vm4, %v1434_v41, %v1438_v35  ;;  %v6690_v1 = vrot.slane %v12370_v56, 5  ;;  %v12374_v35 = vld [vmem:[%s14564_s14 + $0xbc] sm:$0x1] }
 0x157   : > { %v1405_v22 = vsel %vm14580_vm4, %v1400_v6, %v15257_v45  ;;  %v6685_v52 = vrot.slane %v6683_v38, 4  ;;  %v6684_v63 = vsel %vm14796_vm7, %v12390_v51, %v6683_v38  ;;  %v11808_v6 = vcombine.low %v1429_v55, %v1439_v2  ;;  %v12376_v2 = vld [vmem:[%s14564_s14 + $0xc4] sm:$0xf] }
 0x158   : > { %v11807_v39 = vcombine.low %v1405_v22, %v1415_v24  ;;  %v12391_v24 = vrot.slane %v12369_v9, 9  ;;  %v6692_v25 = vrot.slane %v6690_v1, 4  ;;  %v1552_v40 = vrot.slane %v1550_v21, 4  ;;  %v12377_v9 = vld [vmem:[%s14564_s14 + $0xc8] sm:$0x1] }
 0x159   : > { %v6687_v8 = vsel %vm14796_vm7, %v6685_v52, %v6686_v53  ;;  %v6700_v52 = vrot.slane %v12374_v35, 5  ;;  %v1556_v55 = vshll.u32 %v1490_v42, 16  ;;  %v6707_v21 = vrot.slane %v12377_v9, 5  ;;  %v14414_v9 = vld [vmem:[%s14661_s17 + $0x18] sm:$0xff]  }
 0x15a   : > { %11822 = vmatmul.mubr.msk.bf16.gmra.mrb[36].mxu1 %vm468_vm1, %v11804_v10  ;;  %v12365_v10 = vld [vmem:[%s14564_s14 + $0x98] sm:$0x1]  ;;  %v12442_v22 = vcombine.low %v6684_v63, %v6687_v8  ;;  %v6691_v41 = vsel %vm14796_vm7, %v12391_v24, %v6690_v1  ;;  %v6704_v8 = vrot.slane %v12376_v2, 5  ;;  %v1500_v2 = vld [vmem:[%s14564_s14 + $0x30] sm:$0xf] }
 0x15b   : > { %2165 = vmatprep.mubr.bf16.mxu1 %v14488_v3  ;;  %v6679_v20 = vrot.slane %v12365_v10, 5  ;;  %v12371_v10 = vld [vmem:[%s14564_s14 + $0xb0] sm:$0x1] }
 0x15c   : > { %v6693_v27 = vrot.slane %v12371_v10, 5 }
 0x15d   : > { %12456 = vmatmul.mubr.msk.bf16.gmra.mrb[32].mxu0 %vm468_vm1, %v12438_v31  ;;  %v1444_v31 = vshll.u32 %v1095_v16, 16  ;;  %v6680_v34 = vsel %vm14796_vm7, %v6678_v19, %v6679_v20  ;;  %v1480_v16 = vrot.slane %v1478_v62, 4  ;;  %v1546_v20 = vshll.u32 %v1489_v5, 16 }
 0x15e   : > { %7314 = vmatprep.mubr.bf16.mxu0 %v14488_v3  ;;  %v12441_v49 = vcombine.low %v6677_v33, %v6680_v34  ;;  %v12372_v33 = vld [vmem:[%s14564_s14 + $0xb4] sm:$0xe]  ;;  %v6697_v34 = vrot.slane %v12373_v17, 5  ;;  %v1558_v5 = vrot.slane %v1556_v55, 5  ;;  %v1495_v17 = vld [vmem:[%s14564_s14 + $0x1c] sm:$0xf] }
 0x15f   : > { %v1446_v45 = vrot.slane %v1444_v31, 5  ;;  %v12392_v50 = vrot.slane %v12372_v33, 9 }
 0x160   : > { %v6699_v51 = vrot.slane %v6697_v34, 4 }
 0x161   : > { %v1447_v59 = vor.u32 %v1446_v45, %v1443_v44  ;;  %v6694_v44 = vsel %vm14796_vm7, %v6692_v25, %v6693_v27  ;;  %v6698_v63 = vsel %vm14796_vm7, %v12392_v50, %v6697_v34  ;;  %v1580_v27 = vshll.u32 %v1493_v14, 16  ;;  %v15409_v14 = vld.sshfl [vmem:[%s17079_s3 + $0x8] sm:$0x33 pattern:$0x76325410] }
 0x162   : > { %11823 = vmatmul.mubr.msk.bf16.gmra.mrb[40].mxu1 %vm468_vm1, %v11805_v47  ;;  %v1456_v47 = vrot.slane %v1454_v7, 4 }
 0x163   : > { %2175 = vmatprep.mubr.bf16.mxu1 %v14488_v3  ;;  %v1448_v26 = vrot.slane %v1447_v59, 4 }
 0x164   : > { %v1457_v60 = vor.u32 %v1456_v47, %v15300_v46  ;;  %v1491_v47 = vld [vmem:[%s14564_s14 + $0xc] sm:$0xf] }
 0x165   : > { %12457 = vmatmul.mubr.msk.bf16.gmra.mrb[36].mxu0 %vm468_vm1, %v12439_v48  ;;  %v1098_v48 = vld [vmem:[%s14661_s17 + $0xb4] sm:$0xf]  ;;  %v1453_v31 = vsel %vm14580_vm4, %v1448_v26, %v15300_v46  ;;  %v1486_v46 = vrot.slane %v1484_v29, 5  ;;  %v1561_v56 = vshrl.u32 %v1491_v47, 16 }
 0x166   : > { %7324 = vmatprep.mubr.bf16.mxu0 %v14488_v3  ;;  %v1465_v58 = vshrl.u32 %v1098_v48, 16  ;;  %v1468_v23 = vshll.u32 %v1098_v48, 16  ;;  %v1458_v13 = vrot.slane %v1457_v60, 4  ;;  %v1492_v48 = vld [vmem:[%s14564_s14 + $0x10] sm:$0xf]  ;;  %v12443_v60 = vcombine.low %v6691_v41, %v6694_v44 }
 0x167   : > { %v1574_v59 = vshrl.u32 %v1492_v48, 16  ;;  %v1563_v10 = vrot.slane %v1561_v56, 4  ;;  %v1497_v44 = vld [vmem:[%s14564_s14 + $0x24] sm:$0xf] }
 0x168   : > { %v1467_v11 = vrot.slane %v1465_v58, 4  ;;  %v1470_v12 = vrot.slane %v1468_v23, 5  ;;  %v1463_v32 = vsel %vm14580_vm4, %v1458_v13, %v1462_v0  ;;  %v1564_v58 = vshll.u32 %v1491_v47, 16 }
 0x169   : > { %v11809_v43 = vcombine.low %v1453_v31, %v1463_v32  ;;  %v1570_v23 = vshll.u32 %v1492_v48, 16  ;;  %v6701_v0 = vsel %vm14796_vm7, %v6699_v51, %v6700_v52  ;;  %v1576_v26 = vrot.slane %v1574_v59, 4 }
 0x16a   : > { %11824 = vmatmul.mubr.msk.bf16.gmra.mrb[44].mxu1 %vm468_vm1, %v11806_v4  ;;  %v1488_v4 = vld [vmem:[%s14564_s14] sm:$0xf]  ;;  %v1471_v28 = vor.u32 %v1470_v12, %v1467_v11  ;;  %v1566_v11 = vrot.slane %v1564_v58, 5  ;;  %v1594_v31 = vshll.u32 %v1495_v17, 16  ;;  %v1598_v32 = vshrl.u32 %v1495_v17, 16 }
 0x16b   : > { %2185 = vmatprep.mubr.bf16.mxu1 %v14488_v3  ;;  %v1537_v18 = vshrl.u32 %v1488_v4, 16  ;;  %v1540_v19 = vshll.u32 %v1488_v4, 16  ;;  %v1572_v12 = vrot.slane %v1570_v23, 5  ;;  %v1501_v23 = vld [vmem:[%s14564_s14 + $0x34] sm:$0xf] }
 0x16c   : > { %v1472_v45 = vrot.slane %v1471_v28, 4  ;;  %v1567_v24 = vor.u32 %v1566_v11, %v1563_v10  ;;  %v1596_v42 = vrot.slane %v1594_v31, 5  ;;  %v14478_v10 = vld.sshfl [vmem:[%s17079_s3 + $0x18] sm:$0x33 pattern:$0x76325410] }
 0x16d   : > { %12458 = vmatmul.mubr.msk.bf16.gmra.mrb[40].mxu0 %vm468_vm1, %v12440_v15  ;;  %v15323_v15 = vrot.slane %v1474_v61, 5  ;;  %v1539_v36 = vrot.slane %v1537_v18, 4  ;;  %v1542_v38 = vrot.slane %v1540_v19, 5  ;;  %v1577_v25 = vor.u32 %v1576_v26, %v1572_v12 }
 0x16e   : > { %7334 = vmatprep.mubr.bf16.mxu0 %v14488_v3  ;;  %v1568_v35 = vrot.slane %v1567_v24, 4  ;;  %v8057_v11 = vsel %vm517_vm0, %v14478_v10, 0  ;;  %v1508_v10 = vld [vmem:[%s14564_s14 + $0x50] sm:$0x1] }
 0x16f   : > { %v1481_v7 = vor.u32 %v1480_v16, %v15323_v15  ;;  %v1543_v53 = vor.u32 %v1542_v38, %v1539_v36  ;;  %v1477_v61 = vsel %vm14580_vm4, %v1472_v45, %v15323_v15  ;;  %v12444_v15 = vcombine.low %v6698_v63, %v6701_v0  ;;  %v1494_v16 = vld [vmem:[%s14564_s14 + $0x18] sm:$0xf] }
 0x170   : > { %v1585_v28 = vshrl.u32 %v1494_v16, 16  ;;  %v1588_v29 = vshll.u32 %v1494_v16, 16  ;;  %v1578_v36 = vrot.slane %v1577_v25, 4  ;;  %v1582_v38 = vrot.slane %v1580_v27, 5  ;;  %v1502_v25 = vld [vmem:[%s14564_s14 + $0x38] sm:$0x1] }
 0x171   : > { %v1544_v1 = vrot.slane %v1543_v53, 4  ;;  %v3187_v45 = vsel %vm517_vm0, %v15064_v30, 0  ;;  %v1573_v48 = vsel %vm14580_vm4, %v1568_v35, %v1572_v12  ;;  %v1609_v53 = vshrl.u32 %v1497_v44, 16 }
 0x172   : > { %11825 = vmatmul.mubr.msk.bf16.gmra.mrb[48].mxu1 %vm468_vm1, %v11807_v39  ;;  %v15336_v39 = vrot.slane %v1546_v20, 5  ;;  %v6706_v20 = vrot.slane %v6704_v8, 4  ;;  %v1590_v41 = vrot.slane %v1588_v29, 5  ;;  %v1504_v29 = vld [vmem:[%s14564_s14 + $0x40] sm:$0xf]  ;;  %v1652_v35 = vshll.u32 %v1502_v25, 16 }
 0x173   : > { %2195 = vmatprep.mubr.bf16.mxu1 %v14488_v3  ;;  %v1512_v25 = vld [vmem:[%s14564_s14 + $0x60] sm:$0xf] }
 0x174   : > { %v1553_v54 = vor.u32 %v1552_v40, %v15336_v39  ;;  %v1549_v18 = vsel %vm14580_vm4, %v1544_v1, %v15336_v39  ;;  %v6708_v33 = vsel %vm14796_vm7, %v6706_v20, %v6707_v21  ;;  %v1496_v39 = vld [vmem:[%s14564_s14 + $0x20] sm:$0x1]  ;;  %v1587_v40 = vrot.slane %v1585_v28, 4  ;;  %v1503_v28 = vld [vmem:[%s14564_s14 + $0x3c] sm:$0xf] }
 0x175   : > { %12459 = vmatmul.mubr.msk.bf16.gmra.mrb[44].mxu0 %vm468_vm1, %v12441_v49  ;;  %v1482_v49 = vrot.slane %v1481_v7, 4  ;;  %v1604_v50 = vshll.u32 %v1496_v39, 16  ;;  %v1633_v1 = vshrl.u32 %v1500_v2, 16  ;;  %v1666_v39 = vshll.u32 %v1504_v29, 16 }
 0x176   : > { %7344 = vmatprep.mubr.bf16.mxu0 %v14488_v3  ;;  %v1554_v4 = vrot.slane %v1553_v54, 4  ;;  %v1591_v51 = vor.u32 %v1590_v41, %v1587_v40  ;;  %v1612_v54 = vshll.u32 %v1497_v44, 16  ;;  %v1670_v40 = vshrl.u32 %v1504_v29, 16  ;;  %v14415_v41 = vld [vmem:[%s14661_s17 + $0x24] sm:$0xff]  }
 0x177   : > { %v1487_v62 = vsel %vm14580_vm4, %v1482_v49, %v1486_v46  ;;  %v1498_v46 = vld [vmem:[%s14564_s14 + $0x28] sm:$0xf]  ;;  %v1583_v49 = vsel %vm14580_vm4, %v1578_v36, %v1582_v38  ;;  %v1606_v58 = vrot.slane %v1604_v50, 5  ;;  %v1635_v17 = vrot.slane %v1633_v1, 4 }
 0x178   : > { %v11810_v13 = vcombine.low %v1477_v61, %v1487_v62  ;;  %v1618_v30 = vshll.u32 %v1498_v46, 16  ;;  %v1622_v55 = vshrl.u32 %v1498_v46, 16  ;;  %v11831_v56 = vcombine.low %v1573_v48, %v1583_v49 }
 0x179   : > { %v1592_v59 = vrot.slane %v1591_v51, 4  ;;  %v1611_v61 = vrot.slane %v1609_v53, 4  ;;  %v1614_v62 = vrot.slane %v1612_v54, 5  ;;  %v1657_v36 = vshrl.u32 %v1503_v28, 16  ;;  %v1506_v53 = vld [vmem:[%s14564_s14 + $0x48] sm:$0xf] }
 0x17a   : > { %11826 = vmatmul.mubr.msk.bf16.gmra.mrb[52].mxu1 %vm468_vm1, %v11808_v6  ;;  %v12375_v6 = vld [vmem:[%s14564_s14 + $0xc0] sm:$0xe]  ;;  %v1620_v63 = vrot.slane %v1618_v30, 5  ;;  %v1624_v0 = vrot.slane %v1622_v55, 4  ;;  %v1660_v38 = vshll.u32 %v1503_v28, 16  ;;  %v1654_v46 = vrot.slane %v1652_v35, 5 }
 0x17b   : > { %2205 = vmatprep.mubr.bf16.mxu1 %v14488_v3  ;;  %v12393_v19 = vrot.slane %v12375_v6, 9  ;;  %v1642_v6 = vshll.u32 %v1501_v23, 16  ;;  %v1597_v12 = vsel %vm14580_vm4, %v1592_v59, %v1596_v42  ;;  %v1668_v49 = vrot.slane %v1666_v39, 5  ;;  %v1507_v54 = vld [vmem:[%s14564_s14 + $0x4c] sm:$0xf] }
 0x17c   : > { %v1662_v48 = vrot.slane %v1660_v38, 5  ;;  %v1672_v50 = vrot.slane %v1670_v40, 4  ;;  %v1681_v59 = vshrl.u32 %v1506_v53, 16  ;;  %v1729_v38 = vshrl.u32 %v1512_v25, 16 }
 0x17d   : > { %12460 = vmatmul.mubr.msk.bf16.gmra.mrb[48].mxu0 %vm468_vm1, %v12442_v22  ;;  %v1559_v22 = vsel %vm14580_vm4, %v1554_v4, %v1558_v5  ;;  %v6705_v7 = vsel %vm14796_vm7, %v12393_v19, %v6704_v8  ;;  %v1499_v4 = vld [vmem:[%s14564_s14 + $0x2c] sm:$0x1]  ;;  %v1636_v5 = vshll.u32 %v1500_v2, 16  ;;  %v1646_v8 = vshrl.u32 %v1501_v23, 16  ;;  %v14416_v23 = vld [vmem:[%s14661_s17 + $0x30] sm:$0xff]  }
 0x17e   : > { %7354 = vmatprep.mubr.bf16.mxu0 %v14488_v3  ;;  %v11830_v34 = vcombine.low %v1549_v18, %v1559_v22  ;;  %v12445_v47 = vcombine.low %v6705_v7, %v6708_v33  ;;  %v1628_v16 = vshll.u32 %v1499_v4, 16  ;;  %v3507_v18 = vcombine.high %v15409_v14, %v15409_v14  ;;  %v15417_v19 = vld.sshfl [vmem:[%s17078_s2 + $0x1c] sm:$0x33 pattern:$0x76325410] }
 0x17f   : > { %v1638_v20 = vrot.slane %v1636_v5, 5  ;;  %v1644_v21 = vrot.slane %v1642_v6, 5  ;;  %v1648_v22 = vrot.slane %v1646_v8, 4  ;;  %v9241_v24 = vcombine.high %v15417_v19, %v15417_v19 }
 0x180   : > { %v1630_v7 = vrot.slane %v1628_v16, 5  ;;  %v1683_v5 = vrot.slane %v1681_v59, 4  ;;  %v1732_v39 = vshll.u32 %v1512_v25, 16 }
 0x181   : > { %v1639_v33 = vor.u32 %v1638_v20, %v1635_v17 }
 0x182   : > { %11827 = vmatmul.mubr.msk.bf16.gmra.mrb[56].mxu1 %vm468_vm1, %v11809_v43  ;;  %v1600_v43 = vrot.slane %v1598_v32, 4 }
 0x183   : > { %2215 = vmatprep.mubr.bf16.mxu1 %v14488_v3  ;;  %v1640_v44 = vrot.slane %v1639_v33, 4 }
 0x184   : > { %v1601_v52 = vor.u32 %v1600_v43, %v1596_v42 }
 0x185   : > { %12461 = vmatmul.mubr.msk.bf16.gmra.mrb[52].mxu0 %vm468_vm1, %v12443_v60  ;;  %v1645_v30 = vsel %vm14580_vm4, %v1640_v44, %v1644_v21 }
 0x186   : > { %7364 = vmatprep.mubr.bf16.mxu0 %v14488_v3  ;;  %v1602_v60 = vrot.slane %v1601_v52, 4  ;;  %v1505_v52 = vld [vmem:[%s14564_s14 + $0x44] sm:$0x1] }
 0x188   : > { %v1607_v26 = vsel %vm14580_vm4, %v1602_v60, %v1606_v58  ;;  %v1676_v58 = vshll.u32 %v1505_v52, 16  ;;  %v1684_v60 = vshll.u32 %v1506_v53, 16  ;;  %v1514_v52 = vld [vmem:[%s14564_s14 + $0x68] sm:$0x1] }
 0x189   : > { %v11832_v27 = vcombine.low %v1597_v12, %v1607_v26  ;;  %v1510_v12 = vld [vmem:[%s14564_s14 + $0x58] sm:$0xf]  ;;  %v1748_v59 = vshll.u32 %v1514_v52, 16  ;;  %v1524_v52 = vld [vmem:[%s14564_s14 + $0x90] sm:$0xf] }
 0x18a   : > { %11828 = vmatmul.mubr.msk.bf16.gmra.mrb[60].mxu1 %vm468_vm1, %v11810_v13  ;;  %v1615_v13 = vor.u32 %v1614_v62, %v1611_v61  ;;  %v1690_v61 = vshll.u32 %v1507_v54, 16  ;;  %v1694_v62 = vshrl.u32 %v1507_v54, 16  ;;  %v1678_v4 = vrot.slane %v1676_v58, 5  ;;  %v1515_v54 = vld [vmem:[%s14564_s14 + $0x6c] sm:$0xf] }
 0x18b   : > { %2435 = vmatprep.mubr.bf16.mxu1 %v14488_v3  ;;  %v1686_v6 = vrot.slane %v1684_v60, 5  ;;  %v1753_v60 = vshrl.u32 %v1515_v54, 16 }
 0x18c   : > { %v1616_v31 = vrot.slane %v1615_v13, 4  ;;  %v1692_v8 = vrot.slane %v1690_v61, 5  ;;  %v14417_v13 = vld [vmem:[%s14661_s17 + $0x3c] sm:$0xff]   ;;  %v1756_v61 = vshll.u32 %v1515_v54, 16 }
 0x18d   : > { %12462 = vmatmul.mubr.msk.bf16.gmra.mrb[56].mxu0 %vm468_vm1, %v12444_v15  ;;  %v1625_v15 = vor.u32 %v1624_v0, %v1620_v63  ;;  %v1687_v16 = vor.u32 %v1686_v6, %v1683_v5 }
 0x18e   : > { %7374 = vmatprep.mubr.bf16.mxu0 %v14488_v3  ;;  %v1621_v42 = vsel %vm14580_vm4, %v1616_v31, %v1620_v63 }
 0x18f   : > { %v1626_v32 = vrot.slane %v1625_v15, 4  ;;  %v1688_v29 = vrot.slane %v1687_v16, 4  ;;  %v1519_v16 = vld [vmem:[%s14564_s14 + $0x7c] sm:$0xf] }
 0x191   : > { %v1631_v43 = vsel %vm14580_vm4, %v1626_v32, %v1630_v7 }
 0x192   : > { %11848 = vmatmul.mubr.msk.bf16.vlgmr.msra.gmra.mrb[0].mxu1 %vm468_vm1, %v11830_v34  ;;  %v1649_v34 = vor.u32 %v1648_v22, %v1644_v21  ;;  %v11833_v51 = vcombine.low %v1621_v42, %v1631_v43  ;;  %v1714_v22 = vshll.u32 %v1510_v12, 16  ;;  %v14418_v42 = vld [vmem:[%s14661_s17 + $0x48] sm:$0xff]   ;;  %v1693_v43 = vsel %vm14580_vm4, %v1688_v29, %v1692_v8 }
 0x193   : > { %2445 = vmatprep.mubr.bf16.mxu1 %v14488_v3  ;;  %3193 = vmatpush1.bf16.msra.mxu1 %v3187_v45  ;;  %v1790_v29 = vshrl.u32 %v1519_v16, 16 }
 0x194   : > { %11949 = vmatprep.subr.msk.bf16.mxu1 %vm517_vm0, %v3507_v18  ;;  %v1650_v45 = vrot.slane %v1649_v34, 4  ;;  %v1700_v18 = vshll.u32 %v1508_v10, 16  ;;  %v1716_v34 = vrot.slane %v1714_v22, 5  ;;  %v1758_v10 = vrot.slane %v1756_v61, 5 }
 0x195   : > { %12463 = vmatmul.mubr.msk.bf16.gmra.mrb[60].mxu0 %vm468_vm1, %v12445_v47  ;;  %v1659_v47 = vrot.slane %v1657_v36, 4  ;;  %v1511_v36 = vld [vmem:[%s14564_s14 + $0x5c] sm:$0x1]  ;;  %v1825_v61 = vshrl.u32 %v1524_v52, 16 }
 0x196   : > { %7692 = vmatprep.mubr.bf16.mxu0 %v14488_v3  ;;  %v1655_v55 = vsel %vm14580_vm4, %v1650_v45, %v1654_v46  ;;  %v1702_v32 = vrot.slane %v1700_v18, 5 }
 0x197   : > { %v1663_v2 = vor.u32 %v1662_v48, %v1659_v47  ;;  %v11834_v63 = vcombine.low %v1645_v30, %v1655_v55  ;;  %v1724_v47 = vshll.u32 %v1511_v36, 16  ;;  %v1731_v48 = vrot.slane %v1729_v38, 4  ;;  %v1516_v30 = vld [vmem:[%s14564_s14 + $0x70] sm:$0xf] }
 0x198   : > { %v1792_v38 = vrot.slane %v1790_v29, 4 }
 0x199   : > { %v1664_v0 = vrot.slane %v1663_v2, 4 }
 0x19a   : > { %11849 = vmatmul.mubr.msk.bf16.gmra.mrb[4].mxu1 %vm468_vm1, %v11831_v56  ;;  %v1673_v56 = vor.u32 %v1672_v50, %v1668_v49 }
 0x19b   : > { %2455 = vmatprep.mubr.bf16.mxu1 %v14488_v3  ;;  %v1669_v26 = vsel %vm14580_vm4, %v1664_v0, %v1668_v49  ;;  %v1734_v49 = vrot.slane %v1732_v39, 5  ;;  %v14419_v0 = vld [vmem:[%s14661_s17 + $0x54] sm:$0xff]   ;;  %v1520_v39 = vld [vmem:[%s14564_s14 + $0x80] sm:$0x1] }
 0x19c   : > { %v1674_v1 = vrot.slane %v1673_v56, 4  ;;  %v1726_v56 = vrot.slane %v1724_v47, 5  ;;  %v1796_v47 = vshll.u32 %v1520_v39, 16 }
 0x19d   : > { %12547 = vmatmul.mubr.msk.bf16.vlgmr.msra.gmra.mrb[0].mxu0 %vm468_vm1, %v14414_v9  ;;  %v1696_v9 = vrot.slane %v1694_v62, 4  ;;  %v1735_v58 = vor.u32 %v1734_v49, %v1731_v48  ;;  %v1762_v62 = vshll.u32 %v1516_v30, 16 }
 0x19e   : > { %8063 = vmatpush1.bf16.msra.mxu0 %v8057_v11  ;;  %7702 = vmatprep.mubr.bf16.mxu0 %v14488_v3  ;;  %v1509_v11 = vld [vmem:[%s14564_s14 + $0x54] sm:$0xf]  ;;  %v1679_v15 = vsel %vm14580_vm4, %v1674_v1, %v1678_v4 }
 0x19f   : > { %12712 = vmatprep.subr.msk.bf16.mxu0 %vm517_vm0, %v9241_v24  ;;  %v1697_v17 = vor.u32 %v1696_v9, %v1692_v8  ;;  %v1705_v20 = vshrl.u32 %v1509_v11, 16  ;;  %v1708_v21 = vshll.u32 %v1509_v11, 16  ;;  %v1718_v24 = vshrl.u32 %v1510_v12, 16 }
 0x1a0   : > { %v11835_v28 = vcombine.low %v1669_v26, %v1679_v15  ;;  %v1736_v5 = vrot.slane %v1735_v58, 4  ;;  %v1750_v8 = vrot.slane %v1748_v59, 5  ;;  %v1755_v9 = vrot.slane %v1753_v60, 4  ;;  %v1518_v15 = vld [vmem:[%s14564_s14 + $0x78] sm:$0xf] }
 0x1a1   : > { %v1698_v31 = vrot.slane %v1697_v17, 4  ;;  %v1707_v7 = vrot.slane %v1705_v20, 4  ;;  %v1710_v33 = vrot.slane %v1708_v21, 5  ;;  %v1720_v35 = vrot.slane %v1718_v24, 4  ;;  %v14420_v24 = vld [vmem:[%s14661_s17 + $0x60] sm:$0xff]  }
 0x1a2   : > { %11850 = vmatmul.mubr.msk.bf16.gmra.mrb[8].mxu1 %vm468_vm1, %v11832_v27  ;;  %v1513_v27 = vld [vmem:[%s14564_s14 + $0x64] sm:$0xf]  ;;  %v1764_v11 = vrot.slane %v1762_v62, 5  ;;  %v1759_v20 = vor.u32 %v1758_v10, %v1755_v9  ;;  %v1777_v25 = vshrl.u32 %v1518_v15, 16  ;;  %v1523_v60 = vld [vmem:[%s14564_s14 + $0x8c] sm:$0x1] }
 0x1a3   : > { %2465 = vmatprep.mubr.bf16.mxu1 %v14488_v3  ;;  %v1738_v40 = vshll.u32 %v1513_v27, 16  ;;  %v1703_v44 = vsel %vm14580_vm4, %v1698_v31, %v1702_v32  ;;  %v1711_v45 = vor.u32 %v1710_v33, %v1707_v7  ;;  %v1721_v46 = vor.u32 %v1720_v35, %v1716_v34 }
 0x1a4   : > { %v11836_v53 = vcombine.low %v1693_v43, %v1703_v44  ;;  %v1760_v32 = vrot.slane %v1759_v20, 4  ;;  %v14421_v43 = vld [vmem:[%s14661_s17 + $0x6c] sm:$0xff]   ;;  %v1828_v62 = vshll.u32 %v1524_v52, 16  ;;  %v1820_v9 = vshll.u32 %v1523_v60, 16 }
 0x1a5   : > { %12548 = vmatmul.mubr.msk.bf16.gmra.mrb[4].mxu0 %vm468_vm1, %v14415_v41  ;;  %v1742_v41 = vshrl.u32 %v1513_v27, 16  ;;  %v1740_v50 = vrot.slane %v1738_v40, 5  ;;  %v1712_v55 = vrot.slane %v1711_v45, 4  ;;  %v1722_v2 = vrot.slane %v1721_v46, 4  ;;  %v1521_v40 = vld [vmem:[%s14564_s14 + $0x84] sm:$0xf] }
 0x1a6   : > { %7712 = vmatprep.mubr.bf16.mxu0 %v14488_v3  ;;  %v1780_v27 = vshll.u32 %v1518_v15, 16  ;;  %v1801_v48 = vshrl.u32 %v1521_v40, 16  ;;  %v1804_v49 = vshll.u32 %v1521_v40, 16  ;;  %v1827_v10 = vrot.slane %v1825_v61, 4 }
 0x1a7   : > { %v1717_v1 = vsel %vm14580_vm4, %v1712_v55, %v1716_v34  ;;  %v1727_v4 = vsel %vm14580_vm4, %v1722_v2, %v1726_v56  ;;  %v1741_v17 = vsel %vm14580_vm4, %v1736_v5, %v1740_v50  ;;  %v1779_v34 = vrot.slane %v1777_v25, 4 }
 0x1a8   : > { %v11837_v26 = vcombine.low %v1717_v1, %v1727_v4  ;;  %v1782_v35 = vrot.slane %v1780_v27, 5  ;;  %v1798_v2 = vrot.slane %v1796_v47, 5  ;;  %v1803_v56 = vrot.slane %v1801_v48, 4  ;;  %v14422_v1 = vld [vmem:[%s14661_s17 + $0x78] sm:$0xff]  }
 0x1a9   : > { %v1806_v58 = vrot.slane %v1804_v49, 5 }
 0x1aa   : > { %11851 = vmatmul.mubr.msk.bf16.gmra.mrb[12].mxu1 %vm468_vm1, %v11833_v51  ;;  %v1744_v51 = vrot.slane %v1742_v41, 4  ;;  %v1522_v41 = vld [vmem:[%s14564_s14 + $0x88] sm:$0xf]  ;;  %v1783_v45 = vor.u32 %v1782_v35, %v1779_v34 }
 0x1ab   : > { %2475 = vmatprep.mubr.bf16.mxu1 %v14488_v3 }
 0x1ad   : > { %12549 = vmatmul.mubr.msk.bf16.gmra.mrb[8].mxu0 %vm468_vm1, %v14416_v23  ;;  %v1745_v23 = vor.u32 %v1744_v51, %v1740_v50  ;;  %v1810_v50 = vshll.u32 %v1522_v41, 16  ;;  %v1814_v51 = vshrl.u32 %v1522_v41, 16 }
 0x1ae   : > { %7722 = vmatprep.mubr.bf16.mxu0 %v14488_v3 }
 0x1af   : > { %v1746_v6 = vrot.slane %v1745_v23, 4  ;;  %v1812_v23 = vrot.slane %v1810_v50, 5  ;;  %v1816_v59 = vrot.slane %v1814_v51, 4  ;;  %v14424_v51 = vld [vmem:[%s14661_s17 + $0x90] sm:$0xff]  }
 0x1b1   : > { %v1751_v18 = vsel %vm14580_vm4, %v1746_v6, %v1750_v8  ;;  %v1807_v6 = vor.u32 %v1806_v58, %v1803_v56  ;;  %v1817_v8 = vor.u32 %v1816_v59, %v1812_v23 }
 0x1b2   : > { %11852 = vmatmul.mubr.msk.bf16.gmra.mrb[16].mxu1 %vm468_vm1, %v11834_v63  ;;  %v1766_v63 = vshrl.u32 %v1516_v30, 16  ;;  %v11838_v31 = vcombine.low %v1741_v17, %v1751_v18  ;;  %v1784_v30 = vrot.slane %v1783_v45, 4  ;;  %v1528_v17 = vld [vmem:[%s14564_s14 + $0xa0] sm:$0xf]  ;;  %v1531_v45 = vld [vmem:[%s14564_s14 + $0xac] sm:$0xf] }
 0x1b3   : > { %2485 = vmatprep.mubr.bf16.mxu1 %v14488_v3  ;;  %v1808_v18 = vrot.slane %v1807_v6, 4  ;;  %v1818_v20 = vrot.slane %v1817_v8, 4  ;;  %v1858_v29 = vshll.u32 %v1528_v17, 16 }
 0x1b4   : > { %v1768_v12 = vrot.slane %v1766_v63, 4 }
 0x1b5   : > { %12550 = vmatmul.mubr.msk.bf16.gmra.mrb[12].mxu0 %vm468_vm1, %v14417_v13  ;;  %v1517_v13 = vld [vmem:[%s14564_s14 + $0x74] sm:$0x1]  ;;  %v1860_v40 = vrot.slane %v1858_v29, 5 }
 0x1b6   : > { %7732 = vmatprep.mubr.bf16.mxu0 %v14488_v3  ;;  %v1769_v21 = vor.u32 %v1768_v12, %v1764_v11  ;;  %v1772_v22 = vshll.u32 %v1517_v13, 16  ;;  %v1526_v13 = vld [vmem:[%s14564_s14 + $0x98] sm:$0x1] }
 0x1b7   : > { %v1844_v25 = vshll.u32 %v1526_v13, 16 }
 0x1b8   : > { %v1770_v7 = vrot.slane %v1769_v21, 4  ;;  %v1774_v33 = vrot.slane %v1772_v22, 5  ;;  %v1822_v21 = vrot.slane %v1820_v9, 5 }
 0x1ba   : > { %11853 = vmatmul.mubr.msk.bf16.gmra.mrb[20].mxu1 %vm468_vm1, %v11835_v28  ;;  %v1786_v28 = vshll.u32 %v1519_v16, 16  ;;  %v1775_v44 = vsel %vm14580_vm4, %v1770_v7, %v1774_v33  ;;  %v1527_v16 = vld [vmem:[%s14564_s14 + $0x9c] sm:$0xf]  ;;  %v1813_v7 = vsel %vm14580_vm4, %v1808_v18, %v1812_v23  ;;  %v1823_v33 = vsel %vm14580_vm4, %v1818_v20, %v1822_v21 }
 0x1bb   : > { %2495 = vmatprep.mubr.bf16.mxu1 %v14488_v3  ;;  %v1849_v27 = vshrl.u32 %v1527_v16, 16 }
 0x1bc   : > { %v1788_v36 = vrot.slane %v1786_v28, 5  ;;  %v1852_v28 = vshll.u32 %v1527_v16, 16 }
 0x1bd   : > { %12551 = vmatmul.mubr.msk.bf16.gmra.mrb[16].mxu0 %vm468_vm1, %v14418_v42  ;;  %v1765_v42 = vsel %vm14580_vm4, %v1760_v32, %v1764_v11  ;;  %v1830_v11 = vrot.slane %v1828_v62, 5  ;;  %v14423_v32 = vld [vmem:[%s14661_s17 + $0x84] sm:$0xff]   ;;  %v1532_v62 = vld [vmem:[%s14564_s14 + $0xb0] sm:$0x1] }
 0x1be   : > { %7742 = vmatprep.mubr.bf16.mxu0 %v14488_v3  ;;  %v1793_v46 = vor.u32 %v1792_v38, %v1788_v36  ;;  %v11839_v54 = vcombine.low %v1765_v42, %v1775_v44  ;;  %v1789_v4 = vsel %vm14580_vm4, %v1784_v30, %v1788_v36  ;;  %v1846_v36 = vrot.slane %v1844_v25, 5  ;;  %v1530_v44 = vld [vmem:[%s14564_s14 + $0xa8] sm:$0xf] }
 0x1bf   : > { %v1831_v22 = vor.u32 %v1830_v11, %v1827_v10  ;;  %v1851_v38 = vrot.slane %v1849_v27, 4  ;;  %v1854_v39 = vrot.slane %v1852_v28, 5  ;;  %v11841_v42 = vcombine.low %v1813_v7, %v1823_v33  ;;  %v14426_v25 = vld [vmem:[%s14661_s17 + $0xa8] sm:$0xff]  }
 0x1c0   : > { %v1794_v55 = vrot.slane %v1793_v46, 4  ;;  %v1873_v52 = vshrl.u32 %v1530_v44, 16  ;;  %v1886_v30 = vshrl.u32 %v1531_v45, 16  ;;  %v1892_v9 = vshll.u32 %v1532_v62, 16 }
 0x1c1   : > { %v1832_v34 = vrot.slane %v1831_v22, 4  ;;  %v1855_v48 = vor.u32 %v1854_v39, %v1851_v38  ;;  %v14427_v38 = vld [vmem:[%s14661_s17 + $0xb4] sm:$0xff]  }
 0x1c2   : > { %11854 = vmatmul.mubr.msk.bf16.gmra.mrb[24].mxu1 %vm468_vm1, %v11836_v53  ;;  %v1525_v53 = vld [vmem:[%s14564_s14 + $0x94] sm:$0xf]  ;;  %v1799_v5 = vsel %vm14580_vm4, %v1794_v55, %v1798_v2  ;;  %v1875_v23 = vrot.slane %v1873_v52, 4  ;;  %v1888_v61 = vrot.slane %v1886_v30, 4 }
 0x1c3   : > { %2505 = vmatprep.mubr.bf16.mxu1 %v14488_v3  ;;  %v1834_v63 = vshll.u32 %v1525_v53, 16  ;;  %v11840_v15 = vcombine.low %v1789_v4, %v1799_v5  ;;  %v1856_v2 = vrot.slane %v1855_v48, 4  ;;  %v14425_v4 = vld [vmem:[%s14661_s17 + $0x9c] sm:$0xff]   ;;  %v2664_v48 = vld [vmem:[%s14661_s17 + $0x10] sm:$0xf] }
 0x1c4   : > { %v2768_v52 = vrot.slane %v2664_v48, 5  ;;  %v2679_v48 = vld [vmem:[%s14661_s17 + $0x4c] sm:$0xf] }
 0x1c5   : > { %12552 = vmatmul.mubr.msk.bf16.gmra.mrb[20].mxu0 %vm468_vm1, %v14419_v0  ;;  %v1838_v0 = vshrl.u32 %v1525_v53, 16  ;;  %v1836_v12 = vrot.slane %v1834_v63, 5  ;;  %v1876_v53 = vshll.u32 %v1530_v44, 16  ;;  %v1533_v63 = vld [vmem:[%s14564_s14 + $0xb4] sm:$0xf] }
 0x1c6   : > { %7752 = vmatprep.mubr.bf16.mxu0 %v14488_v3  ;;  %v1897_v10 = vshrl.u32 %v1533_v63, 16  ;;  %v1900_v11 = vshll.u32 %v1533_v63, 16  ;;  %v2666_v63 = vld [vmem:[%s14661_s17 + $0x18] sm:$0xe] }
 0x1c7   : > { %v1837_v46 = vsel %vm14580_vm4, %v1832_v34, %v1836_v12  ;;  %v1878_v59 = vrot.slane %v1876_v53, 5  ;;  %v2663_v53 = vld [vmem:[%s14661_s17 + $0xc] sm:$0xe] }
 0x1c8   : > { %v1899_v18 = vrot.slane %v1897_v10, 4  ;;  %v1902_v20 = vrot.slane %v1900_v11, 5 }
 0x1c9   : > { %v1879_v6 = vor.u32 %v1878_v59, %v1875_v23  ;;  %v2667_v23 = vld [vmem:[%s14661_s17 + $0x1c] sm:$0xf]  ;;  %v14429_v59 = vld [vmem:[%s14661_s17 + $0xcc] sm:$0xff]  }
 0x1ca   : > { %11855 = vmatmul.mubr.msk.bf16.gmra.mrb[28].mxu1 %vm468_vm1, %v11837_v26  ;;  %v1840_v26 = vrot.slane %v1838_v0, 4  ;;  %v1534_v0 = vld [vmem:[%s14564_s14 + $0xb8] sm:$0xf]  ;;  %v1903_v29 = vor.u32 %v1902_v20, %v1899_v18  ;;  %v2775_v62 = vrot.slane %v2667_v23, 5  ;;  %v14434_v23 = vld [vmem:[%s14564_s14 + $0x48] sm:$0xff]  }
 0x1cb   : > { %2515 = vmatprep.mubr.bf16.mxu1 %v14488_v3 }
 0x1cc   : > { %v1904_v33 = vrot.slane %v1903_v29, 4 }
 0x1cd   : > { %12553 = vmatmul.mubr.msk.bf16.gmra.mrb[24].mxu0 %vm468_vm1, %v14420_v24  ;;  %v1841_v24 = vor.u32 %v1840_v26, %v1836_v12  ;;  %v1906_v12 = vshll.u32 %v1534_v0, 16  ;;  %v1910_v26 = vshrl.u32 %v1534_v0, 16  ;;  %v2668_v0 = vld [vmem:[%s14661_s17 + $0x20] sm:$0x1] }
 0x1ce   : > { %7762 = vmatprep.mubr.bf16.mxu0 %v14488_v3 }
 0x1cf   : > { %v1842_v35 = vrot.slane %v1841_v24, 4  ;;  %v1908_v21 = vrot.slane %v1906_v12, 5  ;;  %v1912_v22 = vrot.slane %v1910_v26, 4  ;;  %v1535_v24 = vld [vmem:[%s14564_s14 + $0xbc] sm:$0x1] }
 0x1d1   : > { %v1847_v47 = vsel %vm14580_vm4, %v1842_v35, %v1846_v36  ;;  %v2661_v36 = vld [vmem:[%s14661_s17 + $0x4] sm:$0xf]  ;;  %v1909_v39 = vsel %vm14580_vm4, %v1904_v33, %v1908_v21 }
 0x1d2   : > { %11856 = vmatmul.mubr.msk.bf16.gmra.mrb[32].mxu1 %vm468_vm1, %v11838_v31  ;;  %v1862_v31 = vshrl.u32 %v1528_v17, 16  ;;  %v11842_v55 = vcombine.low %v1837_v46, %v1847_v47  ;;  %v1894_v17 = vrot.slane %v1892_v9, 5  ;;  %v15611_v9 = vld.sshfl [vmem:[%s17078_s2 + $0xc] sm:$0x33 pattern:$0x76325410] }
 0x1d3   : > { %2525 = vmatprep.mubr.bf16.mxu1 %v14488_v3  ;;  %v3975_v26 = vcombine.high %v15611_v9, %v15611_v9 }
 0x1d4   : > { %v1864_v41 = vrot.slane %v1862_v31, 4  ;;  %v1913_v31 = vor.u32 %v1912_v22, %v1908_v21 }
 0x1d5   : > { %12554 = vmatmul.mubr.msk.bf16.gmra.mrb[28].mxu0 %vm468_vm1, %v14421_v43  ;;  %v1529_v43 = vld [vmem:[%s14564_s14 + $0xa4] sm:$0x1] }
 0x1d6   : > { %7772 = vmatprep.mubr.bf16.mxu0 %v14488_v3  ;;  %v1865_v49 = vor.u32 %v1864_v41, %v1860_v40  ;;  %v1868_v50 = vshll.u32 %v1529_v43, 16  ;;  %v1914_v34 = vrot.slane %v1913_v31, 4  ;;  %v2761_v41 = vrot.slane %v2661_v36, 5  ;;  %v2662_v43 = vld [vmem:[%s14661_s17 + $0x8] sm:$0x1] }
 0x1d7   : > { %v2764_v47 = vrot.slane %v2662_v43, 5  ;;  %v2672_v31 = vld [vmem:[%s14661_s17 + $0x30] sm:$0xe]  ;;  %v2676_v36 = vld [vmem:[%s14661_s17 + $0x40] sm:$0xf] }
 0x1d8   : > { %v1866_v56 = vrot.slane %v1865_v49, 4  ;;  %v1870_v58 = vrot.slane %v1868_v50, 5  ;;  %v2763_v46 = vrot.slane %v2761_v41, 4  ;;  %v14428_v49 = vld [vmem:[%s14661_s17 + $0xc0] sm:$0xff]   ;;  %v11868_v33 = vrot.slane %v2672_v31, 9 }
 0x1d9   : > { %v2677_v43 = vld [vmem:[%s14661_s17 + $0x44] sm:$0x1] }
 0x1da   : > { %11857 = vmatmul.mubr.msk.bf16.gmra.mrb[36].mxu1 %vm468_vm1, %v11839_v54  ;;  %v1882_v54 = vshll.u32 %v1531_v45, 16  ;;  %v1871_v5 = vsel %vm14580_vm4, %v1866_v56, %v1870_v58  ;;  %v3557_v58 = vsel %vm517_vm0, %v15409_v14, 0 }
 0x1db   : > { %2535 = vmatprep.mubr.bf16.mxu1 %v14488_v3 }
 0x1dc   : > { %v1884_v60 = vrot.slane %v1882_v54, 5  ;;  %v2665_v54 = vld [vmem:[%s14661_s17 + $0x14] sm:$0x1] }
 0x1dd   : > { %12555 = vmatmul.mubr.msk.bf16.gmra.mrb[32].mxu0 %vm468_vm1, %v14422_v1  ;;  %v1861_v1 = vsel %vm14580_vm4, %v1856_v2, %v1860_v40  ;;  %v2770_v2 = vrot.slane %v2768_v52, 4  ;;  %v2771_v56 = vrot.slane %v2665_v54, 5  ;;  %v2680_v54 = vld [vmem:[%s14661_s17 + $0x50] sm:$0x1] }
 0x1de   : > { %7782 = vmatprep.mubr.bf16.mxu0 %v14488_v3  ;;  %v1889_v8 = vor.u32 %v1888_v61, %v1884_v60  ;;  %v11843_v13 = vcombine.low %v1861_v1, %v1871_v5  ;;  %v11866_v1 = vrot.slane %v2666_v63, 9  ;;  %v2778_v5 = vrot.slane %v2668_v0, 5  ;;  %v2683_v63 = vld [vmem:[%s14661_s17 + $0x5c] sm:$0x1] }
 0x1df   : > { %v2772_v61 = vsel %vm14796_vm7, %v2770_v2, %v2771_v56  ;;  %v2806_v56 = vrot.slane %v2680_v54, 5 }
 0x1e0   : > { %v1890_v16 = vrot.slane %v1889_v8, 4  ;;  %v14430_v8 = vld [vmem:[%s14564_s14 + $0x18] sm:$0xff]   ;;  %v2776_v10 = vsel %vm14796_vm7, %v11866_v1, %v2775_v62 }
 0x1e2   : > { %11858 = vmatmul.mubr.msk.bf16.gmra.mrb[40].mxu1 %vm468_vm1, %v11840_v15  ;;  %v1880_v15 = vrot.slane %v1879_v6, 4  ;;  %v1895_v28 = vsel %vm14580_vm4, %v1890_v16, %v1894_v17  ;;  %v2670_v6 = vld [vmem:[%s14661_s17 + $0x28] sm:$0xf]  ;;  %v2669_v16 = vld [vmem:[%s14661_s17 + $0x24] sm:$0xe] }
 0x1e3   : > { %2545 = vmatprep.mubr.bf16.mxu1 %v14488_v3  ;;  %v2782_v12 = vrot.slane %v2670_v6, 5  ;;  %v2671_v17 = vld [vmem:[%s14661_s17 + $0x2c] sm:$0x1]  ;;  %v11867_v21 = vrot.slane %v2669_v16, 9  ;;  %v14435_v6 = vld [vmem:[%s14564_s14 + $0x54] sm:$0xff]  }
 0x1e4   : > { %v1885_v27 = vsel %vm14580_vm4, %v1880_v15, %v1884_v60  ;;  %v9291_v15 = vsel %vm517_vm0, %v15417_v19, 0  ;;  %v14431_v19 = vld [vmem:[%s14564_s14 + $0x24] sm:$0xff]  }
 0x1e5   : > { %12556 = vmatmul.mubr.msk.bf16.gmra.mrb[36].mxu0 %vm468_vm1, %v14423_v32  ;;  %v1916_v32 = vshll.u32 %v1535_v24, 16  ;;  %v11844_v7 = vcombine.low %v1885_v27, %v1895_v28  ;;  %v2784_v22 = vrot.slane %v2782_v12, 4  ;;  %v2785_v24 = vrot.slane %v2671_v17, 5 }
 0x1e6   : > { %7792 = vmatprep.mubr.bf16.mxu0 %v14488_v3  ;;  %v2783_v27 = vsel %vm14796_vm7, %v11867_v21, %v2782_v12  ;;  %v2684_v12 = vld [vmem:[%s14661_s17 + $0x60] sm:$0xe] }
 0x1e7   : > { %v1918_v35 = vrot.slane %v1916_v32, 5  ;;  %v2786_v28 = vsel %vm14796_vm7, %v2784_v22, %v2785_v24  ;;  %v2674_v32 = vld [vmem:[%s14661_s17 + $0x38] sm:$0x1]  ;;  %v11872_v16 = vrot.slane %v2684_v12, 9  ;;  %v14436_v21 = vld [vmem:[%s14564_s14 + $0x60] sm:$0xff]  }
 0x1e9   : > { %v1919_v40 = vsel %vm14580_vm4, %v1914_v34, %v1918_v35  ;;  %v2792_v35 = vrot.slane %v2674_v32, 5 }
 0x1ea   : > { %11859 = vmatmul.mubr.msk.bf16.gmra.mrb[44].mxu1 %vm468_vm1, %v11841_v42  ;;  %v2660_v42 = vld [vmem:[%s14661_s17] sm:$0xe]  ;;  %v11845_v44 = vcombine.low %v1909_v39, %v1919_v40 }
 0x1eb   : > { %2555 = vmatprep.mubr.bf16.mxu1 %v14488_v3  ;;  %v11864_v45 = vrot.slane %v2660_v42, 9  ;;  %v2675_v42 = vld [vmem:[%s14661_s17 + $0x3c] sm:$0xe] }
 0x1ed   : > { %12557 = vmatmul.mubr.msk.bf16.gmra.mrb[40].mxu0 %vm468_vm1, %v14424_v51  ;;  %v2762_v50 = vsel %vm14796_vm7, %v11864_v45, %v2761_v41  ;;  %v2765_v51 = vsel %vm14796_vm7, %v2763_v46, %v2764_v47  ;;  %v2796_v41 = vrot.slane %v2676_v36, 5  ;;  %v11869_v45 = vrot.slane %v2675_v42, 9 }
 0x1ee   : > { %7802 = vmatprep.mubr.bf16.mxu0 %v14488_v3  ;;  %v11897_v30 = vcombine.low %v2762_v50, %v2765_v51  ;;  %v2799_v47 = vrot.slane %v2677_v43, 5 }
 0x1ef   : > { %v2798_v46 = vrot.slane %v2796_v41, 4  ;;  %v2797_v50 = vsel %vm14796_vm7, %v11869_v45, %v2796_v41  ;;  %v14438_v45 = vld [vmem:[%s14564_s14 + $0x78] sm:$0xff]  }
 0x1f1   : > { %v2800_v51 = vsel %vm14796_vm7, %v2798_v46, %v2799_v47 }
 0x1f2   : > { %11860 = vmatmul.mubr.msk.bf16.gmra.mrb[48].mxu1 %vm468_vm1, %v11842_v55  ;;  %v11865_v55 = vrot.slane %v2663_v53, 9  ;;  %v2678_v53 = vld [vmem:[%s14661_s17 + $0x48] sm:$0xe] }
 0x1f3   : > { %2565 = vmatprep.mubr.bf16.mxu1 %v14488_v3 }
 0x1f4   : > { %v2769_v60 = vsel %vm14796_vm7, %v11865_v55, %v2768_v52  ;;  %v2803_v52 = vrot.slane %v2679_v48, 5  ;;  %v11870_v55 = vrot.slane %v2678_v53, 9 }
 0x1f5   : > { %12558 = vmatmul.mubr.msk.bf16.gmra.mrb[44].mxu0 %vm468_vm1, %v14425_v4  ;;  %v11898_v14 = vcombine.low %v2769_v60, %v2772_v61  ;;  %v2777_v4 = vrot.slane %v2775_v62, 4  ;;  %v2681_v62 = vld [vmem:[%s14661_s17 + $0x54] sm:$0xe] }
 0x1f6   : > { %7812 = vmatprep.mubr.bf16.mxu0 %v14488_v3  ;;  %v2805_v2 = vrot.slane %v2803_v52, 4 }
 0x1f7   : > { %v2779_v11 = vsel %vm14796_vm7, %v2777_v4, %v2778_v5  ;;  %v2813_v4 = vrot.slane %v2683_v63, 5  ;;  %v2685_v5 = vld [vmem:[%s14661_s17 + $0x64] sm:$0xf] }
 0x1f8   : > { %v11899_v20 = vcombine.low %v2776_v10, %v2779_v11  ;;  %v2807_v60 = vsel %vm14796_vm7, %v2805_v2, %v2806_v56  ;;  %v2817_v11 = vrot.slane %v2685_v5, 5 }
 0x1fa   : > { %11861 = vmatmul.mubr.msk.bf16.gmra.mrb[52].mxu1 %vm468_vm1, %v11843_v13  ;;  %v15623_v13 = vld.sshfl [vmem:[%s17079_s3 + $0x1c] sm:$0x33 pattern:$0x76325410]  ;;  %v2819_v17 = vrot.slane %v2817_v11, 4  ;;  %v2818_v22 = vsel %vm14796_vm7, %v11872_v16, %v2817_v11 }
 0x1fb   : > { %2575 = vmatprep.mubr.bf16.mxu1 %v14488_v3  ;;  %v9611_v18 = vcombine.high %v15623_v13, %v15623_v13  ;;  %v14441_v16 = vld [vmem:[%s14564_s14 + $0x9c] sm:$0xff]  }
 0x1fd   : > { %12559 = vmatmul.mubr.msk.bf16.gmra.mrb[48].mxu0 %vm468_vm1, %v14426_v25  ;;  %v2673_v25 = vld [vmem:[%s14661_s17 + $0x34] sm:$0xf] }
 0x1fe   : > { %7822 = vmatprep.mubr.bf16.mxu0 %v14488_v3  ;;  %v2789_v29 = vrot.slane %v2673_v25, 5 }
 0x200   : > { %v2791_v34 = vrot.slane %v2789_v29, 4  ;;  %v2790_v39 = vsel %vm14796_vm7, %v11868_v33, %v2789_v29  ;;  %v14437_v33 = vld [vmem:[%s14564_s14 + $0x6c] sm:$0xff]  }
 0x202   : > { %11862 = vmatmul.mubr.msk.bf16.gmra.mrb[56].mxu1 %vm468_vm1, %v11844_v7  ;;  %v11900_v7 = vcombine.low %v2783_v27, %v2786_v28  ;;  %v2793_v40 = vsel %vm14796_vm7, %v2791_v34, %v2792_v35  ;;  %v2689_v27 = vld [vmem:[%s14661_s17 + $0x74] sm:$0x1] }
 0x203   : > { %2585 = vmatprep.mubr.bf16.mxu1 %v14488_v3  ;;  %v2827_v32 = vrot.slane %v2689_v27, 5 }
 0x205   : > { %12560 = vmatmul.mubr.msk.bf16.gmra.mrb[52].mxu0 %vm468_vm1, %v14427_v38  ;;  %v14432_v38 = vld [vmem:[%s14564_s14 + $0x30] sm:$0xff]  }
 0x206   : > { %7832 = vmatprep.mubr.bf16.mxu0 %v14488_v3 }
 0x20a   : > { %11863 = vmatmul.mubr.msk.bf16.gmra.mrb[60].mxu1 %vm468_vm1, %v11845_v44  ;;  %v11901_v44 = vcombine.low %v2790_v39, %v2793_v40  ;;  %v2692_v39 = vld [vmem:[%s14661_s17 + $0x80] sm:$0x1] }
 0x20b   : > { %3224 = vmatprep.mubr.bf16.mxu1 %v14488_v3  ;;  %v2834_v43 = vrot.slane %v2692_v39, 5 }
 0x20d   : > { %12561 = vmatmul.mubr.msk.bf16.gmra.mrb[56].mxu0 %vm468_vm1, %v14428_v49  ;;  %v14433_v49 = vld [vmem:[%s14564_s14 + $0x3c] sm:$0xff]  }
 0x20e   : > { %7842 = vmatprep.mubr.bf16.mxu0 %v14488_v3 }
 0x212   : > { %11915 = vmatmul.mubr.msk.bf16.vlgmr.msra.gmra.mrb[0].mxu1 %vm468_vm1, %v11897_v30  ;;  %v11902_v30 = vcombine.low %v2797_v50, %v2800_v51  ;;  %v2695_v50 = vld [vmem:[%s14661_s17 + $0x8c] sm:$0x1] }
 0x213   : > { %3234 = vmatprep.mubr.bf16.mxu1 %v14488_v3  ;;  %3563 = vmatpush1.bf16.msra.mxu1 %v3557_v58  ;;  %v2682_v58 = vld [vmem:[%s14661_s17 + $0x58] sm:$0xf]  ;;  %v2841_v54 = vrot.slane %v2695_v50, 5 }
 0x214   : > { %12048 = vmatprep.subr.msk.bf16.mxu1 %vm517_vm0, %v3975_v26  ;;  %v2810_v61 = vrot.slane %v2682_v58, 5  ;;  %v2686_v26 = vld [vmem:[%s14661_s17 + $0x68] sm:$0x1] }
 0x215   : > { %12562 = vmatmul.mubr.msk.bf16.gmra.mrb[60].mxu0 %vm468_vm1, %v14429_v59  ;;  %v2804_v59 = vsel %vm14796_vm7, %v11870_v55, %v2803_v52  ;;  %v14439_v55 = vld [vmem:[%s14564_s14 + $0x84] sm:$0xff]  }
 0x216   : > { %8094 = vmatprep.mubr.bf16.mxu0 %v14488_v3  ;;  %v11903_v0 = vcombine.low %v2804_v59, %v2807_v60  ;;  %v2812_v1 = vrot.slane %v2810_v61, 4  ;;  %v2698_v59 = vld [vmem:[%s14661_s17 + $0x98] sm:$0x1] }
 0x217   : > { %v2848_v63 = vrot.slane %v2698_v59, 5 }
 0x218   : > { %v2814_v10 = vsel %vm14796_vm7, %v2812_v1, %v2813_v4 }
 0x21a   : > { %11916 = vmatmul.mubr.msk.bf16.gmra.mrb[4].mxu1 %vm468_vm1, %v11898_v14  ;;  %v11871_v14 = vrot.slane %v2681_v62, 9 }
 0x21b   : > { %3244 = vmatprep.mubr.bf16.mxu1 %v14488_v3 }
 0x21d   : > { %12582 = vmatmul.mubr.msk.bf16.vlgmr.msra.gmra.mrb[0].mxu0 %vm468_vm1, %v14430_v8  ;;  %v2811_v8 = vsel %vm14796_vm7, %v11871_v14, %v2810_v61  ;;  %v14440_v14 = vld [vmem:[%s14564_s14 + $0x90] sm:$0xff]  }
 0x21e   : > { %9297 = vmatpush1.bf16.msra.mxu0 %v9291_v15  ;;  %8104 = vmatprep.mubr.bf16.mxu0 %v14488_v3  ;;  %v11904_v15 = vcombine.low %v2811_v8, %v2814_v10  ;;  %v2701_v8 = vld [vmem:[%s14661_s17 + $0xa4] sm:$0x1] }
 0x21f   : > { %12747 = vmatprep.subr.msk.bf16.mxu0 %vm517_vm0, %v9611_v18  ;;  %v2820_v18 = vrot.slane %v2686_v26, 5  ;;  %v2855_v26 = vrot.slane %v2701_v8, 5 }
 0x221   : > { %v2821_v24 = vsel %vm14796_vm7, %v2819_v17, %v2820_v18 }
 0x222   : > { %11917 = vmatmul.mubr.msk.bf16.gmra.mrb[8].mxu1 %vm468_vm1, %v11899_v20  ;;  %v2688_v20 = vld [vmem:[%s14661_s17 + $0x70] sm:$0xf]  ;;  %v11905_v28 = vcombine.low %v2818_v22, %v2821_v24 }
 0x223   : > { %3254 = vmatprep.mubr.bf16.mxu1 %v14488_v3  ;;  %v2824_v25 = vrot.slane %v2688_v20, 5  ;;  %v2704_v22 = vld [vmem:[%s14661_s17 + $0xb0] sm:$0x1] }
 0x224   : > { %v2862_v27 = vrot.slane %v2704_v22, 5 }
 0x225   : > { %12583 = vmatmul.mubr.msk.bf16.gmra.mrb[4].mxu0 %vm468_vm1, %v14431_v19  ;;  %v2687_v19 = vld [vmem:[%s14661_s17 + $0x6c] sm:$0xe]  ;;  %v2826_v31 = vrot.slane %v2824_v25, 4 }
 0x226   : > { %8114 = vmatprep.mubr.bf16.mxu0 %v14488_v3  ;;  %v11873_v29 = vrot.slane %v2687_v19, 9 }
 0x227   : > { %v2828_v35 = vsel %vm14796_vm7, %v2826_v31, %v2827_v32 }
 0x228   : > { %v2825_v34 = vsel %vm14796_vm7, %v11873_v29, %v2824_v25  ;;  %v14442_v29 = vld [vmem:[%s14564_s14 + $0xa8] sm:$0xff]  }
 0x229   : > { %v11906_v40 = vcombine.low %v2825_v34, %v2828_v35  ;;  %v2707_v34 = vld [vmem:[%s14661_s17 + $0xbc] sm:$0x1] }
 0x22a   : > { %11918 = vmatmul.mubr.msk.bf16.gmra.mrb[12].mxu1 %vm468_vm1, %v11900_v7  ;;  %v2691_v7 = vld [vmem:[%s14661_s17 + $0x7c] sm:$0xf] }
 0x22b   : > { %3264 = vmatprep.mubr.bf16.mxu1 %v14488_v3  ;;  %v2831_v36 = vrot.slane %v2691_v7, 5 }
 0x22d   : > { %12584 = vmatmul.mubr.msk.bf16.gmra.mrb[8].mxu0 %vm468_vm1, %v14432_v38  ;;  %v2690_v38 = vld [vmem:[%s14661_s17 + $0x78] sm:$0xe]  ;;  %v2833_v42 = vrot.slane %v2831_v36, 4 }
 0x22e   : > { %8124 = vmatprep.mubr.bf16.mxu0 %v14488_v3  ;;  %v11874_v41 = vrot.slane %v2690_v38, 9 }
 0x22f   : > { %v2835_v47 = vsel %vm14796_vm7, %v2833_v42, %v2834_v43  ;;  %v14443_v43 = vld [vmem:[%s14564_s14 + $0xb4] sm:$0xff]  }
 0x230   : > { %v2832_v46 = vsel %vm14796_vm7, %v11874_v41, %v2831_v36  ;;  %v2872_v36 = vld [vmem:[%s14564_s14 + $0x4] sm:$0xf]  ;;  %v2871_v41 = vld [vmem:[%s14564_s14] sm:$0xe] }
 0x231   : > { %v11907_v51 = vcombine.low %v2832_v46, %v2835_v47  ;;  %v2969_v42 = vrot.slane %v2872_v36, 5  ;;  %v2877_v36 = vld [vmem:[%s14564_s14 + $0x18] sm:$0xe] }
 0x232   : > { %11919 = vmatmul.mubr.msk.bf16.gmra.mrb[16].mxu1 %vm468_vm1, %v11901_v44  ;;  %v2694_v44 = vld [vmem:[%s14661_s17 + $0x88] sm:$0xf] }
 0x233   : > { %3274 = vmatprep.mubr.bf16.mxu1 %v14488_v3  ;;  %v2838_v48 = vrot.slane %v2694_v44, 5  ;;  %v2873_v44 = vld [vmem:[%s14564_s14 + $0x8] sm:$0x1]  ;;  %v2971_v50 = vrot.slane %v2969_v42, 4 }
 0x235   : > { %12585 = vmatmul.mubr.msk.bf16.gmra.mrb[12].mxu0 %vm468_vm1, %v14433_v49  ;;  %v2693_v49 = vld [vmem:[%s14661_s17 + $0x84] sm:$0xe]  ;;  %v2840_v53 = vrot.slane %v2838_v48, 4 }
 0x236   : > { %8134 = vmatprep.mubr.bf16.mxu0 %v14488_v3  ;;  %v11875_v52 = vrot.slane %v2693_v49, 9  ;;  %v11880_v49 = vrot.slane %v2871_v41, 9  ;;  %v2879_v41 = vld [vmem:[%s14564_s14 + $0x20] sm:$0x1] }
 0x237   : > { %v2842_v56 = vsel %vm14796_vm7, %v2840_v53, %v2841_v54 }
 0x238   : > { %v2839_v2 = vsel %vm14796_vm7, %v11875_v52, %v2838_v48  ;;  %v12599_v48 = vld [vmem:[%s14661_s17 + $0x1c] sm:$0xf] }
 0x239   : > { %v11908_v60 = vcombine.low %v2839_v2, %v2842_v56  ;;  %v8381_v2 = vshrl.u32 %v12599_v48, 16  ;;  %v2970_v56 = vsel %vm14796_vm7, %v11880_v49, %v2969_v42 }
 0x23a   : > { %11920 = vmatmul.mubr.msk.bf16.gmra.mrb[20].mxu1 %vm468_vm1, %v11902_v30  ;;  %v2697_v30 = vld [vmem:[%s14661_s17 + $0x94] sm:$0xf] }
 0x23b   : > { %3284 = vmatprep.mubr.bf16.mxu1 %v14488_v3  ;;  %v2845_v58 = vrot.slane %v2697_v30, 5  ;;  %v2875_v30 = vld [vmem:[%s14564_s14 + $0x10] sm:$0xf] }
 0x23d   : > { %12586 = vmatmul.mubr.msk.bf16.gmra.mrb[16].mxu0 %vm468_vm1, %v14434_v23  ;;  %v2696_v23 = vld [vmem:[%s14661_s17 + $0x90] sm:$0xe]  ;;  %v2847_v62 = vrot.slane %v2845_v58, 4 }
 0x23e   : > { %8144 = vmatprep.mubr.bf16.mxu0 %v14488_v3  ;;  %v11876_v61 = vrot.slane %v2696_v23, 9  ;;  %v14444_v23 = vld [vmem:[%s14564_s14 + $0xc0] sm:$0xff]  }
 0x23f   : > { %v2849_v4 = vsel %vm14796_vm7, %v2847_v62, %v2848_v63  ;;  %v2874_v63 = vld [vmem:[%s14564_s14 + $0xc] sm:$0xe] }
 0x240   : > { %v2846_v1 = vsel %vm14796_vm7, %v11876_v61, %v2845_v58  ;;  %v12601_v58 = vld [vmem:[%s14661_s17 + $0x24] sm:$0xf] }
 0x241   : > { %v11909_v10 = vcombine.low %v2846_v1, %v2849_v4  ;;  %v12602_v1 = vld [vmem:[%s14661_s17 + $0x28] sm:$0xf]  ;;  %v2876_v4 = vld [vmem:[%s14564_s14 + $0x14] sm:$0x1]  ;;  %v8395_v8 = vshll.u32 %v12601_v58, 16 }
 0x242   : > { %11921 = vmatmul.mubr.msk.bf16.gmra.mrb[24].mxu1 %vm468_vm1, %v11903_v0  ;;  %v2700_v0 = vld [vmem:[%s14661_s17 + $0xa0] sm:$0xf] }
 0x243   : > { %3294 = vmatprep.mubr.bf16.mxu1 %v14488_v3  ;;  %v2852_v5 = vrot.slane %v2700_v0, 5  ;;  %v8397_v22 = vrot.slane %v8395_v8, 5 }
 0x245   : > { %12587 = vmatmul.mubr.msk.bf16.gmra.mrb[20].mxu0 %vm468_vm1, %v14435_v6  ;;  %v2699_v6 = vld [vmem:[%s14661_s17 + $0x9c] sm:$0xe]  ;;  %v2854_v12 = vrot.slane %v2852_v5, 4 }
 0x246   : > { %8154 = vmatprep.mubr.bf16.mxu0 %v14488_v3  ;;  %v11877_v11 = vrot.slane %v2699_v6, 9  ;;  %v8392_v6 = vshrl.u32 %v12601_v58, 16 }
 0x247   : > { %v2856_v18 = vsel %vm14796_vm7, %v2854_v12, %v2855_v26  ;;  %v8401_v26 = vshll.u32 %v12602_v1, 16 }
 0x248   : > { %v2853_v17 = vsel %vm14796_vm7, %v11877_v11, %v2852_v5  ;;  %v12600_v5 = vld [vmem:[%s14661_s17 + $0x20] sm:$0x1]  ;;  %v11881_v11 = vrot.slane %v2874_v63, 9  ;;  %v12606_v63 = vld [vmem:[%s14661_s17 + $0x38] sm:$0x1] }
 0x249   : > { %v11910_v24 = vcombine.low %v2853_v17, %v2856_v18 }
 0x24a   : > { %11922 = vmatmul.mubr.msk.bf16.gmra.mrb[28].mxu1 %vm468_vm1, %v11904_v15  ;;  %v2703_v15 = vld [vmem:[%s14661_s17 + $0xac] sm:$0xf] }
 0x24b   : > { %3304 = vmatprep.mubr.bf16.mxu1 %v14488_v3  ;;  %v2859_v20 = vrot.slane %v2703_v15, 5  ;;  %v8405_v15 = vshrl.u32 %v12602_v1, 16 }
 0x24d   : > { %12588 = vmatmul.mubr.msk.bf16.gmra.mrb[24].mxu0 %vm468_vm1, %v14436_v21  ;;  %v2702_v21 = vld [vmem:[%s14661_s17 + $0xa8] sm:$0xe]  ;;  %v2861_v19 = vrot.slane %v2859_v20, 4 }
 0x24e   : > { %8164 = vmatprep.mubr.bf16.mxu0 %v14488_v3  ;;  %v11878_v25 = vrot.slane %v2702_v21, 9  ;;  %v8394_v21 = vrot.slane %v8392_v6, 4  ;;  %v12909_v6 = vld.sshfl [vmem:[%s17078_s2 + $0x20] sm:$0x33 pattern:$0x76325410] }
 0x24f   : > { %v2863_v32 = vsel %vm14796_vm7, %v2861_v19, %v2862_v27  ;;  %v12603_v19 = vld [vmem:[%s14661_s17 + $0x2c] sm:$0x1] }
 0x250   : > { %v2860_v31 = vsel %vm14796_vm7, %v11878_v25, %v2859_v20  ;;  %v8387_v20 = vshll.u32 %v12600_v5, 16  ;;  %v2878_v25 = vld [vmem:[%s14564_s14 + $0x1c] sm:$0xf] }
 0x251   : > { %v11911_v35 = vcombine.low %v2860_v31, %v2863_v32  ;;  %v12604_v31 = vld [vmem:[%s14661_s17 + $0x30] sm:$0xf]  ;;  %v12605_v32 = vld [vmem:[%s14661_s17 + $0x34] sm:$0xf] }
 0x252   : > { %11923 = vmatmul.mubr.msk.bf16.gmra.mrb[32].mxu1 %vm468_vm1, %v11905_v28  ;;  %v2706_v28 = vld [vmem:[%s14661_s17 + $0xb8] sm:$0xf]  ;;  %v8416_v42 = vshrl.u32 %v12604_v31, 16 }
 0x253   : > { %3314 = vmatprep.mubr.bf16.mxu1 %v14488_v3  ;;  %v2866_v7 = vrot.slane %v2706_v28, 5  ;;  %v15817_v28 = vrot.slane %v8401_v26, 5  ;;  %v10397_v26 = vcombine.high %v12909_v6, %v12909_v6  ;;  %v12614_v6 = vld [vmem:[%s14661_s17 + $0x58] sm:$0xf] }
 0x255   : > { %12589 = vmatmul.mubr.msk.bf16.gmra.mrb[28].mxu0 %vm468_vm1, %v14437_v33  ;;  %v2705_v33 = vld [vmem:[%s14661_s17 + $0xb4] sm:$0xe]  ;;  %v2868_v39 = vrot.slane %v2866_v7, 4 }
 0x256   : > { %8174 = vmatprep.mubr.bf16.mxu0 %v14488_v3  ;;  %v11879_v38 = vrot.slane %v2705_v33, 9 }
 0x258   : > { %v2867_v46 = vsel %vm14796_vm7, %v11879_v38, %v2866_v7  ;;  %v14445_v7 = vld [vmem:[%s14564_s14 + $0xcc] sm:$0xff]   ;;  %v2983_v38 = vrot.slane %v2878_v25, 5  ;;  %v2884_v25 = vld [vmem:[%s14564_s14 + $0x34] sm:$0xf] }
 0x25a   : > { %11924 = vmatmul.mubr.msk.bf16.gmra.mrb[36].mxu1 %vm468_vm1, %v11906_v40  ;;  %v2869_v40 = vrot.slane %v2707_v34, 5 }
 0x25b   : > { %3324 = vmatprep.mubr.bf16.mxu1 %v14488_v3 }
 0x25c   : > { %v2870_v47 = vsel %vm14796_vm7, %v2868_v39, %v2869_v40  ;;  %v8398_v39 = vor.u32 %v8397_v22, %v8394_v21  ;;  %v8411_v40 = vshll.u32 %v12603_v19, 16  ;;  %v8435_v21 = vshll.u32 %v12606_v63, 16  ;;  %v12613_v63 = vld [vmem:[%s14661_s17 + $0x54] sm:$0xf] }
 0x25d   : > { %12590 = vmatmul.mubr.msk.bf16.gmra.mrb[32].mxu0 %vm468_vm1, %v14438_v45  ;;  %v12598_v45 = vld [vmem:[%s14661_s17 + $0x18] sm:$0xf]  ;;  %v11912_v54 = vcombine.low %v2867_v46, %v2870_v47  ;;  %v2881_v47 = vld [vmem:[%s14564_s14 + $0x28] sm:$0xf] }
 0x25e   : > { %8184 = vmatprep.mubr.bf16.mxu0 %v14488_v3  ;;  %v8368_v52 = vshrl.u32 %v12598_v45, 16  ;;  %v8371_v53 = vshll.u32 %v12598_v45, 16 }
 0x260   : > { %v8370_v61 = vrot.slane %v8368_v52, 4  ;;  %v8373_v62 = vrot.slane %v8371_v53, 5  ;;  %v11882_v52 = vrot.slane %v2877_v36, 9  ;;  %v2985_v53 = vrot.slane %v2983_v38, 4 }
 0x262   : > { %11925 = vmatmul.mubr.msk.bf16.gmra.mrb[40].mxu1 %vm468_vm1, %v11907_v51  ;;  %v2972_v51 = vrot.slane %v2873_v44, 5  ;;  %v8374_v17 = vor.u32 %v8373_v62, %v8370_v61  ;;  %v8425_v44 = vshll.u32 %v12605_v32, 16  ;;  %v2882_v61 = vld [vmem:[%s14564_s14 + $0x2c] sm:$0x1] }
 0x263   : > { %3334 = vmatprep.mubr.bf16.mxu1 %v14488_v3 }
 0x264   : > { %v2973_v59 = vsel %vm14796_vm7, %v2971_v50, %v2972_v51  ;;  %v9661_v51 = vsel %vm517_vm0, %v15623_v13, 0 }
 0x265   : > { %12591 = vmatmul.mubr.msk.bf16.gmra.mrb[36].mxu0 %vm468_vm1, %v14439_v55  ;;  %v8377_v55 = vshll.u32 %v12599_v48, 16  ;;  %v8429_v48 = vshrl.u32 %v12605_v32, 16 }
 0x266   : > { %8194 = vmatprep.mubr.bf16.mxu0 %v14488_v3 }
 0x267   : > { %v15802_v0 = vrot.slane %v8377_v55, 5  ;;  %v8413_v55 = vrot.slane %v8411_v40, 5  ;;  %v8431_v62 = vrot.slane %v8429_v48, 4  ;;  %v2885_v40 = vld [vmem:[%s14564_s14 + $0x38] sm:$0x1] }
 0x26a   : > { %11926 = vmatmul.mubr.msk.bf16.gmra.mrb[44].mxu1 %vm468_vm1, %v11908_v60  ;;  %v2976_v60 = vrot.slane %v2875_v30, 5  ;;  %v8399_v30 = vrot.slane %v8398_v39, 4  ;;  %v2883_v39 = vld [vmem:[%s14564_s14 + $0x30] sm:$0xe] }
 0x26b   : > { %3344 = vmatprep.mubr.bf16.mxu1 %v14488_v3 }
 0x26c   : > { %v2978_v12 = vrot.slane %v2976_v60, 4  ;;  %v2977_v27 = vsel %vm14796_vm7, %v11881_v11, %v2976_v60  ;;  %v2880_v60 = vld [vmem:[%s14564_s14 + $0x24] sm:$0xe]  ;;  %v8404_v8 = vsel %vm14580_vm4, %v8399_v30, %v15817_v28 }
 0x26d   : > { %12592 = vmatmul.mubr.msk.bf16.gmra.mrb[40].mxu0 %vm468_vm1, %v14440_v14  ;;  %v8383_v14 = vrot.slane %v8381_v2, 4  ;;  %v2990_v2 = vrot.slane %v2881_v47, 5 }
 0x26e   : > { %8204 = vmatprep.mubr.bf16.mxu0 %v14488_v3 }
 0x26f   : > { %v8384_v18 = vor.u32 %v8383_v14, %v15802_v0  ;;  %v2984_v14 = vsel %vm14796_vm7, %v11882_v52, %v2983_v38  ;;  %v2992_v11 = vrot.slane %v2990_v2, 4 }
 0x271   : > { %v8385_v34 = vrot.slane %v8384_v18, 4 }
 0x272   : > { %11927 = vmatmul.mubr.msk.bf16.gmra.mrb[48].mxu1 %vm468_vm1, %v11909_v10  ;;  %v11932_v10 = vcombine.low %v2970_v56, %v2973_v59  ;;  %v8418_v56 = vrot.slane %v8416_v42, 4 }
 0x273   : > { %3354 = vmatprep.mubr.bf16.mxu1 %v14488_v3 }
 0x275   : > { %12593 = vmatmul.mubr.msk.bf16.gmra.mrb[44].mxu0 %vm468_vm1, %v14441_v16  ;;  %v2979_v16 = vrot.slane %v2876_v4, 5  ;;  %v12607_v4 = vld [vmem:[%s14661_s17 + $0x3c] sm:$0xf] }
 0x276   : > { %8214 = vmatprep.mubr.bf16.mxu0 %v14488_v3  ;;  %v8440_v22 = vshrl.u32 %v12607_v4, 16 }
 0x277   : > { %v2980_v33 = vsel %vm14796_vm7, %v2978_v12, %v2979_v16  ;;  %v12608_v12 = vld [vmem:[%s14661_s17 + $0x40] sm:$0xf]  ;;  %v2993_v16 = vrot.slane %v2882_v61, 5 }
 0x278   : > { %v11933_v45 = vcombine.low %v2977_v27, %v2980_v33  ;;  %v8449_v19 = vshll.u32 %v12608_v12, 16  ;;  %v8453_v27 = vshrl.u32 %v12608_v12, 16  ;;  %v12610_v33 = vld [vmem:[%s14661_s17 + $0x48] sm:$0xf]  ;;  %v8442_v36 = vrot.slane %v8440_v22, 4 }
 0x279   : > { %v8501_v22 = vshrl.u32 %v12614_v6, 16 }
 0x27a   : > { %11928 = vmatmul.mubr.msk.bf16.gmra.mrb[52].mxu1 %vm468_vm1, %v11910_v24  ;;  %v4025_v24 = vsel %vm517_vm0, %v15611_v9, 0  ;;  %v8375_v9 = vrot.slane %v8374_v17, 4  ;;  %v8455_v42 = vrot.slane %v8453_v27, 4 }
 0x27b   : > { %3364 = vmatprep.mubr.bf16.mxu1 %v14488_v3 }
 0x27c   : > { %v8380_v49 = vsel %vm14580_vm4, %v8375_v9, %v15802_v0  ;;  %v15848_v0 = vld.sshfl [vmem:[%s17079_s3 + $0xc] sm:$0x33 pattern:$0x76325410] }
 0x27d   : > { %12594 = vmatmul.mubr.msk.bf16.gmra.mrb[48].mxu0 %vm468_vm1, %v14442_v29  ;;  %v8407_v29 = vrot.slane %v8405_v15, 4  ;;  %v4377_v5 = vcombine.high %v15848_v0, %v15848_v0  ;;  %v12611_v9 = vld [vmem:[%s14661_s17 + $0x4c] sm:$0xf] }
 0x27e   : > { %8224 = vmatprep.mubr.bf16.mxu0 %v14488_v3  ;;  %v8477_v47 = vshrl.u32 %v12611_v9, 16 }
 0x27f   : > { %v8408_v46 = vor.u32 %v8407_v29, %v15817_v28 }
 0x281   : > { %v8409_v59 = vrot.slane %v8408_v46, 4  ;;  %v8473_v46 = vshll.u32 %v12611_v9, 16 }
 0x282   : > { %11929 = vmatmul.mubr.msk.bf16.gmra.mrb[56].mxu1 %vm468_vm1, %v11911_v35  ;;  %v8389_v35 = vrot.slane %v8387_v20, 5 }
 0x283   : > { %3374 = vmatprep.mubr.bf16.mxu1 %v14488_v3  ;;  %v8414_v15 = vsel %vm14580_vm4, %v8409_v59, %v8413_v55  ;;  %v15892_v59 = vrot.slane %v8473_v46, 5  ;;  %v12617_v46 = vld [vmem:[%s14661_s17 + $0x64] sm:$0xf] }
 0x284   : > { %v8390_v50 = vsel %vm14580_vm4, %v8385_v34, %v8389_v35  ;;  %v12696_v28 = vcombine.low %v8404_v8, %v8414_v15  ;;  %v8437_v34 = vrot.slane %v8435_v21, 5  ;;  %v2997_v35 = vrot.slane %v2884_v25, 5  ;;  %v2886_v8 = vld [vmem:[%s14564_s14 + $0x3c] sm:$0xe] }
 0x285   : > { %12595 = vmatmul.mubr.msk.bf16.gmra.mrb[52].mxu0 %vm468_vm1, %v14443_v43  ;;  %v8419_v43 = vshll.u32 %v12604_v31, 16  ;;  %v12695_v13 = vcombine.low %v8380_v49, %v8390_v50  ;;  %v2994_v31 = vsel %vm14796_vm7, %v2992_v11, %v2993_v16  ;;  %v8488_v15 = vshrl.u32 %v12613_v63, 16 }
 0x286   : > { %8234 = vmatprep.mubr.bf16.mxu0 %v14488_v3  ;;  %v8491_v16 = vshll.u32 %v12613_v63, 16  ;;  %v8497_v21 = vshll.u32 %v12614_v6, 16  ;;  %v11885_v25 = vrot.slane %v2886_v8, 9 }
 0x287   : > { %v8421_v58 = vrot.slane %v8419_v43, 5  ;;  %v12609_v43 = vld [vmem:[%s14661_s17 + $0x44] sm:$0x1] }
 0x288   : > { %v8459_v55 = vshll.u32 %v12609_v43, 16  ;;  %v8493_v9 = vrot.slane %v8491_v16, 5 }
 0x289   : > { %v8422_v17 = vor.u32 %v8421_v58, %v8418_v56 }
 0x28a   : > { %11930 = vmatmul.mubr.msk.bf16.gmra.mrb[60].mxu1 %vm468_vm1, %v11912_v54  ;;  %v2986_v54 = vrot.slane %v2879_v41, 5  ;;  %v8451_v41 = vrot.slane %v8449_v19, 5 }
 0x28b   : > { %3594 = vmatprep.mubr.bf16.mxu1 %v14488_v3  ;;  %v8423_v32 = vrot.slane %v8422_v17, 4 }
 0x28c   : > { %v2987_v1 = vsel %vm14796_vm7, %v2985_v53, %v2986_v54  ;;  %v2999_v53 = vrot.slane %v2997_v35, 4  ;;  %v3000_v54 = vrot.slane %v2885_v40, 5  ;;  %v8456_v30 = vor.u32 %v8455_v42, %v8451_v41  ;;  %v12616_v42 = vld [vmem:[%s14661_s17 + $0x60] sm:$0xf] }
 0x28d   : > { %12596 = vmatmul.mubr.msk.bf16.gmra.mrb[56].mxu0 %vm468_vm1, %v14444_v23  ;;  %v15839_v23 = vrot.slane %v8425_v44, 5  ;;  %v11934_v20 = vcombine.low %v2984_v14, %v2987_v1  ;;  %v8464_v44 = vshrl.u32 %v12610_v33, 16 }
 0x28e   : > { %8244 = vmatprep.mubr.bf16.mxu0 %v14488_v3  ;;  %v3001_v14 = vsel %vm14796_vm7, %v2999_v53, %v3000_v54  ;;  %v8457_v1 = vrot.slane %v8456_v30, 4  ;;  %v8512_v53 = vshrl.u32 %v12616_v42, 16  ;;  %v8515_v54 = vshll.u32 %v12616_v42, 16  ;;  %v2893_v30 = vld [vmem:[%s14564_s14 + $0x58] sm:$0xf] }
 0x28f   : > { %v8432_v18 = vor.u32 %v8431_v62, %v15839_v23  ;;  %v8428_v49 = vsel %vm14580_vm4, %v8423_v32, %v15839_v23  ;;  %v8466_v56 = vrot.slane %v8464_v44, 4  ;;  %v8479_v23 = vrot.slane %v8477_v47, 4  ;;  %v2889_v32 = vld [vmem:[%s14564_s14 + $0x48] sm:$0xe]  ;;  %v2895_v42 = vld [vmem:[%s14564_s14 + $0x60] sm:$0xe] }
 0x290   : > { %v3018_v63 = vrot.slane %v2893_v30, 5  ;;  %v11888_v30 = vrot.slane %v2895_v42, 9 }
 0x291   : > { %v8480_v12 = vor.u32 %v8479_v23, %v15892_v59 }
 0x292   : > { %11950 = vmatmul.mubr.msk.bf16.vlgmr.msra.gmra.mrb[0].mxu1 %vm468_vm1, %v11932_v10  ;;  %v11883_v10 = vrot.slane %v2880_v60, 9  ;;  %v12612_v60 = vld [vmem:[%s14661_s17 + $0x50] sm:$0x1] }
 0x293   : > { %3604 = vmatprep.mubr.bf16.mxu1 %v14488_v3  ;;  %4031 = vmatpush1.bf16.msra.mxu1 %v4025_v24  ;;  %v8443_v24 = vshll.u32 %v12607_v4, 16  ;;  %v8461_v4 = vrot.slane %v8459_v55, 5  ;;  %v8521_v55 = vshll.u32 %v12617_v46, 16 }
 0x294   : > { %12083 = vmatprep.subr.msk.bf16.mxu1 %vm517_vm0, %v4377_v5  ;;  %v2991_v29 = vsel %vm14796_vm7, %v11883_v10, %v2990_v2  ;;  %v2887_v2 = vld [vmem:[%s14564_s14 + $0x40] sm:$0xf]  ;;  %v2888_v10 = vld [vmem:[%s14564_s14 + $0x44] sm:$0x1] }
 0x295   : > { %12597 = vmatmul.mubr.msk.bf16.gmra.mrb[60].mxu0 %vm468_vm1, %v14445_v7  ;;  %v8433_v7 = vrot.slane %v8432_v18, 4  ;;  %v8445_v38 = vrot.slane %v8443_v24, 5  ;;  %v11935_v48 = vcombine.low %v2991_v29, %v2994_v31  ;;  %v3004_v5 = vrot.slane %v2887_v2, 5 }
 0x296   : > { %9328 = vmatprep.mubr.bf16.mxu0 %v14488_v3  ;;  %v8462_v24 = vsel %vm14580_vm4, %v8457_v1, %v8461_v4  ;;  %v3007_v27 = vrot.slane %v2888_v10, 5  ;;  %v8481_v29 = vrot.slane %v8480_v12, 4  ;;  %v8525_v2 = vshrl.u32 %v12617_v46, 16  ;;  %v2892_v4 = vld [vmem:[%s14564_s14 + $0x54] sm:$0xe] }
 0x297   : > { %v8438_v50 = vsel %vm14580_vm4, %v8433_v7, %v8437_v34  ;;  %v8446_v52 = vor.u32 %v8445_v38, %v8442_v36  ;;  %v3006_v19 = vrot.slane %v3004_v5, 4  ;;  %v12615_v36 = vld [vmem:[%s14661_s17 + $0x5c] sm:$0x1]  ;;  %v15917_v38 = vrot.slane %v8497_v21, 5  ;;  %v12618_v10 = vld [vmem:[%s14661_s17 + $0x68] sm:$0x1] }
 0x298   : > { %v12697_v61 = vcombine.low %v8428_v49, %v8438_v50  ;;  %v3005_v40 = vsel %vm14796_vm7, %v11885_v25, %v3004_v5  ;;  %v8507_v50 = vshll.u32 %v12615_v36, 16  ;;  %v8517_v1 = vrot.slane %v8515_v54, 5  ;;  %v2894_v5 = vld [vmem:[%s14564_s14 + $0x5c] sm:$0x1] }
 0x299   : > { %v8523_v6 = vrot.slane %v8521_v55, 5  ;;  %v8527_v8 = vrot.slane %v8525_v2, 4 }
 0x29a   : > { %11951 = vmatmul.mubr.msk.bf16.gmra.mrb[4].mxu1 %vm468_vm1, %v11933_v45  ;;  %v8467_v45 = vshll.u32 %v12610_v33, 16  ;;  %v8490_v33 = vrot.slane %v8488_v15, 4 }
 0x29b   : > { %3614 = vmatprep.mubr.bf16.mxu1 %v14488_v3  ;;  %v8528_v25 = vor.u32 %v8527_v8, %v8523_v6  ;;  %v12625_v8 = vld [vmem:[%s14661_s17 + $0x84] sm:$0xf] }
 0x29c   : > { %v8469_v58 = vrot.slane %v8467_v45, 5  ;;  %v11886_v45 = vrot.slane %v2889_v32, 9  ;;  %v8494_v49 = vor.u32 %v8493_v9, %v8490_v33 }
 0x29d   : > { %12713 = vmatmul.mubr.msk.bf16.vlgmr.msra.gmra.mrb[0].mxu0 %vm468_vm1, %v12695_v13  ;;  %v8447_v13 = vrot.slane %v8446_v52, 4 }
 0x29e   : > { %9667 = vmatpush1.bf16.msra.mxu0 %v9661_v51  ;;  %9338 = vmatprep.mubr.bf16.mxu0 %v14488_v3  ;;  %v11884_v51 = vrot.slane %v2883_v39, 9  ;;  %v8470_v11 = vor.u32 %v8469_v58, %v8466_v56  ;;  %v8503_v39 = vrot.slane %v8501_v22, 4  ;;  %v8495_v23 = vrot.slane %v8494_v49, 4 }
 0x29f   : > { %12910 = vmatprep.subr.msk.bf16.mxu0 %vm517_vm0, %v10397_v26  ;;  %v8483_v26 = vshll.u32 %v12612_v60, 16  ;;  %v8452_v18 = vsel %vm14580_vm4, %v8447_v13, %v8451_v41  ;;  %v3008_v41 = vsel %vm14796_vm7, %v3006_v19, %v3007_v27  ;;  %v8509_v60 = vrot.slane %v8507_v50, 5  ;;  %v2896_v27 = vld [vmem:[%s14564_s14 + $0x64] sm:$0xf] }
 0x2a0   : > { %v2998_v62 = vsel %vm14796_vm7, %v11884_v51, %v2997_v35  ;;  %v12698_v34 = vcombine.low %v8452_v18, %v8462_v24  ;;  %v2891_v35 = vld [vmem:[%s14564_s14 + $0x50] sm:$0x1]  ;;  %v11937_v51 = vcombine.low %v3005_v40, %v3008_v41  ;;  %v8504_v52 = vor.u32 %v8503_v39, %v15917_v38  ;;  %v12623_v41 = vld [vmem:[%s14661_s17 + $0x7c] sm:$0xf] }
 0x2a1   : > { %v11936_v17 = vcombine.low %v2998_v62, %v3001_v14  ;;  %v8485_v31 = vrot.slane %v8483_v26, 5  ;;  %v12620_v62 = vld [vmem:[%s14661_s17 + $0x70] sm:$0xf]  ;;  %v8514_v14 = vrot.slane %v8512_v53, 4  ;;  %v3020_v22 = vrot.slane %v3018_v63, 4 }
 0x2a2   : > { %11952 = vmatmul.mubr.msk.bf16.gmra.mrb[8].mxu1 %vm468_vm1, %v11934_v20  ;;  %v2890_v20 = vld [vmem:[%s14564_s14 + $0x4c] sm:$0xf]  ;;  %v8505_v13 = vrot.slane %v8504_v52, 4  ;;  %v8545_v26 = vshll.u32 %v12620_v62, 16  ;;  %v8549_v15 = vshrl.u32 %v12620_v62, 16  ;;  %v3021_v24 = vrot.slane %v2894_v5, 5 }
 0x2a3   : > { %3624 = vmatprep.mubr.bf16.mxu1 %v14488_v3  ;;  %v3011_v7 = vrot.slane %v2890_v20, 5  ;;  %v8486_v44 = vsel %vm14580_vm4, %v8481_v29, %v8485_v31  ;;  %v11887_v20 = vrot.slane %v2892_v4, 9  ;;  %v8518_v21 = vor.u32 %v8517_v1, %v8514_v14  ;;  %v12624_v14 = vld [vmem:[%s14661_s17 + $0x80] sm:$0x1] }
 0x2a4   : > { %v8510_v18 = vsel %vm14580_vm4, %v8505_v13, %v8509_v60  ;;  %v8531_v19 = vshll.u32 %v12618_v10, 16  ;;  %v15954_v31 = vrot.slane %v8545_v26, 5  ;;  %v8551_v32 = vrot.slane %v8549_v15, 4  ;;  %v12626_v26 = vld [vmem:[%s14661_s17 + $0x88] sm:$0xf] }
 0x2a5   : > { %12714 = vmatmul.mubr.msk.bf16.gmra.mrb[4].mxu0 %vm468_vm1, %v12696_v28  ;;  %v8471_v28 = vrot.slane %v8470_v11, 4  ;;  %v3013_v47 = vrot.slane %v3011_v7, 4  ;;  %v3012_v58 = vsel %vm14796_vm7, %v11886_v45, %v3011_v7  ;;  %v12621_v7 = vld [vmem:[%s14661_s17 + $0x74] sm:$0x1]  ;;  %v3019_v9 = vsel %vm14796_vm7, %v11887_v20, %v3018_v63 }
 0x2a6   : > { %9348 = vmatprep.mubr.bf16.mxu0 %v14488_v3  ;;  %v3022_v36 = vsel %vm14796_vm7, %v3020_v22, %v3021_v24  ;;  %v8533_v39 = vrot.slane %v8531_v19, 5  ;;  %v3025_v40 = vrot.slane %v2896_v27, 5  ;;  %v8552_v45 = vor.u32 %v8551_v32, %v15954_v31  ;;  %v2900_v63 = vld [vmem:[%s14564_s14 + $0x74] sm:$0x1] }
 0x2a7   : > { %v8476_v43 = vsel %vm14580_vm4, %v8471_v28, %v15892_v59  ;;  %v8555_v46 = vshll.u32 %v12621_v7, 16  ;;  %v11939_v49 = vcombine.low %v3019_v9, %v3022_v36  ;;  %v8569_v52 = vshll.u32 %v12623_v41, 16  ;;  %v12629_v9 = vld [vmem:[%s14661_s17 + $0x94] sm:$0xf] }
 0x2a8   : > { %v12699_v56 = vcombine.low %v8476_v43, %v8486_v44  ;;  %v2897_v43 = vld [vmem:[%s14564_s14 + $0x68] sm:$0x1]  ;;  %v8573_v53 = vshrl.u32 %v12623_v41, 16  ;;  %v3027_v55 = vrot.slane %v3025_v40, 4  ;;  %v3026_v5 = vsel %vm14796_vm7, %v11888_v30, %v3025_v40  ;;  %v2903_v40 = vld [vmem:[%s14564_s14 + $0x80] sm:$0x1] }
 0x2a9   : > { %v3028_v2 = vrot.slane %v2897_v43, 5  ;;  %v15979_v1 = vrot.slane %v8569_v52, 5  ;;  %v8584_v22 = vshrl.u32 %v12625_v8, 16  ;;  %v8587_v24 = vshll.u32 %v12625_v8, 16  ;;  %v12627_v41 = vld [vmem:[%s14661_s17 + $0x8c] sm:$0x1] }
 0x2aa   : > { %11953 = vmatmul.mubr.msk.bf16.gmra.mrb[12].mxu1 %vm468_vm1, %v11935_v48  ;;  %v3014_v48 = vrot.slane %v2891_v35, 5  ;;  %v12622_v35 = vld [vmem:[%s14661_s17 + $0x78] sm:$0xf]  ;;  %v8575_v4 = vrot.slane %v8573_v53, 4  ;;  %v8593_v19 = vshll.u32 %v12626_v26, 16  ;;  %v8597_v27 = vshrl.u32 %v12626_v26, 16 }
 0x2ab   : > { %3634 = vmatprep.mubr.bf16.mxu1 %v14488_v3  ;;  %v3042_v53 = vrot.slane %v2903_v40, 5  ;;  %v12633_v40 = vld [vmem:[%s14661_s17 + $0xa4] sm:$0x1] }
 0x2ac   : > { %v3015_v59 = vsel %vm14796_vm7, %v3013_v47, %v3014_v48  ;;  %v8560_v47 = vshrl.u32 %v12622_v35, 16  ;;  %v8563_v48 = vshll.u32 %v12622_v35, 16  ;;  %v2901_v35 = vld [vmem:[%s14564_s14 + $0x78] sm:$0xe]  ;;  %v16008_v42 = vrot.slane %v8593_v19, 5 }
 0x2ad   : > { %12715 = vmatmul.mubr.msk.bf16.gmra.mrb[8].mxu0 %vm468_vm1, %v12697_v61  ;;  %v12619_v61 = vld [vmem:[%s14661_s17 + $0x6c] sm:$0xf]  ;;  %v11938_v16 = vcombine.low %v3012_v58, %v3015_v59  ;;  %v8553_v58 = vrot.slane %v8552_v45, 4  ;;  %v8557_v59 = vrot.slane %v8555_v46, 5  ;;  %v8599_v43 = vrot.slane %v8597_v27, 4 }
 0x2ae   : > { %9358 = vmatprep.mubr.bf16.mxu0 %v14488_v3  ;;  %v8536_v11 = vshrl.u32 %v12619_v61, 16  ;;  %v8539_v12 = vshll.u32 %v12619_v61, 16  ;;  %v8562_v61 = vrot.slane %v8560_v47, 4  ;;  %v8565_v62 = vrot.slane %v8563_v48, 5 }
 0x2af   : > { %v8617_v47 = vshll.u32 %v12629_v9, 16  ;;  %v8621_v48 = vshrl.u32 %v12629_v9, 16 }
 0x2b0   : > { %v8538_v28 = vrot.slane %v8536_v11, 4  ;;  %v8541_v29 = vrot.slane %v8539_v12, 5  ;;  %v8558_v11 = vsel %vm14580_vm4, %v8553_v58, %v8557_v59  ;;  %v2904_v58 = vld [vmem:[%s14564_s14 + $0x84] sm:$0xe] }
 0x2b2   : > { %11954 = vmatmul.mubr.msk.bf16.gmra.mrb[16].mxu1 %vm468_vm1, %v11936_v17  ;;  %v8500_v17 = vsel %vm14580_vm4, %v8495_v23, %v15917_v38  ;;  %v8529_v38 = vrot.slane %v8528_v25, 4  ;;  %v8542_v44 = vor.u32 %v8541_v29, %v8538_v28  ;;  %v2898_v23 = vld [vmem:[%s14564_s14 + $0x6c] sm:$0xe]  ;;  %v2902_v25 = vld [vmem:[%s14564_s14 + $0x7c] sm:$0xf] }
 0x2b3   : > { %3644 = vmatprep.mubr.bf16.mxu1 %v14488_v3  ;;  %v12700_v33 = vcombine.low %v8500_v17, %v8510_v18  ;;  %v11889_v12 = vrot.slane %v2898_v23, 9  ;;  %v8566_v17 = vor.u32 %v8565_v62, %v8562_v61  ;;  %v8579_v18 = vshll.u32 %v12624_v14, 16  ;;  %v2906_v62 = vld [vmem:[%s14564_s14 + $0x8c] sm:$0x1] }
 0x2b4   : > { %v8534_v54 = vsel %vm14580_vm4, %v8529_v38, %v8533_v39  ;;  %v3039_v36 = vrot.slane %v2902_v25, 5  ;;  %v8586_v38 = vrot.slane %v8584_v22, 4  ;;  %v8589_v39 = vrot.slane %v8587_v24, 5 }
 0x2b5   : > { %12716 = vmatmul.mubr.msk.bf16.gmra.mrb[12].mxu0 %vm468_vm1, %v12698_v34  ;;  %v8519_v34 = vrot.slane %v8518_v21, 4  ;;  %v8576_v21 = vor.u32 %v8575_v4, %v15979_v1  ;;  %v8567_v32 = vrot.slane %v8566_v17, 4  ;;  %v8581_v7 = vrot.slane %v8579_v18, 5 }
 0x2b6   : > { %9368 = vmatprep.mubr.bf16.mxu0 %v14488_v3  ;;  %v3041_v52 = vrot.slane %v3039_v36, 4  ;;  %v8623_v61 = vrot.slane %v8621_v48, 4  ;;  %v3049_v26 = vrot.slane %v2906_v62, 5  ;;  %v12638_v62 = vld [vmem:[%s14661_s17 + $0xb8] sm:$0xf] }
 0x2b7   : > { %v8524_v50 = vsel %vm14580_vm4, %v8519_v34, %v8523_v6  ;;  %v3029_v6 = vsel %vm14796_vm7, %v3027_v55, %v3028_v2  ;;  %v8577_v34 = vrot.slane %v8576_v21, 4  ;;  %v8600_v55 = vor.u32 %v8599_v43, %v16008_v42 }
 0x2b8   : > { %v12701_v13 = vcombine.low %v8524_v50, %v8534_v54  ;;  %v11940_v20 = vcombine.low %v3026_v5, %v3029_v6  ;;  %v8572_v50 = vsel %vm14580_vm4, %v8567_v32, %v15979_v1  ;;  %v8590_v54 = vor.u32 %v8589_v39, %v8586_v38  ;;  %v12631_v5 = vld [vmem:[%s14661_s17 + $0x9c] sm:$0xf]  ;;  %v12632_v6 = vld [vmem:[%s14661_s17 + $0xa0] sm:$0xf]  ;;  %v2907_v38 = vld [vmem:[%s14564_s14 + $0x90] sm:$0xe] }
 0x2b9   : > { %v8582_v30 = vsel %vm14580_vm4, %v8577_v34, %v8581_v7  ;;  %v8603_v2 = vshll.u32 %v12627_v41, 16  ;;  %v3043_v1 = vsel %vm14796_vm7, %v3041_v52, %v3042_v53  ;;  %v8601_v8 = vrot.slane %v8600_v55, 4  ;;  %v2909_v41 = vld [vmem:[%s14564_s14 + $0x98] sm:$0x1]  ;;  %v2911_v53 = vld [vmem:[%s14564_s14 + $0xa0] sm:$0xf] }
 0x2ba   : > { %11955 = vmatmul.mubr.msk.bf16.gmra.mrb[20].mxu1 %vm468_vm1, %v11937_v51  ;;  %v2899_v51 = vld [vmem:[%s14564_s14 + $0x70] sm:$0xf]  ;;  %v8591_v4 = vrot.slane %v8590_v54, 4  ;;  %v8632_v18 = vshrl.u32 %v12631_v5, 16  ;;  %v8641_v21 = vshll.u32 %v12632_v6, 16  ;;  %v8645_v22 = vshrl.u32 %v12632_v6, 16 }
 0x2bb   : > { %3654 = vmatprep.mubr.bf16.mxu1 %v14488_v3  ;;  %v3032_v60 = vrot.slane %v2899_v51, 5  ;;  %v11890_v51 = vrot.slane %v2901_v35, 9  ;;  %v3056_v52 = vrot.slane %v2909_v41, 5  ;;  %v12636_v6 = vld [vmem:[%s14661_s17 + $0xb0] sm:$0x1] }
 0x2bc   : > { %v8596_v25 = vsel %vm14580_vm4, %v8591_v4, %v16008_v42  ;;  %v16045_v34 = vrot.slane %v8641_v21, 5  ;;  %v8647_v35 = vrot.slane %v8645_v22, 4  ;;  %v12634_v42 = vld [vmem:[%s14661_s17 + $0xa8] sm:$0xf]  ;;  %v12640_v41 = vld [vmem:[%s14661_s17 + $0xc0] sm:$0xf] }
 0x2bd   : > { %12717 = vmatmul.mubr.msk.bf16.gmra.mrb[16].mxu0 %vm468_vm1, %v12699_v56  ;;  %v8543_v56 = vrot.slane %v8542_v44, 4  ;;  %v3034_v15 = vrot.slane %v3032_v60, 4  ;;  %v3033_v29 = vsel %vm14796_vm7, %v11889_v12, %v3032_v60  ;;  %v2905_v44 = vld [vmem:[%s14564_s14 + $0x88] sm:$0xf]  ;;  %v16020_v60 = vrot.slane %v8617_v47, 5 }
 0x2be   : > { %9378 = vmatprep.mubr.bf16.mxu0 %v14488_v3  ;;  %v3040_v14 = vsel %vm14796_vm7, %v11890_v51, %v3039_v36  ;;  %v11892_v47 = vrot.slane %v2907_v38, 9  ;;  %v8656_v54 = vshrl.u32 %v12634_v42, 16 }
 0x2bf   : > { %v8548_v10 = vsel %vm14580_vm4, %v8543_v56, %v15954_v31  ;;  %v3046_v56 = vrot.slane %v2905_v44, 5  ;;  %v11942_v24 = vcombine.low %v3040_v14, %v3043_v1  ;;  %v2910_v14 = vld [vmem:[%s14564_s14 + $0x9c] sm:$0xe]  ;;  %v2912_v1 = vld [vmem:[%s14564_s14 + $0xa4] sm:$0x1] }
 0x2c0   : > { %v12702_v28 = vcombine.low %v8548_v10, %v8558_v11  ;;  %v8605_v10 = vrot.slane %v8603_v2, 5  ;;  %v11891_v11 = vrot.slane %v2904_v58, 9  ;;  %v12637_v58 = vld [vmem:[%s14661_s17 + $0xb4] sm:$0xf]  ;;  %v8658_v4 = vrot.slane %v8656_v54, 4 }
 0x2c1   : > { %v3048_v12 = vrot.slane %v3046_v56, 4  ;;  %v11893_v21 = vrot.slane %v2910_v14, 9 }
 0x2c2   : > { %11956 = vmatmul.mubr.msk.bf16.gmra.mrb[24].mxu1 %vm468_vm1, %v11938_v16  ;;  %v3035_v16 = vrot.slane %v2900_v63, 5  ;;  %v12703_v63 = vcombine.low %v8572_v50, %v8582_v30  ;;  %v8606_v19 = vsel %vm14580_vm4, %v8601_v8, %v8605_v10  ;;  %v3047_v27 = vsel %vm14796_vm7, %v11891_v11, %v3046_v56 }
 0x2c3   : > { %3664 = vmatprep.mubr.bf16.mxu1 %v14488_v3  ;;  %v12704_v36 = vcombine.low %v8596_v25, %v8606_v19  ;;  %v8651_v50 = vshll.u32 %v12633_v40, 16  ;;  %v8659_v30 = vshll.u32 %v12634_v42, 16  ;;  %v8680_v11 = vshrl.u32 %v12637_v58, 16 }
 0x2c4   : > { %v3036_v31 = vsel %vm14796_vm7, %v3034_v15, %v3035_v16  ;;  %v8624_v16 = vor.u32 %v8623_v61, %v16020_v60  ;;  %v3060_v61 = vrot.slane %v2911_v53, 5  ;;  %v8675_v19 = vshll.u32 %v12636_v6, 16  ;;  %v12643_v6 = vld [vmem:[%s14661_s17 + $0xcc] sm:$0xf] }
 0x2c5   : > { %12718 = vmatmul.mubr.msk.bf16.gmra.mrb[20].mxu0 %vm468_vm1, %v12700_v33  ;;  %v12628_v33 = vld [vmem:[%s14661_s17 + $0x90] sm:$0xf] }
 0x2c6   : > { %9388 = vmatprep.mubr.bf16.mxu0 %v14488_v3  ;;  %v8608_v45 = vshrl.u32 %v12628_v33, 16  ;;  %v8611_v46 = vshll.u32 %v12628_v33, 16  ;;  %v8625_v32 = vrot.slane %v8624_v16, 4  ;;  %v8634_v33 = vrot.slane %v8632_v18, 4 }
 0x2c7   : > { %v8693_v16 = vshrl.u32 %v12638_v62, 16  ;;  %v3062_v22 = vrot.slane %v3060_v61, 4  ;;  %v8677_v40 = vrot.slane %v8675_v19, 5 }
 0x2c8   : > { %v8610_v59 = vrot.slane %v8608_v45, 4  ;;  %v8613_v23 = vrot.slane %v8611_v46, 5  ;;  %v12635_v46 = vld [vmem:[%s14661_s17 + $0xac] sm:$0xf] }
 0x2c9   : > { %v8665_v55 = vshll.u32 %v12635_v46, 16  ;;  %v8669_v2 = vshrl.u32 %v12635_v46, 16  ;;  %v12641_v46 = vld [vmem:[%s14661_s17 + $0xc4] sm:$0xf] }
 0x2ca   : > { %11957 = vmatmul.mubr.msk.bf16.gmra.mrb[28].mxu1 %vm468_vm1, %v11939_v49  ;;  %v11941_v49 = vcombine.low %v3033_v29, %v3036_v31  ;;  %v8614_v15 = vor.u32 %v8613_v23, %v8610_v59  ;;  %v3050_v29 = vsel %vm14796_vm7, %v3048_v12, %v3049_v26  ;;  %v8683_v12 = vshll.u32 %v12637_v58, 16  ;;  %v2914_v26 = vld [vmem:[%s14564_s14 + $0xac] sm:$0xf] }
 0x2cb   : > { %3674 = vmatprep.mubr.bf16.mxu1 %v14488_v3  ;;  %v11943_v43 = vcombine.low %v3047_v27, %v3050_v29  ;;  %v16074_v8 = vrot.slane %v8665_v55, 5  ;;  %v8671_v10 = vrot.slane %v8669_v2, 4  ;;  %v8682_v29 = vrot.slane %v8680_v11, 4  ;;  %v12644_v11 = vld [vmem:[%s14661_s17 + $0xd0] sm:$0xf] }
 0x2cc   : > { %v8615_v31 = vrot.slane %v8614_v15, 4  ;;  %v8689_v15 = vshll.u32 %v12638_v62, 16  ;;  %v8713_v54 = vshll.u32 %v12641_v46, 16  ;;  %v2916_v62 = vld [vmem:[%s14564_s14 + $0xb4] sm:$0xe]  ;;  %v8741_v19 = vshrl.u32 %v12644_v11, 16 }
 0x2cd   : > { %12719 = vmatmul.mubr.msk.bf16.gmra.mrb[24].mxu0 %vm468_vm1, %v12701_v13  ;;  %v12630_v13 = vld [vmem:[%s14661_s17 + $0x98] sm:$0x1]  ;;  %v8672_v27 = vor.u32 %v8671_v10, %v16074_v8  ;;  %v12642_v10 = vld [vmem:[%s14661_s17 + $0xc8] sm:$0x1] }
 0x2ce   : > { %9398 = vmatprep.mubr.bf16.mxu0 %v14488_v3  ;;  %v8627_v17 = vshll.u32 %v12630_v13, 16  ;;  %v8620_v44 = vsel %vm14580_vm4, %v8615_v31, %v16020_v60  ;;  %v8653_v60 = vrot.slane %v8651_v50, 5  ;;  %v8685_v31 = vrot.slane %v8683_v12, 5  ;;  %v2917_v50 = vld [vmem:[%s14564_s14 + $0xb8] sm:$0xf] }
 0x2cf   : > { %v8673_v42 = vrot.slane %v8672_v27, 4 }
 0x2d0   : > { %v8629_v7 = vrot.slane %v8627_v17, 5 }
 0x2d1   : > { %v8678_v2 = vsel %vm14580_vm4, %v8673_v42, %v8677_v40 }
 0x2d2   : > { %11958 = vmatmul.mubr.msk.bf16.gmra.mrb[32].mxu1 %vm468_vm1, %v11940_v20  ;;  %v8635_v20 = vshll.u32 %v12631_v5, 16  ;;  %v8630_v45 = vsel %vm14580_vm4, %v8625_v32, %v8629_v7  ;;  %v8661_v5 = vrot.slane %v8659_v30, 5  ;;  %v2913_v32 = vld [vmem:[%s14564_s14 + $0xa8] sm:$0xe]  ;;  %v2915_v7 = vld [vmem:[%s14564_s14 + $0xb0] sm:$0x1] }
 0x2d3   : > { %3684 = vmatprep.mubr.bf16.mxu1 %v14488_v3  ;;  %v12705_v56 = vcombine.low %v8620_v44, %v8630_v45  ;;  %v3070_v45 = vrot.slane %v2915_v7, 5  ;;  %v8717_v30 = vshrl.u32 %v12641_v46, 16 }
 0x2d4   : > { %v8637_v9 = vrot.slane %v8635_v20, 5  ;;  %v8662_v25 = vor.u32 %v8661_v5, %v8658_v4  ;;  %v8715_v4 = vrot.slane %v8713_v54, 5  ;;  %v12649_v54 = vld [vmem:[%s14564_s14 + $0x24] sm:$0xf] }
 0x2d5   : > { %12720 = vmatmul.mubr.msk.bf16.gmra.mrb[28].mxu0 %vm468_vm1, %v12702_v28  ;;  %v2908_v28 = vld [vmem:[%s14564_s14 + $0x94] sm:$0xf]  ;;  %v8719_v5 = vrot.slane %v8717_v30, 4  ;;  %v12650_v30 = vld [vmem:[%s14564_s14 + $0x28] sm:$0xf] }
 0x2d6   : > { %9408 = vmatprep.mubr.bf16.mxu0 %v14488_v3  ;;  %v3053_v39 = vrot.slane %v2908_v28, 5  ;;  %v8638_v48 = vor.u32 %v8637_v9, %v8634_v33  ;;  %v3067_v28 = vrot.slane %v2914_v26, 5  ;;  %v16087_v33 = vrot.slane %v8689_v15, 5 }
 0x2d7   : > { %v8695_v9 = vrot.slane %v8693_v16, 4  ;;  %v11895_v15 = vrot.slane %v2916_v62, 9  ;;  %v8837_v62 = vshrl.u32 %v12650_v30, 16 }
 0x2d8   : > { %v3055_v51 = vrot.slane %v3053_v39, 4  ;;  %v8639_v59 = vrot.slane %v8638_v48, 4  ;;  %v3054_v13 = vsel %vm14796_vm7, %v11892_v47, %v3053_v39  ;;  %v8663_v39 = vrot.slane %v8662_v25, 4 }
 0x2d9   : > { %v3069_v44 = vrot.slane %v3067_v28, 4  ;;  %v8686_v47 = vor.u32 %v8685_v31, %v8682_v29  ;;  %v8696_v48 = vor.u32 %v8695_v9, %v16087_v33  ;;  %v8737_v25 = vshll.u32 %v12644_v11, 16 }
 0x2da   : > { %11959 = vmatmul.mubr.msk.bf16.gmra.mrb[36].mxu1 %vm468_vm1, %v11941_v49  ;;  %v8648_v49 = vor.u32 %v8647_v35, %v16045_v34  ;;  %v8644_v18 = vsel %vm14580_vm4, %v8639_v59, %v16045_v34  ;;  %v12639_v35 = vld [vmem:[%s14661_s17 + $0xbc] sm:$0x1]  ;;  %v8668_v55 = vsel %vm14580_vm4, %v8663_v39, %v16074_v8 }
 0x2db   : > { %3694 = vmatprep.mubr.bf16.mxu1 %v14488_v3  ;;  %v3071_v58 = vsel %vm14796_vm7, %v3069_v44, %v3070_v45  ;;  %v8687_v59 = vrot.slane %v8686_v47, 4  ;;  %v12707_v14 = vcombine.low %v8668_v55, %v8678_v2  ;;  %v12647_v39 = vld [vmem:[%s14564_s14 + $0x1c] sm:$0xf] }
 0x2dc   : > { %v8649_v23 = vrot.slane %v8648_v49, 4  ;;  %v8699_v49 = vshll.u32 %v12639_v35, 16  ;;  %v8743_v35 = vrot.slane %v8741_v19, 4 }
 0x2dd   : > { %12721 = vmatmul.mubr.msk.bf16.gmra.mrb[32].mxu0 %vm468_vm1, %v12703_v63  ;;  %v3057_v63 = vsel %vm14796_vm7, %v3055_v51, %v3056_v52  ;;  %v8704_v51 = vshrl.u32 %v12640_v41, 16  ;;  %v8707_v52 = vshll.u32 %v12640_v41, 16  ;;  %v8692_v12 = vsel %vm14580_vm4, %v8687_v59, %v16087_v33  ;;  %v12648_v59 = vld [vmem:[%s14564_s14 + $0x20] sm:$0x1] }
 0x2de   : > { %9418 = vmatprep.mubr.bf16.mxu0 %v14488_v3  ;;  %v11944_v17 = vcombine.low %v3054_v13, %v3057_v63  ;;  %v8654_v20 = vsel %vm14580_vm4, %v8649_v23, %v8653_v60  ;;  %v8697_v23 = vrot.slane %v8696_v48, 4  ;;  %v8701_v60 = vrot.slane %v8699_v49, 5 }
 0x2df   : > { %v12706_v34 = vcombine.low %v8644_v18, %v8654_v20  ;;  %v8706_v13 = vrot.slane %v8704_v51, 4  ;;  %v8709_v63 = vrot.slane %v8707_v52, 5  ;;  %v8728_v20 = vshrl.u32 %v12643_v6, 16 }
 0x2e0   : > { %v8702_v26 = vsel %vm14580_vm4, %v8697_v23, %v8701_v60  ;;  %v8809_v48 = vshll.u32 %v12647_v39, 16  ;;  %v8813_v49 = vshrl.u32 %v12647_v39, 16  ;;  %v8824_v23 = vshrl.u32 %v12649_v54, 16 }
 0x2e1   : > { %v8710_v18 = vor.u32 %v8709_v63, %v8706_v13  ;;  %v12708_v27 = vcombine.low %v8692_v12, %v8702_v26  ;;  %v8827_v60 = vshll.u32 %v12649_v54, 16  ;;  %v14446_v13 = vld [vmem:[%s14661_s17 + $0xc] sm:$0xff]   ;;  %v8839_v26 = vrot.slane %v8837_v62, 4 }
 0x2e2   : > { %11960 = vmatmul.mubr.msk.bf16.gmra.mrb[40].mxu1 %vm468_vm1, %v11942_v24  ;;  %v3063_v24 = vrot.slane %v2912_v1, 5  ;;  %v2918_v1 = vld [vmem:[%s14564_s14 + $0xbc] sm:$0x1] }
 0x2e3   : > { %3704 = vmatprep.mubr.bf16.mxu1 %v14488_v3  ;;  %v8711_v31 = vrot.slane %v8710_v18, 4  ;;  %v8829_v11 = vrot.slane %v8827_v60, 5 }
 0x2e4   : > { %v3064_v38 = vsel %vm14796_vm7, %v3062_v22, %v3063_v24  ;;  %v8720_v22 = vor.u32 %v8719_v5, %v8715_v4  ;;  %v8723_v24 = vshll.u32 %v12642_v10, 16  ;;  %v8819_v5 = vshll.u32 %v12648_v59, 16  ;;  %v12659_v59 = vld [vmem:[%s14564_s14 + $0x4c] sm:$0xf] }
 0x2e5   : > { %12722 = vmatmul.mubr.msk.bf16.gmra.mrb[36].mxu0 %vm468_vm1, %v12704_v36  ;;  %v3061_v36 = vsel %vm14796_vm7, %v11893_v21, %v3060_v61  ;;  %v3074_v61 = vrot.slane %v2917_v50, 5  ;;  %v8731_v21 = vshll.u32 %v12643_v6, 16  ;;  %v8716_v42 = vsel %vm14580_vm4, %v8711_v31, %v8715_v4 }
 0x2e6   : > { %9428 = vmatprep.mubr.bf16.mxu0 %v14488_v3  ;;  %v11945_v53 = vcombine.low %v3061_v36, %v3064_v38  ;;  %v8721_v33 = vrot.slane %v8720_v22, 4  ;;  %v8725_v9 = vrot.slane %v8723_v24, 5  ;;  %v12645_v36 = vld [vmem:[%s14661_s17 + $0xd4] sm:$0x1]  ;;  %v12646_v38 = vld [vmem:[%s14564_s14 + $0x18] sm:$0xf] }
 0x2e7   : > { %v3076_v16 = vrot.slane %v3074_v61, 4  ;;  %v8733_v7 = vrot.slane %v8731_v21, 5  ;;  %v8747_v45 = vshll.u32 %v12645_v36, 16  ;;  %v8800_v46 = vshrl.u32 %v12646_v38, 16  ;;  %v12653_v21 = vld [vmem:[%s14564_s14 + $0x34] sm:$0xf] }
 0x2e8   : > { %v8803_v47 = vshll.u32 %v12646_v38, 16  ;;  %v4427_v6 = vsel %vm517_vm0, %v15848_v0, 0  ;;  %v8826_v10 = vrot.slane %v8824_v23, 4 }
 0x2e9   : > { %v8802_v55 = vrot.slane %v8800_v46, 4  ;;  %v12655_v46 = vld [vmem:[%s14564_s14 + $0x3c] sm:$0xf] }
 0x2ea   : > { %11961 = vmatmul.mubr.msk.bf16.gmra.mrb[44].mxu1 %vm468_vm1, %v11943_v43  ;;  %v11894_v43 = vrot.slane %v2913_v32, 9  ;;  %v8730_v32 = vrot.slane %v8728_v20, 4  ;;  %v8805_v2 = vrot.slane %v8803_v47, 5  ;;  %v8821_v20 = vrot.slane %v8819_v5, 5  ;;  %v12656_v47 = vld [vmem:[%s14564_s14 + $0x40] sm:$0xf] }
 0x2eb   : > { %3714 = vmatprep.mubr.bf16.mxu1 %v14488_v3  ;;  %v8830_v24 = vor.u32 %v8829_v11, %v8826_v10  ;;  %v8909_v10 = vshrl.u32 %v12659_v59, 16  ;;  %v14449_v11 = vld [vmem:[%s14661_s17 + $0x30] sm:$0xff]  }
 0x2ec   : > { %v8734_v41 = vor.u32 %v8733_v7, %v8730_v32 }
 0x2ed   : > { %12723 = vmatmul.mubr.msk.bf16.gmra.mrb[40].mxu0 %vm468_vm1, %v12705_v56  ;;  %v3068_v56 = vsel %vm14796_vm7, %v11894_v43, %v3067_v28  ;;  %v3075_v28 = vsel %vm14796_vm7, %v11895_v15, %v3074_v61  ;;  %v8726_v43 = vsel %vm14580_vm4, %v8721_v33, %v8725_v9  ;;  %v8833_v61 = vshll.u32 %v12650_v30, 16 }
 0x2ee   : > { %9438 = vmatprep.mubr.bf16.mxu0 %v14488_v3  ;;  %v11946_v8 = vcombine.low %v3068_v56, %v3071_v58  ;;  %v8735_v50 = vrot.slane %v8734_v41, 4  ;;  %v12709_v51 = vcombine.low %v8716_v42, %v8726_v43  ;;  %v8811_v56 = vrot.slane %v8809_v48, 5  ;;  %v12654_v41 = vld [vmem:[%s14564_s14 + $0x38] sm:$0x1] }
 0x2ef   : > { %v8815_v58 = vrot.slane %v8813_v49, 4  ;;  %v8835_v12 = vrot.slane %v8833_v61, 5  ;;  %v8831_v33 = vrot.slane %v8830_v24, 4  ;;  %v8867_v54 = vshll.u32 %v12654_v41, 16  ;;  %v12660_v24 = vld [vmem:[%s14564_s14 + $0x50] sm:$0x1] }
 0x2f0   : > { %v16179_v43 = vld.sshfl [vmem:[%s17079_s3 + $0x20] sm:$0x33 pattern:$0x76325410]  ;;  %v8872_v30 = vshrl.u32 %v12655_v46, 16 }
 0x2f1   : > { %v8816_v4 = vor.u32 %v8815_v58, %v8811_v56  ;;  %v8840_v0 = vor.u32 %v8839_v26, %v8835_v12  ;;  %v10767_v48 = vcombine.high %v16179_v43, %v16179_v43  ;;  %v8836_v49 = vsel %vm14580_vm4, %v8831_v33, %v8835_v12  ;;  %v12658_v58 = vld [vmem:[%s14564_s14 + $0x48] sm:$0xf] }
 0x2f2   : > { %11962 = vmatmul.mubr.msk.bf16.gmra.mrb[48].mxu1 %vm468_vm1, %v11944_v17  ;;  %v3077_v17 = vrot.slane %v2918_v1, 5  ;;  %v8806_v1 = vor.u32 %v8805_v2, %v8802_v55  ;;  %v8875_v55 = vshll.u32 %v12655_v46, 16  ;;  %v8881_v2 = vshll.u32 %v12656_v47, 16 }
 0x2f3   : > { %3724 = vmatprep.mubr.bf16.mxu1 %v14488_v3  ;;  %v8817_v18 = vrot.slane %v8816_v4, 4  ;;  %v8841_v9 = vrot.slane %v8840_v0, 4  ;;  %v8869_v62 = vrot.slane %v8867_v54, 5  ;;  %v12657_v4 = vld [vmem:[%s14564_s14 + $0x44] sm:$0x1]  ;;  %v8896_v5 = vshrl.u32 %v12658_v58, 16 }
 0x2f4   : > { %v3078_v29 = vsel %vm14796_vm7, %v3076_v16, %v3077_v17  ;;  %v12652_v16 = vld [vmem:[%s14564_s14 + $0x30] sm:$0xf]  ;;  %v8807_v17 = vrot.slane %v8806_v1, 4 }
 0x2f5   : > { %12724 = vmatmul.mubr.msk.bf16.gmra.mrb[44].mxu0 %vm468_vm1, %v12706_v34  ;;  %v8739_v34 = vrot.slane %v8737_v25, 5  ;;  %v11947_v40 = vcombine.low %v3075_v28, %v3078_v29  ;;  %v8848_v25 = vshrl.u32 %v12652_v16, 16  ;;  %v8851_v19 = vshll.u32 %v12652_v16, 16 }
 0x2f6   : > { %9448 = vmatprep.mubr.bf16.mxu0 %v14488_v3  ;;  %v8857_v28 = vshll.u32 %v12653_v21, 16  ;;  %v8861_v29 = vshrl.u32 %v12653_v21, 16  ;;  %v8812_v31 = vsel %vm14580_vm4, %v8807_v17, %v8811_v56  ;;  %v8822_v32 = vsel %vm14580_vm4, %v8817_v18, %v8821_v20 }
 0x2f7   : > { %v8744_v44 = vor.u32 %v8743_v35, %v8739_v34  ;;  %v8740_v63 = vsel %vm14580_vm4, %v8735_v50, %v8739_v34  ;;  %v8850_v34 = vrot.slane %v8848_v25, 4  ;;  %v8853_v35 = vrot.slane %v8851_v19, 5  ;;  %v14448_v50 = vld [vmem:[%s14661_s17 + $0x24] sm:$0xff]   ;;  %v12661_v25 = vld [vmem:[%s14564_s14 + $0x54] sm:$0xf] }
 0x2f8   : > { %v12730_v36 = vcombine.low %v8812_v31, %v8822_v32  ;;  %v8859_v38 = vrot.slane %v8857_v28, 5  ;;  %v8863_v39 = vrot.slane %v8861_v29, 4  ;;  %v8885_v56 = vshrl.u32 %v12656_v47, 16  ;;  %v12662_v19 = vld [vmem:[%s14564_s14 + $0x58] sm:$0xf] }
 0x2f9   : > { %v8745_v52 = vrot.slane %v8744_v44, 4  ;;  %v14479_v44 = vld.sshfl [vmem:[%s17078_s2 + $0x20] sm:$0x33 pattern:$0x76325410]  ;;  %v8891_v17 = vshll.u32 %v12657_v4, 16 }
 0x2fa   : > { %11963 = vmatmul.mubr.msk.bf16.gmra.mrb[52].mxu1 %vm468_vm1, %v11945_v53  ;;  %v8749_v53 = vrot.slane %v8747_v45, 5  ;;  %v10447_v45 = vsel %vm517_vm0, %v14479_v44, 0  ;;  %v8887_v1 = vrot.slane %v8885_v56, 4  ;;  %v8898_v18 = vrot.slane %v8896_v5, 4  ;;  %v14451_v56 = vld [vmem:[%s14661_s17 + $0x48] sm:$0xff]  }
 0x2fb   : > { %3734 = vmatprep.mubr.bf16.mxu1 %v14488_v3  ;;  %v8893_v29 = vrot.slane %v8891_v17, 5  ;;  %v8920_v33 = vshrl.u32 %v12661_v25, 16 }
 0x2fd   : > { %12725 = vmatmul.mubr.msk.bf16.gmra.mrb[48].mxu0 %vm468_vm1, %v12707_v14  ;;  %v8750_v14 = vsel %vm14580_vm4, %v8745_v52, %v8749_v53  ;;  %v8854_v52 = vor.u32 %v8853_v35, %v8850_v34  ;;  %v8864_v53 = vor.u32 %v8863_v39, %v8859_v38  ;;  %v8929_v34 = vshll.u32 %v12662_v19, 16 }
 0x2fe   : > { %9458 = vmatprep.mubr.bf16.mxu0 %v14488_v3  ;;  %v12710_v15 = vcombine.low %v8740_v63, %v8750_v14  ;;  %v8877_v63 = vrot.slane %v8875_v55, 5  ;;  %v8883_v14 = vrot.slane %v8881_v2, 5  ;;  %v8933_v35 = vshrl.u32 %v12662_v19, 16 }
 0x2ff   : > { %v8855_v60 = vrot.slane %v8854_v52, 4  ;;  %v8865_v61 = vrot.slane %v8864_v53, 4  ;;  %v8931_v47 = vrot.slane %v8929_v34, 5  ;;  %v12665_v52 = vld [vmem:[%s14564_s14 + $0x64] sm:$0xf] }
 0x300   : > { %v8888_v16 = vor.u32 %v8887_v1, %v8883_v14 }
 0x301   : > { %v8860_v12 = vsel %vm14580_vm4, %v8855_v60, %v8859_v38  ;;  %v8870_v26 = vsel %vm14580_vm4, %v8865_v61, %v8869_v62  ;;  %v8957_v60 = vshrl.u32 %v12665_v52, 16 }
 0x302   : > { %11964 = vmatmul.mubr.msk.bf16.gmra.mrb[56].mxu1 %vm468_vm1, %v11946_v8  ;;  %v12651_v8 = vld [vmem:[%s14564_s14 + $0x2c] sm:$0x1]  ;;  %v12732_v0 = vcombine.low %v8860_v12, %v8870_v26  ;;  %v8889_v28 = vrot.slane %v8888_v16, 4  ;;  %v14452_v12 = vld [vmem:[%s14661_s17 + $0x54] sm:$0xff]  }
 0x303   : > { %3744 = vmatprep.mubr.bf16.mxu1 %v14488_v3  ;;  %v8843_v22 = vshll.u32 %v12651_v8, 16  ;;  %v8905_v8 = vshll.u32 %v12659_v59, 16  ;;  %v8959_v5 = vrot.slane %v8957_v60, 4 }
 0x304   : > { %v8894_v39 = vsel %vm14580_vm4, %v8889_v28, %v8893_v29 }
 0x305   : > { %12726 = vmatmul.mubr.msk.bf16.gmra.mrb[52].mxu0 %vm468_vm1, %v12708_v27  ;;  %v14447_v27 = vld [vmem:[%s14661_s17 + $0x18] sm:$0xff]   ;;  %v8845_v7 = vrot.slane %v8843_v22, 5  ;;  %v8907_v21 = vrot.slane %v8905_v8, 5  ;;  %v8911_v22 = vrot.slane %v8909_v10, 4  ;;  %v12667_v8 = vld [vmem:[%s14564_s14 + $0x6c] sm:$0xf] }
 0x306   : > { %9468 = vmatprep.mubr.bf16.mxu0 %v14488_v3  ;;  %v12668_v10 = vld [vmem:[%s14564_s14 + $0x70] sm:$0xf] }
 0x307   : > { %v8912_v32 = vor.u32 %v8911_v22, %v8907_v21  ;;  %v8981_v22 = vshrl.u32 %v12668_v10, 16 }
 0x30a   : > { %11965 = vmatmul.mubr.msk.bf16.gmra.mrb[60].mxu1 %vm468_vm1, %v11947_v40  ;;  %v16170_v40 = vld.sshfl [vmem:[%s17078_s2 + $0x10] sm:$0x33 pattern:$0x76325410] }
 0x30b   : > { %4062 = vmatprep.mubr.bf16.mxu1 %v14488_v3  ;;  %v5611_v42 = vcombine.high %v16170_v40, %v16170_v40 }
 0x30d   : > { %12727 = vmatmul.mubr.msk.bf16.gmra.mrb[56].mxu0 %vm468_vm1, %v12709_v51  ;;  %v8846_v51 = vsel %vm14580_vm4, %v8841_v9, %v8845_v7  ;;  %v8915_v7 = vshll.u32 %v12660_v24, 16  ;;  %v8923_v9 = vshll.u32 %v12661_v25, 16  ;;  %v12670_v24 = vld [vmem:[%s14564_s14 + $0x78] sm:$0xf] }
 0x30e   : > { %9478 = vmatprep.mubr.bf16.mxu0 %v14488_v3  ;;  %v12731_v23 = vcombine.low %v8836_v49, %v8846_v51  ;;  %v12664_v51 = vld [vmem:[%s14564_s14 + $0x60] sm:$0xf]  ;;  %v8995_v34 = vshll.u32 %v12670_v24, 16 }
 0x30f   : > { %v8917_v44 = vrot.slane %v8915_v7, 5  ;;  %v8925_v46 = vrot.slane %v8923_v9, 5  ;;  %v8947_v59 = vshll.u32 %v12664_v51, 16  ;;  %v8983_v7 = vrot.slane %v8981_v22, 4  ;;  %v14455_v22 = vld [vmem:[%s14661_s17 + $0x78] sm:$0xff]  }
 0x310   : > { %v8992_v9 = vshrl.u32 %v12670_v24, 16 }
 0x311   : > { %v8949_v1 = vrot.slane %v8947_v59, 5 }
 0x312   : > { %12049 = vmatmul.mubr.msk.bf16.vlgmr.msra.gmra.mrb[0].mxu1 %vm468_vm1, %v14446_v13  ;;  %v8874_v13 = vrot.slane %v8872_v30, 4 }
 0x313   : > { %4072 = vmatprep.mubr.bf16.mxu1 %v14488_v3  ;;  %4433 = vmatpush1.bf16.msra.mxu1 %v4427_v6  ;;  %v8899_v6 = vshll.u32 %v12658_v58, 16  ;;  %v8944_v58 = vshrl.u32 %v12664_v51, 16 }
 0x314   : > { %12214 = vmatprep.subr.msk.bf16.mxu1 %vm517_vm0, %v5611_v42  ;;  %v8913_v42 = vrot.slane %v8912_v32, 4 }
 0x315   : > { %12728 = vmatmul.mubr.msk.bf16.gmra.mrb[60].mxu0 %vm468_vm1, %v12710_v15  ;;  %v8878_v15 = vor.u32 %v8877_v63, %v8874_v13  ;;  %v8901_v20 = vrot.slane %v8899_v6, 5  ;;  %v12666_v6 = vld [vmem:[%s14564_s14 + $0x68] sm:$0x1] }
 0x316   : > { %9698 = vmatprep.mubr.bf16.mxu0 %v14488_v3  ;;  %v8918_v54 = vsel %vm14580_vm4, %v8913_v42, %v8917_v44  ;;  %v8963_v17 = vshll.u32 %v12666_v6, 16 }
 0x317   : > { %v8902_v31 = vor.u32 %v8901_v20, %v8898_v18  ;;  %v8968_v18 = vshrl.u32 %v12667_v8, 16  ;;  %v8971_v20 = vshll.u32 %v12667_v8, 16 }
 0x318   : > { %v8965_v28 = vrot.slane %v8963_v17, 5 }
 0x319   : > { %v8903_v41 = vrot.slane %v8902_v31, 4  ;;  %v8970_v29 = vrot.slane %v8968_v18, 4  ;;  %v8973_v31 = vrot.slane %v8971_v20, 5 }
 0x31a   : > { %12050 = vmatmul.mubr.msk.bf16.gmra.mrb[4].mxu1 %vm468_vm1, %v14447_v27  ;;  %v8879_v27 = vrot.slane %v8878_v15, 4 }
 0x31b   : > { %4082 = vmatprep.mubr.bf16.mxu1 %v14488_v3  ;;  %v8908_v53 = vsel %vm14580_vm4, %v8903_v41, %v8907_v21  ;;  %v8977_v21 = vshll.u32 %v12668_v10, 16  ;;  %v8974_v42 = vor.u32 %v8973_v31, %v8970_v29 }
 0x31c   : > { %v8884_v38 = vsel %vm14580_vm4, %v8879_v27, %v8883_v14  ;;  %v12734_v61 = vcombine.low %v8908_v53, %v8918_v54  ;;  %v8946_v14 = vrot.slane %v8944_v58, 4  ;;  %v12674_v53 = vld [vmem:[%s14564_s14 + $0x88] sm:$0xf] }
 0x31d   : > { %12748 = vmatmul.mubr.msk.bf16.vlgmr.msra.gmra.mrb[0].mxu0 %vm468_vm1, %v12730_v36  ;;  %v14450_v36 = vld [vmem:[%s14661_s17 + $0x3c] sm:$0xff]   ;;  %v12733_v49 = vcombine.low %v8884_v38, %v8894_v39  ;;  %v8979_v32 = vrot.slane %v8977_v21, 5  ;;  %v8975_v54 = vrot.slane %v8974_v42, 4  ;;  %v9025_v60 = vshll.u32 %v12674_v53, 16 }
 0x31e   : > { %10453 = vmatpush1.bf16.msra.mxu0 %v10447_v45  ;;  %9708 = vmatprep.mubr.bf16.mxu0 %v14488_v3  ;;  %v8922_v45 = vrot.slane %v8920_v33, 4  ;;  %v8950_v15 = vor.u32 %v8949_v1, %v8946_v14  ;;  %v12669_v33 = vld [vmem:[%s14564_s14 + $0x74] sm:$0x1]  ;;  %v14453_v38 = vld [vmem:[%s14661_s17 + $0x60] sm:$0xff]  }
 0x31f   : > { %12945 = vmatprep.subr.msk.bf16.mxu0 %vm517_vm0, %v10767_v48  ;;  %v8935_v48 = vrot.slane %v8933_v35, 4  ;;  %v8984_v44 = vor.u32 %v8983_v7, %v8979_v32  ;;  %v9027_v8 = vrot.slane %v9025_v60, 5 }
 0x320   : > { %v8926_v30 = vor.u32 %v8925_v46, %v8922_v45  ;;  %v8951_v19 = vrot.slane %v8950_v15, 4  ;;  %v8987_v45 = vshll.u32 %v12669_v33, 16  ;;  %v8994_v46 = vrot.slane %v8992_v9, 4  ;;  %v12677_v15 = vld [vmem:[%s14564_s14 + $0x94] sm:$0xf] }
 0x321   : > { %v8936_v55 = vor.u32 %v8935_v48, %v8931_v47 }
 0x322   : > { %12051 = vmatmul.mubr.msk.bf16.gmra.mrb[8].mxu1 %vm468_vm1, %v14448_v50  ;;  %v12663_v50 = vld [vmem:[%s14564_s14 + $0x5c] sm:$0x1]  ;;  %v8927_v62 = vrot.slane %v8926_v30, 4  ;;  %v8985_v30 = vrot.slane %v8984_v44, 4 }
 0x323   : > { %4092 = vmatprep.mubr.bf16.mxu1 %v14488_v3  ;;  %v8939_v2 = vshll.u32 %v12663_v50, 16  ;;  %v8937_v13 = vrot.slane %v8936_v55, 4  ;;  %v12672_v50 = vld [vmem:[%s14564_s14 + $0x80] sm:$0x1]  ;;  %v8989_v55 = vrot.slane %v8987_v45, 5 }
 0x324   : > { %v9011_v58 = vshll.u32 %v12672_v50, 16  ;;  %v12682_v50 = vld [vmem:[%s14564_s14 + $0xa8] sm:$0xf] }
 0x325   : > { %12749 = vmatmul.mubr.msk.bf16.gmra.mrb[4].mxu0 %vm468_vm1, %v12731_v23  ;;  %v8953_v23 = vshll.u32 %v12665_v52, 16  ;;  %v8941_v63 = vrot.slane %v8939_v2, 5  ;;  %v12673_v52 = vld [vmem:[%s14564_s14 + $0x84] sm:$0xf]  ;;  %v9091_v60 = vshll.u32 %v12682_v50, 16 }
 0x326   : > { %9718 = vmatprep.mubr.bf16.mxu0 %v14488_v3  ;;  %v9016_v59 = vshrl.u32 %v12673_v52, 16 }
 0x327   : > { %v8955_v4 = vrot.slane %v8953_v23, 5  ;;  %v8942_v26 = vsel %vm14580_vm4, %v8937_v13, %v8941_v63  ;;  %v9019_v23 = vshll.u32 %v12673_v52, 16  ;;  %v8980_v13 = vsel %vm14580_vm4, %v8975_v54, %v8979_v32 }
 0x328   : > { %v8990_v63 = vsel %vm14580_vm4, %v8985_v30, %v8989_v55 }
 0x329   : > { %v8960_v16 = vor.u32 %v8959_v5, %v8955_v4  ;;  %v8956_v39 = vsel %vm14580_vm4, %v8951_v19, %v8955_v4  ;;  %v9013_v4 = vrot.slane %v9011_v58, 5  ;;  %v9018_v5 = vrot.slane %v9016_v59, 4  ;;  %v12681_v59 = vld [vmem:[%s14564_s14 + $0xa4] sm:$0x1] }
 0x32a   : > { %12052 = vmatmul.mubr.msk.bf16.gmra.mrb[12].mxu1 %vm468_vm1, %v14449_v11  ;;  %v8932_v11 = vsel %vm14580_vm4, %v8927_v62, %v8931_v47  ;;  %v8997_v47 = vrot.slane %v8995_v34, 5  ;;  %v14454_v62 = vld [vmem:[%s14661_s17 + $0x6c] sm:$0xff]   ;;  %v9021_v6 = vrot.slane %v9019_v23, 5  ;;  %v9053_v19 = vshrl.u32 %v12677_v15, 16  ;;  %v12678_v34 = vld [vmem:[%s14564_s14 + $0x98] sm:$0x1] }
 0x32b   : > { %4102 = vmatprep.mubr.bf16.mxu1 %v14488_v3  ;;  %v12735_v25 = vcombine.low %v8932_v11, %v8942_v26  ;;  %v8961_v27 = vrot.slane %v8960_v16, 4  ;;  %v12737_v11 = vcombine.low %v8980_v13, %v8990_v63  ;;  %v12676_v26 = vld [vmem:[%s14564_s14 + $0x90] sm:$0xf]  ;;  %v9059_v45 = vshll.u32 %v12678_v34, 16 }
 0x32c   : > { %v8998_v2 = vor.u32 %v8997_v47, %v8994_v46  ;;  %v9022_v18 = vor.u32 %v9021_v6, %v9018_v5  ;;  %v9040_v24 = vshrl.u32 %v12676_v26, 16  ;;  %v9055_v9 = vrot.slane %v9053_v19, 4  ;;  %v14457_v13 = vld [vmem:[%s14661_s17 + $0x90] sm:$0xff]  }
 0x32d   : > { %12750 = vmatmul.mubr.msk.bf16.gmra.mrb[8].mxu0 %vm468_vm1, %v12732_v0  ;;  %v12671_v0 = vld [vmem:[%s14564_s14 + $0x7c] sm:$0xf]  ;;  %v8966_v41 = vsel %vm14580_vm4, %v8961_v27, %v8965_v28  ;;  %v9061_v30 = vrot.slane %v9059_v45, 5  ;;  %v9088_v23 = vshrl.u32 %v12682_v50, 16  ;;  %v9083_v5 = vshll.u32 %v12681_v59, 16 }
 0x32e   : > { %9728 = vmatprep.mubr.bf16.mxu0 %v14488_v3  ;;  %v9001_v35 = vshll.u32 %v12671_v0, 16  ;;  %v12736_v51 = vcombine.low %v8956_v39, %v8966_v41  ;;  %v8999_v14 = vrot.slane %v8998_v2, 4  ;;  %v9023_v28 = vrot.slane %v9022_v18, 4  ;;  %v14456_v39 = vld [vmem:[%s14661_s17 + $0x84] sm:$0xff]  }
 0x32f   : > { %v9042_v32 = vrot.slane %v9040_v24, 4  ;;  %v9090_v6 = vrot.slane %v9088_v23, 4 }
 0x330   : > { %v9003_v48 = vrot.slane %v9001_v35, 5  ;;  %v12679_v35 = vld [vmem:[%s14564_s14 + $0x9c] sm:$0xf] }
 0x331   : > { %v9064_v46 = vshrl.u32 %v12679_v35, 16  ;;  %v9067_v47 = vshll.u32 %v12679_v35, 16 }
 0x332   : > { %12053 = vmatmul.mubr.msk.bf16.gmra.mrb[16].mxu1 %vm468_vm1, %v14450_v36  ;;  %v9005_v36 = vshrl.u32 %v12671_v0, 16  ;;  %v9004_v16 = vsel %vm14580_vm4, %v8999_v14, %v9003_v48  ;;  %v9043_v0 = vshll.u32 %v12676_v26, 16 }
 0x333   : > { %4112 = vmatprep.mubr.bf16.mxu1 %v14488_v3  ;;  %v9066_v55 = vrot.slane %v9064_v46, 4  ;;  %v9069_v2 = vrot.slane %v9067_v47, 5 }
 0x334   : > { %v9045_v7 = vrot.slane %v9043_v0, 5 }
 0x335   : > { %12751 = vmatmul.mubr.msk.bf16.gmra.mrb[12].mxu0 %vm468_vm1, %v12733_v49  ;;  %v9007_v49 = vrot.slane %v9005_v36, 4  ;;  %v12680_v36 = vld [vmem:[%s14564_s14 + $0xa0] sm:$0xf] }
 0x336   : > { %9738 = vmatprep.mubr.bf16.mxu0 %v14488_v3  ;;  %v9046_v42 = vor.u32 %v9045_v7, %v9042_v32 }
 0x33a   : > { %12054 = vmatmul.mubr.msk.bf16.gmra.mrb[20].mxu1 %vm468_vm1, %v14451_v56  ;;  %v9008_v56 = vor.u32 %v9007_v49, %v9003_v48  ;;  %v9073_v48 = vshll.u32 %v12680_v36, 16  ;;  %v9077_v49 = vshrl.u32 %v12680_v36, 16 }
 0x33b   : > { %4122 = vmatprep.mubr.bf16.mxu1 %v14488_v3 }
 0x33c   : > { %v9009_v1 = vrot.slane %v9008_v56, 4  ;;  %v9075_v56 = vrot.slane %v9073_v48, 5  ;;  %v9079_v58 = vrot.slane %v9077_v49, 4  ;;  %v14459_v49 = vld [vmem:[%s14661_s17 + $0xa8] sm:$0xff]  }
 0x33d   : > { %12752 = vmatmul.mubr.msk.bf16.gmra.mrb[16].mxu0 %vm468_vm1, %v12734_v61  ;;  %v9029_v61 = vshrl.u32 %v12674_v53, 16  ;;  %v9047_v53 = vrot.slane %v9046_v42, 4  ;;  %v12689_v42 = vld [vmem:[%s14564_s14 + $0xc4] sm:$0xf] }
 0x33e   : > { %9748 = vmatprep.mubr.bf16.mxu0 %v14488_v3  ;;  %v9014_v17 = vsel %vm14580_vm4, %v9009_v1, %v9013_v4  ;;  %v9070_v1 = vor.u32 %v9069_v2, %v9066_v55  ;;  %v9080_v4 = vor.u32 %v9079_v58, %v9075_v56 }
 0x33f   : > { %v9031_v10 = vrot.slane %v9029_v61, 4  ;;  %v12738_v27 = vcombine.low %v9004_v16, %v9014_v17  ;;  %v12686_v16 = vld [vmem:[%s14564_s14 + $0xb8] sm:$0xf] }
 0x340   : > { %v9071_v17 = vrot.slane %v9070_v1, 4  ;;  %v9081_v18 = vrot.slane %v9080_v4, 4  ;;  %v9121_v19 = vshll.u32 %v12686_v16, 16 }
 0x341   : > { %v9032_v20 = vor.u32 %v9031_v10, %v9027_v8 }
 0x342   : > { %12055 = vmatmul.mubr.msk.bf16.gmra.mrb[24].mxu1 %vm468_vm1, %v14452_v12  ;;  %v12675_v12 = vld [vmem:[%s14564_s14 + $0x8c] sm:$0x1]  ;;  %v9123_v35 = vrot.slane %v9121_v19, 5 }
 0x343   : > { %4132 = vmatprep.mubr.bf16.mxu1 %v14488_v3  ;;  %v9035_v21 = vshll.u32 %v12675_v12, 16  ;;  %v9033_v29 = vrot.slane %v9032_v20, 4  ;;  %v12684_v12 = vld [vmem:[%s14564_s14 + $0xb0] sm:$0x1]  ;;  %v9085_v20 = vrot.slane %v9083_v5, 5 }
 0x344   : > { %v9107_v24 = vshll.u32 %v12684_v12, 16 }
 0x345   : > { %12753 = vmatmul.mubr.msk.bf16.gmra.mrb[20].mxu0 %vm468_vm1, %v12735_v25  ;;  %v9049_v25 = vshll.u32 %v12677_v15, 16  ;;  %v9037_v31 = vrot.slane %v9035_v21, 5  ;;  %v12685_v15 = vld [vmem:[%s14564_s14 + $0xb4] sm:$0xf] }
 0x346   : > { %9758 = vmatprep.mubr.bf16.mxu0 %v14488_v3  ;;  %v9112_v0 = vshrl.u32 %v12685_v15, 16 }
 0x347   : > { %v9051_v33 = vrot.slane %v9049_v25, 5  ;;  %v9038_v41 = vsel %vm14580_vm4, %v9033_v29, %v9037_v31  ;;  %v9115_v25 = vshll.u32 %v12685_v15, 16  ;;  %v9076_v29 = vsel %vm14580_vm4, %v9071_v17, %v9075_v56 }
 0x348   : > { %v9086_v31 = vsel %vm14580_vm4, %v9081_v18, %v9085_v20 }
 0x349   : > { %v9056_v44 = vor.u32 %v9055_v9, %v9051_v33  ;;  %v9052_v63 = vsel %vm14580_vm4, %v9047_v53, %v9051_v33  ;;  %v9109_v33 = vrot.slane %v9107_v24, 5  ;;  %v9114_v9 = vrot.slane %v9112_v0, 4  ;;  %v14461_v24 = vld [vmem:[%s14661_s17 + $0xc0] sm:$0xff]  }
 0x34a   : > { %12056 = vmatmul.mubr.msk.bf16.gmra.mrb[28].mxu1 %vm468_vm1, %v14453_v38  ;;  %v9028_v38 = vsel %vm14580_vm4, %v9023_v28, %v9027_v8  ;;  %v9093_v8 = vrot.slane %v9091_v60, 5  ;;  %v14458_v28 = vld [vmem:[%s14661_s17 + $0x9c] sm:$0xff]   ;;  %v9117_v34 = vrot.slane %v9115_v25, 5  ;;  %v9149_v53 = vshrl.u32 %v12689_v42, 16  ;;  %v12690_v60 = vld [vmem:[%s14564_s14 + $0xc8] sm:$0x1] }
 0x34b   : > { %4142 = vmatprep.mubr.bf16.mxu1 %v14488_v3  ;;  %v12739_v52 = vcombine.low %v9028_v38, %v9038_v41  ;;  %v9057_v54 = vrot.slane %v9056_v44, 4  ;;  %v12741_v38 = vcombine.low %v9076_v29, %v9086_v31  ;;  %v12688_v41 = vld [vmem:[%s14564_s14 + $0xc0] sm:$0xf]  ;;  %v9155_v5 = vshll.u32 %v12690_v60, 16 }
 0x34c   : > { %v9094_v21 = vor.u32 %v9093_v8, %v9090_v6  ;;  %v9118_v46 = vor.u32 %v9117_v34, %v9114_v9  ;;  %v9136_v50 = vshrl.u32 %v12688_v41, 16  ;;  %v9151_v23 = vrot.slane %v9149_v53, 4  ;;  %v14462_v9 = vld [vmem:[%s14564_s14 + $0xc] sm:$0xff]  }
 0x34d   : > { %12754 = vmatmul.mubr.msk.bf16.gmra.mrb[24].mxu0 %vm468_vm1, %v12736_v51  ;;  %v12683_v51 = vld [vmem:[%s14564_s14 + $0xac] sm:$0xf]  ;;  %v9062_v14 = vsel %vm14580_vm4, %v9057_v54, %v9061_v30 }
 0x34e   : > { %9768 = vmatprep.mubr.bf16.mxu0 %v14488_v3  ;;  %v9097_v61 = vshll.u32 %v12683_v51, 16  ;;  %v12740_v26 = vcombine.low %v9052_v63, %v9062_v14  ;;  %v9095_v32 = vrot.slane %v9094_v21, 4  ;;  %v9119_v30 = vrot.slane %v9118_v46, 4  ;;  %v14460_v63 = vld [vmem:[%s14661_s17 + $0xb4] sm:$0xff]  }
 0x34f   : > { %v9138_v56 = vrot.slane %v9136_v50, 4 }
 0x350   : > { %v9099_v10 = vrot.slane %v9097_v61, 5  ;;  %v12691_v61 = vld [vmem:[%s14564_s14 + $0xcc] sm:$0xf] }
 0x351   : > { %v9160_v6 = vshrl.u32 %v12691_v61, 16  ;;  %v9163_v8 = vshll.u32 %v12691_v61, 16  ;;  %v12770_v61 = vld [vmem:[%s14661_s17 + $0x30] sm:$0xe] }
 0x352   : > { %12057 = vmatmul.mubr.msk.bf16.gmra.mrb[32].mxu1 %vm468_vm1, %v14454_v62  ;;  %v9101_v62 = vshrl.u32 %v12683_v51, 16  ;;  %v9100_v44 = vsel %vm14580_vm4, %v9095_v32, %v9099_v10  ;;  %v9139_v51 = vshll.u32 %v12688_v41, 16  ;;  %v12766_v41 = vld [vmem:[%s14661_s17 + $0x20] sm:$0x1] }
 0x353   : > { %4152 = vmatprep.mubr.bf16.mxu1 %v14488_v3  ;;  %v9162_v17 = vrot.slane %v9160_v6, 4  ;;  %v9165_v18 = vrot.slane %v9163_v8, 5  ;;  %v10024_v46 = vrot.slane %v12766_v41, 5  ;;  %v12783_v41 = vld [vmem:[%s14661_s17 + $0x64] sm:$0xf] }
 0x354   : > { %v9141_v58 = vrot.slane %v9139_v51, 5  ;;  %v12767_v51 = vld [vmem:[%s14661_s17 + $0x24] sm:$0xe] }
 0x355   : > { %12755 = vmatmul.mubr.msk.bf16.gmra.mrb[28].mxu0 %vm468_vm1, %v12737_v11  ;;  %v9103_v11 = vrot.slane %v9101_v62, 4  ;;  %v12692_v62 = vld [vmem:[%s14564_s14 + $0xd0] sm:$0xf]  ;;  %v9166_v19 = vor.u32 %v9165_v18, %v9162_v17  ;;  %v12777_v17 = vld [vmem:[%s14661_s17 + $0x4c] sm:$0xf]  ;;  %v14466_v18 = vld [vmem:[%s14564_s14 + $0x3c] sm:$0xff]  }
 0x356   : > { %9778 = vmatprep.mubr.bf16.mxu0 %v14488_v3  ;;  %v9142_v1 = vor.u32 %v9141_v58, %v9138_v56  ;;  %v12771_v56 = vld [vmem:[%s14661_s17 + $0x34] sm:$0xf]  ;;  %v14464_v58 = vld [vmem:[%s14564_s14 + $0x24] sm:$0xff]  }
 0x357   : > { %v9167_v31 = vrot.slane %v9166_v19, 4  ;;  %v10035_v60 = vrot.slane %v12771_v56, 5  ;;  %v12787_v56 = vld [vmem:[%s14661_s17 + $0x74] sm:$0x1] }
 0x35a   : > { %12058 = vmatmul.mubr.msk.bf16.gmra.mrb[36].mxu1 %vm468_vm1, %v14455_v22  ;;  %v9104_v22 = vor.u32 %v9103_v11, %v9099_v10  ;;  %v9169_v10 = vshll.u32 %v12692_v62, 16  ;;  %v9173_v11 = vshrl.u32 %v12692_v62, 16 }
 0x35b   : > { %4162 = vmatprep.mubr.bf16.mxu1 %v14488_v3 }
 0x35c   : > { %v9105_v7 = vrot.slane %v9104_v22, 4  ;;  %v9171_v20 = vrot.slane %v9169_v10, 5  ;;  %v9175_v21 = vrot.slane %v9173_v11, 4  ;;  %v12693_v22 = vld [vmem:[%s14564_s14 + $0xd4] sm:$0x1] }
 0x35d   : > { %12756 = vmatmul.mubr.msk.bf16.gmra.mrb[32].mxu0 %vm468_vm1, %v12738_v27  ;;  %v9125_v27 = vshrl.u32 %v12686_v16, 16  ;;  %v9157_v16 = vrot.slane %v9155_v5, 5  ;;  %v12773_v10 = vld [vmem:[%s14661_s17 + $0x3c] sm:$0xe]  ;;  %v12775_v11 = vld [vmem:[%s14661_s17 + $0x44] sm:$0x1] }
 0x35e   : > { %9788 = vmatprep.mubr.bf16.mxu0 %v14488_v3  ;;  %v9110_v45 = vsel %vm14580_vm4, %v9105_v7, %v9109_v33  ;;  %v12765_v33 = vld [vmem:[%s14661_s17 + $0x1c] sm:$0xf]  ;;  %v9172_v34 = vsel %vm14580_vm4, %v9167_v31, %v9171_v20  ;;  %v14467_v31 = vld [vmem:[%s14564_s14 + $0x48] sm:$0xff]  }
 0x35f   : > { %v9127_v36 = vrot.slane %v9125_v27, 4  ;;  %v12742_v54 = vcombine.low %v9100_v44, %v9110_v45  ;;  %v9176_v27 = vor.u32 %v9175_v21, %v9171_v20 }
 0x361   : > { %v9128_v47 = vor.u32 %v9127_v36, %v9123_v35  ;;  %v9177_v32 = vrot.slane %v9176_v27, 4  ;;  %v10021_v36 = vrot.slane %v12765_v33, 5 }
 0x362   : > { %12059 = vmatmul.mubr.msk.bf16.gmra.mrb[40].mxu1 %vm468_vm1, %v14456_v39  ;;  %v12687_v39 = vld [vmem:[%s14564_s14 + $0xbc] sm:$0x1] }
 0x363   : > { %4172 = vmatprep.mubr.bf16.mxu1 %v14488_v3  ;;  %v9131_v48 = vshll.u32 %v12687_v39, 16  ;;  %v9129_v55 = vrot.slane %v9128_v47, 4  ;;  %v12764_v39 = vld [vmem:[%s14661_s17 + $0x18] sm:$0xe]  ;;  %v10023_v45 = vrot.slane %v10021_v36, 4 }
 0x364   : > { %v12812_v44 = vrot.slane %v12764_v39, 9  ;;  %v12768_v47 = vld [vmem:[%s14661_s17 + $0x28] sm:$0xf] }
 0x365   : > { %12757 = vmatmul.mubr.msk.bf16.gmra.mrb[36].mxu0 %vm468_vm1, %v12739_v52  ;;  %v9145_v52 = vshll.u32 %v12689_v42, 16  ;;  %v9133_v2 = vrot.slane %v9131_v48, 5  ;;  %v14463_v48 = vld [vmem:[%s14564_s14 + $0x18] sm:$0xff]   ;;  %v10028_v50 = vrot.slane %v12768_v47, 5  ;;  %v12782_v47 = vld [vmem:[%s14661_s17 + $0x60] sm:$0xe] }
 0x366   : > { %9798 = vmatprep.mubr.bf16.mxu0 %v14488_v3 }
 0x367   : > { %v9147_v59 = vrot.slane %v9145_v52, 5  ;;  %v9134_v14 = vsel %vm14580_vm4, %v9129_v55, %v9133_v2  ;;  %v12769_v52 = vld [vmem:[%s14661_s17 + $0x2c] sm:$0x1]  ;;  %v10817_v2 = vsel %vm517_vm0, %v16179_v43, 0  ;;  %v12772_v43 = vld [vmem:[%s14661_s17 + $0x38] sm:$0x1] }
 0x368   : > { %v10031_v55 = vrot.slane %v12769_v52, 5  ;;  %v12786_v52 = vld [vmem:[%s14661_s17 + $0x70] sm:$0xf] }
 0x369   : > { %v9152_v4 = vor.u32 %v9151_v23, %v9147_v59 }
 0x36a   : > { %12060 = vmatmul.mubr.msk.bf16.gmra.mrb[44].mxu1 %vm468_vm1, %v14457_v13  ;;  %v9124_v13 = vsel %vm14580_vm4, %v9119_v30, %v9123_v35  ;;  %v10030_v30 = vrot.slane %v10028_v50, 4 }
 0x36b   : > { %4182 = vmatprep.mubr.bf16.mxu1 %v14488_v3  ;;  %v12743_v12 = vcombine.low %v9124_v13, %v9134_v14  ;;  %v9153_v15 = vrot.slane %v9152_v4, 4  ;;  %v12814_v13 = vrot.slane %v12770_v61, 9  ;;  %v10038_v14 = vrot.slane %v12772_v43, 5  ;;  %v14465_v4 = vld [vmem:[%s14564_s14 + $0x30] sm:$0xff]   ;;  %v12789_v61 = vld [vmem:[%s14661_s17 + $0x7c] sm:$0xf] }
 0x36c   : > { %v10032_v23 = vsel %vm14796_vm7, %v10030_v30, %v10031_v55  ;;  %v10070_v55 = vrot.slane %v12786_v52, 5  ;;  %v14470_v43 = vld [vmem:[%s14564_s14 + $0x6c] sm:$0xff]  }
 0x36d   : > { %12758 = vmatmul.mubr.msk.bf16.gmra.mrb[40].mxu0 %vm468_vm1, %v12740_v26  ;;  %v9143_v26 = vrot.slane %v9142_v1, 4  ;;  %v9158_v25 = vsel %vm14580_vm4, %v9153_v15, %v9157_v16  ;;  %v12774_v1 = vld [vmem:[%s14661_s17 + $0x40] sm:$0xf]  ;;  %v10036_v5 = vsel %vm14796_vm7, %v12814_v13, %v10035_v60  ;;  %v10045_v16 = vrot.slane %v12775_v11, 5  ;;  %v14471_v11 = vld [vmem:[%s14564_s14 + $0x78] sm:$0xff]  }
 0x36e   : > { %9808 = vmatprep.mubr.bf16.mxu0 %v14488_v3  ;;  %v10042_v8 = vrot.slane %v12774_v1, 5  ;;  %v12790_v1 = vld [vmem:[%s14661_s17 + $0x80] sm:$0x1]  ;;  %v12802_v52 = vld [vmem:[%s14661_s17 + $0xb0] sm:$0x1] }
 0x36f   : > { %v9148_v0 = vsel %vm14580_vm4, %v9143_v26, %v9147_v59  ;;  %v12815_v26 = vrot.slane %v12773_v10, 9  ;;  %v12792_v10 = vld [vmem:[%s14661_s17 + $0x88] sm:$0xf] }
 0x370   : > { %v12744_v29 = vcombine.low %v9148_v0, %v9158_v25  ;;  %v10044_v15 = vrot.slane %v10042_v8, 4  ;;  %v12778_v0 = vld [vmem:[%s14661_s17 + $0x50] sm:$0x1] }
 0x371   : > { %v10043_v20 = vsel %vm14796_vm7, %v12815_v26, %v10042_v8  ;;  %v10080_v8 = vrot.slane %v12790_v1, 5  ;;  %v12807_v1 = vld [vmem:[%s14661_s17 + $0xc4] sm:$0xf] }
 0x372   : > { %12061 = vmatmul.mubr.msk.bf16.gmra.mrb[48].mxu1 %vm468_vm1, %v14458_v28  ;;  %v9179_v28 = vshll.u32 %v12693_v22, 16  ;;  %v10046_v21 = vsel %vm14796_vm7, %v10044_v15, %v10045_v16  ;;  %v10049_v22 = vrot.slane %v12777_v17, 5  ;;  %v10084_v15 = vrot.slane %v12792_v10, 5  ;;  %v12791_v16 = vld [vmem:[%s14661_s17 + $0x84] sm:$0xe] }
 0x373   : > { %4192 = vmatprep.mubr.bf16.mxu1 %v14488_v3  ;;  %v12896_v25 = vcombine.low %v10043_v20, %v10046_v21  ;;  %v12793_v17 = vld [vmem:[%s14661_s17 + $0x8c] sm:$0x1]  ;;  %v12821_v20 = vrot.slane %v12791_v16, 9  ;;  %v12102_v16 = vld [vmem:[%s14661_s17 + $0x14] sm:$0x1] }
 0x374   : > { %v9181_v7 = vrot.slane %v9179_v28, 5  ;;  %v10051_v27 = vrot.slane %v10049_v22, 4  ;;  %v10052_v28 = vrot.slane %v12778_v0, 5  ;;  %v10086_v21 = vrot.slane %v10084_v15, 4  ;;  %v14472_v0 = vld [vmem:[%s14564_s14 + $0x84] sm:$0xff]  }
 0x375   : > { %12759 = vmatmul.mubr.msk.bf16.gmra.mrb[44].mxu0 %vm468_vm1, %v12741_v38  ;;  %v5661_v38 = vsel %vm517_vm0, %v16170_v40, 0  ;;  %v10022_v40 = vsel %vm14796_vm7, %v12812_v44, %v10021_v36 }
 0x376   : > { %9818 = vmatprep.mubr.bf16.mxu0 %v14488_v3  ;;  %v9182_v35 = vsel %vm14580_vm4, %v9177_v32, %v9181_v7  ;;  %v10053_v7 = vsel %vm14796_vm7, %v10051_v27, %v10052_v28  ;;  %v12794_v28 = vld [vmem:[%s14661_s17 + $0x90] sm:$0xe] }
 0x377   : > { %v12745_v42 = vcombine.low %v9172_v34, %v9182_v35  ;;  %v12781_v34 = vld [vmem:[%s14661_s17 + $0x5c] sm:$0x1] }
 0x378   : > { %v10059_v39 = vrot.slane %v12781_v34, 5  ;;  %v14473_v34 = vld [vmem:[%s14564_s14 + $0x90] sm:$0xff]  }
 0x37a   : > { %12062 = vmatmul.mubr.msk.bf16.gmra.mrb[52].mxu1 %vm468_vm1, %v14459_v49  ;;  %v10025_v49 = vsel %vm14796_vm7, %v10023_v45, %v10024_v46  ;;  %v10063_v46 = vrot.slane %v12783_v41, 5  ;;  %v12799_v41 = vld [vmem:[%s14661_s17 + $0xa4] sm:$0x1] }
 0x37b   : > { %4202 = vmatprep.mubr.bf16.mxu1 %v14488_v3  ;;  %v12893_v53 = vcombine.low %v10022_v40, %v10025_v49  ;;  %v12818_v49 = vrot.slane %v12782_v47, 9  ;;  %v12801_v47 = vld [vmem:[%s14661_s17 + $0xac] sm:$0xf] }
 0x37d   : > { %12760 = vmatmul.mubr.msk.bf16.gmra.mrb[48].mxu0 %vm468_vm1, %v12742_v54  ;;  %v12813_v54 = vrot.slane %v12767_v51, 9 }
 0x37e   : > { %9828 = vmatprep.mubr.bf16.mxu0 %v14488_v3 }
 0x37f   : > { %v10029_v59 = vsel %vm14796_vm7, %v12813_v54, %v10028_v50  ;;  %v10065_v50 = vrot.slane %v10063_v46, 4  ;;  %v10064_v54 = vsel %vm14796_vm7, %v12818_v49, %v10063_v46  ;;  %v10101_v46 = vrot.slane %v12799_v41, 5 }
 0x380   : > { %v12894_v62 = vcombine.low %v10029_v59, %v10032_v23  ;;  %v10072_v23 = vrot.slane %v10070_v55, 4 }
 0x382   : > { %12063 = vmatmul.mubr.msk.bf16.gmra.mrb[56].mxu1 %vm468_vm1, %v14460_v63  ;;  %v10037_v63 = vrot.slane %v10035_v60, 4  ;;  %v10073_v60 = vrot.slane %v12787_v56, 5 }
 0x383   : > { %4212 = vmatprep.mubr.bf16.mxu1 %v14488_v3 }
 0x384   : > { %v10039_v6 = vsel %vm14796_vm7, %v10037_v63, %v10038_v14  ;;  %v10074_v13 = vsel %vm14796_vm7, %v10072_v23, %v10073_v60  ;;  %v10077_v63 = vrot.slane %v12789_v61, 5  ;;  %v12788_v14 = vld [vmem:[%s14661_s17 + $0x78] sm:$0xe]  ;;  %v14475_v23 = vld [vmem:[%s14564_s14 + $0xa8] sm:$0xff]   ;;  %v12101_v61 = vld [vmem:[%s14661_s17 + $0x10] sm:$0xf] }
 0x385   : > { %12761 = vmatmul.mubr.msk.bf16.gmra.mrb[52].mxu0 %vm468_vm1, %v12743_v12  ;;  %v12895_v12 = vcombine.low %v10036_v5, %v10039_v6  ;;  %v12820_v5 = vrot.slane %v12788_v14, 9  ;;  %v12100_v60 = vld [vmem:[%s14661_s17 + $0xc] sm:$0xf] }
 0x386   : > { %9838 = vmatprep.mubr.bf16.mxu0 %v14488_v3  ;;  %v10079_v6 = vrot.slane %v10077_v63, 4 }
 0x388   : > { %v10081_v26 = vsel %vm14796_vm7, %v10079_v6, %v10080_v8  ;;  %v4747_v6 = vshll.u32 %v12101_v61, 16  ;;  %v4751_v8 = vshrl.u32 %v12101_v61, 16 }
 0x38a   : > { %12064 = vmatmul.mubr.msk.bf16.gmra.mrb[60].mxu1 %vm468_vm1, %v14461_v24  ;;  %v12776_v24 = vld [vmem:[%s14661_s17 + $0x48] sm:$0xe] }
 0x38b   : > { %4464 = vmatprep.mubr.bf16.mxu1 %v14488_v3  ;;  %v12816_v19 = vrot.slane %v12776_v24, 9  ;;  %v12795_v24 = vld [vmem:[%s14661_s17 + $0x94] sm:$0xf] }
 0x38c   : > { %v10091_v27 = vrot.slane %v12795_v24, 5  ;;  %v12808_v24 = vld [vmem:[%s14661_s17 + $0xc8] sm:$0x1] }
 0x38d   : > { %12762 = vmatmul.mubr.msk.bf16.gmra.mrb[56].mxu0 %vm468_vm1, %v12744_v29  ;;  %v12780_v29 = vld [vmem:[%s14661_s17 + $0x58] sm:$0xf]  ;;  %v10050_v32 = vsel %vm14796_vm7, %v12816_v19, %v10049_v22  ;;  %v10087_v22 = vrot.slane %v12793_v17, 5 }
 0x38e   : > { %9848 = vmatprep.mubr.bf16.mxu0 %v14488_v3  ;;  %v10056_v33 = vrot.slane %v12780_v29, 5  ;;  %v12897_v35 = vcombine.low %v10050_v32, %v10053_v7  ;;  %v12796_v29 = vld [vmem:[%s14661_s17 + $0x98] sm:$0x1]  ;;  %v12822_v32 = vrot.slane %v12794_v28, 9  ;;  %v10093_v7 = vrot.slane %v10091_v27, 4 }
 0x38f   : > { %v10088_v19 = vsel %vm14796_vm7, %v10086_v21, %v10087_v22  ;;  %v4753_v21 = vrot.slane %v4751_v8, 4  ;;  %v14476_v22 = vld [vmem:[%s14564_s14 + $0xb4] sm:$0xff]   ;;  %v4757_v28 = vshll.u32 %v12102_v16, 16  ;;  %v12830_v16 = vld [vmem:[%s14564_s14 + $0x20] sm:$0x1] }
 0x390   : > { %v12110_v8 = vld [vmem:[%s14661_s17 + $0x34] sm:$0xf] }
 0x392   : > { %12084 = vmatmul.mubr.msk.bf16.vlgmr.msra.gmra.mrb[0].mxu1 %vm468_vm1, %v14462_v9  ;;  %v12779_v9 = vld [vmem:[%s14661_s17 + $0x54] sm:$0xe] }
 0x393   : > { %4474 = vmatprep.mubr.bf16.mxu1 %v14488_v3  ;;  %5667 = vmatpush1.bf16.msra.mxu1 %v5661_v38  ;;  %v12817_v36 = vrot.slane %v12779_v9, 9  ;;  %v10058_v38 = vrot.slane %v10056_v33, 4  ;;  %v12798_v9 = vld [vmem:[%s14661_s17 + $0xa0] sm:$0xf] }
 0x395   : > { %12763 = vmatmul.mubr.msk.bf16.gmra.mrb[60].mxu0 %vm468_vm1, %v12745_v42  ;;  %v14468_v42 = vld [vmem:[%s14564_s14 + $0x54] sm:$0xff]   ;;  %v10057_v44 = vsel %vm14796_vm7, %v12817_v36, %v10056_v33  ;;  %v10060_v45 = vsel %vm14796_vm7, %v10058_v38, %v10059_v39  ;;  %v10094_v33 = vrot.slane %v12796_v29, 5  ;;  %v10098_v38 = vrot.slane %v12798_v9, 5  ;;  %v12797_v39 = vld [vmem:[%s14661_s17 + $0x9c] sm:$0xe] }
 0x396   : > { %10484 = vmatprep.mubr.bf16.mxu0 %v14488_v3  ;;  %v12898_v40 = vcombine.low %v10057_v44, %v10060_v45  ;;  %v12823_v44 = vrot.slane %v12797_v39, 9  ;;  %v4759_v39 = vrot.slane %v4757_v28, 5 }
 0x397   : > { %v10095_v36 = vsel %vm14796_vm7, %v10093_v7, %v10094_v33  ;;  %v10100_v45 = vrot.slane %v10098_v38, 4  ;;  %v12810_v33 = vld [vmem:[%s14661_s17 + $0xd0] sm:$0xf] }
 0x398   : > { %v10126_v41 = vrot.slane %v12810_v33, 5 }
 0x399   : > { %v10102_v49 = vsel %vm14796_vm7, %v10100_v45, %v10101_v46 }
 0x39a   : > { %12085 = vmatmul.mubr.msk.bf16.gmra.mrb[4].mxu1 %vm468_vm1, %v14463_v48  ;;  %v12784_v48 = vld [vmem:[%s14661_s17 + $0x68] sm:$0x1] }
 0x39b   : > { %4484 = vmatprep.mubr.bf16.mxu1 %v14488_v3  ;;  %v10066_v51 = vrot.slane %v12784_v48, 5  ;;  %v14474_v48 = vld [vmem:[%s14564_s14 + $0x9c] sm:$0xff]  }
 0x39d   : > { %12911 = vmatmul.mubr.msk.bf16.vlgmr.msra.gmra.mrb[0].mxu0 %vm468_vm1, %v12893_v53  ;;  %v14469_v53 = vld [vmem:[%s14564_s14 + $0x60] sm:$0xff]   ;;  %v10067_v30 = vsel %vm14796_vm7, %v10065_v50, %v10066_v51  ;;  %v10105_v50 = vrot.slane %v12801_v47, 5  ;;  %v12800_v51 = vld [vmem:[%s14661_s17 + $0xa8] sm:$0xe]  ;;  %v12809_v47 = vld [vmem:[%s14661_s17 + $0xcc] sm:$0xe] }
 0x39e   : > { %10823 = vmatpush1.bf16.msra.mxu0 %v10817_v2  ;;  %10494 = vmatprep.mubr.bf16.mxu0 %v14488_v3  ;;  %v12785_v2 = vld [vmem:[%s14661_s17 + $0x6c] sm:$0xe] }
 0x39f   : > { %v12819_v59 = vrot.slane %v12785_v2, 9  ;;  %v10108_v2 = vrot.slane %v12802_v52, 5 }
 0x3a2   : > { %12086 = vmatmul.mubr.msk.bf16.gmra.mrb[8].mxu1 %vm468_vm1, %v14464_v58  ;;  %v12899_v58 = vcombine.low %v10064_v54, %v10067_v30  ;;  %v12824_v30 = vrot.slane %v12800_v51, 9 }
 0x3a3   : > { %4494 = vmatprep.mubr.bf16.mxu1 %v14488_v3 }
 0x3a5   : > { %12912 = vmatmul.mubr.msk.bf16.gmra.mrb[4].mxu0 %vm468_vm1, %v12894_v62  ;;  %v10071_v62 = vsel %vm14796_vm7, %v12819_v59, %v10070_v55  ;;  %v10107_v55 = vrot.slane %v10105_v50, 4  ;;  %v12805_v59 = vld [vmem:[%s14661_s17 + $0xbc] sm:$0x1] }
 0x3a6   : > { %10504 = vmatprep.mubr.bf16.mxu0 %v14488_v3  ;;  %v10115_v14 = vrot.slane %v12805_v59, 5 }
 0x3aa   : > { %12087 = vmatmul.mubr.msk.bf16.gmra.mrb[12].mxu1 %vm468_vm1, %v14465_v4  ;;  %v12900_v4 = vcombine.low %v10071_v62, %v10074_v13  ;;  %v10109_v62 = vsel %vm14796_vm7, %v10107_v55, %v10108_v2  ;;  %v12827_v55 = vrot.slane %v12809_v47, 9  ;;  %v10128_v2 = vrot.slane %v10126_v41, 4 }
 0x3ab   : > { %4504 = vmatprep.mubr.bf16.mxu1 %v14488_v3 }
 0x3ad   : > { %12913 = vmatmul.mubr.msk.bf16.gmra.mrb[8].mxu0 %vm468_vm1, %v12895_v12  ;;  %v10078_v12 = vsel %vm14796_vm7, %v12820_v5, %v10077_v63  ;;  %v4741_v5 = vshll.u32 %v12100_v60, 16 }
 0x3ae   : > { %10514 = vmatprep.mubr.bf16.mxu0 %v14488_v3 }
 0x3b2   : > { %12088 = vmatmul.mubr.msk.bf16.gmra.mrb[16].mxu1 %vm468_vm1, %v14466_v18  ;;  %v12901_v18 = vcombine.low %v10078_v12, %v10081_v26  ;;  %v12806_v26 = vld [vmem:[%s14661_s17 + $0xc0] sm:$0xe] }
 0x3b3   : > { %4514 = vmatprep.mubr.bf16.mxu1 %v14488_v3 }
 0x3b5   : > { %12914 = vmatmul.mubr.msk.bf16.gmra.mrb[12].mxu0 %vm468_vm1, %v12896_v25  ;;  %v10085_v25 = vsel %vm14796_vm7, %v12821_v20, %v10084_v15  ;;  %v10119_v15 = vrot.slane %v12807_v1, 5  ;;  %v4749_v20 = vrot.slane %v4747_v6, 5  ;;  %v12109_v6 = vld [vmem:[%s14661_s17 + $0x30] sm:$0xf] }
 0x3b6   : > { %10524 = vmatprep.mubr.bf16.mxu0 %v14488_v3 }
 0x3b7   : > { %v10121_v29 = vrot.slane %v10119_v15, 4  ;;  %v4754_v7 = vor.u32 %v4753_v21, %v4749_v20 }
 0x3b9   : > { %v4755_v46 = vrot.slane %v4754_v7, 4  ;;  %v10232_v7 = vrot.slane %v12830_v16, 5 }
 0x3ba   : > { %12089 = vmatmul.mubr.msk.bf16.gmra.mrb[20].mxu1 %vm468_vm1, %v14467_v31  ;;  %v12902_v31 = vcombine.low %v10085_v25, %v10088_v19  ;;  %v12104_v25 = vld [vmem:[%s14661_s17 + $0x1c] sm:$0xf] }
 0x3bb   : > { %4524 = vmatprep.mubr.bf16.mxu1 %v14488_v3 }
 0x3bd   : > { %12915 = vmatmul.mubr.msk.bf16.gmra.mrb[16].mxu0 %vm468_vm1, %v12897_v35  ;;  %v10092_v35 = vsel %vm14796_vm7, %v12822_v32, %v10091_v27  ;;  %v12826_v27 = vrot.slane %v12806_v26, 9 }
 0x3be   : > { %10534 = vmatprep.mubr.bf16.mxu0 %v14488_v3 }
 0x3c2   : > { %12090 = vmatmul.mubr.msk.bf16.gmra.mrb[24].mxu1 %vm468_vm1, %v14468_v42  ;;  %v12903_v42 = vcombine.low %v10092_v35, %v10095_v36  ;;  %v4771_v35 = vshll.u32 %v12104_v25, 16  ;;  %v4775_v36 = vshrl.u32 %v12104_v25, 16  ;;  %v4813_v25 = vshll.u32 %v12109_v6, 16 }
 0x3c3   : > { %4534 = vmatprep.mubr.bf16.mxu1 %v14488_v3 }
 0x3c4   : > { %v16553_v51 = vrot.slane %v4771_v35, 5  ;;  %v4777_v52 = vrot.slane %v4775_v36, 4  ;;  %v12831_v36 = vld [vmem:[%s14564_s14 + $0x24] sm:$0xe] }
 0x3c5   : > { %12916 = vmatmul.mubr.msk.bf16.gmra.mrb[20].mxu0 %vm468_vm1, %v12898_v40  ;;  %v10099_v40 = vsel %vm14796_vm7, %v12823_v44, %v10098_v38  ;;  %v14477_v38 = vld [vmem:[%s14564_s14 + $0xc0] sm:$0xff]  }
 0x3c6   : > { %10544 = vmatprep.mubr.bf16.mxu0 %v14488_v3  ;;  %v12904_v54 = vcombine.low %v10099_v40, %v10102_v49  ;;  %v12105_v40 = vld [vmem:[%s14661_s17 + $0x20] sm:$0x1]  ;;  %v4778_v61 = vor.u32 %v4777_v52, %v16553_v51 }
 0x3c8   : > { %v4779_v26 = vrot.slane %v4778_v61, 4 }
 0x3ca   : > { %12091 = vmatmul.mubr.msk.bf16.gmra.mrb[28].mxu1 %vm468_vm1, %v14469_v53  ;;  %v12804_v53 = vld [vmem:[%s14661_s17 + $0xb8] sm:$0xf] }
 0x3cb   : > { %4544 = vmatprep.mubr.bf16.mxu1 %v14488_v3  ;;  %v10112_v56 = vrot.slane %v12804_v53, 5 }
 0x3cd   : > { %12917 = vmatmul.mubr.msk.bf16.gmra.mrb[24].mxu0 %vm468_vm1, %v12899_v58  ;;  %v12803_v58 = vld [vmem:[%s14661_s17 + $0xb4] sm:$0xe]  ;;  %v10114_v63 = vrot.slane %v10112_v56, 4 }
 0x3ce   : > { %10554 = vmatprep.mubr.bf16.mxu0 %v14488_v3  ;;  %v12825_v13 = vrot.slane %v12803_v58, 9  ;;  %v4781_v58 = vshll.u32 %v12105_v40, 16 }
 0x3cf   : > { %v10116_v12 = vsel %vm14796_vm7, %v10114_v63, %v10115_v14 }
 0x3d2   : > { %12092 = vmatmul.mubr.msk.bf16.gmra.mrb[32].mxu1 %vm468_vm1, %v14470_v43  ;;  %v10106_v43 = vsel %vm14796_vm7, %v12824_v30, %v10105_v50  ;;  %v12107_v30 = vld [vmem:[%s14661_s17 + $0x28] sm:$0xf] }
 0x3d3   : > { %4554 = vmatprep.mubr.bf16.mxu1 %v14488_v3  ;;  %v12905_v10 = vcombine.low %v10106_v43, %v10109_v62  ;;  %v12829_v43 = vld [vmem:[%s14564_s14 + $0x1c] sm:$0xf]  ;;  %v4795_v63 = vshll.u32 %v12107_v30, 16  ;;  %v4799_v14 = vshrl.u32 %v12107_v30, 16 }
 0x3d5   : > { %12918 = vmatmul.mubr.msk.bf16.gmra.mrb[28].mxu0 %vm468_vm1, %v12900_v4  ;;  %v4738_v4 = vshrl.u32 %v12100_v60, 16  ;;  %v16577_v21 = vrot.slane %v4795_v63, 5 }
 0x3d6   : > { %10564 = vmatprep.mubr.bf16.mxu0 %v14488_v3 }
 0x3d7   : > { %v4740_v17 = vrot.slane %v4738_v4, 4  ;;  %v4783_v4 = vrot.slane %v4781_v58, 5 }
 0x3da   : > { %12093 = vmatmul.mubr.msk.bf16.gmra.mrb[36].mxu1 %vm468_vm1, %v14471_v11  ;;  %v10113_v11 = vsel %vm14796_vm7, %v12825_v13, %v10112_v56 }
 0x3db   : > { %4564 = vmatprep.mubr.bf16.mxu1 %v14488_v3  ;;  %v12906_v19 = vcombine.low %v10113_v11, %v10116_v12 }
 0x3dd   : > { %12919 = vmatmul.mubr.msk.bf16.gmra.mrb[32].mxu0 %vm468_vm1, %v12901_v18  ;;  %v4743_v18 = vrot.slane %v4741_v5, 5  ;;  %v10229_v5 = vrot.slane %v12829_v43, 5 }
 0x3de   : > { %10574 = vmatprep.mubr.bf16.mxu0 %v14488_v3 }
 0x3df   : > { %v4744_v32 = vor.u32 %v4743_v18, %v4740_v17  ;;  %v12108_v17 = vld [vmem:[%s14661_s17 + $0x2c] sm:$0x1] }
 0x3e0   : > { %v4805_v33 = vshll.u32 %v12108_v17, 16 }
 0x3e1   : > { %v4745_v45 = vrot.slane %v4744_v32, 4  ;;  %v10231_v32 = vrot.slane %v10229_v5, 4 }
 0x3e2   : > { %12094 = vmatmul.mubr.msk.bf16.gmra.mrb[40].mxu1 %vm468_vm1, %v14472_v0  ;;  %v12103_v0 = vld [vmem:[%s14661_s17 + $0x18] sm:$0xf] }
 0x3e3   : > { %4574 = vmatprep.mubr.bf16.mxu1 %v14488_v3  ;;  %v4762_v9 = vshrl.u32 %v12103_v0, 16  ;;  %v4750_v59 = vsel %vm14580_vm4, %v4745_v45, %v4749_v20  ;;  %v10233_v40 = vsel %vm14796_vm7, %v10231_v32, %v10232_v7  ;;  %v12838_v32 = vld [vmem:[%s14564_s14 + $0x40] sm:$0xf] }
 0x3e5   : > { %12920 = vmatmul.mubr.msk.bf16.gmra.mrb[36].mxu0 %vm468_vm1, %v12902_v31  ;;  %v10122_v31 = vrot.slane %v12808_v24, 5  ;;  %v4764_v49 = vrot.slane %v4762_v9, 4  ;;  %v12832_v24 = vld [vmem:[%s14564_s14 + $0x28] sm:$0xf]  ;;  %v4784_v9 = vsel %vm14580_vm4, %v4779_v26, %v4783_v4 }
 0x3e6   : > { %10584 = vmatprep.mubr.bf16.mxu0 %v14488_v3 }
 0x3e7   : > { %v10123_v44 = vsel %vm14796_vm7, %v10121_v29, %v10122_v31 }
 0x3ea   : > { %12095 = vmatmul.mubr.msk.bf16.gmra.mrb[44].mxu1 %vm468_vm1, %v14473_v34  ;;  %v4765_v34 = vshll.u32 %v12103_v0, 16  ;;  %v4810_v0 = vshrl.u32 %v12109_v6, 16 }
 0x3eb   : > { %4584 = vmatprep.mubr.bf16.mxu1 %v14488_v3 }
 0x3ec   : > { %v4767_v50 = vrot.slane %v4765_v34, 5 }
 0x3ed   : > { %12921 = vmatmul.mubr.msk.bf16.gmra.mrb[40].mxu0 %vm468_vm1, %v12903_v42  ;;  %v10120_v42 = vsel %vm14796_vm7, %v12826_v27, %v10119_v15  ;;  %v12828_v15 = vld [vmem:[%s14564_s14 + $0x18] sm:$0xe]  ;;  %v4823_v27 = vshrl.u32 %v12110_v8, 16 }
 0x3ee   : > { %10594 = vmatprep.mubr.bf16.mxu0 %v14488_v3  ;;  %v12907_v53 = vcombine.low %v10120_v42, %v10123_v44  ;;  %v4768_v60 = vor.u32 %v4767_v50, %v4764_v49  ;;  %v12876_v29 = vrot.slane %v12828_v15, 9  ;;  %v4815_v42 = vrot.slane %v4813_v25, 5  ;;  %v12112_v50 = vld [vmem:[%s14661_s17 + $0x3c] sm:$0xf] }
 0x3ef   : > { %v4825_v45 = vrot.slane %v4823_v27, 4  ;;  %v4807_v49 = vrot.slane %v4805_v33, 5 }
 0x3f0   : > { %v4769_v12 = vrot.slane %v4768_v60, 4  ;;  %v4837_v60 = vshll.u32 %v12112_v50, 16 }
 0x3f2   : > { %12096 = vmatmul.mubr.msk.bf16.gmra.mrb[48].mxu1 %vm468_vm1, %v14474_v48  ;;  %v12811_v48 = vld [vmem:[%s14661_s17 + $0xd4] sm:$0x1]  ;;  %v4774_v31 = vsel %vm14580_vm4, %v4769_v12, %v16553_v51  ;;  %v12113_v51 = vld [vmem:[%s14661_s17 + $0x40] sm:$0xf]  ;;  %v12114_v12 = vld [vmem:[%s14661_s17 + $0x44] sm:$0x1] }
 0x3f3   : > { %4594 = vmatprep.mubr.bf16.mxu1 %v14488_v3  ;;  %v10129_v56 = vrot.slane %v12811_v48, 5  ;;  %v12198_v47 = vcombine.low %v4774_v31, %v4784_v9  ;;  %v10230_v48 = vsel %vm14796_vm7, %v12876_v29, %v10229_v5  ;;  %v4843_v61 = vshll.u32 %v12113_v51, 16 }
 0x3f4   : > { %v4847_v43 = vshrl.u32 %v12113_v51, 16  ;;  %v4839_v15 = vrot.slane %v4837_v60, 5  ;;  %v12841_v60 = vld [vmem:[%s14564_s14 + $0x4c] sm:$0xf] }
 0x3f5   : > { %12922 = vmatmul.mubr.msk.bf16.gmra.mrb[44].mxu0 %vm468_vm1, %v12904_v54  ;;  %v12106_v54 = vld [vmem:[%s14661_s17 + $0x24] sm:$0xf]  ;;  %v10130_v11 = vsel %vm14796_vm7, %v10128_v2, %v10129_v56  ;;  %v16617_v16 = vrot.slane %v4843_v61, 5 }
 0x3f6   : > { %10604 = vmatprep.mubr.bf16.mxu0 %v14488_v3  ;;  %v4786_v62 = vshrl.u32 %v12106_v54, 16  ;;  %v4789_v13 = vshll.u32 %v12106_v54, 16  ;;  %v12877_v54 = vrot.slane %v12831_v36, 9  ;;  %v4849_v17 = vrot.slane %v4847_v43, 4 }
 0x3f8   : > { %v4788_v18 = vrot.slane %v4786_v62, 4  ;;  %v4791_v20 = vrot.slane %v4789_v13, 5  ;;  %v12928_v62 = vcombine.low %v10230_v48, %v10233_v40  ;;  %v4850_v31 = vor.u32 %v4849_v17, %v16617_v16 }
 0x3fa   : > { %12097 = vmatmul.mubr.msk.bf16.gmra.mrb[52].mxu1 %vm468_vm1, %v14475_v23  ;;  %v4760_v23 = vsel %vm14580_vm4, %v4755_v46, %v4759_v39  ;;  %v4792_v34 = vor.u32 %v4791_v20, %v4788_v18  ;;  %v12111_v39 = vld [vmem:[%s14661_s17 + $0x38] sm:$0x1]  ;;  %v12833_v46 = vld [vmem:[%s14564_s14 + $0x2c] sm:$0x1] }
 0x3fb   : > { %4604 = vmatprep.mubr.bf16.mxu1 %v14488_v3  ;;  %v12197_v1 = vcombine.low %v4750_v59, %v4760_v23  ;;  %v4829_v30 = vshll.u32 %v12111_v39, 16  ;;  %v10239_v2 = vrot.slane %v12833_v46, 5  ;;  %v12835_v59 = vld [vmem:[%s14564_s14 + $0x34] sm:$0xf]  ;;  %v4834_v23 = vshrl.u32 %v12112_v50, 16 }
 0x3fc   : > { %v4793_v52 = vrot.slane %v4792_v34, 4  ;;  %v12839_v46 = vld [vmem:[%s14564_s14 + $0x44] sm:$0x1] }
 0x3fd   : > { %12923 = vmatmul.mubr.msk.bf16.gmra.mrb[48].mxu0 %vm468_vm1, %v12905_v10  ;;  %v10127_v10 = vsel %vm14796_vm7, %v12827_v55, %v10126_v41  ;;  %v4812_v41 = vrot.slane %v4810_v0, 4  ;;  %v4836_v26 = vrot.slane %v4834_v23, 4 }
 0x3fe   : > { %10614 = vmatprep.mubr.bf16.mxu0 %v14488_v3  ;;  %v12908_v28 = vcombine.low %v10127_v10, %v10130_v11  ;;  %v4798_v13 = vsel %vm14580_vm4, %v4793_v52, %v16577_v21  ;;  %v12834_v10 = vld [vmem:[%s14564_s14 + $0x30] sm:$0xe]  ;;  %v12836_v11 = vld [vmem:[%s14564_s14 + $0x38] sm:$0x1]  ;;  %v12118_v52 = vld [vmem:[%s14661_s17 + $0x54] sm:$0xf] }
 0x3ff   : > { %v4816_v56 = vor.u32 %v4815_v42, %v4812_v41  ;;  %v10246_v25 = vrot.slane %v12836_v11, 5  ;;  %v4840_v29 = vor.u32 %v4839_v15, %v4836_v26  ;;  %v4882_v61 = vshrl.u32 %v12118_v52, 16  ;;  %v12842_v26 = vld [vmem:[%s14564_s14 + $0x50] sm:$0x1]  ;;  %v12120_v15 = vld [vmem:[%s14661_s17 + $0x5c] sm:$0x1] }
 0x400   : > { %v4885_v43 = vshll.u32 %v12118_v52, 16 }
 0x401   : > { %v4817_v6 = vrot.slane %v4816_v56, 4  ;;  %v4841_v42 = vrot.slane %v4840_v29, 4 }
 0x402   : > { %12098 = vmatmul.mubr.msk.bf16.gmra.mrb[56].mxu1 %vm468_vm1, %v14476_v22  ;;  %v4801_v22 = vrot.slane %v4799_v14, 4  ;;  %v4831_v14 = vrot.slane %v4829_v30, 5  ;;  %v4887_v17 = vrot.slane %v4885_v43, 5 }
 0x403   : > { %4614 = vmatprep.mubr.bf16.mxu1 %v14488_v3  ;;  %v4846_v56 = vsel %vm14580_vm4, %v4841_v42, %v16617_v16  ;;  %v4884_v16 = vrot.slane %v4882_v61, 4 }
 0x404   : > { %v4802_v35 = vor.u32 %v4801_v22, %v16577_v21  ;;  %v12115_v21 = vld [vmem:[%s14661_s17 + $0x48] sm:$0xf]  ;;  %v12116_v22 = vld [vmem:[%s14661_s17 + $0x4c] sm:$0xf] }
 0x405   : > { %12924 = vmatmul.mubr.msk.bf16.gmra.mrb[52].mxu0 %vm468_vm1, %v12906_v19  ;;  %v4819_v19 = vshll.u32 %v12110_v8, 16  ;;  %v4858_v7 = vshrl.u32 %v12115_v21, 16  ;;  %v4861_v33 = vshll.u32 %v12115_v21, 16  ;;  %v4867_v9 = vshll.u32 %v12116_v22, 16  ;;  %v12844_v21 = vld [vmem:[%s14564_s14 + $0x58] sm:$0xf] }
 0x406   : > { %10624 = vmatprep.mubr.bf16.mxu0 %v14488_v3  ;;  %v4871_v34 = vshrl.u32 %v12116_v22, 16 }
 0x407   : > { %v16590_v44 = vrot.slane %v4819_v19, 5  ;;  %v4853_v19 = vshll.u32 %v12114_v12, 16  ;;  %v4860_v48 = vrot.slane %v4858_v7, 4  ;;  %v4863_v40 = vrot.slane %v4861_v33, 5  ;;  %v12840_v12 = vld [vmem:[%s14564_s14 + $0x48] sm:$0xe] }
 0x408   : > { %v4873_v50 = vrot.slane %v4871_v34, 4  ;;  %v4888_v33 = vor.u32 %v4887_v17, %v4884_v16  ;;  %v12843_v34 = vld [vmem:[%s14564_s14 + $0x54] sm:$0xe] }
 0x409   : > { %v4826_v58 = vor.u32 %v4825_v45, %v16590_v44  ;;  %v4822_v27 = vsel %vm14580_vm4, %v4817_v6, %v16590_v44  ;;  %v4855_v36 = vrot.slane %v4853_v19, 5  ;;  %v4851_v44 = vrot.slane %v4850_v31, 4  ;;  %v12837_v45 = vld [vmem:[%s14564_s14 + $0x3c] sm:$0xe] }
 0x40a   : > { %12099 = vmatmul.mubr.msk.bf16.gmra.mrb[60].mxu1 %vm468_vm1, %v14477_v38  ;;  %v10236_v38 = vrot.slane %v12832_v24, 5  ;;  %v12878_v24 = vrot.slane %v12834_v10, 9  ;;  %v10260_v31 = vrot.slane %v12842_v26, 5  ;;  %v12881_v52 = vrot.slane %v12843_v34, 9 }
 0x40b   : > { %5698 = vmatprep.mubr.bf16.mxu1 %v14488_v3  ;;  %v4827_v8 = vrot.slane %v4826_v58, 4  ;;  %v4856_v58 = vsel %vm14580_vm4, %v4851_v44, %v4855_v36  ;;  %v12123_v36 = vld [vmem:[%s14661_s17 + $0x68] sm:$0x1]  ;;  %v12845_v44 = vld [vmem:[%s14564_s14 + $0x5c] sm:$0x1] }
 0x40c   : > { %v10238_v55 = vrot.slane %v10236_v38, 4  ;;  %v10237_v4 = vsel %vm14796_vm7, %v12877_v54, %v10236_v38  ;;  %v10250_v38 = vrot.slane %v12838_v32, 5  ;;  %v12879_v54 = vrot.slane %v12837_v45, 9 }
 0x40d   : > { %12925 = vmatmul.mubr.msk.bf16.gmra.mrb[56].mxu0 %vm468_vm1, %v12907_v53  ;;  %v4803_v53 = vrot.slane %v4802_v35, 4  ;;  %v12201_v6 = vcombine.low %v4846_v56, %v4856_v58  ;;  %v4901_v32 = vshll.u32 %v12120_v15, 16  ;;  %v12847_v56 = vld [vmem:[%s14564_s14 + $0x64] sm:$0xf] }
 0x40e   : > { %10634 = vmatprep.mubr.bf16.mxu0 %v14488_v3  ;;  %v10240_v5 = vsel %vm14796_vm7, %v10238_v55, %v10239_v2  ;;  %v10252_v30 = vrot.slane %v10250_v38, 4  ;;  %v10253_v55 = vrot.slane %v12839_v46, 5 }
 0x40f   : > { %v4808_v63 = vsel %vm14580_vm4, %v4803_v53, %v4807_v49  ;;  %v12929_v20 = vcombine.low %v10237_v4, %v10240_v5  ;;  %v16640_v49 = vrot.slane %v4867_v9, 5  ;;  %v12119_v53 = vld [vmem:[%s14661_s17 + $0x58] sm:$0xf]  ;;  %v12121_v4 = vld [vmem:[%s14661_s17 + $0x60] sm:$0xf] }
 0x410   : > { %v12199_v18 = vcombine.low %v4798_v13, %v4808_v63  ;;  %v4895_v13 = vshrl.u32 %v12119_v53, 16  ;;  %v10251_v63 = vsel %vm14796_vm7, %v12879_v54, %v10250_v38  ;;  %v12122_v5 = vld [vmem:[%s14661_s17 + $0x64] sm:$0xf]  ;;  %v4906_v22 = vshrl.u32 %v12121_v4, 16 }
 0x411   : > { %v4874_v23 = vor.u32 %v4873_v50, %v16640_v49  ;;  %v4889_v50 = vrot.slane %v4888_v33, 4 }
 0x412   : > { %12215 = vmatmul.mubr.msk.bf16.vlgmr.msra.gmra.mrb[0].mxu1 %vm468_vm1, %v12197_v1  ;;  %v10243_v1 = vrot.slane %v12835_v59, 5  ;;  %v4864_v59 = vor.u32 %v4863_v40, %v4860_v48  ;;  %v4908_v38 = vrot.slane %v4906_v22, 4  ;;  %v4903_v48 = vrot.slane %v4901_v32, 5  ;;  %v12124_v40 = vld [vmem:[%s14661_s17 + $0x6c] sm:$0xf] }
 0x413   : > { %5708 = vmatprep.mubr.bf16.mxu1 %v14488_v3  ;;  %v4875_v11 = vrot.slane %v4874_v23, 4  ;;  %v4930_v58 = vshrl.u32 %v12124_v40, 16 }
 0x414   : > { %v10245_v0 = vrot.slane %v10243_v1, 4  ;;  %v10244_v35 = vsel %vm14796_vm7, %v12878_v24, %v10243_v1  ;;  %v10257_v1 = vrot.slane %v12841_v60, 5  ;;  %v4865_v10 = vrot.slane %v4864_v59, 4 }
 0x415   : > { %12926 = vmatmul.mubr.msk.bf16.gmra.mrb[60].mxu0 %vm468_vm1, %v12908_v28  ;;  %v4832_v28 = vsel %vm14580_vm4, %v4827_v8, %v4831_v14  ;;  %v10254_v8 = vsel %vm14796_vm7, %v10252_v30, %v10253_v55  ;;  %v4909_v24 = vshll.u32 %v12121_v4, 16  ;;  %v10267_v30 = vrot.slane %v12845_v44, 5  ;;  %v12851_v44 = vld [vmem:[%s14564_s14 + $0x74] sm:$0x1] }
 0x416   : > { %10854 = vmatprep.mubr.bf16.mxu0 %v14488_v3  ;;  %v12200_v39 = vcombine.low %v4822_v27, %v4832_v28  ;;  %v10247_v41 = vsel %vm14796_vm7, %v10245_v0, %v10246_v25  ;;  %v4915_v0 = vshll.u32 %v12122_v5, 16  ;;  %v4919_v25 = vshrl.u32 %v12122_v5, 16 }
 0x417   : > { %v12930_v51 = vcombine.low %v10244_v35, %v10247_v41  ;;  %v12931_v19 = vcombine.low %v10251_v63, %v10254_v8  ;;  %v12880_v27 = vrot.slane %v12840_v12, 9  ;;  %v4870_v28 = vsel %vm14580_vm4, %v4865_v10, %v16640_v49  ;;  %v12125_v49 = vld [vmem:[%s14661_s17 + $0x70] sm:$0xf]  ;;  %v12848_v8 = vld [vmem:[%s14564_s14 + $0x68] sm:$0x1] }
 0x418   : > { %v10259_v29 = vrot.slane %v10257_v1, 4  ;;  %v10264_v35 = vrot.slane %v12844_v21, 5  ;;  %v16678_v41 = vrot.slane %v4915_v0, 5  ;;  %v4921_v42 = vrot.slane %v4919_v25, 4  ;;  %v12126_v10 = vld [vmem:[%s14661_s17 + $0x74] sm:$0x1] }
 0x419   : > { %v10258_v46 = vsel %vm14796_vm7, %v12880_v27, %v10257_v1  ;;  %v4933_v59 = vshll.u32 %v12124_v40, 16  ;;  %v4939_v23 = vshll.u32 %v12125_v49, 16  ;;  %v4943_v60 = vshrl.u32 %v12125_v49, 16 }
 0x41a   : > { %12216 = vmatmul.mubr.msk.bf16.gmra.mrb[4].mxu1 %vm468_vm1, %v12198_v47  ;;  %v12117_v47 = vld [vmem:[%s14661_s17 + $0x50] sm:$0x1]  ;;  %v10266_v54 = vrot.slane %v10264_v35, 4  ;;  %v10271_v63 = vrot.slane %v12847_v56, 5  ;;  %v4949_v0 = vshll.u32 %v12126_v10, 16 }
 0x41b   : > { %5718 = vmatprep.mubr.bf16.mxu1 %v14488_v3  ;;  %v4877_v2 = vshll.u32 %v12117_v47, 16  ;;  %v10261_v47 = vsel %vm14796_vm7, %v10259_v29, %v10260_v31  ;;  %v4935_v12 = vrot.slane %v4933_v59, 5  ;;  %v16705_v26 = vrot.slane %v4939_v23, 5  ;;  %v12850_v29 = vld [vmem:[%s14564_s14 + $0x70] sm:$0xf] }
 0x41c   : > { %v12932_v61 = vcombine.low %v10258_v46, %v10261_v47  ;;  %v10268_v1 = vsel %vm14796_vm7, %v10266_v54, %v10267_v30  ;;  %v4945_v15 = vrot.slane %v4943_v60, 4  ;;  %v10273_v22 = vrot.slane %v10271_v63, 4  ;;  %v12853_v59 = vld [vmem:[%s14564_s14 + $0x7c] sm:$0xf]  ;;  %v12132_v10 = vld [vmem:[%s14661_s17 + $0x8c] sm:$0x1] }
 0x41d   : > { %12946 = vmatmul.mubr.msk.bf16.vlgmr.msra.gmra.mrb[0].mxu0 %vm468_vm1, %v12928_v62  ;;  %v4891_v62 = vshll.u32 %v12119_v53, 16  ;;  %v4879_v14 = vrot.slane %v4877_v2, 5  ;;  %v4925_v53 = vshll.u32 %v12123_v36, 16  ;;  %v4922_v2 = vor.u32 %v4921_v42, %v16678_v41  ;;  %v12849_v42 = vld [vmem:[%s14564_s14 + $0x6c] sm:$0xe] }
 0x41e   : > { %10864 = vmatprep.mubr.bf16.mxu0 %v14488_v3  ;;  %v4951_v34 = vrot.slane %v4949_v0, 5  ;;  %v10281_v54 = vrot.slane %v12851_v44, 5 }
 0x41f   : > { %v4880_v7 = vsel %vm14580_vm4, %v4875_v11, %v4879_v14  ;;  %v10265_v14 = vsel %vm14796_vm7, %v12881_v52, %v10264_v35  ;;  %v4923_v5 = vrot.slane %v4922_v2, 4  ;;  %v4932_v11 = vrot.slane %v4930_v58, 4 }
 0x420   : > { %v12202_v45 = vcombine.low %v4870_v28, %v4880_v7  ;;  %v12933_v17 = vcombine.low %v10265_v14, %v10268_v1  ;;  %v4946_v28 = vor.u32 %v4945_v15, %v16705_v26  ;;  %v10278_v35 = vrot.slane %v12850_v29, 5  ;;  %v12852_v14 = vld [vmem:[%s14564_s14 + $0x78] sm:$0xe] }
 0x421   : > { %v4936_v27 = vor.u32 %v4935_v12, %v4932_v11  ;;  %v12883_v52 = vrot.slane %v12849_v42, 9  ;;  %v10285_v1 = vrot.slane %v12853_v59, 5  ;;  %v12857_v42 = vld [vmem:[%s14564_s14 + $0x8c] sm:$0x1] }
 0x422   : > { %12217 = vmatmul.mubr.msk.bf16.gmra.mrb[8].mxu1 %vm468_vm1, %v12199_v18  ;;  %v16665_v18 = vrot.slane %v4891_v62, 5 }
 0x423   : > { %5728 = vmatprep.mubr.bf16.mxu1 %v14488_v3 }
 0x424   : > { %v4894_v43 = vsel %vm14580_vm4, %v4889_v50, %v16665_v18  ;;  %v12130_v50 = vld [vmem:[%s14661_s17 + $0x84] sm:$0xf] }
 0x425   : > { %12947 = vmatmul.mubr.msk.bf16.gmra.mrb[4].mxu0 %vm468_vm1, %v12929_v20  ;;  %v4897_v20 = vrot.slane %v4895_v13, 4  ;;  %v4927_v13 = vrot.slane %v4925_v53, 5  ;;  %v10280_v53 = vrot.slane %v10278_v35, 4  ;;  %v4978_v23 = vshrl.u32 %v12130_v50, 16 }
 0x426   : > { %10874 = vmatprep.mubr.bf16.mxu0 %v14488_v3  ;;  %v4981_v60 = vshll.u32 %v12130_v50, 16  ;;  %v12859_v50 = vld [vmem:[%s14564_s14 + $0x94] sm:$0xf] }
 0x427   : > { %v4898_v9 = vor.u32 %v4897_v20, %v16665_v18  ;;  %v12127_v18 = vld [vmem:[%s14661_s17 + $0x78] sm:$0xf]  ;;  %v12128_v20 = vld [vmem:[%s14661_s17 + $0x7c] sm:$0xf]  ;;  %v4980_v11 = vrot.slane %v4978_v23, 4 }
 0x428   : > { %v4954_v31 = vshrl.u32 %v12127_v18, 16  ;;  %v4957_v32 = vshll.u32 %v12127_v18, 16  ;;  %v4963_v7 = vshll.u32 %v12128_v20, 16  ;;  %v4967_v33 = vshrl.u32 %v12128_v20, 16  ;;  %v12134_v18 = vld [vmem:[%s14661_s17 + $0x94] sm:$0xf] }
 0x429   : > { %v4983_v12 = vrot.slane %v4981_v60, 5  ;;  %v12884_v20 = vrot.slane %v12852_v14, 9 }
 0x42a   : > { %12218 = vmatmul.mubr.msk.bf16.gmra.mrb[12].mxu1 %vm468_vm1, %v12200_v39  ;;  %v4911_v39 = vrot.slane %v4909_v24, 5  ;;  %v10274_v24 = vrot.slane %v12848_v8, 5  ;;  %v4956_v46 = vrot.slane %v4954_v31, 4  ;;  %v4959_v47 = vrot.slane %v4957_v32, 5  ;;  %v12854_v8 = vld [vmem:[%s14564_s14 + $0x80] sm:$0x1] }
 0x42b   : > { %5738 = vmatprep.mubr.bf16.mxu1 %v14488_v3  ;;  %v4969_v40 = vrot.slane %v4967_v33, 4  ;;  %v4984_v29 = vor.u32 %v4983_v12, %v4980_v11  ;;  %v5011_v32 = vshll.u32 %v12134_v18, 16  ;;  %v10286_v33 = vsel %vm14796_vm7, %v12884_v20, %v10285_v1 }
 0x42c   : > { %v4912_v55 = vor.u32 %v4911_v39, %v4908_v38  ;;  %v10275_v38 = vsel %vm14796_vm7, %v10273_v22, %v10274_v24  ;;  %v4937_v39 = vrot.slane %v4936_v27, 4  ;;  %v4960_v56 = vor.u32 %v4959_v47, %v4956_v46 }
 0x42d   : > { %12948 = vmatmul.mubr.msk.bf16.gmra.mrb[8].mxu0 %vm468_vm1, %v12930_v51  ;;  %v4899_v51 = vrot.slane %v4898_v9, 4  ;;  %v10288_v22 = vrot.slane %v12854_v8, 5  ;;  %v4997_v24 = vshll.u32 %v12132_v10, 16  ;;  %v4985_v46 = vrot.slane %v4984_v29, 4 }
 0x42e   : > { %10884 = vmatprep.mubr.bf16.mxu0 %v14488_v3  ;;  %v4913_v4 = vrot.slane %v4912_v55, 4  ;;  %v4942_v55 = vsel %vm14580_vm4, %v4937_v39, %v16705_v26 }
 0x42f   : > { %v4904_v62 = vsel %vm14580_vm4, %v4899_v51, %v4903_v48  ;;  %v4965_v48 = vrot.slane %v4963_v7, 5  ;;  %v12131_v51 = vld [vmem:[%s14661_s17 + $0x88] sm:$0xf]  ;;  %v5015_v7 = vshrl.u32 %v12134_v18, 16 }
 0x430   : > { %v12203_v16 = vcombine.low %v4894_v43, %v4904_v62  ;;  %v4918_v25 = vsel %vm14580_vm4, %v4913_v4, %v16678_v41  ;;  %v4947_v41 = vrot.slane %v4946_v28, 4  ;;  %v4991_v43 = vshrl.u32 %v12131_v51, 16 }
 0x431   : > { %v4970_v58 = vor.u32 %v4969_v40, %v4965_v48  ;;  %v10279_v62 = vsel %vm14796_vm7, %v12883_v52, %v10278_v35  ;;  %v12136_v35 = vld [vmem:[%s14661_s17 + $0x9c] sm:$0xf]  ;;  %v16771_v40 = vrot.slane %v5011_v32, 5 }
 0x432   : > { %12219 = vmatmul.mubr.msk.bf16.gmra.mrb[16].mxu1 %vm468_vm1, %v12201_v6  ;;  %v12846_v6 = vld [vmem:[%s14564_s14 + $0x60] sm:$0xe]  ;;  %v4952_v2 = vsel %vm14580_vm4, %v4947_v41, %v4951_v34  ;;  %v4993_v15 = vrot.slane %v4991_v43, 4  ;;  %v12855_v41 = vld [vmem:[%s14564_s14 + $0x84] sm:$0xe]  ;;  %v5029_v52 = vshll.u32 %v12136_v35, 16 }
 0x433   : > { %5748 = vmatprep.mubr.bf16.mxu1 %v14488_v3  ;;  %v12882_v21 = vrot.slane %v12846_v6, 9  ;;  %v12205_v4 = vcombine.low %v4942_v55, %v4952_v2  ;;  %v4971_v6 = vrot.slane %v4970_v58, 4  ;;  %v12885_v55 = vrot.slane %v12855_v41, 9  ;;  %v12858_v43 = vld [vmem:[%s14564_s14 + $0x90] sm:$0xe] }
 0x434   : > { %v5031_v14 = vrot.slane %v5029_v52, 5 }
 0x435   : > { %12949 = vmatmul.mubr.msk.bf16.gmra.mrb[12].mxu0 %vm468_vm1, %v12931_v19  ;;  %v4928_v19 = vsel %vm14580_vm4, %v4923_v5, %v4927_v13  ;;  %v10272_v9 = vsel %vm14796_vm7, %v12882_v21, %v10271_v63  ;;  %v10282_v13 = vsel %vm14796_vm7, %v10280_v53, %v10281_v54  ;;  %v4961_v5 = vrot.slane %v4960_v56, 4 }
 0x436   : > { %10894 = vmatprep.mubr.bf16.mxu0 %v14488_v3  ;;  %v12204_v36 = vcombine.low %v4918_v25, %v4928_v19  ;;  %v12934_v49 = vcombine.low %v10272_v9, %v10275_v38  ;;  %v10287_v21 = vrot.slane %v10285_v1, 4  ;;  %v12856_v19 = vld [vmem:[%s14564_s14 + $0x88] sm:$0xf]  ;;  %v4999_v9 = vrot.slane %v4997_v24, 5 }
 0x437   : > { %v4966_v0 = vsel %vm14580_vm4, %v4961_v5, %v4965_v48  ;;  %v10292_v34 = vrot.slane %v12856_v19, 5  ;;  %v12135_v48 = vld [vmem:[%s14661_s17 + $0x98] sm:$0x1]  ;;  %v10295_v56 = vrot.slane %v12857_v42, 5 }
 0x438   : > { %v10289_v39 = vsel %vm14796_vm7, %v10287_v21, %v10288_v22  ;;  %v5021_v59 = vshll.u32 %v12135_v48, 16 }
 0x439   : > { %v10294_v2 = vrot.slane %v10292_v34, 4  ;;  %v10293_v5 = vsel %vm14796_vm7, %v12885_v55, %v10292_v34 }
 0x43a   : > { %12220 = vmatmul.mubr.msk.bf16.gmra.mrb[20].mxu1 %vm468_vm1, %v12202_v45  ;;  %v12129_v45 = vld [vmem:[%s14661_s17 + $0x80] sm:$0x1]  ;;  %v5023_v12 = vrot.slane %v5021_v59, 5 }
 0x43b   : > { %5758 = vmatprep.mubr.bf16.mxu1 %v14488_v3  ;;  %v4973_v30 = vshll.u32 %v12129_v45, 16  ;;  %v10296_v10 = vsel %vm14796_vm7, %v10294_v2, %v10295_v56  ;;  %v12865_v56 = vld [vmem:[%s14564_s14 + $0xac] sm:$0xf] }
 0x43c   : > { %v12937_v29 = vcombine.low %v10293_v5, %v10296_v10  ;;  %v12866_v5 = vld [vmem:[%s14564_s14 + $0xb0] sm:$0x1] }
 0x43d   : > { %12950 = vmatmul.mubr.msk.bf16.gmra.mrb[16].mxu0 %vm468_vm1, %v12932_v61  ;;  %v4987_v61 = vshll.u32 %v12131_v51, 16  ;;  %v4975_v63 = vrot.slane %v4973_v30, 5  ;;  %v5026_v51 = vshrl.u32 %v12136_v35, 16  ;;  %v12936_v30 = vcombine.low %v10286_v33, %v10289_v39  ;;  %v12863_v39 = vld [vmem:[%s14564_s14 + $0xa4] sm:$0x1] }
 0x43e   : > { %10904 = vmatprep.mubr.bf16.mxu0 %v14488_v3 }
 0x43f   : > { %v16748_v26 = vrot.slane %v4987_v61, 5  ;;  %v4976_v25 = vsel %vm14580_vm4, %v4971_v6, %v4975_v63  ;;  %v5028_v63 = vrot.slane %v5026_v51, 4  ;;  %v12138_v6 = vld [vmem:[%s14661_s17 + $0xa4] sm:$0x1] }
 0x440   : > { %v12206_v38 = vcombine.low %v4966_v0, %v4976_v25  ;;  %v5045_v24 = vshll.u32 %v12138_v6, 16  ;;  %v12862_v0 = vld [vmem:[%s14564_s14 + $0xa0] sm:$0xf] }
 0x441   : > { %v4994_v31 = vor.u32 %v4993_v15, %v16748_v26  ;;  %v4990_v23 = vsel %vm14580_vm4, %v4985_v46, %v16748_v26  ;;  %v12139_v26 = vld [vmem:[%s14661_s17 + $0xa8] sm:$0xf]  ;;  %v12140_v15 = vld [vmem:[%s14661_s17 + $0xac] sm:$0xf]  ;;  %v5032_v21 = vor.u32 %v5031_v14, %v5028_v63 }
 0x442   : > { %12221 = vmatmul.mubr.msk.bf16.gmra.mrb[24].mxu1 %vm468_vm1, %v12203_v16  ;;  %v12133_v16 = vld [vmem:[%s14661_s17 + $0x90] sm:$0xf]  ;;  %v5050_v25 = vshrl.u32 %v12139_v26, 16  ;;  %v5053_v19 = vshll.u32 %v12139_v26, 16  ;;  %v5047_v35 = vrot.slane %v5045_v24, 5 }
 0x443   : > { %5768 = vmatprep.mubr.bf16.mxu1 %v14488_v3  ;;  %v5002_v27 = vshrl.u32 %v12133_v16, 16  ;;  %v5005_v28 = vshll.u32 %v12133_v16, 16  ;;  %v4995_v47 = vrot.slane %v4994_v31, 4 }
 0x444   : > { %v5052_v41 = vrot.slane %v5050_v25, 4  ;;  %v5055_v42 = vrot.slane %v5053_v19, 5  ;;  %v12868_v19 = vld [vmem:[%s14564_s14 + $0xb8] sm:$0xf] }
 0x445   : > { %12951 = vmatmul.mubr.msk.bf16.gmra.mrb[20].mxu0 %vm468_vm1, %v12933_v17  ;;  %v12935_v17 = vcombine.low %v10279_v62, %v10282_v13  ;;  %v5004_v44 = vrot.slane %v5002_v27, 4  ;;  %v5007_v45 = vrot.slane %v5005_v28, 5  ;;  %v5000_v60 = vsel %vm14580_vm4, %v4995_v47, %v4999_v9  ;;  %v12860_v13 = vld [vmem:[%s14564_s14 + $0x98] sm:$0x1]  ;;  %v12141_v47 = vld [vmem:[%s14661_s17 + $0xb0] sm:$0x1] }
 0x446   : > { %10914 = vmatprep.mubr.bf16.mxu0 %v14488_v3  ;;  %v10299_v62 = vrot.slane %v12859_v50, 5  ;;  %v12207_v8 = vcombine.low %v4990_v23, %v5000_v60  ;;  %v10302_v20 = vrot.slane %v12860_v13, 5  ;;  %v5059_v27 = vshll.u32 %v12140_v15, 16 }
 0x447   : > { %v5008_v58 = vor.u32 %v5007_v45, %v5004_v44  ;;  %v5063_v28 = vshrl.u32 %v12140_v15, 16  ;;  %v5033_v9 = vrot.slane %v5032_v21, 4  ;;  %v5069_v2 = vshll.u32 %v12141_v47, 16  ;;  %v12145_v15 = vld [vmem:[%s14661_s17 + $0xc0] sm:$0xf] }
 0x448   : > { %v10301_v18 = vrot.slane %v10299_v62, 4  ;;  %v5061_v44 = vrot.slane %v5059_v27, 5  ;;  %v10316_v21 = vrot.slane %v12866_v5, 5  ;;  %v5098_v27 = vshrl.u32 %v12145_v15, 16  ;;  %v12874_v5 = vld [vmem:[%s14564_s14 + $0xd0] sm:$0xf] }
 0x449   : > { %v5009_v11 = vrot.slane %v5008_v58, 4  ;;  %v5065_v45 = vrot.slane %v5063_v28, 4  ;;  %v5071_v14 = vrot.slane %v5069_v2, 5  ;;  %v5101_v28 = vshll.u32 %v12145_v15, 16 }
 0x44a   : > { %12222 = vmatmul.mubr.msk.bf16.gmra.mrb[28].mxu1 %vm468_vm1, %v12204_v36  ;;  %v12137_v36 = vld [vmem:[%s14661_s17 + $0xa0] sm:$0xf]  ;;  %v10303_v33 = vsel %vm14796_vm7, %v10301_v18, %v10302_v20 }
 0x44b   : > { %5778 = vmatprep.mubr.bf16.mxu1 %v14488_v3  ;;  %v5035_v53 = vshll.u32 %v12137_v36, 16  ;;  %v5039_v54 = vshrl.u32 %v12137_v36, 16  ;;  %v5014_v31 = vsel %vm14580_vm4, %v5009_v11, %v16771_v40  ;;  %v12861_v36 = vld [vmem:[%s14564_s14 + $0x9c] sm:$0xe]  ;;  %v5066_v55 = vor.u32 %v5065_v45, %v5061_v44 }
 0x44c   : > { %v12887_v51 = vrot.slane %v12861_v36, 9  ;;  %v12867_v36 = vld [vmem:[%s14564_s14 + $0xb4] sm:$0xe] }
 0x44d   : > { %12952 = vmatmul.mubr.msk.bf16.gmra.mrb[24].mxu0 %vm468_vm1, %v12934_v49  ;;  %v5017_v49 = vrot.slane %v5015_v7, 4  ;;  %v16784_v1 = vrot.slane %v5035_v53, 5  ;;  %v10309_v53 = vrot.slane %v12863_v39, 5  ;;  %v5067_v63 = vrot.slane %v5066_v55, 4  ;;  %v12869_v39 = vld [vmem:[%s14564_s14 + $0xbc] sm:$0x1] }
 0x44e   : > { %10924 = vmatprep.mubr.bf16.mxu0 %v14488_v3 }
 0x44f   : > { %v5018_v61 = vor.u32 %v5017_v49, %v16771_v40  ;;  %v12142_v40 = vld [vmem:[%s14661_s17 + $0xb4] sm:$0xf]  ;;  %v12143_v49 = vld [vmem:[%s14661_s17 + $0xb8] sm:$0xf]  ;;  %v5038_v50 = vsel %vm14580_vm4, %v5033_v9, %v16784_v1 }
 0x450   : > { %v5074_v58 = vshrl.u32 %v12142_v40, 16  ;;  %v5077_v59 = vshll.u32 %v12142_v40, 16  ;;  %v5083_v23 = vshll.u32 %v12143_v49, 16  ;;  %v5087_v60 = vshrl.u32 %v12143_v49, 16 }
 0x451   : > { %v5019_v16 = vrot.slane %v5018_v61, 4  ;;  %v12889_v40 = vrot.slane %v12867_v36, 9 }
 0x452   : > { %12223 = vmatmul.mubr.msk.bf16.gmra.mrb[32].mxu1 %vm468_vm1, %v12205_v4  ;;  %v5041_v4 = vrot.slane %v5039_v54, 4  ;;  %v5076_v6 = vrot.slane %v5074_v58, 4  ;;  %v5085_v10 = vrot.slane %v5083_v23, 5  ;;  %v5089_v11 = vrot.slane %v5087_v60, 4  ;;  %v12870_v60 = vld [vmem:[%s14564_s14 + $0xc0] sm:$0xe] }
 0x453   : > { %5788 = vmatprep.mubr.bf16.mxu1 %v14488_v3  ;;  %v5024_v32 = vsel %vm14580_vm4, %v5019_v16, %v5023_v12  ;;  %v12144_v12 = vld [vmem:[%s14661_s17 + $0xbc] sm:$0x1]  ;;  %v12146_v16 = vld [vmem:[%s14661_s17 + $0xc4] sm:$0xf] }
 0x454   : > { %v5042_v22 = vor.u32 %v5041_v4, %v16784_v1  ;;  %v12208_v46 = vcombine.low %v5014_v31, %v5024_v32  ;;  %v12864_v1 = vld [vmem:[%s14564_s14 + $0xa8] sm:$0xe]  ;;  %v10313_v4 = vrot.slane %v12865_v56, 5  ;;  %v5093_v25 = vshll.u32 %v12144_v12, 16  ;;  %v12873_v12 = vld [vmem:[%s14564_s14 + $0xcc] sm:$0xe] }
 0x455   : > { %12953 = vmatmul.mubr.msk.bf16.gmra.mrb[28].mxu0 %vm468_vm1, %v12935_v17  ;;  %v12886_v17 = vrot.slane %v12858_v43, 9  ;;  %v12888_v18 = vrot.slane %v12864_v1, 9  ;;  %v5111_v31 = vshrl.u32 %v12146_v16, 16  ;;  %v12891_v15 = vrot.slane %v12873_v12, 9 }
 0x456   : > { %10934 = vmatprep.mubr.bf16.mxu0 %v14488_v3  ;;  %v5043_v34 = vrot.slane %v5042_v22, 4  ;;  %v10315_v20 = vrot.slane %v10313_v4, 4  ;;  %v5072_v22 = vsel %vm14580_vm4, %v5067_v63, %v5071_v14 }
 0x457   : > { %v10300_v7 = vsel %vm14796_vm7, %v12886_v17, %v10299_v62  ;;  %v5113_v45 = vrot.slane %v5111_v31, 4 }
 0x458   : > { %v12938_v48 = vcombine.low %v10300_v7, %v10303_v33  ;;  %v5048_v54 = vsel %vm14580_vm4, %v5043_v34, %v5047_v35  ;;  %v10314_v7 = vsel %vm14796_vm7, %v12888_v18, %v10313_v4  ;;  %v10317_v33 = vsel %vm14796_vm7, %v10315_v20, %v10316_v21 }
 0x459   : > { %v12209_v61 = vcombine.low %v5038_v50, %v5048_v54  ;;  %v5095_v35 = vrot.slane %v5093_v25, 5  ;;  %v12940_v47 = vcombine.low %v10314_v7, %v10317_v33  ;;  %v10323_v50 = vrot.slane %v12869_v39, 5 }
 0x45a   : > { %12224 = vmatmul.mubr.msk.bf16.gmra.mrb[36].mxu1 %vm468_vm1, %v12206_v38  ;;  %v10306_v38 = vrot.slane %v12862_v0, 5  ;;  %v5090_v0 = vor.u32 %v5089_v11, %v5085_v10  ;;  %v10334_v11 = vrot.slane %v12874_v5, 5 }
 0x45b   : > { %5798 = vmatprep.mubr.bf16.mxu1 %v14488_v3 }
 0x45c   : > { %v10308_v52 = vrot.slane %v10306_v38, 4  ;;  %v10307_v43 = vsel %vm14796_vm7, %v12887_v51, %v10306_v38  ;;  %v5091_v34 = vrot.slane %v5090_v0, 4  ;;  %v10320_v38 = vrot.slane %v12868_v19, 5 }
 0x45d   : > { %12954 = vmatmul.mubr.msk.bf16.gmra.mrb[32].mxu0 %vm468_vm1, %v12936_v30  ;;  %v5056_v30 = vor.u32 %v5055_v42, %v5052_v41  ;;  %v5100_v41 = vrot.slane %v5098_v27, 4  ;;  %v5103_v42 = vrot.slane %v5101_v28, 5  ;;  %v10335_v18 = vsel %vm14796_vm7, %v12891_v15, %v10334_v11 }
 0x45e   : > { %10944 = vmatprep.mubr.bf16.mxu0 %v14488_v3  ;;  %v10310_v62 = vsel %vm14796_vm7, %v10308_v52, %v10309_v53  ;;  %v10322_v49 = vrot.slane %v10320_v38, 4  ;;  %v5096_v51 = vsel %vm14580_vm4, %v5091_v34, %v5095_v35  ;;  %v10321_v2 = vsel %vm14796_vm7, %v12889_v40, %v10320_v38 }
 0x45f   : > { %v5057_v13 = vrot.slane %v5056_v30, 4  ;;  %v12939_v26 = vcombine.low %v10307_v43, %v10310_v62  ;;  %v5104_v52 = vor.u32 %v5103_v42, %v5100_v41  ;;  %v12871_v30 = vld [vmem:[%s14564_s14 + $0xc4] sm:$0xf]  ;;  %v12872_v43 = vld [vmem:[%s14564_s14 + $0xc8] sm:$0x1] }
 0x460   : > { %v10324_v56 = vsel %vm14796_vm7, %v10322_v49, %v10323_v50  ;;  %v10330_v4 = vrot.slane %v12872_v43, 5 }
 0x461   : > { %v5062_v17 = vsel %vm14580_vm4, %v5057_v13, %v5061_v44  ;;  %v5105_v58 = vrot.slane %v5104_v52, 4  ;;  %v12941_v62 = vcombine.low %v10321_v2, %v10324_v56  ;;  %v12890_v13 = vrot.slane %v12870_v60, 9 }
 0x462   : > { %12225 = vmatmul.mubr.msk.bf16.gmra.mrb[40].mxu1 %vm468_vm1, %v12207_v8  ;;  %v5079_v8 = vrot.slane %v5077_v59, 5  ;;  %v12210_v32 = vcombine.low %v5062_v17, %v5072_v22  ;;  %v11081_v22 = vlaneseq }
 0x463   : > { %5808 = vmatprep.mubr.bf16.mxu1 %v14488_v3 }
 0x464   : > { %v5080_v24 = vor.u32 %v5079_v8, %v5076_v6  ;;  %v11082_v27 = vshrl.u32 %v11081_v22, 7 }
 0x465   : > { %12955 = vmatmul.mubr.msk.bf16.gmra.mrb[36].mxu0 %vm468_vm1, %v12937_v29  ;;  %v5107_v29 = vshll.u32 %v12146_v16, 16  ;;  %v10336_v16 = vrot.slane %v10334_v11, 4 }
 0x466   : > { %10954 = vmatprep.mubr.bf16.mxu0 %v14488_v3  ;;  %v5081_v9 = vrot.slane %v5080_v24, 4  ;;  %v11083_v28 = vsub.s32 0, %v11082_v27  ;;  %v11087_v31 = vsub.s32 1, %v11082_v27 }
 0x467   : > { %v5109_v44 = vrot.slane %v5107_v29, 5 }
 0x468   : > { %v16898_v38 = vrot.slane %v11155_v57, %v11083_v28  ;;  %v16900_v42 = vrot.slane %v11155_v57, %v11087_v31 }
 0x469   : > { %v5114_v53 = vor.u32 %v5113_v45, %v5109_v44  ;;  %v5110_v63 = vsel %vm14580_vm4, %v5105_v58, %v5109_v44 }
 0x46a   : > { %12226 = vmatmul.mubr.msk.bf16.gmra.mrb[44].mxu1 %vm468_vm1, %v12208_v46  ;;  %v12147_v46 = vld [vmem:[%s14661_s17 + $0xc8] sm:$0x1] }
 0x46b   : > { %5818 = vmatprep.mubr.bf16.mxu1 %v14488_v3  ;;  %v5117_v54 = vshll.u32 %v12147_v46, 16  ;;  %v5115_v59 = vrot.slane %v5114_v53, 4 }
 0x46d   : > { %12956 = vmatmul.mubr.msk.bf16.gmra.mrb[40].mxu0 %vm468_vm1, %v12938_v48  ;;  %v5086_v48 = vsel %vm14580_vm4, %v5081_v9, %v5085_v10  ;;  %v5119_v23 = vrot.slane %v5117_v54, 5 }
 0x46e   : > { %10964 = vmatprep.mubr.bf16.mxu0 %v14488_v3  ;;  %v12211_v55 = vcombine.low %v5086_v48, %v5096_v51 }
 0x46f   : > { %v5120_v14 = vsel %vm14580_vm4, %v5115_v59, %v5119_v23 }
 0x470   : > { %v12212_v6 = vcombine.low %v5110_v63, %v5120_v14 }
 0x472   : > { %12227 = vmatmul.mubr.msk.bf16.gmra.mrb[48].mxu1 %vm468_vm1, %v12209_v61  ;;  %v10327_v61 = vrot.slane %v12871_v30, 5 }
 0x473   : > { %5828 = vmatprep.mubr.bf16.mxu1 %v14488_v3 }
 0x474   : > { %v10329_v1 = vrot.slane %v10327_v61, 4  ;;  %v10328_v8 = vsel %vm14796_vm7, %v12890_v13, %v10327_v61 }
 0x475   : > { %12957 = vmatmul.mubr.msk.bf16.gmra.mrb[44].mxu0 %vm468_vm1, %v12939_v26  ;;  %v12875_v26 = vld [vmem:[%s14564_s14 + $0xd4] sm:$0x1] }
 0x476   : > { %10974 = vmatprep.mubr.bf16.mxu0 %v14488_v3  ;;  %v10331_v10 = vsel %vm14796_vm7, %v10329_v1, %v10330_v4  ;;  %v10337_v17 = vrot.slane %v12875_v26, 5 }
 0x477   : > { %v12942_v37 = vcombine.low %v10328_v8, %v10331_v10 }
 0x478   : > { %v10338_v20 = vsel %vm14796_vm7, %v10336_v16, %v10337_v17 }
 0x479   : > { %v12943_v21 = vcombine.low %v10335_v18, %v10338_v20 }
 0x47a   : > { %12228 = vmatmul.mubr.msk.bf16.gmra.mrb[52].mxu1 %vm468_vm1, %v12210_v32 }
 0x47b   : > { %5838 = vmatprep.mubr.bf16.mxu1 %v14488_v3 }
 0x47d   : > { %12958 = vmatmul.mubr.msk.bf16.gmra.mrb[48].mxu0 %vm468_vm1, %v12940_v47 }
 0x47e   : > { %10984 = vmatprep.mubr.bf16.mxu0 %v14488_v3 }
 0x482   : > { %12229 = vmatmul.mubr.msk.bf16.gmra.mrb[56].mxu1 %vm468_vm1, %v12211_v55 }
 0x483   : > { %5848 = vmatprep.mubr.bf16.mxu1 %v14488_v3 }
 0x485   : > { %12959 = vmatmul.mubr.msk.bf16.gmra.mrb[52].mxu0 %vm468_vm1, %v12941_v62 }
 0x486   : > { %10994 = vmatprep.mubr.bf16.mxu0 %v14488_v3 }
 0x48a   : > { %12230 = vmatmul.mubr.msk.bf16.gmra.mrb[60].mxu1 %vm468_vm1, %v12212_v6 }
 0x48d   : > { %12960 = vmatmul.mubr.msk.bf16.gmra.mrb[56].mxu0 %vm468_vm1, %v12942_v37 }
 0x48e   : > { %11004 = vmatprep.mubr.bf16.mxu0 %v14488_v3  ;;  %v11079_v3 = vld [vmem:[%s17080_s4] sm:$0x3] }
 0x48f   : > { %v16894_v33 = vrot.slane %v11079_v3, %v11083_v28  ;;  %v16896_v35 = vrot.slane %v11079_v3, %v11087_v31 }
 0x495   : > { %12961 = vmatmul.mubr.msk.bf16.gmra.mrb[60].mxu0 %vm468_vm1, %v12943_v21 }
 0x4e5   : > { %v5700_v24 = vpop.f32.mrb[0].mxu1 }
 0x4e6   : > { %v5702_v0 = vpop.f32.mrb[1].mxu1 }
 0x4e7   : > { %v5704_v25 = vpop.f32.mrb[2].mxu1 }
 0x4e8   : > { %v5706_v19 = vpop.f32.mrb[3].mxu1 }
 0x4ed   : > { %v5710_v29 = vpop.f32.mrb[4].mxu1 }
 0x4ee   : > { %v5712_v32 = vpop.f32.mrb[5].mxu1 }
 0x4ef   : > { %v5714_v7 = vpop.f32.mrb[6].mxu1 }
 0x4f0   : > { %v5716_v9 = vpop.f32.mrb[7].mxu1  ;;  %v10856_v34 = vpop.f32.mrb[0].mxu0 }
 0x4f1   : > { %v13284_v36 = vadd.f32 %v10856_v34, %v5700_v24  ;;  %v10858_v39 = vpop.f32.mrb[1].mxu0 }
 0x4f2   : > { %v13285_v41 = vadd.f32 %v10858_v39, %v5702_v0  ;;  %v10860_v44 = vpop.f32.mrb[2].mxu0 }
 0x4f3   : > { %v11091_v45 = vmul.f32 %v13284_v36, %v16894_v33  ;;  %v13286_v46 = vadd.f32 %v10860_v44, %v5704_v25  ;;  %v10862_v47 = vpop.f32.mrb[3].mxu0 }
 0x4f4   : > { %v11092_v48 = vmul.f32 %v13285_v41, %v16896_v35  ;;  %v13287_v40 = vadd.f32 %v10862_v47, %v5706_v19 }
 0x4f5   : > { %v5720_v49 = vpop.f32.mrb[8].mxu1  ;;  %v11167_v50 = vadd.f32 %v16898_v38, %v11091_v45  ;;  %v11093_v51 = vmul.f32 %v13286_v46, %v16894_v33 }
 0x4f6   : > { %v5722_v52 = vpop.f32.mrb[9].mxu1  ;;  %v11168_v53 = vadd.f32 %v16900_v42, %v11092_v48  ;;  %v11094_v54 = vmul.f32 %v13287_v40, %v16896_v35 }
 0x4f7   : > { %v5724_v30 = vpop.f32.mrb[10].mxu1  ;;  %v11169_v55 = vadd.f32 %v16898_v38, %v11093_v51  ;;  %v11231_v59 = vmax.f32 %v11167_v50, 0.0 }
 0x4f8   : > { %v5726_v2 = vpop.f32.mrb[11].mxu1  ;;  %v11170_v56 = vadd.f32 %v16900_v42, %v11094_v54  ;;  %v10866_v58 = vpop.f32.mrb[4].mxu0  ;;  %v11232_v43 = vmax.f32 %v11168_v53, 0.0 }
 0x4f9   : > { %v11233_v23 = vmax.f32 %v11169_v55, 0.0  ;;  %v13288_v60 = vadd.f32 %v10866_v58, %v5710_v29  ;;  %v10868_v61 = vpop.f32.mrb[5].mxu0 }
 0x4fa   : > { %v11234_v62 = vmax.f32 %v11170_v56, 0.0  ;;  %v13289_v13 = vadd.f32 %v10868_v61, %v5712_v32  ;;  %v10870_v63 = vpop.f32.mrb[6].mxu0 }
 0x4fb   : > { %v13097_v14 = vpack.c.bf16 %v11233_v23, %v11231_v59  ;;  %v11095_v1 = vmul.f32 %v13288_v60, %v16894_v33  ;;  %v13290_v4 = vadd.f32 %v10870_v63, %v5714_v7  ;;  %v10872_v5 = vpop.f32.mrb[7].mxu0 }
 0x4fc   : > { %v13177_v6 = vpack.c.bf16 %v11234_v62, %v11232_v43  ;;  %v11096_v8 = vmul.f32 %v13289_v13, %v16896_v35  ;;  %v13291_v10 = vadd.f32 %v10872_v5, %v5716_v9 }
 0x4fd   : > { %v5730_v11 = vpop.f32.mrb[12].mxu1  ;;  %13098 = vst [vmem:[%s16914_s16] sm:$0xff] %v13097_v14   ;;  %v11171_v12 = vadd.f32 %v16898_v38, %v11095_v1  ;;  %v11097_v26 = vmul.f32 %v13290_v4, %v16894_v33 }
 0x4fe   : > { %v5732_v37 = vpop.f32.mrb[13].mxu1  ;;  %13178 = vst [vmem:[%s16919_s19] sm:$0xff] %v13177_v6   ;;  %v11172_v15 = vadd.f32 %v16900_v42, %v11096_v8  ;;  %v11098_v16 = vmul.f32 %v13291_v10, %v16896_v35 }
 0x4ff   : > { %v5734_v17 = vpop.f32.mrb[14].mxu1  ;;  %v11173_v18 = vadd.f32 %v16898_v38, %v11097_v26  ;;  %v11235_v24 = vmax.f32 %v11171_v12, 0.0 }
 0x500   : > { %v5736_v20 = vpop.f32.mrb[15].mxu1  ;;  %v11174_v21 = vadd.f32 %v16900_v42, %v11098_v16  ;;  %v10876_v22 = vpop.f32.mrb[8].mxu0  ;;  %v11236_v27 = vmax.f32 %v11172_v15, 0.0 }
 0x501   : > { %v11237_v0 = vmax.f32 %v11173_v18, 0.0  ;;  %v13292_v25 = vadd.f32 %v10876_v22, %v5720_v49  ;;  %v10878_v19 = vpop.f32.mrb[9].mxu0 }
 0x502   : > { %v11238_v28 = vmax.f32 %v11174_v21, 0.0  ;;  %v13293_v29 = vadd.f32 %v10878_v19, %v5722_v52  ;;  %v10880_v3 = vpop.f32.mrb[10].mxu0 }
 0x503   : > { %v13102_v31 = vpack.c.bf16 %v11237_v0, %v11235_v24  ;;  %v11099_v32 = vmul.f32 %v13292_v25, %v16894_v33  ;;  %v13294_v57 = vadd.f32 %v10880_v3, %v5724_v30  ;;  %v10882_v7 = vpop.f32.mrb[11].mxu0 }
 0x504   : > { %v13182_v9 = vpack.c.bf16 %v11238_v28, %v11236_v27  ;;  %v11100_v34 = vmul.f32 %v13293_v29, %v16896_v35  ;;  %v13295_v36 = vadd.f32 %v10882_v7, %v5726_v2 }
 0x505   : > { %v5740_v39 = vpop.f32.mrb[16].mxu1  ;;  %13254 = vst [vmem:[%s16914_s16 + $0x8] sm:$0xff] %v13102_v31   ;;  %v11175_v41 = vadd.f32 %v16898_v38, %v11099_v32  ;;  %v11101_v44 = vmul.f32 %v13294_v57, %v16894_v33 }
 0x506   : > { %v5742_v45 = vpop.f32.mrb[17].mxu1  ;;  %13269 = vst [vmem:[%s16919_s19 + $0x8] sm:$0xff] %v13182_v9   ;;  %v11176_v46 = vadd.f32 %v16900_v42, %v11100_v34  ;;  %v11102_v47 = vmul.f32 %v13295_v36, %v16896_v35 }
 0x507   : > { %v5744_v48 = vpop.f32.mrb[18].mxu1  ;;  %v11177_v40 = vadd.f32 %v16898_v38, %v11101_v44  ;;  %v11239_v52 = vmax.f32 %v11175_v41, 0.0 }
 0x508   : > { %v5746_v49 = vpop.f32.mrb[19].mxu1  ;;  %v11178_v50 = vadd.f32 %v16900_v42, %v11102_v47  ;;  %v10886_v51 = vpop.f32.mrb[12].mxu0  ;;  %v11240_v55 = vmax.f32 %v11176_v46, 0.0 }
 0x509   : > { %v11241_v53 = vmax.f32 %v11177_v40, 0.0  ;;  %v13296_v54 = vadd.f32 %v10886_v51, %v5730_v11  ;;  %v10888_v30 = vpop.f32.mrb[13].mxu0 }
 0x50a   : > { %v11242_v2 = vmax.f32 %v11178_v50, 0.0  ;;  %v13297_v56 = vadd.f32 %v10888_v30, %v5732_v37  ;;  %v10890_v58 = vpop.f32.mrb[14].mxu0 }
 0x50b   : > { %v13107_v59 = vpack.c.bf16 %v11241_v53, %v11239_v52  ;;  %v11103_v23 = vmul.f32 %v13296_v54, %v16894_v33  ;;  %v13298_v60 = vadd.f32 %v10890_v58, %v5734_v17  ;;  %v10892_v61 = vpop.f32.mrb[15].mxu0 }
 0x50c   : > { %v13187_v43 = vpack.c.bf16 %v11242_v2, %v11240_v55  ;;  %v11104_v62 = vmul.f32 %v13297_v56, %v16896_v35  ;;  %v13299_v13 = vadd.f32 %v10892_v61, %v5736_v20 }
 0x50d   : > { %v5750_v63 = vpop.f32.mrb[20].mxu1  ;;  %13255 = vst [vmem:[%s16914_s16 + $0x10] sm:$0xff] %v13107_v59   ;;  %v11179_v14 = vadd.f32 %v16898_v38, %v11103_v23  ;;  %v11105_v1 = vmul.f32 %v13298_v60, %v16894_v33 }
 0x50e   : > { %v5752_v4 = vpop.f32.mrb[21].mxu1  ;;  %13270 = vst [vmem:[%s16919_s19 + $0x10] sm:$0xff] %v13187_v43   ;;  %v11180_v5 = vadd.f32 %v16900_v42, %v11104_v62  ;;  %v11106_v6 = vmul.f32 %v13299_v13, %v16896_v35 }
 0x50f   : > { %v5754_v8 = vpop.f32.mrb[22].mxu1  ;;  %v11181_v10 = vadd.f32 %v16898_v38, %v11105_v1  ;;  %v11243_v37 = vmax.f32 %v11179_v14, 0.0 }
 0x510   : > { %v5756_v11 = vpop.f32.mrb[23].mxu1  ;;  %v11182_v12 = vadd.f32 %v16900_v42, %v11106_v6  ;;  %v10896_v26 = vpop.f32.mrb[16].mxu0  ;;  %v11244_v18 = vmax.f32 %v11180_v5, 0.0 }
 0x511   : > { %v11245_v15 = vmax.f32 %v11181_v10, 0.0  ;;  %v13300_v16 = vadd.f32 %v10896_v26, %v5740_v39  ;;  %v10898_v17 = vpop.f32.mrb[17].mxu0 }
 0x512   : > { %v11246_v20 = vmax.f32 %v11182_v12, 0.0  ;;  %v13301_v21 = vadd.f32 %v10898_v17, %v5742_v45  ;;  %v10900_v22 = vpop.f32.mrb[18].mxu0 }
 0x513   : > { %v13112_v24 = vpack.c.bf16 %v11245_v15, %v11243_v37  ;;  %v11107_v0 = vmul.f32 %v13300_v16, %v16894_v33  ;;  %v13302_v25 = vadd.f32 %v10900_v22, %v5744_v48  ;;  %v10902_v19 = vpop.f32.mrb[19].mxu0 }
 0x514   : > { %v13192_v27 = vpack.c.bf16 %v11246_v20, %v11244_v18  ;;  %v11108_v28 = vmul.f32 %v13301_v21, %v16896_v35  ;;  %v13303_v29 = vadd.f32 %v10902_v19, %v5746_v49 }
 0x515   : > { %v5760_v3 = vpop.f32.mrb[24].mxu1  ;;  %13256 = vst [vmem:[%s16914_s16 + $0x18] sm:$0xff] %v13112_v24   ;;  %v11183_v31 = vadd.f32 %v16898_v38, %v11107_v0  ;;  %v11109_v32 = vmul.f32 %v13302_v25, %v16894_v33 }
 0x516   : > { %v5762_v57 = vpop.f32.mrb[25].mxu1  ;;  %13271 = vst [vmem:[%s16919_s19 + $0x18] sm:$0xff] %v13192_v27   ;;  %v11184_v7 = vadd.f32 %v16900_v42, %v11108_v28  ;;  %v11110_v9 = vmul.f32 %v13303_v29, %v16896_v35 }
 0x517   : > { %v5764_v34 = vpop.f32.mrb[26].mxu1  ;;  %v11185_v36 = vadd.f32 %v16898_v38, %v11109_v32  ;;  %v11247_v45 = vmax.f32 %v11183_v31, 0.0 }
 0x518   : > { %v5766_v39 = vpop.f32.mrb[27].mxu1  ;;  %v11186_v41 = vadd.f32 %v16900_v42, %v11110_v9  ;;  %v10906_v44 = vpop.f32.mrb[20].mxu0  ;;  %v11248_v40 = vmax.f32 %v11184_v7, 0.0 }
 0x519   : > { %v11249_v46 = vmax.f32 %v11185_v36, 0.0  ;;  %v13304_v47 = vadd.f32 %v10906_v44, %v5750_v63  ;;  %v10908_v48 = vpop.f32.mrb[21].mxu0 }
 0x51a   : > { %v11250_v49 = vmax.f32 %v11186_v41, 0.0  ;;  %v13305_v50 = vadd.f32 %v10908_v48, %v5752_v4  ;;  %v10910_v51 = vpop.f32.mrb[22].mxu0 }
 0x51b   : > { %v13117_v52 = vpack.c.bf16 %v11249_v46, %v11247_v45  ;;  %v11111_v53 = vmul.f32 %v13304_v47, %v16894_v33  ;;  %v13306_v54 = vadd.f32 %v10910_v51, %v5754_v8  ;;  %v10912_v30 = vpop.f32.mrb[23].mxu0 }
 0x51c   : > { %v13197_v55 = vpack.c.bf16 %v11250_v49, %v11248_v40  ;;  %v11112_v2 = vmul.f32 %v13305_v50, %v16896_v35  ;;  %v13307_v56 = vadd.f32 %v10912_v30, %v5756_v11 }
 0x51d   : > { %v5770_v58 = vpop.f32.mrb[28].mxu1  ;;  %13257 = vst [vmem:[%s16914_s16 + $0x20] sm:$0xff] %v13117_v52   ;;  %v11187_v59 = vadd.f32 %v16898_v38, %v11111_v53  ;;  %v11113_v23 = vmul.f32 %v13306_v54, %v16894_v33 }
 0x51e   : > { %v5772_v60 = vpop.f32.mrb[29].mxu1  ;;  %13272 = vst [vmem:[%s16919_s19 + $0x20] sm:$0xff] %v13197_v55   ;;  %v11188_v61 = vadd.f32 %v16900_v42, %v11112_v2  ;;  %v11114_v43 = vmul.f32 %v13307_v56, %v16896_v35 }
 0x51f   : > { %v5774_v62 = vpop.f32.mrb[30].mxu1  ;;  %v11189_v13 = vadd.f32 %v16898_v38, %v11113_v23  ;;  %v11251_v4 = vmax.f32 %v11187_v59, 0.0 }
 0x520   : > { %v5776_v63 = vpop.f32.mrb[31].mxu1  ;;  %v11190_v14 = vadd.f32 %v16900_v42, %v11114_v43  ;;  %v10916_v1 = vpop.f32.mrb[24].mxu0  ;;  %v11252_v10 = vmax.f32 %v11188_v61, 0.0 }
 0x521   : > { %v11253_v5 = vmax.f32 %v11189_v13, 0.0  ;;  %v13308_v6 = vadd.f32 %v10916_v1, %v5760_v3  ;;  %v10918_v8 = vpop.f32.mrb[25].mxu0 }
 0x522   : > { %v11254_v11 = vmax.f32 %v11190_v14, 0.0  ;;  %v13309_v12 = vadd.f32 %v10918_v8, %v5762_v57  ;;  %v10920_v26 = vpop.f32.mrb[26].mxu0 }
 0x523   : > { %v13122_v37 = vpack.c.bf16 %v11253_v5, %v11251_v4  ;;  %v11115_v15 = vmul.f32 %v13308_v6, %v16894_v33  ;;  %v13310_v16 = vadd.f32 %v10920_v26, %v5764_v34  ;;  %v10922_v17 = vpop.f32.mrb[27].mxu0 }
 0x524   : > { %v13202_v18 = vpack.c.bf16 %v11254_v11, %v11252_v10  ;;  %v11116_v20 = vmul.f32 %v13309_v12, %v16896_v35  ;;  %v13311_v21 = vadd.f32 %v10922_v17, %v5766_v39 }
 0x525   : > { %v5780_v22 = vpop.f32.mrb[32].mxu1  ;;  %13258 = vst [vmem:[%s16914_s16 + $0x28] sm:$0xff] %v13122_v37   ;;  %v11191_v24 = vadd.f32 %v16898_v38, %v11115_v15  ;;  %v11117_v0 = vmul.f32 %v13310_v16, %v16894_v33 }
 0x526   : > { %v5782_v25 = vpop.f32.mrb[33].mxu1  ;;  %13273 = vst [vmem:[%s16919_s19 + $0x28] sm:$0xff] %v13202_v18   ;;  %v11192_v19 = vadd.f32 %v16900_v42, %v11116_v20  ;;  %v11118_v27 = vmul.f32 %v13311_v21, %v16896_v35 }
 0x527   : > { %v5784_v28 = vpop.f32.mrb[34].mxu1  ;;  %v11193_v29 = vadd.f32 %v16898_v38, %v11117_v0  ;;  %v11255_v57 = vmax.f32 %v11191_v24, 0.0 }
 0x528   : > { %v5786_v3 = vpop.f32.mrb[35].mxu1  ;;  %v11194_v31 = vadd.f32 %v16900_v42, %v11118_v27  ;;  %v10926_v32 = vpop.f32.mrb[28].mxu0  ;;  %v11256_v36 = vmax.f32 %v11192_v19, 0.0 }
 0x529   : > { %v11257_v7 = vmax.f32 %v11193_v29, 0.0  ;;  %v13312_v9 = vadd.f32 %v10926_v32, %v5770_v58  ;;  %v10928_v34 = vpop.f32.mrb[29].mxu0 }
 0x52a   : > { %v11258_v39 = vmax.f32 %v11194_v31, 0.0  ;;  %v13313_v41 = vadd.f32 %v10928_v34, %v5772_v60  ;;  %v10930_v44 = vpop.f32.mrb[30].mxu0 }
 0x52b   : > { %v13127_v45 = vpack.c.bf16 %v11257_v7, %v11255_v57  ;;  %v11119_v46 = vmul.f32 %v13312_v9, %v16894_v33  ;;  %v13314_v47 = vadd.f32 %v10930_v44, %v5774_v62  ;;  %v10932_v48 = vpop.f32.mrb[31].mxu0 }
 0x52c   : > { %v13207_v40 = vpack.c.bf16 %v11258_v39, %v11256_v36  ;;  %v11120_v49 = vmul.f32 %v13313_v41, %v16896_v35  ;;  %v13315_v50 = vadd.f32 %v10932_v48, %v5776_v63 }
 0x52d   : > { %v5790_v51 = vpop.f32.mrb[36].mxu1  ;;  %13259 = vst [vmem:[%s16914_s16 + $0x30] sm:$0xff] %v13127_v45   ;;  %v11195_v52 = vadd.f32 %v16898_v38, %v11119_v46  ;;  %v11121_v53 = vmul.f32 %v13314_v47, %v16894_v33 }
 0x52e   : > { %v5792_v54 = vpop.f32.mrb[37].mxu1  ;;  %13274 = vst [vmem:[%s16919_s19 + $0x30] sm:$0xff] %v13207_v40   ;;  %v11196_v30 = vadd.f32 %v16900_v42, %v11120_v49  ;;  %v11122_v55 = vmul.f32 %v13315_v50, %v16896_v35 }
 0x52f   : > { %v5794_v2 = vpop.f32.mrb[38].mxu1  ;;  %v11197_v56 = vadd.f32 %v16898_v38, %v11121_v53  ;;  %v11259_v60 = vmax.f32 %v11195_v52, 0.0 }
 0x530   : > { %v5796_v58 = vpop.f32.mrb[39].mxu1  ;;  %v11198_v59 = vadd.f32 %v16900_v42, %v11122_v55  ;;  %v10936_v23 = vpop.f32.mrb[32].mxu0  ;;  %v11260_v13 = vmax.f32 %v11196_v30, 0.0 }
 0x531   : > { %v11261_v61 = vmax.f32 %v11197_v56, 0.0  ;;  %v13316_v43 = vadd.f32 %v10936_v23, %v5780_v22  ;;  %v10938_v62 = vpop.f32.mrb[33].mxu0 }
 0x532   : > { %v11262_v63 = vmax.f32 %v11198_v59, 0.0  ;;  %v13317_v14 = vadd.f32 %v10938_v62, %v5782_v25  ;;  %v10940_v1 = vpop.f32.mrb[34].mxu0 }
 0x533   : > { %v13132_v4 = vpack.c.bf16 %v11261_v61, %v11259_v60  ;;  %v11123_v5 = vmul.f32 %v13316_v43, %v16894_v33  ;;  %v13318_v6 = vadd.f32 %v10940_v1, %v5784_v28  ;;  %v10942_v8 = vpop.f32.mrb[35].mxu0 }
 0x534   : > { %v13212_v10 = vpack.c.bf16 %v11262_v63, %v11260_v13  ;;  %v11124_v11 = vmul.f32 %v13317_v14, %v16896_v35  ;;  %v13319_v12 = vadd.f32 %v10942_v8, %v5786_v3 }
 0x535   : > { %v5800_v26 = vpop.f32.mrb[40].mxu1  ;;  %13260 = vst [vmem:[%s16914_s16 + $0x38] sm:$0xff] %v13132_v4   ;;  %v11199_v37 = vadd.f32 %v16898_v38, %v11123_v5  ;;  %v11125_v15 = vmul.f32 %v13318_v6, %v16894_v33 }
 0x536   : > { %v5802_v16 = vpop.f32.mrb[41].mxu1  ;;  %13275 = vst [vmem:[%s16919_s19 + $0x38] sm:$0xff] %v13212_v10   ;;  %v11200_v17 = vadd.f32 %v16900_v42, %v11124_v11  ;;  %v11126_v18 = vmul.f32 %v13319_v12, %v16896_v35 }
 0x537   : > { %v5804_v20 = vpop.f32.mrb[42].mxu1  ;;  %v11201_v21 = vadd.f32 %v16898_v38, %v11125_v15  ;;  %v11263_v25 = vmax.f32 %v11199_v37, 0.0 }
 0x538   : > { %v5806_v22 = vpop.f32.mrb[43].mxu1  ;;  %v11202_v24 = vadd.f32 %v16900_v42, %v11126_v18  ;;  %v10946_v0 = vpop.f32.mrb[36].mxu0  ;;  %v11264_v29 = vmax.f32 %v11200_v17, 0.0 }
 0x539   : > { %v11265_v19 = vmax.f32 %v11201_v21, 0.0  ;;  %v13320_v27 = vadd.f32 %v10946_v0, %v5790_v51  ;;  %v10948_v28 = vpop.f32.mrb[37].mxu0 }
 0x53a   : > { %v11266_v3 = vmax.f32 %v11202_v24, 0.0  ;;  %v13321_v31 = vadd.f32 %v10948_v28, %v5792_v54  ;;  %v10950_v32 = vpop.f32.mrb[38].mxu0 }
 0x53b   : > { %v13137_v57 = vpack.c.bf16 %v11265_v19, %v11263_v25  ;;  %v11127_v7 = vmul.f32 %v13320_v27, %v16894_v33  ;;  %v13322_v9 = vadd.f32 %v10950_v32, %v5794_v2  ;;  %v10952_v34 = vpop.f32.mrb[39].mxu0 }
 0x53c   : > { %v13217_v36 = vpack.c.bf16 %v11266_v3, %v11264_v29  ;;  %v11128_v39 = vmul.f32 %v13321_v31, %v16896_v35  ;;  %v13323_v41 = vadd.f32 %v10952_v34, %v5796_v58 }
 0x53d   : > { %v5810_v44 = vpop.f32.mrb[44].mxu1  ;;  %13261 = vst [vmem:[%s16914_s16 + $0x40] sm:$0xff] %v13137_v57   ;;  %v11203_v45 = vadd.f32 %v16898_v38, %v11127_v7  ;;  %v11129_v46 = vmul.f32 %v13322_v9, %v16894_v33 }
 0x53e   : > { %v5812_v47 = vpop.f32.mrb[45].mxu1  ;;  %13276 = vst [vmem:[%s16919_s19 + $0x40] sm:$0xff] %v13217_v36   ;;  %v11204_v48 = vadd.f32 %v16900_v42, %v11128_v39  ;;  %v11130_v40 = vmul.f32 %v13323_v41, %v16896_v35 }
 0x53f   : > { %v5814_v49 = vpop.f32.mrb[46].mxu1  ;;  %v11205_v50 = vadd.f32 %v16898_v38, %v11129_v46  ;;  %v11267_v54 = vmax.f32 %v11203_v45, 0.0 }
 0x540   : > { %v5816_v51 = vpop.f32.mrb[47].mxu1  ;;  %v11206_v52 = vadd.f32 %v16900_v42, %v11130_v40  ;;  %v10956_v53 = vpop.f32.mrb[40].mxu0  ;;  %v11268_v56 = vmax.f32 %v11204_v48, 0.0 }
 0x541   : > { %v11269_v30 = vmax.f32 %v11205_v50, 0.0  ;;  %v13324_v55 = vadd.f32 %v10956_v53, %v5800_v26  ;;  %v10958_v2 = vpop.f32.mrb[41].mxu0 }
 0x542   : > { %v11270_v58 = vmax.f32 %v11206_v52, 0.0  ;;  %v13325_v59 = vadd.f32 %v10958_v2, %v5802_v16  ;;  %v10960_v23 = vpop.f32.mrb[42].mxu0 }
 0x543   : > { %v13142_v60 = vpack.c.bf16 %v11269_v30, %v11267_v54  ;;  %v11131_v61 = vmul.f32 %v13324_v55, %v16894_v33  ;;  %v13326_v43 = vadd.f32 %v10960_v23, %v5804_v20  ;;  %v10962_v62 = vpop.f32.mrb[43].mxu0 }
 0x544   : > { %v13222_v13 = vpack.c.bf16 %v11270_v58, %v11268_v56  ;;  %v11132_v63 = vmul.f32 %v13325_v59, %v16896_v35  ;;  %v13327_v14 = vadd.f32 %v10962_v62, %v5806_v22 }
 0x545   : > { %v5820_v1 = vpop.f32.mrb[48].mxu1  ;;  %13262 = vst [vmem:[%s16914_s16 + $0x48] sm:$0xff] %v13142_v60   ;;  %v11207_v4 = vadd.f32 %v16898_v38, %v11131_v61  ;;  %v11133_v5 = vmul.f32 %v13326_v43, %v16894_v33 }
 0x546   : > { %v5822_v6 = vpop.f32.mrb[49].mxu1  ;;  %13277 = vst [vmem:[%s16919_s19 + $0x48] sm:$0xff] %v13222_v13   ;;  %v11208_v8 = vadd.f32 %v16900_v42, %v11132_v63  ;;  %v11134_v10 = vmul.f32 %v13327_v14, %v16896_v35 }
 0x547   : > { %v5824_v11 = vpop.f32.mrb[50].mxu1  ;;  %v11209_v12 = vadd.f32 %v16898_v38, %v11133_v5  ;;  %v11271_v16 = vmax.f32 %v11207_v4, 0.0 }
 0x548   : > { %v5826_v26 = vpop.f32.mrb[51].mxu1  ;;  %v11210_v37 = vadd.f32 %v16900_v42, %v11134_v10  ;;  %v10966_v15 = vpop.f32.mrb[44].mxu0  ;;  %v11272_v21 = vmax.f32 %v11208_v8, 0.0 }
 0x549   : > { %v11273_v17 = vmax.f32 %v11209_v12, 0.0  ;;  %v13328_v18 = vadd.f32 %v10966_v15, %v5810_v44  ;;  %v10968_v20 = vpop.f32.mrb[45].mxu0 }
 0x54a   : > { %v11274_v22 = vmax.f32 %v11210_v37, 0.0  ;;  %v13329_v24 = vadd.f32 %v10968_v20, %v5812_v47  ;;  %v10970_v0 = vpop.f32.mrb[46].mxu0 }
 0x54b   : > { %v13147_v25 = vpack.c.bf16 %v11273_v17, %v11271_v16  ;;  %v11135_v19 = vmul.f32 %v13328_v18, %v16894_v33  ;;  %v13330_v27 = vadd.f32 %v10970_v0, %v5814_v49  ;;  %v10972_v28 = vpop.f32.mrb[47].mxu0 }
 0x54c   : > { %v13227_v29 = vpack.c.bf16 %v11274_v22, %v11272_v21  ;;  %v11136_v3 = vmul.f32 %v13329_v24, %v16896_v35  ;;  %v13331_v31 = vadd.f32 %v10972_v28, %v5816_v51 }
 0x54d   : > { %v5830_v32 = vpop.f32.mrb[52].mxu1  ;;  %13263 = vst [vmem:[%s16914_s16 + $0x50] sm:$0xff] %v13147_v25   ;;  %v11211_v57 = vadd.f32 %v16898_v38, %v11135_v19  ;;  %v11137_v7 = vmul.f32 %v13330_v27, %v16894_v33 }
 0x54e   : > { %v5832_v9 = vpop.f32.mrb[53].mxu1  ;;  %13278 = vst [vmem:[%s16919_s19 + $0x50] sm:$0xff] %v13227_v29   ;;  %v11212_v34 = vadd.f32 %v16900_v42, %v11136_v3  ;;  %v11138_v36 = vmul.f32 %v13331_v31, %v16896_v35 }
 0x54f   : > { %v5834_v39 = vpop.f32.mrb[54].mxu1  ;;  %v11213_v41 = vadd.f32 %v16898_v38, %v11137_v7  ;;  %v11275_v47 = vmax.f32 %v11211_v57, 0.0 }
 0x550   : > { %v5836_v44 = vpop.f32.mrb[55].mxu1  ;;  %v11214_v45 = vadd.f32 %v16900_v42, %v11138_v36  ;;  %v10976_v46 = vpop.f32.mrb[48].mxu0  ;;  %v11276_v50 = vmax.f32 %v11212_v34, 0.0 }
 0x551   : > { %v11277_v48 = vmax.f32 %v11213_v41, 0.0  ;;  %v13332_v40 = vadd.f32 %v10976_v46, %v5820_v1  ;;  %v10978_v49 = vpop.f32.mrb[49].mxu0 }
 0x552   : > { %v11278_v51 = vmax.f32 %v11214_v45, 0.0  ;;  %v13333_v52 = vadd.f32 %v10978_v49, %v5822_v6  ;;  %v10980_v53 = vpop.f32.mrb[50].mxu0 }
 0x553   : > { %v13152_v54 = vpack.c.bf16 %v11277_v48, %v11275_v47  ;;  %v11139_v30 = vmul.f32 %v13332_v40, %v16894_v33  ;;  %v13334_v55 = vadd.f32 %v10980_v53, %v5824_v11  ;;  %v10982_v2 = vpop.f32.mrb[51].mxu0 }
 0x554   : > { %v13232_v56 = vpack.c.bf16 %v11278_v51, %v11276_v50  ;;  %v11140_v58 = vmul.f32 %v13333_v52, %v16896_v35  ;;  %v13335_v59 = vadd.f32 %v10982_v2, %v5826_v26 }
 0x555   : > { %v5840_v23 = vpop.f32.mrb[56].mxu1  ;;  %13264 = vst [vmem:[%s16914_s16 + $0x58] sm:$0xff] %v13152_v54   ;;  %v11215_v60 = vadd.f32 %v16898_v38, %v11139_v30  ;;  %v11141_v61 = vmul.f32 %v13334_v55, %v16894_v33 }
 0x556   : > { %v5842_v43 = vpop.f32.mrb[57].mxu1  ;;  %13279 = vst [vmem:[%s16919_s19 + $0x58] sm:$0xff] %v13232_v56   ;;  %v11216_v62 = vadd.f32 %v16900_v42, %v11140_v58  ;;  %v11142_v13 = vmul.f32 %v13335_v59, %v16896_v35 }
 0x557   : > { %v5844_v63 = vpop.f32.mrb[58].mxu1  ;;  %v11217_v14 = vadd.f32 %v16898_v38, %v11141_v61  ;;  %v11279_v6 = vmax.f32 %v11215_v60, 0.0 }
 0x558   : > { %v5846_v1 = vpop.f32.mrb[59].mxu1  ;;  %v11218_v4 = vadd.f32 %v16900_v42, %v11142_v13  ;;  %v10986_v5 = vpop.f32.mrb[52].mxu0  ;;  %v11280_v12 = vmax.f32 %v11216_v62, 0.0 }
 0x559   : > { %v11281_v8 = vmax.f32 %v11217_v14, 0.0  ;;  %v13336_v10 = vadd.f32 %v10986_v5, %v5830_v32  ;;  %v10988_v11 = vpop.f32.mrb[53].mxu0 }
 0x55a   : > { %v11282_v26 = vmax.f32 %v11218_v4, 0.0  ;;  %v13337_v37 = vadd.f32 %v10988_v11, %v5832_v9  ;;  %v10990_v15 = vpop.f32.mrb[54].mxu0 }
 0x55b   : > { %v13157_v16 = vpack.c.bf16 %v11281_v8, %v11279_v6  ;;  %v11143_v17 = vmul.f32 %v13336_v10, %v16894_v33  ;;  %v13338_v18 = vadd.f32 %v10990_v15, %v5834_v39  ;;  %v10992_v20 = vpop.f32.mrb[55].mxu0 }
 0x55c   : > { %v13237_v21 = vpack.c.bf16 %v11282_v26, %v11280_v12  ;;  %v11144_v22 = vmul.f32 %v13337_v37, %v16896_v35  ;;  %v13339_v24 = vadd.f32 %v10992_v20, %v5836_v44 }
 0x55d   : > { %v5850_v0 = vpop.f32.mrb[60].mxu1  ;;  %13265 = vst [vmem:[%s16914_s16 + $0x60] sm:$0xff] %v13157_v16   ;;  %v11219_v25 = vadd.f32 %v16898_v38, %v11143_v17  ;;  %v11145_v19 = vmul.f32 %v13338_v18, %v16894_v33 }
 0x55e   : > { %v5852_v27 = vpop.f32.mrb[61].mxu1  ;;  %13280 = vst [vmem:[%s16919_s19 + $0x60] sm:$0xff] %v13237_v21   ;;  %v11220_v28 = vadd.f32 %v16900_v42, %v11144_v22  ;;  %v11146_v29 = vmul.f32 %v13339_v24, %v16896_v35 }
 0x55f   : > { %v5854_v3 = vpop.f32.mrb[62].mxu1  ;;  %v11221_v31 = vadd.f32 %v16898_v38, %v11145_v19  ;;  %v11283_v9 = vmax.f32 %v11219_v25, 0.0 }
 0x560   : > { %v5856_v32 = vpop.f32.mrb[63].mxu1  ;;  %v11222_v57 = vadd.f32 %v16900_v42, %v11146_v29  ;;  %v10996_v7 = vpop.f32.mrb[56].mxu0  ;;  %v11284_v41 = vmax.f32 %v11220_v28, 0.0 }
 0x561   : > { %v11285_v34 = vmax.f32 %v11221_v31, 0.0  ;;  %v13340_v36 = vadd.f32 %v10996_v7, %v5840_v23  ;;  %v10998_v39 = vpop.f32.mrb[57].mxu0 }
 0x562   : > { %v11286_v44 = vmax.f32 %v11222_v57, 0.0  ;;  %v13341_v45 = vadd.f32 %v10998_v39, %v5842_v43  ;;  %v11000_v46 = vpop.f32.mrb[58].mxu0 }
 0x563   : > { %v13162_v47 = vpack.c.bf16 %v11285_v34, %v11283_v9  ;;  %v11147_v48 = vmul.f32 %v13340_v36, %v16894_v33  ;;  %v13342_v40 = vadd.f32 %v11000_v46, %v5844_v63  ;;  %v11002_v49 = vpop.f32.mrb[59].mxu0 }
 0x564   : > { %v13242_v50 = vpack.c.bf16 %v11286_v44, %v11284_v41  ;;  %v11148_v51 = vmul.f32 %v13341_v45, %v16896_v35  ;;  %v13343_v52 = vadd.f32 %v11002_v49, %v5846_v1 }
 0x565   : > { %13266 = vst [vmem:[%s16914_s16 + $0x68] sm:$0xff] %v13162_v47   ;;  %v11223_v53 = vadd.f32 %v16898_v38, %v11147_v48  ;;  %v11149_v54 = vmul.f32 %v13342_v40, %v16894_v33 }
 0x566   : > { %13281 = vst [vmem:[%s16919_s19 + $0x68] sm:$0xff] %v13242_v50   ;;  %v11224_v30 = vadd.f32 %v16900_v42, %v11148_v51  ;;  %v11150_v55 = vmul.f32 %v13343_v52, %v16896_v35 }
 0x567   : > { %v11225_v2 = vadd.f32 %v16898_v38, %v11149_v54  ;;  %v11287_v59 = vmax.f32 %v11223_v53, 0.0 }
 0x568   : > { %v11226_v56 = vadd.f32 %v16900_v42, %v11150_v55  ;;  %v11006_v58 = vpop.f32.mrb[60].mxu0  ;;  %v11288_v43 = vmax.f32 %v11224_v30, 0.0 }
 0x569   : > { %v11289_v23 = vmax.f32 %v11225_v2, 0.0  ;;  %v13344_v60 = vadd.f32 %v11006_v58, %v5850_v0  ;;  %v11008_v61 = vpop.f32.mrb[61].mxu0 }
 0x56a   : > { %v11290_v62 = vmax.f32 %v11226_v56, 0.0  ;;  %v13345_v13 = vadd.f32 %v11008_v61, %v5852_v27  ;;  %v11010_v63 = vpop.f32.mrb[62].mxu0 }
 0x56b   : > { %v13167_v14 = vpack.c.bf16 %v11289_v23, %v11287_v59  ;;  %v11151_v1 = vmul.f32 %v13344_v60, %v16894_v33  ;;  %v13346_v4 = vadd.f32 %v11010_v63, %v5854_v3  ;;  %v11012_v5 = vpop.f32.mrb[63].mxu0 }
 0x56c   : > { %v13247_v6 = vpack.c.bf16 %v11290_v62, %v11288_v43  ;;  %v11152_v8 = vmul.f32 %v13345_v13, %v16896_v35  ;;  %v13347_v10 = vadd.f32 %v11012_v5, %v5856_v32 }
 0x56d   : > { %13267 = vst [vmem:[%s16914_s16 + $0x70] sm:$0xff] %v13167_v14   ;;  %v11227_v11 = vadd.f32 %v16898_v38, %v11151_v1  ;;  %v11153_v12 = vmul.f32 %v13346_v4, %v16894_v33 }
 0x56e   : > { %13282 = vst [vmem:[%s16919_s19 + $0x70] sm:$0xff] %v13247_v6   ;;  %v11228_v26 = vadd.f32 %v16900_v42, %v11152_v8  ;;  %v11154_v37 = vmul.f32 %v13347_v10, %v16896_v35 }
 0x56f   : > { %v11229_v15 = vadd.f32 %v16898_v38, %v11153_v12  ;;  %v11291_v17 = vmax.f32 %v11227_v11, 0.0 }
 0x570   : > { %v11230_v16 = vadd.f32 %v16900_v42, %v11154_v37  ;;  %v11292_v20 = vmax.f32 %v11228_v26, 0.0 }
 0x571   : > { %v11293_v18 = vmax.f32 %v11229_v15, 0.0 }
 0x572   : > { %v11294_v21 = vmax.f32 %v11230_v16, 0.0 }
 0x573   : > { %v13172_v22 = vpack.c.bf16 %v11293_v18, %v11291_v17 }
 0x574   : > { %v13252_v24 = vpack.c.bf16 %v11294_v21, %v11292_v20 }
 0x575   : > { %13268 = vst [vmem:[%s16914_s16 + $0x78] sm:$0xff] %v13172_v22  }
 0x576   : > { %13283 = vst [vmem:[%s16919_s19 + $0x78] sm:$0xff] %v13252_v24  }
 0x577 PF: > { %s18_s24 = sadd.s32 1, %s14486_s24  }
 0x578   : > { %p15_p4 = scmp.ge.s32.totalorder %s18_s24, 4  }
 0x57a   :  { %17 = sbr.rel (!%p15_p4) target bundleno = 1 (0x1), region = 109 }

</bundles_post_ra>
